<compile_context>
chip_gen: v5e
topology: v5e:2x2
jax: 0.10.0
libtpu: 0.0.40
codegen_flags: <defaults>
</compile_context>

<pallas_src>
import jax
import jax.numpy as jnp
import numpy as np
from jax.experimental import pallas as pl
from jax.experimental.pallas import tpu as pltpu


def _stable_sigmoid(v):
    # == 1/(1+exp(-v)); tanh form never overflows and uses the EUP slot.
    return 0.5 * (jnp.tanh(0.5 * v) + 1.0)


# --------------------------------------------------------------------------
# Kernel
# --------------------------------------------------------------------------
def stock_block_kernel(x_ref, L_ref, w0_ref, b0_ref, w12_ref, b12_ref,
                       wg_ref, wh_ref, bh_ref, wt_ref, bt_ref, out_ref):
    Bt, N, T = x_ref.shape
    TM = wg_ref.shape[-1]              # time_step * multi
    H2 = w0_ref.shape[-1] // 2         # width of packed [real | img] activations
    hp = jax.lax.Precision.HIGHEST

    Ls = L_ref[...]                    # (4N, N) = [L_S ; L_D02 ; L_A ; L_D31]

    # --- graph conv + closed-form 4-point FFT, one dot per batch element ---
    feats, xrows = [], []
    for b in range(Bt):
        xb = x_ref[b]                                              # (N, T)
        z = jnp.dot(Ls, xb, preferred_element_type=jnp.float32,
                    precision=hp)                                  # (4N, T)
        # rows of z: [S ; D02 ; A ; D31] -> lane-concat to the packed
        # GLU0 feature layout [S | D02 | A | D31]  (N, 4T)
        feats.append(jnp.concatenate(
            [z[0:N], z[N:2 * N], z[2 * N:3 * N], z[3 * N:4 * N]], axis=-1))
        xrows.append(xb)
    v = jnp.concatenate(feats, axis=0)          # (R, 4T), R = Bt*N
    x_rows = jnp.concatenate(xrows, axis=0)     # (R, T)

    # --- GLU stack: 3 dots total (real/img packed on lanes, left|right packed
    #     on the output lanes: pre = [left_real|left_img|right_real|right_img])
    def glu_packed(act, W, bias):
        pre = jnp.dot(act, W, preferred_element_type=jnp.float32,
                      precision=hp) + bias
        return pre[:, :H2] * _stable_sigmoid(pre[:, H2:])

    v = glu_packed(v, w0_ref[...], b0_ref[...])     # (R, 2H) = [real | img]
    v = glu_packed(v, w12_ref[0], b12_ref[0])
    v = glu_packed(v, w12_ref[1], b12_ref[1])

    # --- irfft(n=4) + spectral graph-conv weight contraction, folded into one dot
    igfted = jnp.dot(v, wg_ref[...], preferred_element_type=jnp.float32,
                     precision=hp)                  # (R, TM)

    # --- output heads: forecast / backcast linears fused column-wise ---
    head = jnp.dot(igfted, wh_ref[...], preferred_element_type=jnp.float32,
                   precision=hp) + bh_ref[...]      # (R, TM + T)
    fsrc = _stable_sigmoid(head[:, :TM])            # forecast_source
    bc_pre = head[:, TM:]                           # backcast pre-activation

    # tail dot: [forecast_result | backcast_short_cut] block-diagonal
    tail_in = jnp.concatenate([fsrc, x_rows], axis=-1)          # (R, TM + T)
    tail = jnp.dot(tail_in, wt_ref[...], preferred_element_type=jnp.float32,
                   precision=hp) + bt_ref[...]                  # (R, 2T)
    forecast = tail[:, :T]
    bshort = tail[:, T:]
    backcast = _stable_sigmoid(bc_pre - bshort)

    fb = jnp.concatenate([forecast, backcast], axis=-1)         # (R, 2T)
    for b in range(Bt):                                         # (b, n)-major rows
        out_ref[b] = fb[b * N:(b + 1) * N, :].astype(out_ref.dtype)


# --------------------------------------------------------------------------
# Parameter / operator packing (pure JAX; could be cached once at init time)
# --------------------------------------------------------------------------
def _pack_operands(mul_L, p):
    f32 = jnp.float32
    T = p["bs_W"].shape[0]
    H = p["glu0_W"].shape[-1]          # time_step * output_channel
    TM = p["fc_W"].shape[0]            # time_step * multi

    L0, L1, L2, L3 = (mul_L[k].astype(f32) for k in range(4))
    # 4-point FFT of real g_k: F0=S, F1=D02+i*D31, F2=A, F3=D02-i*D31
    L_stack = jnp.concatenate([L0 + L1 + L2 + L3,      # S
                               L0 - L2,                # D02
                               L0 - L1 + L2 - L3,      # A
                               L3 - L1], axis=0)       # D31      -> (4N, N)

    # GLU0: original real chunks are [S, D02, A, D02], img chunks [0, D31, 0, -D31].
    Wl_r, Wr_r, Wl_i, Wr_i = (p["glu0_W"][k].astype(f32) for k in range(4))

    def real_block(W):     # acts on packed features [S | D02 | A | D31]
        return jnp.concatenate([W[0:T], W[T:2 * T] + W[3 * T:4 * T],
                                W[2 * T:3 * T], jnp.zeros((T, H), f32)], axis=0)

    def imag_block(W):
        return jnp.concatenate([jnp.zeros((3 * T, H), f32),
                                W[T:2 * T] - W[3 * T:4 * T]], axis=0)

    W0p = jnp.concatenate([real_block(Wl_r), imag_block(Wl_i),
                           real_block(Wr_r), imag_block(Wr_i)], axis=1)  # (4T, 4H)
    b0p = jnp.concatenate([p["glu0_b"][0], p["glu0_b"][2],
                           p["glu0_b"][1], p["glu0_b"][3]], axis=1)      # (1, 4H)

    def layer_block(Wl_real, Wr_real, Wl_img, Wr_img):
        Z = jnp.zeros((H, H), f32)
        top = jnp.concatenate([Wl_real, Z, Wr_real, Z], axis=1)   # real-input rows
        bot = jnp.concatenate([Z, Wl_img, Z, Wr_img], axis=1)     # img-input rows
        return jnp.concatenate([top, bot], axis=0)                # (2H, 4H)

    W12p = jnp.stack([layer_block(p["glu12_W"][l, 0], p["glu12_W"][l, 1],
                                  p["glu12_W"][l, 2], p["glu12_W"][l, 3])
                      for l in range(2)])                                    # (2, 2H, 4H)
    b12p = jnp.stack([jnp.concatenate([p["glu12_b"][l, 0], p["glu12_b"][l, 2],
                                       p["glu12_b"][l, 1], p["glu12_b"][l, 3]],
                                      axis=1) for l in range(2)])            # (2, 1, 4H)

    # irfft(n=4) (c2r: imag of bins 0 and 2 ignored, bin 3 cropped) + gconv fold.
    G0, G1, G2, G3 = (p["gconv_W"][k].astype(f32) for k in range(4))
    Zt = jnp.zeros((TM, TM), f32)
    Wg = jnp.concatenate([0.25 * (G0 + G1 + G2 + G3),   # real chunk 0
                          0.50 * (G0 - G2),             # real chunk 1
                          0.25 * (G0 - G1 + G2 - G3),   # real chunk 2
                          Zt,                           # real chunk 3 (unused)
                          Zt,                           # imag chunk 0 (ignored: DC)
                          0.50 * (G3 - G1),             # imag chunk 1
                          Zt, Zt], axis=0)              # imag chunks 2,3     (2H, TM)

    Whead = jnp.concatenate([p["fc_W"], p["bc_W"]], axis=1)        # (TM, TM+T)
    bhead = jnp.concatenate([p["fc_b"], p["bc_b"]], axis=1)        # (1, TM+T)

    Wtail = jnp.concatenate(
        [jnp.concatenate([p["fr_W"], jnp.zeros((TM, T), f32)], axis=1),
         jnp.concatenate([jnp.zeros((T, T), f32), p["bs_W"]], axis=1)],
        axis=0)                                                    # (TM+T, 2T)
    btail = jnp.concatenate([p["fr_b"], p["bs_b"]], axis=1)        # (1, 2T)

    return (L_stack, W0p, b0p, W12p, b12p, Wg, Whead, bhead, Wtail, btail)


# --------------------------------------------------------------------------
# Wrapper
# --------------------------------------------------------------------------
def stock_block_layer(x, mul_L, params, block_b=None):
    """x: (B, 1, N, T); mul_L: (4, N, N). Returns forecast (B,N,T), backcast (B,1,N,T)."""
    B, C, N, T = x.shape
    assert C == 1
    xs = x[:, 0]                                        # (B, N, T)
    ops = _pack_operands(mul_L, params)

    if block_b is None:
        block_b = min(B, 8)
        while B % block_b:
            block_b -= 1
        if B // block_b < 2:          # prefer >= 2 grid steps (v7x has 2 TensorCores)
            cand = block_b // 2
            while cand >= 1 and B % cand:
                cand -= 1
            if cand >= 1:
                block_b = cand
    assert B % block_b == 0
    grid = (B // block_b,)

    def _resident_spec(a):
        nd = a.ndim
        return pl.BlockSpec(a.shape, lambda i, _nd=nd: (0,) * _nd)

    in_specs = [pl.BlockSpec((block_b, N, T), lambda i: (i, 0, 0))]
    in_specs += [_resident_spec(a) for a in ops]

    out = pl.pallas_call(
        stock_block_kernel,
        out_shape=jax.ShapeDtypeStruct((B, N, 2 * T), jnp.float32),
        grid_spec=pltpu.PrefetchScalarGridSpec(
            num_scalar_prefetch=0,
            grid=grid,
            in_specs=in_specs,
            out_specs=pl.BlockSpec((block_b, N, 2 * T), lambda i: (i, 0, 0))),
        compiler_params=pltpu.CompilerParams(dimension_semantics=("parallel",)),
    )(xs, *ops)

    forecast = out[..., :T]
    backcast = out[..., T:]
    return forecast, backcast[:, None, :, :]


# --------------------------------------------------------------------------
# Pure-JAX reference (uses jnp.fft) mirroring the PyTorch forward
# --------------------------------------------------------------------------
def reference(x, mul_L, p):
    B, _, N, T = x.shape
    xs = x[:, 0]
    gfted = jnp.einsum('knm,bmt->bknt', mul_L, xs)               # (B,4,N,T)
    ffted = jnp.fft.fft(gfted, axis=1)
    real = jnp.transpose(ffted.real, (0, 2, 1, 3)).reshape(B, N, -1)
    img = jnp.transpose(ffted.imag, (0, 2, 1, 3)).reshape(B, N, -1)

    def glu(v, Wl, bl, Wr, br):
        return (v @ Wl + bl) * jax.nn.sigmoid(v @ Wr + br)

    real = glu(real, p["glu0_W"][0], p["glu0_b"][0], p["glu0_W"][1], p["glu0_b"][1])
    img = glu(img, p["glu0_W"][2], p["glu0_b"][2], p["glu0_W"][3], p["glu0_b"][3])
    for layer in range(2):
        real = glu(real, p["glu12_W"][layer, 0], p["glu12_b"][layer, 0],
                   p["glu12_W"][layer, 1], p["glu12_b"][layer, 1])
        img = glu(img, p["glu12_W"][layer, 2], p["glu12_b"][layer, 2],
                  p["glu12_W"][layer, 3], p["glu12_b"][layer, 3])
    TM = p["gconv_W"].shape[-1]
    realr = jnp.transpose(real.reshape(B, N, 4, TM), (0, 2, 1, 3))
    imgr = jnp.transpose(img.reshape(B, N, 4, TM), (0, 2, 1, 3))
    comp = realr.astype(jnp.complex64) + 1j * imgr.astype(jnp.complex64)
    iffted = jnp.fft.irfft(comp, n=4, axis=1)                    # (B,4,N,TM)
    igfted = jnp.einsum('bknm,kmo->bno', iffted, p["gconv_W"])
    fsrc = jax.nn.sigmoid(igfted @ p["fc_W"] + p["fc_b"])
    forecast = fsrc @ p["fr_W"] + p["fr_b"]
    bshort = xs @ p["bs_W"] + p["bs_b"]
    backcast = jax.nn.sigmoid(igfted @ p["bc_W"] + p["bc_b"] - bshort)
    return forecast, backcast[:, None, :, :]


if __name__ == "__main__":
    # Full-f32 matmuls everywhere (kernel + reference) so the comparison is tight.
    jax.config.update("jax_default_matmul_precision", "highest")

    # StockBlockLayer(time_step=8, unit=16, multi_layer=2, stack_cnt=0)
    B, N, T, M = 8, 16, 8, 2
    TM = T * M                                                   # 16
    OC = 4 * M                                                   # output_channel
    H = T * OC                                                   # GLU width = 64
    f32 = jnp.float32
    key = jax.random.PRNGKey(0)
    ks = jax.random.split(key, 16)
    s = 0.1

    # Parameters stored as (in, out) so y = x @ W + b (torch Linear transposed).
    params = {
        "glu0_W": s * jax.random.normal(ks[0], (4, 4 * T, H), f32),          # GLU0/1 L,R
        "glu0_b": s * jax.random.normal(ks[1], (4, 1, H), f32),
        "glu12_W": s * jax.random.normal(ks[2], (2, 4, H, H), f32),          # GLU2..5
        "glu12_b": s * jax.random.normal(ks[3], (2, 4, 1, H), f32),
        "gconv_W": s * jax.random.normal(ks[4], (4, TM, TM), f32),           # weight[0,:,0]
        "fc_W": s * jax.random.normal(ks[5], (TM, TM), f32),                 # forecast
        "fc_b": s * jax.random.normal(ks[6], (1, TM), f32),
        "fr_W": s * jax.random.normal(ks[7], (TM, T), f32),                  # forecast_result
        "fr_b": s * jax.random.normal(ks[8], (1, T), f32),
        "bc_W": s * jax.random.normal(ks[9], (TM, T), f32),                  # backcast
        "bc_b": s * jax.random.normal(ks[10], (1, T), f32),
        "bs_W": s * jax.random.normal(ks[11], (T, T), f32),                  # backcast_short_cut
        "bs_b": s * jax.random.normal(ks[12], (1, T), f32),
    }
    x = jax.random.normal(ks[13], (B, 1, N, T), f32)
    mul_L = 0.3 * jax.random.normal(ks[14], (4, N, N), f32)

    fwd = jax.jit(stock_block_layer)
    forecast, backcast = fwd(x, mul_L, params)
    forecast = jax.block_until_ready(forecast)
    backcast = jax.block_until_ready(backcast)

    ref_f, ref_b = reference(x, mul_L, params)
    assert forecast.shape == (B, N, T) and backcast.shape == (B, 1, N, T)
    np.testing.assert_allclose(np.asarray(forecast), np.asarray(ref_f),
                               rtol=1e-4, atol=1e-4)
    np.testing.assert_allclose(np.asarray(backcast), np.asarray(ref_b),
                               rtol=1e-4, atol=1e-4)
    print("KERNEL_OK")
</pallas_src>

<mosaic_0001>
module attributes {stable_mosaic.version = 11 : i64} {
  func.func @stock_block_kernel(%arg0: i32, %arg1: memref<4x16x8xf32, #tpu.memory_space<vmem>>, %arg2: memref<64x16xf32, #tpu.memory_space<vmem>>, %arg3: memref<32x256xf32, #tpu.memory_space<vmem>>, %arg4: memref<1x256xf32, #tpu.memory_space<vmem>>, %arg5: memref<2x128x256xf32, #tpu.memory_space<vmem>>, %arg6: memref<2x1x256xf32, #tpu.memory_space<vmem>>, %arg7: memref<128x16xf32, #tpu.memory_space<vmem>>, %arg8: memref<16x24xf32, #tpu.memory_space<vmem>>, %arg9: memref<1x24xf32, #tpu.memory_space<vmem>>, %arg10: memref<24x16xf32, #tpu.memory_space<vmem>>, %arg11: memref<1x16xf32, #tpu.memory_space<vmem>>, %arg12: memref<4x16x16xf32, #tpu.memory_space<vmem>>) attributes {dimension_semantics = [#tpu.dimension_semantics<parallel>], iteration_bounds = array<i64: 2>, scalar_prefetch = 0 : i64, scratch_operands = 0 : i64, tpu.core_type = #tpu.core_type<tc>, window_params = [{transform_indices = @transform_0, window_bounds = array<i64: 4, 16, 8>}, {pipeline_mode = #tpu.pipeline_mode<synchronous>, transform_indices = @transform_1, window_bounds = array<i64: 64, 16>}, {pipeline_mode = #tpu.pipeline_mode<synchronous>, transform_indices = @transform_2, window_bounds = array<i64: 32, 256>}, {pipeline_mode = #tpu.pipeline_mode<synchronous>, transform_indices = @transform_3, window_bounds = array<i64: 1, 256>}, {pipeline_mode = #tpu.pipeline_mode<synchronous>, transform_indices = @transform_4, window_bounds = array<i64: 2, 128, 256>}, {pipeline_mode = #tpu.pipeline_mode<synchronous>, transform_indices = @transform_5, window_bounds = array<i64: 2, 1, 256>}, {pipeline_mode = #tpu.pipeline_mode<synchronous>, transform_indices = @transform_6, window_bounds = array<i64: 128, 16>}, {pipeline_mode = #tpu.pipeline_mode<synchronous>, transform_indices = @transform_7, window_bounds = array<i64: 16, 24>}, {pipeline_mode = #tpu.pipeline_mode<synchronous>, transform_indices = @transform_8, window_bounds = array<i64: 1, 24>}, {pipeline_mode = #tpu.pipeline_mode<synchronous>, transform_indices = @transform_9, window_bounds = array<i64: 24, 16>}, {pipeline_mode = #tpu.pipeline_mode<synchronous>, transform_indices = @transform_10, window_bounds = array<i64: 1, 16>}, {transform_indices = @transform_11, window_bounds = array<i64: 4, 16, 16>}]} {
    %c0 = arith.constant 0 : index
    %c0_0 = arith.constant 0 : index
    %0 = vector.load %arg2[%c0, %c0_0] : memref<64x16xf32, #tpu.memory_space<vmem>>, vector<64x16xf32>
    %c0_1 = arith.constant 0 : index
    %c0_2 = arith.constant 0 : index
    %c0_3 = arith.constant 0 : index
    %1 = vector.load %arg1[%c0_1, %c0_2, %c0_3] : memref<4x16x8xf32, #tpu.memory_space<vmem>>, vector<1x16x8xf32>
    %2 = vector.shape_cast %1 : vector<1x16x8xf32> to vector<16x8xf32>
    %cst = arith.constant dense<0.000000e+00> : vector<64x8xf32>
    %3 = tpu.matmul %0, %2, %cst {dimension_numbers = #tpu.dot_dimension_numbers<[1], [0], [0], [1], [0, 0, 1, 1], [], []>, precision = #tpu.contract_precision<fp32>} : vector<64x16xf32>, vector<16x8xf32>, vector<64x8xf32> -> vector<64x8xf32>
    %4 = vector.extract_strided_slice %3 {offsets = [0, 0], sizes = [16, 8], strides = [1, 1]} : vector<64x8xf32> to vector<16x8xf32>
    %5 = vector.extract_strided_slice %3 {offsets = [16, 0], sizes = [16, 8], strides = [1, 1]} : vector<64x8xf32> to vector<16x8xf32>
    %6 = vector.extract_strided_slice %3 {offsets = [32, 0], sizes = [16, 8], strides = [1, 1]} : vector<64x8xf32> to vector<16x8xf32>
    %7 = vector.extract_strided_slice %3 {offsets = [48, 0], sizes = [16, 8], strides = [1, 1]} : vector<64x8xf32> to vector<16x8xf32>
    %8 = tpu.concatenate %4, %5, %6, %7 in 1 : vector<16x8xf32>, vector<16x8xf32>, vector<16x8xf32>, vector<16x8xf32> -> vector<16x32xf32>
    %c1 = arith.constant 1 : index
    %c0_4 = arith.constant 0 : index
    %c0_5 = arith.constant 0 : index
    %9 = vector.load %arg1[%c1, %c0_4, %c0_5] : memref<4x16x8xf32, #tpu.memory_space<vmem>>, vector<1x16x8xf32>
    %10 = vector.shape_cast %9 : vector<1x16x8xf32> to vector<16x8xf32>
    %cst_6 = arith.constant dense<0.000000e+00> : vector<64x8xf32>
    %11 = tpu.matmul %0, %10, %cst_6 {dimension_numbers = #tpu.dot_dimension_numbers<[1], [0], [0], [1], [0, 0, 1, 1], [], []>, precision = #tpu.contract_precision<fp32>} : vector<64x16xf32>, vector<16x8xf32>, vector<64x8xf32> -> vector<64x8xf32>
    %12 = vector.extract_strided_slice %11 {offsets = [0, 0], sizes = [16, 8], strides = [1, 1]} : vector<64x8xf32> to vector<16x8xf32>
    %13 = vector.extract_strided_slice %11 {offsets = [16, 0], sizes = [16, 8], strides = [1, 1]} : vector<64x8xf32> to vector<16x8xf32>
    %14 = vector.extract_strided_slice %11 {offsets = [32, 0], sizes = [16, 8], strides = [1, 1]} : vector<64x8xf32> to vector<16x8xf32>
    %15 = vector.extract_strided_slice %11 {offsets = [48, 0], sizes = [16, 8], strides = [1, 1]} : vector<64x8xf32> to vector<16x8xf32>
    %16 = tpu.concatenate %12, %13, %14, %15 in 1 : vector<16x8xf32>, vector<16x8xf32>, vector<16x8xf32>, vector<16x8xf32> -> vector<16x32xf32>
    %c2 = arith.constant 2 : index
    %c0_7 = arith.constant 0 : index
    %c0_8 = arith.constant 0 : index
    %17 = vector.load %arg1[%c2, %c0_7, %c0_8] : memref<4x16x8xf32, #tpu.memory_space<vmem>>, vector<1x16x8xf32>
    %18 = vector.shape_cast %17 : vector<1x16x8xf32> to vector<16x8xf32>
    %cst_9 = arith.constant dense<0.000000e+00> : vector<64x8xf32>
    %19 = tpu.matmul %0, %18, %cst_9 {dimension_numbers = #tpu.dot_dimension_numbers<[1], [0], [0], [1], [0, 0, 1, 1], [], []>, precision = #tpu.contract_precision<fp32>} : vector<64x16xf32>, vector<16x8xf32>, vector<64x8xf32> -> vector<64x8xf32>
    %20 = vector.extract_strided_slice %19 {offsets = [0, 0], sizes = [16, 8], strides = [1, 1]} : vector<64x8xf32> to vector<16x8xf32>
    %21 = vector.extract_strided_slice %19 {offsets = [16, 0], sizes = [16, 8], strides = [1, 1]} : vector<64x8xf32> to vector<16x8xf32>
    %22 = vector.extract_strided_slice %19 {offsets = [32, 0], sizes = [16, 8], strides = [1, 1]} : vector<64x8xf32> to vector<16x8xf32>
    %23 = vector.extract_strided_slice %19 {offsets = [48, 0], sizes = [16, 8], strides = [1, 1]} : vector<64x8xf32> to vector<16x8xf32>
    %24 = tpu.concatenate %20, %21, %22, %23 in 1 : vector<16x8xf32>, vector<16x8xf32>, vector<16x8xf32>, vector<16x8xf32> -> vector<16x32xf32>
    %c3 = arith.constant 3 : index
    %c0_10 = arith.constant 0 : index
    %c0_11 = arith.constant 0 : index
    %25 = vector.load %arg1[%c3, %c0_10, %c0_11] : memref<4x16x8xf32, #tpu.memory_space<vmem>>, vector<1x16x8xf32>
    %26 = vector.shape_cast %25 : vector<1x16x8xf32> to vector<16x8xf32>
    %cst_12 = arith.constant dense<0.000000e+00> : vector<64x8xf32>
    %27 = tpu.matmul %0, %26, %cst_12 {dimension_numbers = #tpu.dot_dimension_numbers<[1], [0], [0], [1], [0, 0, 1, 1], [], []>, precision = #tpu.contract_precision<fp32>} : vector<64x16xf32>, vector<16x8xf32>, vector<64x8xf32> -> vector<64x8xf32>
    %28 = vector.extract_strided_slice %27 {offsets = [0, 0], sizes = [16, 8], strides = [1, 1]} : vector<64x8xf32> to vector<16x8xf32>
    %29 = vector.extract_strided_slice %27 {offsets = [16, 0], sizes = [16, 8], strides = [1, 1]} : vector<64x8xf32> to vector<16x8xf32>
    %30 = vector.extract_strided_slice %27 {offsets = [32, 0], sizes = [16, 8], strides = [1, 1]} : vector<64x8xf32> to vector<16x8xf32>
    %31 = vector.extract_strided_slice %27 {offsets = [48, 0], sizes = [16, 8], strides = [1, 1]} : vector<64x8xf32> to vector<16x8xf32>
    %32 = tpu.concatenate %28, %29, %30, %31 in 1 : vector<16x8xf32>, vector<16x8xf32>, vector<16x8xf32>, vector<16x8xf32> -> vector<16x32xf32>
    %33 = tpu.concatenate %8, %16, %24, %32 in 0 : vector<16x32xf32>, vector<16x32xf32>, vector<16x32xf32>, vector<16x32xf32> -> vector<64x32xf32>
    %34 = tpu.concatenate %2, %10, %18, %26 in 0 : vector<16x8xf32>, vector<16x8xf32>, vector<16x8xf32>, vector<16x8xf32> -> vector<64x8xf32>
    %c0_13 = arith.constant 0 : index
    %c0_14 = arith.constant 0 : index
    %35 = vector.load %arg3[%c0_13, %c0_14] : memref<32x256xf32, #tpu.memory_space<vmem>>, vector<32x256xf32>
    %c0_15 = arith.constant 0 : index
    %c0_16 = arith.constant 0 : index
    %36 = vector.load %arg4[%c0_15, %c0_16] : memref<1x256xf32, #tpu.memory_space<vmem>>, vector<1x256xf32>
    %cst_17 = arith.constant dense<0.000000e+00> : vector<64x256xf32>
    %37 = tpu.matmul %33, %35, %cst_17 {dimension_numbers = #tpu.dot_dimension_numbers<[1], [0], [0], [1], [0, 0, 1, 1], [], []>, precision = #tpu.contract_precision<fp32>} : vector<64x32xf32>, vector<32x256xf32>, vector<64x256xf32> -> vector<64x256xf32>
    %38 = vector.broadcast %36 : vector<1x256xf32> to vector<64x256xf32>
    %39 = arith.addf %37, %38 : vector<64x256xf32>
    %40 = vector.extract_strided_slice %39 {offsets = [0, 0], sizes = [64, 128], strides = [1, 1]} : vector<64x256xf32> to vector<64x128xf32>
    %41 = vector.extract_strided_slice %39 {offsets = [0, 128], sizes = [64, 128], strides = [1, 1]} : vector<64x256xf32> to vector<64x128xf32>
    %cst_18 = arith.constant 5.000000e-01 : f32
    %42 = vector.broadcast %cst_18 : f32 to vector<64x128xf32>
    %43 = arith.mulf %42, %41 : vector<64x128xf32>
    %44 = math.tanh %43 : vector<64x128xf32>
    %cst_19 = arith.constant 1.000000e+00 : f32
    %45 = vector.broadcast %cst_19 : f32 to vector<64x128xf32>
    %46 = arith.addf %44, %45 : vector<64x128xf32>
    %cst_20 = arith.constant 5.000000e-01 : f32
    %47 = vector.broadcast %cst_20 : f32 to vector<64x128xf32>
    %48 = arith.mulf %47, %46 : vector<64x128xf32>
    %49 = arith.mulf %40, %48 : vector<64x128xf32>
    %c0_21 = arith.constant 0 : index
    %c0_22 = arith.constant 0 : index
    %c0_23 = arith.constant 0 : index
    %50 = vector.load %arg5[%c0_21, %c0_22, %c0_23] : memref<2x128x256xf32, #tpu.memory_space<vmem>>, vector<1x128x256xf32>
    %51 = vector.shape_cast %50 : vector<1x128x256xf32> to vector<128x256xf32>
    %c0_24 = arith.constant 0 : index
    %c0_25 = arith.constant 0 : index
    %c0_26 = arith.constant 0 : index
    %52 = vector.load %arg6[%c0_24, %c0_25, %c0_26] : memref<2x1x256xf32, #tpu.memory_space<vmem>>, vector<1x1x256xf32>
    %53 = vector.shape_cast %52 : vector<1x1x256xf32> to vector<1x256xf32>
    %cst_27 = arith.constant dense<0.000000e+00> : vector<64x256xf32>
    %54 = tpu.matmul %49, %51, %cst_27 {dimension_numbers = #tpu.dot_dimension_numbers<[1], [0], [0], [1], [0, 0, 1, 1], [], []>, precision = #tpu.contract_precision<fp32>} : vector<64x128xf32>, vector<128x256xf32>, vector<64x256xf32> -> vector<64x256xf32>
    %55 = vector.broadcast %53 : vector<1x256xf32> to vector<64x256xf32>
    %56 = arith.addf %54, %55 : vector<64x256xf32>
    %57 = vector.extract_strided_slice %56 {offsets = [0, 0], sizes = [64, 128], strides = [1, 1]} : vector<64x256xf32> to vector<64x128xf32>
    %58 = vector.extract_strided_slice %56 {offsets = [0, 128], sizes = [64, 128], strides = [1, 1]} : vector<64x256xf32> to vector<64x128xf32>
    %cst_28 = arith.constant 5.000000e-01 : f32
    %59 = vector.broadcast %cst_28 : f32 to vector<64x128xf32>
    %60 = arith.mulf %59, %58 : vector<64x128xf32>
    %61 = math.tanh %60 : vector<64x128xf32>
    %cst_29 = arith.constant 1.000000e+00 : f32
    %62 = vector.broadcast %cst_29 : f32 to vector<64x128xf32>
    %63 = arith.addf %61, %62 : vector<64x128xf32>
    %cst_30 = arith.constant 5.000000e-01 : f32
    %64 = vector.broadcast %cst_30 : f32 to vector<64x128xf32>
    %65 = arith.mulf %64, %63 : vector<64x128xf32>
    %66 = arith.mulf %57, %65 : vector<64x128xf32>
    %c1_31 = arith.constant 1 : index
    %c0_32 = arith.constant 0 : index
    %c0_33 = arith.constant 0 : index
    %67 = vector.load %arg5[%c1_31, %c0_32, %c0_33] : memref<2x128x256xf32, #tpu.memory_space<vmem>>, vector<1x128x256xf32>
    %68 = vector.shape_cast %67 : vector<1x128x256xf32> to vector<128x256xf32>
    %c1_34 = arith.constant 1 : index
    %c0_35 = arith.constant 0 : index
    %c0_36 = arith.constant 0 : index
    %69 = vector.load %arg6[%c1_34, %c0_35, %c0_36] : memref<2x1x256xf32, #tpu.memory_space<vmem>>, vector<1x1x256xf32>
    %70 = vector.shape_cast %69 : vector<1x1x256xf32> to vector<1x256xf32>
    %cst_37 = arith.constant dense<0.000000e+00> : vector<64x256xf32>
    %71 = tpu.matmul %66, %68, %cst_37 {dimension_numbers = #tpu.dot_dimension_numbers<[1], [0], [0], [1], [0, 0, 1, 1], [], []>, precision = #tpu.contract_precision<fp32>} : vector<64x128xf32>, vector<128x256xf32>, vector<64x256xf32> -> vector<64x256xf32>
    %72 = vector.broadcast %70 : vector<1x256xf32> to vector<64x256xf32>
    %73 = arith.addf %71, %72 : vector<64x256xf32>
    %74 = vector.extract_strided_slice %73 {offsets = [0, 0], sizes = [64, 128], strides = [1, 1]} : vector<64x256xf32> to vector<64x128xf32>
    %75 = vector.extract_strided_slice %73 {offsets = [0, 128], sizes = [64, 128], strides = [1, 1]} : vector<64x256xf32> to vector<64x128xf32>
    %cst_38 = arith.constant 5.000000e-01 : f32
    %76 = vector.broadcast %cst_38 : f32 to vector<64x128xf32>
    %77 = arith.mulf %76, %75 : vector<64x128xf32>
    %78 = math.tanh %77 : vector<64x128xf32>
    %cst_39 = arith.constant 1.000000e+00 : f32
    %79 = vector.broadcast %cst_39 : f32 to vector<64x128xf32>
    %80 = arith.addf %78, %79 : vector<64x128xf32>
    %cst_40 = arith.constant 5.000000e-01 : f32
    %81 = vector.broadcast %cst_40 : f32 to vector<64x128xf32>
    %82 = arith.mulf %81, %80 : vector<64x128xf32>
    %83 = arith.mulf %74, %82 : vector<64x128xf32>
    %c0_41 = arith.constant 0 : index
    %c0_42 = arith.constant 0 : index
    %84 = vector.load %arg7[%c0_41, %c0_42] : memref<128x16xf32, #tpu.memory_space<vmem>>, vector<128x16xf32>
    %cst_43 = arith.constant dense<0.000000e+00> : vector<64x16xf32>
    %85 = tpu.matmul %83, %84, %cst_43 {dimension_numbers = #tpu.dot_dimension_numbers<[1], [0], [0], [1], [0, 0, 1, 1], [], []>, precision = #tpu.contract_precision<fp32>} : vector<64x128xf32>, vector<128x16xf32>, vector<64x16xf32> -> vector<64x16xf32>
    %c0_44 = arith.constant 0 : index
    %c0_45 = arith.constant 0 : index
    %86 = vector.load %arg8[%c0_44, %c0_45] : memref<16x24xf32, #tpu.memory_space<vmem>>, vector<16x24xf32>
    %cst_46 = arith.constant dense<0.000000e+00> : vector<64x24xf32>
    %87 = tpu.matmul %85, %86, %cst_46 {dimension_numbers = #tpu.dot_dimension_numbers<[1], [0], [0], [1], [0, 0, 1, 1], [], []>, precision = #tpu.contract_precision<fp32>} : vector<64x16xf32>, vector<16x24xf32>, vector<64x24xf32> -> vector<64x24xf32>
    %c0_47 = arith.constant 0 : index
    %c0_48 = arith.constant 0 : index
    %88 = vector.load %arg9[%c0_47, %c0_48] : memref<1x24xf32, #tpu.memory_space<vmem>>, vector<1x24xf32>
    %89 = vector.broadcast %88 : vector<1x24xf32> to vector<64x24xf32>
    %90 = arith.addf %87, %89 : vector<64x24xf32>
    %91 = vector.extract_strided_slice %90 {offsets = [0, 0], sizes = [64, 16], strides = [1, 1]} : vector<64x24xf32> to vector<64x16xf32>
    %cst_49 = arith.constant 5.000000e-01 : f32
    %92 = vector.broadcast %cst_49 : f32 to vector<64x16xf32>
    %93 = arith.mulf %92, %91 : vector<64x16xf32>
    %94 = math.tanh %93 : vector<64x16xf32>
    %cst_50 = arith.constant 1.000000e+00 : f32
    %95 = vector.broadcast %cst_50 : f32 to vector<64x16xf32>
    %96 = arith.addf %94, %95 : vector<64x16xf32>
    %cst_51 = arith.constant 5.000000e-01 : f32
    %97 = vector.broadcast %cst_51 : f32 to vector<64x16xf32>
    %98 = arith.mulf %97, %96 : vector<64x16xf32>
    %99 = vector.extract_strided_slice %90 {offsets = [0, 16], sizes = [64, 8], strides = [1, 1]} : vector<64x24xf32> to vector<64x8xf32>
    %100 = tpu.concatenate %98, %34 in 1 : vector<64x16xf32>, vector<64x8xf32> -> vector<64x24xf32>
    %c0_52 = arith.constant 0 : index
    %c0_53 = arith.constant 0 : index
    %101 = vector.load %arg10[%c0_52, %c0_53] : memref<24x16xf32, #tpu.memory_space<vmem>>, vector<24x16xf32>
    %cst_54 = arith.constant dense<0.000000e+00> : vector<64x16xf32>
    %102 = tpu.matmul %100, %101, %cst_54 {dimension_numbers = #tpu.dot_dimension_numbers<[1], [0], [0], [1], [0, 0, 1, 1], [], []>, precision = #tpu.contract_precision<fp32>} : vector<64x24xf32>, vector<24x16xf32>, vector<64x16xf32> -> vector<64x16xf32>
    %c0_55 = arith.constant 0 : index
    %c0_56 = arith.constant 0 : index
    %103 = vector.load %arg11[%c0_55, %c0_56] : memref<1x16xf32, #tpu.memory_space<vmem>>, vector<1x16xf32>
    %104 = vector.broadcast %103 : vector<1x16xf32> to vector<64x16xf32>
    %105 = arith.addf %102, %104 : vector<64x16xf32>
    %106 = vector.extract_strided_slice %105 {offsets = [0, 0], sizes = [64, 8], strides = [1, 1]} : vector<64x16xf32> to vector<64x8xf32>
    %107 = vector.extract_strided_slice %105 {offsets = [0, 8], sizes = [64, 8], strides = [1, 1]} : vector<64x16xf32> to vector<64x8xf32>
    %108 = arith.subf %99, %107 : vector<64x8xf32>
    %cst_57 = arith.constant 5.000000e-01 : f32
    %109 = vector.broadcast %cst_57 : f32 to vector<64x8xf32>
    %110 = arith.mulf %109, %108 : vector<64x8xf32>
    %111 = math.tanh %110 : vector<64x8xf32>
    %cst_58 = arith.constant 1.000000e+00 : f32
    %112 = vector.broadcast %cst_58 : f32 to vector<64x8xf32>
    %113 = arith.addf %111, %112 : vector<64x8xf32>
    %cst_59 = arith.constant 5.000000e-01 : f32
    %114 = vector.broadcast %cst_59 : f32 to vector<64x8xf32>
    %115 = arith.mulf %114, %113 : vector<64x8xf32>
    %116 = tpu.concatenate %106, %115 in 1 : vector<64x8xf32>, vector<64x8xf32> -> vector<64x16xf32>
    %117 = vector.extract_strided_slice %116 {offsets = [0, 0], sizes = [16, 16], strides = [1, 1]} : vector<64x16xf32> to vector<16x16xf32>
    %c0_60 = arith.constant 0 : index
    %c0_61 = arith.constant 0 : index
    %c0_62 = arith.constant 0 : index
    %118 = vector.load %arg12[%c0_60, %c0_61, %c0_62] : memref<4x16x16xf32, #tpu.memory_space<vmem>>, vector<1x16x16xf32>
    %119 = vector.shape_cast %118 : vector<1x16x16xf32> to vector<16x16xf32>
    %120 = vector.shape_cast %117 : vector<16x16xf32> to vector<1x16x16xf32>
    tpu.vector_store %arg12[%c0_60, %c0_61, %c0_62], %120 {strides = array<i32>} : memref<4x16x16xf32, #tpu.memory_space<vmem>>, vector<1x16x16xf32>,
    %121 = vector.extract_strided_slice %116 {offsets = [16, 0], sizes = [16, 16], strides = [1, 1]} : vector<64x16xf32> to vector<16x16xf32>
    %c1_63 = arith.constant 1 : index
    %c0_64 = arith.constant 0 : index
    %c0_65 = arith.constant 0 : index
    %122 = vector.load %arg12[%c1_63, %c0_64, %c0_65] : memref<4x16x16xf32, #tpu.memory_space<vmem>>, vector<1x16x16xf32>
    %123 = vector.shape_cast %122 : vector<1x16x16xf32> to vector<16x16xf32>
    %124 = vector.shape_cast %121 : vector<16x16xf32> to vector<1x16x16xf32>
    tpu.vector_store %arg12[%c1_63, %c0_64, %c0_65], %124 {strides = array<i32>} : memref<4x16x16xf32, #tpu.memory_space<vmem>>, vector<1x16x16xf32>,
    %125 = vector.extract_strided_slice %116 {offsets = [32, 0], sizes = [16, 16], strides = [1, 1]} : vector<64x16xf32> to vector<16x16xf32>
    %c2_66 = arith.constant 2 : index
    %c0_67 = arith.constant 0 : index
    %c0_68 = arith.constant 0 : index
    %126 = vector.load %arg12[%c2_66, %c0_67, %c0_68] : memref<4x16x16xf32, #tpu.memory_space<vmem>>, vector<1x16x16xf32>
    %127 = vector.shape_cast %126 : vector<1x16x16xf32> to vector<16x16xf32>
    %128 = vector.shape_cast %125 : vector<16x16xf32> to vector<1x16x16xf32>
    tpu.vector_store %arg12[%c2_66, %c0_67, %c0_68], %128 {strides = array<i32>} : memref<4x16x16xf32, #tpu.memory_space<vmem>>, vector<1x16x16xf32>,
    %129 = vector.extract_strided_slice %116 {offsets = [48, 0], sizes = [16, 16], strides = [1, 1]} : vector<64x16xf32> to vector<16x16xf32>
    %c3_69 = arith.constant 3 : index
    %c0_70 = arith.constant 0 : index
    %c0_71 = arith.constant 0 : index
    %130 = vector.load %arg12[%c3_69, %c0_70, %c0_71] : memref<4x16x16xf32, #tpu.memory_space<vmem>>, vector<1x16x16xf32>
    %131 = vector.shape_cast %130 : vector<1x16x16xf32> to vector<16x16xf32>
    %132 = vector.shape_cast %129 : vector<16x16xf32> to vector<1x16x16xf32>
    tpu.vector_store %arg12[%c3_69, %c0_70, %c0_71], %132 {strides = array<i32>} : memref<4x16x16xf32, #tpu.memory_space<vmem>>, vector<1x16x16xf32>,
    return
  }
  func.func @transform_0(%arg0: i32) -> (i32, i32, i32) {
    %c0_i32 = arith.constant 0 : i32
    %c0_i32_0 = arith.constant 0 : i32
    %c0_i32_1 = arith.constant 0 : i32
    return %arg0, %c0_i32, %c0_i32_0 : i32, i32, i32
  }
  func.func @transform_1(%arg0: i32) -> (i32, i32) {
    %c0_i32 = arith.constant 0 : i32
    %c0_i32_0 = arith.constant 0 : i32
    %c0_i32_1 = arith.constant 0 : i32
    return %c0_i32, %c0_i32_0 : i32, i32
  }
  func.func @transform_2(%arg0: i32) -> (i32, i32) {
    %c0_i32 = arith.constant 0 : i32
    %c0_i32_0 = arith.constant 0 : i32
    %c0_i32_1 = arith.constant 0 : i32
    return %c0_i32, %c0_i32_0 : i32, i32
  }
  func.func @transform_3(%arg0: i32) -> (i32, i32) {
    %c0_i32 = arith.constant 0 : i32
    %c0_i32_0 = arith.constant 0 : i32
    %c0_i32_1 = arith.constant 0 : i32
    return %c0_i32, %c0_i32_0 : i32, i32
  }
  func.func @transform_4(%arg0: i32) -> (i32, i32, i32) {
    %c0_i32 = arith.constant 0 : i32
    %c0_i32_0 = arith.constant 0 : i32
    %c0_i32_1 = arith.constant 0 : i32
    %c0_i32_2 = arith.constant 0 : i32
    return %c0_i32, %c0_i32_0, %c0_i32_1 : i32, i32, i32
  }
  func.func @transform_5(%arg0: i32) -> (i32, i32, i32) {
    %c0_i32 = arith.constant 0 : i32
    %c0_i32_0 = arith.constant 0 : i32
    %c0_i32_1 = arith.constant 0 : i32
    %c0_i32_2 = arith.constant 0 : i32
    return %c0_i32, %c0_i32_0, %c0_i32_1 : i32, i32, i32
  }
  func.func @transform_6(%arg0: i32) -> (i32, i32) {
    %c0_i32 = arith.constant 0 : i32
    %c0_i32_0 = arith.constant 0 : i32
    %c0_i32_1 = arith.constant 0 : i32
    return %c0_i32, %c0_i32_0 : i32, i32
  }
  func.func @transform_7(%arg0: i32) -> (i32, i32) {
    %c0_i32 = arith.constant 0 : i32
    %c0_i32_0 = arith.constant 0 : i32
    %c0_i32_1 = arith.constant 0 : i32
    return %c0_i32, %c0_i32_0 : i32, i32
  }
  func.func @transform_8(%arg0: i32) -> (i32, i32) {
    %c0_i32 = arith.constant 0 : i32
    %c0_i32_0 = arith.constant 0 : i32
    %c0_i32_1 = arith.constant 0 : i32
    return %c0_i32, %c0_i32_0 : i32, i32
  }
  func.func @transform_9(%arg0: i32) -> (i32, i32) {
    %c0_i32 = arith.constant 0 : i32
    %c0_i32_0 = arith.constant 0 : i32
    %c0_i32_1 = arith.constant 0 : i32
    return %c0_i32, %c0_i32_0 : i32, i32
  }
  func.func @transform_10(%arg0: i32) -> (i32, i32) {
    %c0_i32 = arith.constant 0 : i32
    %c0_i32_0 = arith.constant 0 : i32
    %c0_i32_1 = arith.constant 0 : i32
    return %c0_i32, %c0_i32_0 : i32, i32
  }
  func.func @transform_11(%arg0: i32) -> (i32, i32, i32) {
    %c0_i32 = arith.constant 0 : i32
    %c0_i32_0 = arith.constant 0 : i32
    %c0_i32_1 = arith.constant 0 : i32
    return %arg0, %c0_i32, %c0_i32_0 : i32, i32, i32
  }
}

</mosaic_0001>

<bundles_post_ra>
// kernel: stock_block_layer.1
= control target key start
LH: loop header
LB: loop body
LE: loop exit
PB: predicated region body
PF: predicated region fallthrough
CT: control target
= control target key end

     0   :  { %s7228_s17 = smov 0   ;;  %s10970_s0 = inlined_call_operand.vmem [shape: f32[8,16,8], index: 0, kind: input, shape index: {}]   ;;  %s10971_s1 = inlined_call_operand.vmem [shape: f32[64,16], index: 1, kind: input, shape index: {}]   ;;  %s10972_s2 = inlined_call_operand.vmem [shape: f32[32,256], index: 2, kind: input, shape index: {}]   ;;  %s10973_s3 = inlined_call_operand.vmem [shape: f32[1,256], index: 3, kind: input, shape index: {}]   ;;  %s10974_s4 = inlined_call_operand.vmem [shape: f32[2,128,256], index: 4, kind: input, shape index: {}]   ;;  %s10975_s5 = inlined_call_operand.vmem [shape: f32[2,1,256], index: 5, kind: input, shape index: {}]   ;;  %s10976_s6 = inlined_call_operand.vmem [shape: f32[128,16], index: 6, kind: input, shape index: {}]   ;;  %s10977_s7 = inlined_call_operand.vmem [shape: f32[16,24], index: 7, kind: input, shape index: {}]   ;;  %s10978_s8 = inlined_call_operand.vmem [shape: f32[1,24], index: 8, kind: input, shape index: {}]   ;;  %s10979_s9 = inlined_call_operand.vmem [shape: f32[24,16], index: 9, kind: input, shape index: {}]   ;;  %s10980_s10 = inlined_call_operand.vmem [shape: f32[1,16], index: 10, kind: input, shape index: {}]   ;;  %s10981_s11 = inlined_call_operand.vmem [shape: f32[8,16,16], index: 11, kind: output, shape index: {}]  }
   0x1 LB: > { %s6991_s18 = sadd.s32 4294967295, %s7162_s17   ;;  %p6995_p0 = scmp.ge.s32.totalorder %s7162_s17, 1  ;;  %s7162_s17 = sphi %s7228_s17, %s21_s17  }
   0x2   : > { %p339_p1 = scmp.lt.s32.totalorder %s7162_s17, 3 }
   0x4   : > { %p340_p2 = pnand %p6995_p0, %p339_p1 }
   0x6   : > { %343 = sbr.rel (%p340_p2) target bundleno = 2402 (0x962), region = 64 }
   0xb   : > { %s6996_s19 = sshll.u32 %s6991_s18, 2  ;;  %v399_v0 = vld [vmem:[%s10971_s1 + $0x20] sm:$0xff]  ;;  %vm405_vm0 = vcmask 130048   ;;  %v400_v2 = vld [vmem:[%s10971_s1 + $0x28] sm:$0xff]  ;;  %v401_v12 = vld [vmem:[%s10971_s1 + $0x30] sm:$0xff]  ;;  %s7164_s23 = smov 8  }
   0xc   : > { %v395_v1 = vld [vmem:[%s10971_s1] sm:$0xff]  ;;  %p382_p3 = scmp.lt.s32.totalorder %s6996_s19, 7  ;;  %v419_v3 = vsel %vm405_vm0, %v399_v0, 0  ;;  %v422_v5 = vsel %vm405_vm0, %v400_v2, 0  ;;  %v396_v6 = vld [vmem:[%s10971_s1 + $0x8] sm:$0xff]  ;;  %v397_v13 = vld [vmem:[%s10971_s1 + $0x10] sm:$0xff] }
   0xd   : > { %v407_v4 = vsel %vm405_vm0, %v395_v1, 0  ;;  %v7251_v7 = vand.u32 4294901760, %v419_v3  ;;  %v7255_v9 = vand.u32 4294901760, %v422_v5  ;;  %v410_v10 = vsel %vm405_vm0, %v396_v6, 0  ;;  %v402_v36 = vld [vmem:[%s10971_s1 + $0x38] sm:$0xff]  ;;  %s7165_s24 = smov 16  }
   0xe   : > { %v7253_v8 = vand.u32 4294901760, %v407_v4  ;;  %s11481_s19 = smov (!%p382_p3, %s6996_s19), 7  ;;  %v7260_v11 = vand.u32 4294901760, %v410_v10  ;;  %v425_v20 = vsel %vm405_vm0, %v401_v12, 0  ;;  %v413_v21 = vsel %vm405_vm0, %v397_v13, 0  ;;  %v398_v39 = vld [vmem:[%s10971_s1 + $0x18] sm:$0xff] }
   0xf   : > { %v7269_v14 = vsub.f32 %v419_v3, %v7251_v7  ;;  %s7049_s13 = sshll.u32 %s11481_s19, 4  ;;  %v7276_v16 = vsub.f32 %v422_v5, %v7255_v9  ;;  %v7310_v30 = vand.u32 4294901760, %v425_v20  ;;  %v7312_v31 = vand.u32 4294901760, %v413_v21  ;;  %s7166_s25 = smov 24  }
  0x10   : > { %v7272_v15 = vsub.f32 %v407_v4, %v7253_v8  ;;  %v7279_v17 = vsub.f32 %v410_v10, %v7260_v11  ;;  %s7286_s16 = scalar_lea.vmem %s10970_s0, %s7049_s13  ;;  %v428_v46 = vsel %vm405_vm0, %v402_v36, 0  ;;  %v416_v48 = vsel %vm405_vm0, %v398_v39, 0  ;;  %s7167_s27 = smov 120  }
  0x11   : > { %v7289_v18 = vand.u32 4294901760, %v7269_v14  ;;  %v404_v22 = vld [vmem:[%s7286_s16 + $0x8] sm:$0xff]  ;;  %v403_v23 = vld [vmem:[%s7286_s16] sm:$0xff]  ;;  %v7305_v28 = vand.u32 4294901760, %v7276_v16  ;;  %v7332_v41 = vsub.f32 %v425_v20, %v7310_v30  ;;  %v7335_v42 = vsub.f32 %v413_v21, %v7312_v31  ;;  %v7003_v47 = vld [vmem:[%s7286_s16 + $0x18] sm:$0xff]  ;;  %s393_s29 = scalar_lea.vmem %s10981_s11, %s7049_s13 }
  0x12   : > { %v7292_v19 = vand.u32 4294901760, %v7272_v15  ;;  %v444_v24 = vand.u32 4294901760, %v404_v22  ;;  %v7298_v25 = vand.u32 4294901760, %v403_v23  ;;  %v7308_v29 = vand.u32 4294901760, %v7279_v17  ;;  %v7002_v20 = vld [vmem:[%s7286_s16 + $0x10] sm:$0xff] }
  0x13   : > { %v483_v26 = vsub.f32 %v7269_v14, %v7289_v18  ;;  %v491_v40 = vsub.f32 %v7276_v16, %v7305_v28  ;;  %v7342_v49 = vand.u32 4294901760, %v7003_v47  ;;  %v7347_v53 = vand.u32 4294901760, %v7332_v41 }
  0x14   : > { %v451_v27 = vsub.f32 %v7272_v15, %v7292_v19  ;;  %7051 = vmatpush.msra.mxu2 %v444_v24  ;;  %445 = vmatpush.msra.mxu0 %v444_v24  ;;  %v528_v34 = vsub.f32 %v404_v22, %v444_v24  ;;  %v534_v35 = vsub.f32 %v403_v23, %v7298_v25  ;;  %v7349_v54 = vand.u32 4294901760, %v428_v46 }
  0x15   : > { %v7314_v32 = vand.u32 4294901760, %v483_v26  ;;  %v459_v45 = vsub.f32 %v7279_v17, %v7308_v29  ;;  %v7344_v52 = vand.u32 4294901760, %v491_v40  ;;  %v939_v55 = vsub.f32 %v7003_v47, %v7342_v49  ;;  %v7005_v26 = vld [vmem:[%s7286_s16 + $0x28] sm:$0xff] }
  0x16   : > { %v7316_v33 = vand.u32 4294901760, %v451_v27  ;;  %7052 = vmatpush.msra.mxu2 %v7298_v25  ;;  %447 = vmatpush.msra.mxu0 %v7298_v25  ;;  %v529_v37 = vand.u32 4294901760, %v528_v34  ;;  %v535_v38 = vand.u32 4294901760, %v534_v35  ;;  %11092 = vst [vmem:[#allocation2_spill] sm:$0xff] %v7349_v54  ;;  %v7356_v57 = vand.u32 4294901760, %v7335_v42 }
  0x17   : > { %485 = vmatmul.f32.vlgmr.msra.gmra.mxu2 %v7314_v32  ;;  %v7353_v56 = vand.u32 4294901760, %v459_v45  ;;  %v7358_v58 = vand.u32 4294901760, %v416_v48  ;;  %v499_v59 = vsub.f32 %v7332_v41, %v7347_v53  ;;  %v7365_v60 = vsub.f32 %v428_v46, %v7349_v54 }
  0x18   : > { %453 = vmatmul.f32.vlgmr.msra.gmra.mxu0 %v7316_v33  ;;  %v530_v43 = vsub.f32 %v528_v34, %v529_v37  ;;  %588 = vmatpush.msrb.mxu2 %v528_v34  ;;  %v536_v44 = vsub.f32 %v534_v35, %v535_v38  ;;  %v467_v61 = vsub.f32 %v7335_v42, %v7356_v57  ;;  %v940_v63 = vand.u32 4294901760, %v939_v55 }
  0x19   : > { %717 = vmatpush.msrb.mxu0 %v529_v37  ;;  %v7372_v62 = vsub.f32 %v416_v48, %v7358_v58  ;;  %v7374_v1 = vand.u32 4294901760, %v499_v59  ;;  %v7377_v2 = vand.u32 4294901760, %v7365_v60  ;;  %v857_v21 = vand.u32 4294901760, %v7002_v20 }
  0x1a   : > { %v531_v50 = vand.u32 4294901760, %v530_v43  ;;  %v537_v51 = vand.u32 4294901760, %v536_v44  ;;  %591 = vmatpush.msrb.mxu2 %v534_v35  ;;  %v941_v0 = vsub.f32 %v939_v55, %v940_v63  ;;  %v7381_v3 = vand.u32 4294901760, %v467_v61  ;;  %v7004_v35 = vld [vmem:[%s7286_s16 + $0x20] sm:$0xff] }
  0x1b   : > { %721 = vmatpush.msrb.mxu0 %v535_v38  ;;  %11093 = vst [vmem:[#allocation3_spill] sm:$0xff] %v7377_v2  ;;  %v7384_v4 = vand.u32 4294901760, %v7372_v62  ;;  %v507_v6 = vsub.f32 %v7365_v60, %v7377_v2  ;;  %v945_v22 = vsub.f32 %v7002_v20, %v857_v21  ;;  %v1264_v27 = vand.u32 4294901760, %v7005_v26 }
  0x1c   : > { %856 = vmatpush.msra.mxu2 %v7342_v49  ;;  %532 = vmatpush.msra.mxu1 %v531_v50  ;;  %v942_v5 = vand.u32 4294901760, %v941_v0  ;;  %v1266_v37 = vand.u32 4294901760, %v7004_v35  ;;  %vm830_vm1 = vcmask 64512   ;;  %vm835_vm2 = vcmask 195584  }
  0x1d   : > { %7053 = vmatpush.msra.mxu3 %v531_v50  ;;  %999 = vmatpush.msra.mxu0 %v939_v55  ;;  %v475_v10 = vsub.f32 %v7372_v62, %v7384_v4  ;;  %v7395_v12 = vand.u32 4294901760, %v507_v6  ;;  %v946_v23 = vand.u32 4294901760, %v945_v22  ;;  %v1348_v36 = vsub.f32 %v7005_v26, %v1264_v27 }
  0x1e   : > { %538 = vmatpush.msra.mxu1 %v537_v51  ;;  %858 = vmatpush.msra.mxu2 %v857_v21  ;;  %v1354_v39 = vsub.f32 %v7004_v35, %v1266_v37  ;;  %vm2079_vm3 = vcmask 261120  }
  0x1f   : > { %7054 = vmatpush.msra.mxu3 %v537_v51  ;;  %493 = vmatmul.f32.gmra.mxu2 %v7344_v52  ;;  %v7397_v13 = vand.u32 4294901760, %v475_v10  ;;  %v1349_v38 = vand.u32 4294901760, %v1348_v36 }
  0x20   : > { %540 = vmatmul.f32.vlgmr.msra.gmra.mxu1 %v7253_v8  ;;  %556 = vmatmul.f32.vlgmr.msra.gmra.mxu3 %v7251_v7  ;;  %v1355_v43 = vand.u32 4294901760, %v1354_v39 }
  0x21   : > { %461 = vmatmul.f32.gmra.mxu0 %v7353_v56  ;;  %648 = vmatpush.msrb.mxu3 %v444_v24  ;;  %v1350_v40 = vsub.f32 %v1348_v36, %v1349_v38 }
  0x22   : > { %770 = vmatpush.msrb.mxu1 %v444_v24  ;;  %1002 = vmatpush.msra.mxu0 %v945_v22  ;;  %v947_v24 = vsub.f32 %v945_v22, %v946_v23  ;;  %v1356_v46 = vsub.f32 %v1354_v39, %v1355_v43 }
  0x23   : > { %650 = vmatpush.msrb.mxu3 %v7298_v25  ;;  %v1351_v45 = vand.u32 4294901760, %v1350_v40 }
  0x24   : > { %772 = vmatpush.msrb.mxu1 %v7298_v25  ;;  %v948_v25 = vand.u32 4294901760, %v947_v24 }
  0x25   : > { %943 = vmatpush.msra.mxu3 %v942_v5 }
  0x26   : > { %1059 = vmatpush.msra.mxu1 %v7342_v49 }
  0x27   : > { %501 = vmatmul.f32.gmra.mxu2 %v7374_v1  ;;  %949 = vmatpush.msra.mxu3 %v948_v25 }
  0x28   : > { %544 = vmatmul.f32.gmra.mxu1 %v7260_v11  ;;  %560 = vmatmul.f32.gmra.mxu3 %v7255_v9 }
  0x29   : > { %469 = vmatmul.f32.gmra.mxu0 %v7381_v3  ;;  %1061 = vmatpush.msra.mxu1 %v857_v21 }
  0x2f   : > { %509 = vmatmul.f32.gmra.mxu2 %v7395_v12 }
  0x30   : > { %548 = vmatmul.f32.gmra.mxu1 %v7312_v31  ;;  %564 = vmatmul.f32.gmra.mxu3 %v7310_v30 }
  0x31   : > { %477 = vmatmul.f32.gmra.mxu0 %v7397_v13 }
  0x37   : > { %594 = vmatmul.f32.vlgmr.msrb.gmra.mxu2 %v7272_v15 }
  0x38   : > { %552 = vmatmul.f32.gmra.mxu1 %v7358_v58  ;;  %568 = vmatmul.f32.gmra.mxu3 %v7349_v54 }
  0x39   : > { %723 = vmatmul.f32.vlgmr.msrb.gmra.mxu0 %v7253_v8  ;;  %1128 = vmatpush.msrb.mxu2 %v940_v63 }
  0x3a   : > { %1265 = vmatpush.msrb.mxu0 %v1264_v27 }
  0x3b   : > { %1132 = vmatpush.msrb.mxu2 %v946_v23 }
  0x3c   : > { %1267 = vmatpush.msrb.mxu0 %v1266_v37 }
  0x3f   : > { %599 = vmatmul.f32.gmra.mxu2 %v7279_v17 }
  0x40   : > { %774 = vmatmul.f32.vlgmr.msrb.gmra.mxu1 %v7253_v8  ;;  %654 = vmatmul.f32.vlgmr.msrb.gmra.mxu3 %v7292_v19 }
  0x41   : > { %727 = vmatmul.f32.gmra.mxu0 %v7260_v11  ;;  %1181 = vmatpush.msrb.mxu3 %v7342_v49  ;;  %v1357_v49 = vand.u32 4294901760, %v1356_v46 }
  0x42   : > { %1352 = vmatpush.msrb.mxu1 %v1351_v45 }
  0x43   : > { %1183 = vmatpush.msrb.mxu3 %v857_v21 }
  0x44   : > { %1358 = vmatpush.msrb.mxu1 %v1357_v49 }
  0x47   : > { %604 = vmatmul.f32.gmra.mxu2 %v7335_v42 }
  0x48   : > { %778 = vmatmul.f32.gmra.mxu1 %v7260_v11  ;;  %660 = vmatmul.f32.gmra.mxu3 %v7308_v29 }
  0x49   : > { %731 = vmatmul.f32.gmra.mxu0 %v7312_v31 }
  0x4f   : > { %609 = vmatmul.f32.gmra.mxu2 %v7372_v62 }
  0x50   : > { %782 = vmatmul.f32.gmra.mxu1 %v7312_v31  ;;  %666 = vmatmul.f32.gmra.mxu3 %v7356_v57 }
  0x51   : > { %735 = vmatmul.f32.gmra.mxu0 %v7358_v58 }
  0x57   : > { %614 = vmatmul.f32.gmra.mxu2 %v7269_v14 }
  0x58   : > { %786 = vmatmul.f32.gmra.mxu1 %v7358_v58  ;;  %672 = vmatmul.f32.gmra.mxu3 %v7384_v4 }
  0x59   : > { %739 = vmatmul.f32.gmra.mxu0 %v7251_v7 }
  0x5f   : > { %619 = vmatmul.f32.gmra.mxu2 %v7276_v16 }
  0x60   : > { %790 = vmatmul.f32.gmra.mxu1 %v7251_v7  ;;  %678 = vmatmul.f32.gmra.mxu3 %v7289_v18 }
  0x61   : > { %743 = vmatmul.f32.gmra.mxu0 %v7255_v9 }
  0x67   : > { %624 = vmatmul.f32.gmra.mxu2 %v7332_v41 }
  0x68   : > { %794 = vmatmul.f32.gmra.mxu1 %v7255_v9  ;;  %684 = vmatmul.f32.gmra.mxu3 %v7305_v28 }
  0x69   : > { %747 = vmatmul.f32.gmra.mxu0 %v7310_v30 }
  0x6f   : > { %629 = vmatmul.f32.gmra.mxu2 %v7365_v60 }
  0x70   : > { %798 = vmatmul.f32.gmra.mxu1 %v7310_v30  ;;  %690 = vmatmul.f32.gmra.mxu3 %v7347_v53 }
  0x71   : > { %751 = vmatmul.f32.gmra.mxu0 %v7349_v54 }
  0x77   : > { %864 = vmatmul.f32.vlgmr.msra.gmra.mxu2 %v7316_v33 }
  0x78   : > { %802 = vmatmul.f32.gmra.mxu1 %v7349_v54  ;;  %696 = vmatmul.f32.gmra.mxu3 %v7377_v2 }
  0x79   : > { %1005 = vmatmul.f32.vlgmr.msra.gmra.mxu0 %v7272_v15  ;;  %1408 = vmatpush.msra.mxu2 %v1348_v36 }
  0x7a   : > { %1537 = vmatpush.msra.mxu0 %v1349_v38 }
  0x7b   : > { %1411 = vmatpush.msra.mxu2 %v1354_v39 }
  0x7c   : > { %1541 = vmatpush.msra.mxu0 %v1355_v43 }
  0x7f   : > { %872 = vmatmul.f32.gmra.mxu2 %v7353_v56 }
  0x80   : > { %1065 = vmatmul.f32.vlgmr.msra.gmra.mxu1 %v7292_v19  ;;  %951 = vmatmul.f32.vlgmr.msra.gmra.mxu3 %v7253_v8 }
  0x81   : > { %1010 = vmatmul.f32.gmra.mxu0 %v7279_v17  ;;  %1468 = vmatpush.msra.mxu3 %v1264_v27 }
  0x82   : > { %1590 = vmatpush.msra.mxu1 %v1264_v27 }
  0x83   : > { %1470 = vmatpush.msra.mxu3 %v1266_v37 }
  0x84   : > { %1592 = vmatpush.msra.mxu1 %v1266_v37 }
  0x87   : > { %880 = vmatmul.f32.gmra.mxu2 %v7381_v3 }
  0x88   : > { %1071 = vmatmul.f32.gmra.mxu1 %v7308_v29  ;;  %955 = vmatmul.f32.gmra.mxu3 %v7260_v11 }
  0x89   : > { %1015 = vmatmul.f32.gmra.mxu0 %v7335_v42 }
  0x8f   : > { %888 = vmatmul.f32.gmra.mxu2 %v7397_v13 }
  0x90   : > { %1077 = vmatmul.f32.gmra.mxu1 %v7356_v57  ;;  %959 = vmatmul.f32.gmra.mxu3 %v7312_v31 }
  0x91   : > { %1020 = vmatmul.f32.gmra.mxu0 %v7372_v62 }
  0x95   : > { %v454_v34 = vpop.f32.mrf.mxu0 }
  0x97   : > { %896 = vmatmul.f32.gmra.mxu2 %v7314_v32 }
  0x98   : > { %1083 = vmatmul.f32.gmra.mxu1 %v7384_v4  ;;  %963 = vmatmul.f32.gmra.mxu3 %v7358_v58 }
  0x99   : > { %1025 = vmatmul.f32.gmra.mxu0 %v7269_v14 }
  0x9a   : > { %v7459_v44 = vpop.f32.mrf.mxu2 }
  0x9d   : > { %v541_v47 = vpop.f32.mrf.mxu1 }
  0x9e   : > { %v462_v48 = vpop.f32.mrf.mxu0  ;;  %v542_v22 = vadd.f32 %v541_v47, %v454_v34 }
  0x9f   : > { %904 = vmatmul.f32.gmra.mxu2 %v7344_v52 }
  0xa0   : > { %1089 = vmatmul.f32.gmra.mxu1 %v7289_v18  ;;  %967 = vmatmul.f32.gmra.mxu3 %v7251_v7 }
  0xa1   : > { %1030 = vmatmul.f32.gmra.mxu0 %v7276_v16 }
  0xa2   : > { %v7465_v50 = vpop.f32.mrf.mxu2 }
  0xa3   : > { %v7467_v51 = vpop.f32.mrf.mxu3 }
  0xa5   : > { %v545_v55 = vpop.f32.mrf.mxu1 }
  0xa6   : > { %v470_v59 = vpop.f32.mrf.mxu0  ;;  %v546_v35 = vadd.f32 %v545_v55, %v462_v48 }
  0xa7   : > { %912 = vmatmul.f32.gmra.mxu2 %v7374_v1 }
  0xa8   : > { %1095 = vmatmul.f32.gmra.mxu1 %v7305_v28  ;;  %971 = vmatmul.f32.gmra.mxu3 %v7255_v9 }
  0xa9   : > { %1035 = vmatmul.f32.gmra.mxu0 %v7332_v41 }
  0xaa   : > { %v7473_v61 = vpop.f32.mrf.mxu2 }
  0xab   : > { %v7475_v63 = vpop.f32.mrf.mxu3 }
  0xad   : > { %v549_v0 = vpop.f32.mrf.mxu1 }
  0xae   : > { %v7477_v5 = vpop.f32.mrf.mxu0  ;;  %v550_v48 = vadd.f32 %v549_v0, %v470_v59 }
  0xaf   : > { %920 = vmatmul.f32.gmra.mxu2 %v7395_v12 }
  0xb0   : > { %1101 = vmatmul.f32.gmra.mxu1 %v7347_v53  ;;  %975 = vmatmul.f32.gmra.mxu3 %v7310_v30 }
  0xb1   : > { %1040 = vmatmul.f32.gmra.mxu0 %v7365_v60 }
  0xb2   : > { %v7483_v6 = vpop.f32.mrf.mxu2 }
  0xb3   : > { %v7485_v10 = vpop.f32.mrf.mxu3 }
  0xb5   : > { %v7487_v20 = vpop.f32.mrf.mxu1 }
  0xb6   : > { %v724_v21 = vpop.f32.mrf.mxu0 }
  0xb7   : > { %1134 = vmatmul.f32.vlgmr.msrb.gmra.mxu2 %v7253_v8 }
  0xb8   : > { %1107 = vmatmul.f32.gmra.mxu1 %v7377_v2  ;;  %979 = vmatmul.f32.gmra.mxu3 %v7349_v54 }
  0xb9   : > { %1273 = vmatmul.f32.vlgmr.msrb.gmra.mxu0 %v7316_v33 }
  0xba   : > { %v595_v23 = vpop.f32.mrf.mxu2 }
  0xbb   : > { %v7493_v24 = vpop.f32.mrf.mxu3  ;;  %v596_v25 = vadd.f32 %v595_v23, %v542_v22 }
  0xbd   : > { %v775_v26 = vpop.f32.mrf.mxu1 }
  0xbe   : > { %v728_v27 = vpop.f32.mrf.mxu0 }
  0xbf   : > { %1138 = vmatmul.f32.gmra.mxu2 %v7260_v11 }
  0xc0   : > { %1360 = vmatmul.f32.vlgmr.msrb.gmra.mxu1 %v7253_v8  ;;  %1185 = vmatmul.f32.vlgmr.msrb.gmra.mxu3 %v7253_v8 }
  0xc1   : > { %1281 = vmatmul.f32.gmra.mxu0 %v7353_v56 }
  0xc2   : > { %v600_v34 = vpop.f32.mrf.mxu2 }
  0xc3   : > { %v601_v36 = vadd.f32 %v600_v34, %v546_v35  ;;  %v655_v37 = vpop.f32.mrf.mxu3 }
  0xc4   : > { %v656_v38 = vadd.f32 %v655_v37, %v596_v25 }
  0xc5   : > { %v779_v39 = vpop.f32.mrf.mxu1 }
  0xc6   : > { %v732_v40 = vpop.f32.mrf.mxu0  ;;  %v725_v43 = vadd.f32 %v724_v21, %v656_v38 }
  0xc7   : > { %1142 = vmatmul.f32.gmra.mxu2 %v7312_v31 }
  0xc8   : > { %1364 = vmatmul.f32.gmra.mxu1 %v7260_v11  ;;  %v7501_v45 = vadd.f32 %v775_v26, %v725_v43  ;;  %1189 = vmatmul.f32.gmra.mxu3 %v7260_v11 }
  0xc9   : > { %1289 = vmatmul.f32.gmra.mxu0 %v7381_v3 }
  0xca   : > { %v605_v46 = vpop.f32.mrf.mxu2 }
  0xcb   : > { %v661_v47 = vpop.f32.mrf.mxu3  ;;  %v606_v21 = vadd.f32 %v605_v46, %v550_v48  ;;  %v7007_v46 = vld [vmem:[%s7286_s16 + $0x38] sm:$0xff] }
  0xcc   : > { %v662_v49 = vadd.f32 %v661_v47, %v601_v36  ;;  %v558_v47 = vadd.f32 %v7467_v51, %v7459_v44 }
  0xcd   : > { %v783_v55 = vpop.f32.mrf.mxu1 }
  0xce   : > { %v7505_v22 = vpop.f32.mrf.mxu0  ;;  %v729_v23 = vadd.f32 %v728_v27, %v662_v49 }
  0xcf   : > { %1146 = vmatmul.f32.gmra.mxu2 %v7358_v58 }
  0xd0   : > { %1368 = vmatmul.f32.gmra.mxu1 %v7312_v31  ;;  %v7509_v25 = vadd.f32 %v779_v39, %v729_v23  ;;  %1193 = vmatmul.f32.gmra.mxu3 %v7312_v31 }
  0xd1   : > { %1297 = vmatmul.f32.gmra.mxu0 %v7397_v13 }
  0xd2   : > { %11094 = vst [vmem:[#allocation4_spill] sm:$0xff] %v7509_v25  ;;  %v7513_v26 = vpop.f32.mrf.mxu2 }
  0xd3   : > { %v667_v35 = vpop.f32.mrf.mxu3 }
  0xd4   : > { %v668_v59 = vadd.f32 %v667_v35, %v606_v21 }
  0xd5   : > { %v7515_v0 = vpop.f32.mrf.mxu1 }
  0xd6   : > { %v740_v34 = vpop.f32.mrf.mxu0  ;;  %v733_v27 = vadd.f32 %v732_v40, %v668_v59  ;;  %v7525_v40 = vand.u32 4294901760, %v7007_v46 }
  0xd7   : > { %1150 = vmatmul.f32.gmra.mxu2 %v7251_v7 }
  0xd8   : > { %1372 = vmatmul.f32.gmra.mxu1 %v7358_v58  ;;  %1197 = vmatmul.f32.gmra.mxu3 %v7358_v58  ;;  %v784_v36 = vadd.f32 %v783_v55, %v733_v27  ;;  %v7533_v48 = vsub.f32 %v7007_v46, %v7525_v40 }
  0xd9   : > { %1305 = vmatmul.f32.gmra.mxu0 %v7314_v32  ;;  %1674 = vmatpush.msrb.mxu2 %v7525_v40 }
  0xda   : > { %808 = vrot.lane.b32.xlu0 %v784_v36, %s7164_s23  ;;  %v615_v37 = vpop.f32.mrf.mxu2  ;;  %1877 = vmatpush.msrb.mxu1 %v7525_v40  ;;  %v10982_v21 = vand.u32 4294901760, %v7533_v48 }
  0xdb   : > { %v673_v38 = vpop.f32.mrf.mxu3  ;;  %v616_v49 = vadd.f32 %v615_v37, %v558_v47  ;;  %1817 = vmatpush.msrb.mxu0 %v7533_v48  ;;  %v562_v37 = vadd.f32 %v7475_v63, %v7465_v50  ;;  %v566_v50 = vadd.f32 %v7485_v10, %v7473_v61  ;;  %v554_v63 = vadd.f32 %v7487_v20, %v7477_v5 }
  0xdc   : > { %v1759_v59 = vsub.f32 %v7533_v48, %v10982_v21  ;;  %v570_v61 = vadd.f32 %v7493_v24, %v7483_v6 }
  0xdd   : > { %v791_v39 = vpop.f32.mrf.mxu1 }
  0xde   : > { %v744_v43 = vpop.f32.mrf.mxu0  ;;  %v1760_v36 = vand.u32 4294901760, %v1759_v59 }
  0xdf   : > { %1154 = vmatmul.f32.gmra.mxu2 %v7255_v9 }
  0xe0   : > { %1376 = vmatmul.f32.gmra.mxu1 %v7251_v7  ;;  %1201 = vmatmul.f32.gmra.mxu3 %v7251_v7 }
  0xe1   : > { %1313 = vmatmul.f32.gmra.mxu0 %v7344_v52  ;;  %1761 = vmatpush.msrb.mxu3 %v1760_v36 }
  0xe2   : > { %v620_v55 = vpop.f32.mrf.mxu2 }
  0xe3   : > { %v679_v23 = vpop.f32.mrf.mxu3  ;;  %v621_v47 = vadd.f32 %v620_v55, %v562_v37 }
  0xe4   : > { %v680_v35 = vadd.f32 %v679_v23, %v616_v49 }
  0xe5   : > { %v795_v44 = vpop.f32.mrf.mxu1 }
  0xe6   : > { %v748_v51 = vpop.f32.mrf.mxu0  ;;  %v741_v27 = vadd.f32 %v740_v34, %v680_v35 }
  0xe7   : > { %1158 = vmatmul.f32.gmra.mxu2 %v7310_v30 }
  0xe8   : > { %1380 = vmatmul.f32.gmra.mxu1 %v7255_v9  ;;  %1205 = vmatmul.f32.gmra.mxu3 %v7255_v9  ;;  %v792_v46 = vadd.f32 %v791_v39, %v741_v27  ;;  %v611_v27 = vadd.f32 %v7513_v26, %v554_v63 }
  0xe9   : > { %1321 = vmatmul.f32.gmra.mxu0 %v7374_v1 }
  0xea   : > { %816 = vrot.lane.b32.xlu0 %v792_v46, %s7165_s24  ;;  %v625_v49 = vpop.f32.mrf.mxu2  ;;  %v674_v5 = vadd.f32 %v673_v38, %v611_v27 }
  0xeb   : > { %v685_v34 = vpop.f32.mrf.mxu3  ;;  %v626_v55 = vadd.f32 %v625_v49, %v566_v50  ;;  %v7567_v50 = vld [vmem:[%s7286_s16 + $0x30] sm:$0xff] }
  0xec   : > { %v686_v23 = vadd.f32 %v685_v34, %v621_v47  ;;  %11095 = vst [vmem:[#allocation5_spill] sm:$0xff] %v7567_v50  ;;  %v1675_v6 = vand.u32 4294901760, %v7567_v50 }
  0xed   : > { %v799_v35 = vpop.f32.mrf.mxu1 }
  0xee   : > { %v752_v21 = vpop.f32.mrf.mxu0  ;;  %v745_v25 = vadd.f32 %v744_v43, %v686_v23  ;;  %1676 = vmatpush.msrb.mxu2 %v1675_v6  ;;  %1879 = vmatpush.msrb.mxu1 %v1675_v6 }
  0xef   : > { %1162 = vmatmul.f32.gmra.mxu2 %v7349_v54 }
  0xf0   : > { %1384 = vmatmul.f32.gmra.mxu1 %v7310_v30  ;;  %1209 = vmatmul.f32.gmra.mxu3 %v7310_v30  ;;  %v796_v39 = vadd.f32 %v795_v44, %v745_v25  ;;  %v737_v44 = vadd.f32 %v7505_v22, %v674_v5  ;;  %v1763_v22 = vsub.f32 %v7567_v50, %v1675_v6 }
  0xf1   : > { %1329 = vmatmul.f32.gmra.mxu0 %v7395_v12 }
  0xf2   : > { %818 = vrot.lane.b32.xlu2 %v796_v39, %s7165_s24  ;;  %v630_v59 = vpop.f32.mrf.mxu2  ;;  %v788_v38 = vadd.f32 %v7515_v0, %v737_v44  ;;  %v1764_v63 = vand.u32 4294901760, %v1763_v22  ;;  %1820 = vmatpush.msrb.mxu0 %v1763_v22  ;;  %v11096_v39 = vand.u32 4294901760, %v7533_v48 }
  0xf3   : > { %v691_v43 = vpop.f32.mrf.mxu3  ;;  %v631_v20 = vadd.f32 %v630_v59, %v570_v61 }
  0xf4   : > { %v692_v36 = vadd.f32 %v691_v43, %v626_v55  ;;  %v1765_v0 = vsub.f32 %v1763_v22, %v1764_v63 }
  0xf5   : > { %v803_v37 = vpop.f32.mrf.mxu1 }
  0xf6   : > { %v1006_v46 = vpop.f32.mrf.mxu0  ;;  %v749_v47 = vadd.f32 %v748_v51, %v692_v36  ;;  %v1766_v36 = vand.u32 4294901760, %v1765_v0 }
  0xf7   : > { %1414 = vmatmul.f32.vlgmr.msra.gmra.mxu2 %v7272_v15 }
  0xf8   : > { %1388 = vmatmul.f32.gmra.mxu1 %v7349_v54  ;;  %1213 = vmatmul.f32.gmra.mxu3 %v7349_v54  ;;  %v800_v10 = vadd.f32 %v799_v35, %v749_v47 }
  0xf9   : > { %1543 = vmatmul.f32.vlgmr.msra.gmra.mxu0 %v7253_v8  ;;  %1946 = vmatpush.msra.mxu2 %v11096_v39 }
  0xfa   : > { %824 = vrot.lane.b32.xlu1 %v800_v10, %s7166_s25  ;;  %v865_v25 = vpop.f32.mrf.mxu2  ;;  %1767 = vmatpush.msrb.mxu3 %v1766_v36 }
  0xfb   : > { %v697_v26 = vpop.f32.mrf.mxu3  ;;  %1950 = vmatpush.msra.mxu2 %v1764_v63 }
  0xfc   : > { %v698_v51 = vadd.f32 %v697_v26, %v631_v20 }
  0xfd   : > { %v1066_v49 = vpop.f32.mrf.mxu1 }
  0xfe   : > { %v1011_v34 = vpop.f32.mrf.mxu0  ;;  %v753_v23 = vadd.f32 %v752_v21, %v698_v51 }
  0xff   : > { %1419 = vmatmul.f32.gmra.mxu2 %v7279_v17 }
 0x100   : > { %1594 = vmatmul.f32.vlgmr.msra.gmra.mxu1 %v7253_v8  ;;  %1474 = vmatmul.f32.vlgmr.msra.gmra.mxu3 %v7292_v19  ;;  %v804_v24 = vadd.f32 %v803_v37, %v753_v23 }
 0x101   : > { %1547 = vmatmul.f32.gmra.mxu0 %v7260_v11  ;;  %1999 = vmatpush.msra.mxu3 %v7525_v40 }
 0x102   : > { %826 = vrot.lane.b32.xlu2 %v804_v24, %s7166_s25  ;;  %810 = vrot.lane.b32.xlu1 %v788_v38, %s7164_s23  ;;  %v873_v21 = vpop.f32.mrf.mxu2 }
 0x103   : > { %v952_v35 = vpop.f32.mrf.mxu3  ;;  %2001 = vmatpush.msra.mxu3 %v1675_v6 }
 0x104   : > { %v953_v55 = vadd.f32 %v952_v35, %v865_v25 }
 0x105   : > { %v1072_v59 = vpop.f32.mrf.mxu1 }
 0x106   : > { %v7580_v43 = vpop.f32.mrf.mxu0  ;;  %v1007_v27 = vadd.f32 %v1006_v46, %v953_v55 }
 0x107   : > { %1424 = vmatmul.f32.gmra.mxu2 %v7335_v42 }
 0x108   : > { %1598 = vmatmul.f32.gmra.mxu1 %v7260_v11  ;;  %1480 = vmatmul.f32.gmra.mxu3 %v7308_v29  ;;  %v1067_v37 = vadd.f32 %v1066_v49, %v1007_v27 }
 0x109   : > { %1551 = vmatmul.f32.gmra.mxu0 %v7312_v31 }
 0x10a   : > { %v7586_v48 = vpop.f32.mrf.mxu2 }
 0x10b   : > { %v956_v47 = vpop.f32.mrf.mxu3 }
 0x10c   : > { %v957_v61 = vadd.f32 %v956_v47, %v873_v21 }
 0x10d   : > { %v7589_v5 = vpop.f32.mrf.mxu1 }
 0x10e   : > { %v7591_v46 = vpop.f32.mrf.mxu0  ;;  %v1012_v10 = vadd.f32 %v1011_v34, %v957_v61 }
 0x10f   : > { %1429 = vmatmul.f32.gmra.mxu2 %v7372_v62 }
 0x110   : > { %1602 = vmatmul.f32.gmra.mxu1 %v7312_v31  ;;  %1486 = vmatmul.f32.gmra.mxu3 %v7356_v57  ;;  %v1073_v20 = vadd.f32 %v1072_v59, %v1012_v10 }
 0x111   : > { %1555 = vmatmul.f32.gmra.mxu0 %v7358_v58 }
 0x112   : > { %v7597_v25 = vpop.f32.mrf.mxu2 }
 0x113   : > { %v960_v40 = vpop.f32.mrf.mxu3 }
 0x115   : > { %v7599_v26 = vpop.f32.mrf.mxu1 }
 0x116   : > { %v7601_v44 = vpop.f32.mrf.mxu0 }
 0x117   : > { %1434 = vmatmul.f32.gmra.mxu2 %v7269_v14 }
 0x118   : > { %1606 = vmatmul.f32.gmra.mxu1 %v7358_v58  ;;  %1492 = vmatmul.f32.gmra.mxu3 %v7384_v4 }
 0x119   : > { %1559 = vmatmul.f32.gmra.mxu0 %v7251_v7 }
 0x11a   : > { %v7607_v51 = vpop.f32.mrf.mxu2 }
 0x11b   : > { %v964_v49 = vpop.f32.mrf.mxu3 }
 0x11d   : > { %v7609_v34 = vpop.f32.mrf.mxu1 }
 0x11e   : > { %v7611_v23 = vpop.f32.mrf.mxu0 }
 0x11f   : > { %1439 = vmatmul.f32.gmra.mxu2 %v7276_v16 }
 0x120   : > { %1610 = vmatmul.f32.gmra.mxu1 %v7251_v7  ;;  %1498 = vmatmul.f32.gmra.mxu3 %v7289_v18 }
 0x121   : > { %1563 = vmatmul.f32.gmra.mxu0 %v7255_v9 }
 0x122   : > { %v7617_v6 = vpop.f32.mrf.mxu2 }
 0x123   : > { %v7619_v24 = vpop.f32.mrf.mxu3 }
 0x125   : > { %v7621_v38 = vpop.f32.mrf.mxu1 }
 0x126   : > { %v7623_v22 = vpop.f32.mrf.mxu0 }
 0x127   : > { %1444 = vmatmul.f32.gmra.mxu2 %v7332_v41 }
 0x128   : > { %1614 = vmatmul.f32.gmra.mxu1 %v7255_v9  ;;  %1504 = vmatmul.f32.gmra.mxu3 %v7305_v28 }
 0x129   : > { %1567 = vmatmul.f32.gmra.mxu0 %v7310_v30 }
 0x12a   : > { %v7629_v21 = vpop.f32.mrf.mxu2 }
 0x12b   : > { %v7631_v35 = vpop.f32.mrf.mxu3 }
 0x12d   : > { %v7633_v63 = vpop.f32.mrf.mxu1 }
 0x12e   : > { %v7635_v39 = vpop.f32.mrf.mxu0 }
 0x12f   : > { %1449 = vmatmul.f32.gmra.mxu2 %v7365_v60 }
 0x130   : > { %1618 = vmatmul.f32.gmra.mxu1 %v7310_v30  ;;  %1510 = vmatmul.f32.gmra.mxu3 %v7347_v53 }
 0x131   : > { %1571 = vmatmul.f32.gmra.mxu0 %v7349_v54 }
 0x132   : > { %v7641_v55 = vpop.f32.mrf.mxu2 }
 0x133   : > { %v7643_v59 = vpop.f32.mrf.mxu3 }
 0x135   : > { %v7645_v0 = vpop.f32.mrf.mxu1 }
 0x136   : > { %11097 = vst [vmem:[#allocation6_spill] sm:$0xff] %v7645_v0  ;;  %v7647_v27 = vpop.f32.mrf.mxu0 }
 0x137   : > { %1682 = vmatmul.f32.vlgmr.msrb.gmra.mxu2 %v7316_v33 }
 0x138   : > { %1622 = vmatmul.f32.gmra.mxu1 %v7349_v54  ;;  %1516 = vmatmul.f32.gmra.mxu3 %v7377_v2 }
 0x139   : > { %1823 = vmatmul.f32.vlgmr.msrb.gmra.mxu0 %v7272_v15 }
 0x13a   : > { %v1135_v36 = vpop.f32.mrf.mxu2 }
 0x13b   : > { %v7653_v47 = vpop.f32.mrf.mxu3  ;;  %v1136_v61 = vadd.f32 %v1135_v36, %v1067_v37 }
 0x13d   : > { %v7655_v10 = vpop.f32.mrf.mxu1 }
 0x13e   : > { %v7657_v50 = vpop.f32.mrf.mxu0 }
 0x13f   : > { %1690 = vmatmul.f32.gmra.mxu2 %v7353_v56  ;;  %v961_v56 = vadd.f32 %v960_v40, %v7586_v48 }
 0x140   : > { %1883 = vmatmul.f32.vlgmr.msrb.gmra.mxu1 %v7292_v19  ;;  %1769 = vmatmul.f32.vlgmr.msrb.gmra.mxu3 %v7253_v8 }
 0x141   : > { %1828 = vmatmul.f32.gmra.mxu0 %v7279_v17 }
 0x142   : > { %v1139_v33 = vpop.f32.mrf.mxu2 }
 0x143   : > { %v1140_v54 = vadd.f32 %v1139_v33, %v1073_v20  ;;  %v1186_v0 = vpop.f32.mrf.mxu3  ;;  %v1017_v20 = vadd.f32 %v7580_v43, %v961_v56 }
 0x144   : > { %v7663_v15 = vadd.f32 %v1186_v0, %v1136_v61 }
 0x145   : > { %v7665_v2 = vpop.f32.mrf.mxu1  ;;  %v1079_v43 = vadd.f32 %v7589_v5, %v1017_v20  ;;  %v2067_v5 = vld [vmem:[%s10972_s2 + $0x10] sm:$0xff] }
 0x146   : > { %11098 = vst [vmem:[#allocation7_spill] sm:$0xff] %v7663_v15  ;;  %v7667_v37 = vpop.f32.mrf.mxu0 }
 0x147   : > { %1698 = vmatmul.f32.gmra.mxu2 %v7381_v3 }
 0x148   : > { %1889 = vmatmul.f32.gmra.mxu1 %v7308_v29  ;;  %1773 = vmatmul.f32.gmra.mxu3 %v7260_v11  ;;  %v2071_v29 = vld [vmem:[%s10972_s2 + $0x30] sm:$0xff] }
 0x149   : > { %1833 = vmatmul.f32.gmra.mxu0 %v7335_v42  ;;  %v7686_v3 = vand.u32 4294901760, %v2071_v29  ;;  %v965_v42 = vadd.f32 %v964_v49, %v7597_v25 }
 0x14a   : > { %v1143_v17 = vpop.f32.mrf.mxu2 }
 0x14b   : > { %v1190_v19 = vpop.f32.mrf.mxu3  ;;  %2117 = vmatpush.msra.mxu0 %v7686_v3  ;;  %2336 = vmatpush.msrb.mxu3 %v7686_v3  ;;  %v1022_v56 = vadd.f32 %v7591_v46, %v965_v42 }
 0x14c   : > { %v7675_v0 = vadd.f32 %v1190_v19, %v1140_v54  ;;  %v2069_v54 = vld [vmem:[%s10972_s2 + $0x20] sm:$0xff] }
 0x14d   : > { %v7677_v36 = vpop.f32.mrf.mxu1  ;;  %v7697_v48 = vand.u32 4294901760, %v2069_v54 }
 0x14e   : > { %11099 = vst [vmem:[#allocation8_spill] sm:$0xff] %v7675_v0  ;;  %v7679_v61 = vpop.f32.mrf.mxu0 }
 0x14f   : > { %1706 = vmatmul.f32.gmra.mxu2 %v7397_v13  ;;  %v2202_v13 = vsub.f32 %v2071_v29, %v7686_v3  ;;  %2119 = vmatpush.msra.mxu0 %v7697_v48  ;;  %v2208_v33 = vsub.f32 %v2069_v54, %v7697_v48 }
 0x150   : > { %1895 = vmatmul.f32.gmra.mxu1 %v7356_v57  ;;  %1777 = vmatmul.f32.gmra.mxu3 %v7312_v31  ;;  %v1144_v57 = vadd.f32 %v1143_v17, %v1079_v43  ;;  %v2065_v17 = vld [vmem:[%s10972_s2] sm:$0xff] }
 0x151   : > { %1838 = vmatmul.f32.gmra.mxu0 %v7372_v62  ;;  %v7704_v62 = vand.u32 4294901760, %v2067_v5  ;;  %v2203_v49 = vand.u32 4294901760, %v2202_v13  ;;  %2272 = vmatpush.msrb.mxu2 %v2202_v13  ;;  %v7717_v43 = vand.u32 4294901760, %v2065_v17  ;;  %v2209_v54 = vand.u32 4294901760, %v2208_v33 }
 0x152   : > { %v1147_v25 = vpop.f32.mrf.mxu2  ;;  %2338 = vmatpush.msrb.mxu3 %v7697_v48 }
 0x153   : > { %v1194_v40 = vpop.f32.mrf.mxu3  ;;  %2121 = vmatpush.msra.mxu0 %v7704_v62  ;;  %v2204_v0 = vsub.f32 %v2202_v13, %v2203_v49  ;;  %v2214_v15 = vsub.f32 %v2067_v5, %v7704_v62  ;;  %2275 = vmatpush.msrb.mxu2 %v2208_v33  ;;  %v2210_v42 = vsub.f32 %v2208_v33, %v2209_v54 }
 0x154   : > { %v1195_v19 = vadd.f32 %v1194_v40, %v1144_v57  ;;  %2340 = vmatpush.msrb.mxu3 %v7704_v62  ;;  %v2220_v40 = vsub.f32 %v2065_v17, %v7717_v43  ;;  %v969_v13 = vadd.f32 %v7619_v24, %v7607_v51 }
 0x155   : > { %v7712_v20 = vpop.f32.mrf.mxu1  ;;  %v2205_v46 = vand.u32 4294901760, %v2204_v0  ;;  %v2215_v57 = vand.u32 4294901760, %v2214_v15  ;;  %2123 = vmatpush.msra.mxu0 %v7717_v43  ;;  %2278 = vmatpush.msrb.mxu2 %v2214_v15 }
 0x156   : > { %v7714_v29 = vpop.f32.mrf.mxu0  ;;  %1219 = vrot.lane.b32.xlu0 %v1195_v19, %s7164_s23  ;;  %2342 = vmatpush.msrb.mxu3 %v7717_v43 }
 0x157   : > { %11100 = vst [vmem:[#allocation9_spill] sm:$0xff] %v7714_v29  ;;  %1714 = vmatmul.f32.gmra.mxu2 %v7314_v32  ;;  %v1085_v29 = vadd.f32 %v7599_v26, %v1022_v56  ;;  %2206 = vmatpush.msra.mxu1 %v2205_v46  ;;  %v2211_v32 = vand.u32 4294901760, %v2210_v42  ;;  %v2216_v5 = vsub.f32 %v2214_v15, %v2215_v57 }
 0x158   : > { %1901 = vmatmul.f32.gmra.mxu1 %v7384_v4  ;;  %1781 = vmatmul.f32.gmra.mxu3 %v7358_v58  ;;  %v2221_v4 = vand.u32 4294901760, %v2220_v40  ;;  %v1027_v26 = vadd.f32 %v7601_v44, %v969_v13  ;;  %v973_v15 = vadd.f32 %v7631_v35, %v7617_v6 }
 0x159   : > { %1843 = vmatmul.f32.gmra.mxu0 %v7269_v14  ;;  %v1148_v0 = vadd.f32 %v1147_v25, %v1085_v29  ;;  %2212 = vmatpush.msra.mxu1 %v2211_v32  ;;  %v2217_v51 = vand.u32 4294901760, %v2216_v5  ;;  %v809_v25 = vpop.permute.xlu0 %808 }
 0x15a   : > { %v1151_v33 = vpop.f32.mrf.mxu2  ;;  %v2222_v24 = vsub.f32 %v2220_v40, %v2221_v4  ;;  %2407 = vmatpush.msrb.mxu0 %v2203_v49  ;;  %2281 = vmatpush.msrb.mxu2 %v2220_v40  ;;  %v1091_v44 = vadd.f32 %v7609_v34, %v1027_v26  ;;  %v1362_v26 = vadd.f32 %v7655_v10, %v7647_v27 }
 0x15b   : > { %v1198_v19 = vpop.f32.mrf.mxu3  ;;  %2218 = vmatpush.msra.mxu1 %v2217_v51 }
 0x15c   : > { %v1199_v56 = vadd.f32 %v1198_v19, %v1148_v0  ;;  %v2223_v46 = vand.u32 4294901760, %v2222_v24  ;;  %2411 = vmatpush.msrb.mxu0 %v2209_v54  ;;  %v1152_v49 = vadd.f32 %v1151_v33, %v1091_v44  ;;  %v11103_v44 = vld [vmem:[#allocation6_spill] sm:$0xff] }
 0x15d   : > { %v7733_v14 = vpop.f32.mrf.mxu1 }
 0x15e   : > { %v7735_v17 = vpop.f32.mrf.mxu0  ;;  %1221 = vrot.lane.b32.xlu0 %v1199_v56, %s7164_s23  ;;  %2224 = vmatpush.msra.mxu1 %v2223_v46  ;;  %v11102_v46 = vld [vmem:[#allocation3_spill] sm:$0xff] }
 0x15f   : > { %1722 = vmatmul.f32.gmra.mxu2 %v7344_v52  ;;  %2415 = vmatpush.msrb.mxu0 %v2215_v57 }
 0x160   : > { %1907 = vmatmul.f32.gmra.mxu1 %v7289_v18  ;;  %1785 = vmatmul.f32.gmra.mxu3 %v7251_v7  ;;  %v1032_v18 = vadd.f32 %v7611_v23, %v973_v15 }
 0x161   : > { %1848 = vmatmul.f32.gmra.mxu0 %v7276_v16  ;;  %2466 = vmatpush.msrb.mxu1 %v7686_v3  ;;  %v977_v16 = vadd.f32 %v7643_v59, %v7629_v21  ;;  %v817_v35 = vpop.permute.xlu0 %816 }
 0x162   : > { %v1155_v29 = vpop.f32.mrf.mxu2  ;;  %2419 = vmatpush.msrb.mxu0 %v2221_v4  ;;  %v1097_v23 = vadd.f32 %v7621_v38, %v1032_v18 }
 0x163   : > { %v1202_v54 = vpop.f32.mrf.mxu3  ;;  %2468 = vmatpush.msrb.mxu1 %v7697_v48  ;;  %v1037_v21 = vadd.f32 %v7623_v22, %v977_v16  ;;  %v981_v22 = vadd.f32 %v7653_v47, %v7641_v55  ;;  %v11101_v55 = vld [vmem:[#allocation4_spill] sm:$0xff] }
 0x164   : > { %v1203_v52 = vadd.f32 %v1202_v54, %v1152_v49  ;;  %v1156_v3 = vadd.f32 %v1155_v29, %v1097_v23  ;;  %v11104_v29 = vld [vmem:[#allocation2_spill] sm:$0xff] }
 0x165   : > { %v7748_v6 = vpop.f32.mrf.mxu1  ;;  %2470 = vmatpush.msrb.mxu1 %v7704_v62  ;;  %v1103_v13 = vadd.f32 %v7633_v63, %v1037_v21 }
 0x166   : > { %v7750_v34 = vpop.f32.mrf.mxu0  ;;  %1227 = vrot.lane.b32.xlu1 %v1203_v52, %s7165_s24 }
 0x167   : > { %1730 = vmatmul.f32.gmra.mxu2 %v7374_v1  ;;  %2472 = vmatpush.msrb.mxu1 %v7717_v43  ;;  %v831_v1 = vsel %vm830_vm1, %v7501_v45, %v809_v25  ;;  %v819_v43 = vpop.permute.xlu2 %818 }
 0x168   : > { %1913 = vmatmul.f32.gmra.mxu1 %v7305_v28  ;;  %1789 = vmatmul.f32.gmra.mxu3 %v7255_v9  ;;  %v833_v59 = vsel %vm405_vm0, %v831_v1, %v817_v35 }
 0x169   : > { %1853 = vmatmul.f32.gmra.mxu0 %v7332_v41 }
 0x16a   : > { %v1159_v48 = vpop.f32.mrf.mxu2 }
 0x16b   : > { %v1206_v28 = vpop.f32.mrf.mxu3  ;;  %v1160_v5 = vadd.f32 %v1159_v48, %v1103_v13  ;;  %v1366_v48 = vadd.f32 %v7665_v2, %v7657_v50  ;;  %v1370_v13 = vadd.f32 %v7677_v36, %v7667_v37 }
 0x16c   : > { %v1207_v38 = vadd.f32 %v1206_v28, %v1156_v3  ;;  %v825_v62 = vpop.permute.xlu1 %824 }
 0x16d   : > { %v836_v42 = vsel %vm835_vm2, %v833_v59, %v825_v62  ;;  %v7767_v41 = vpop.f32.mrf.mxu1 }
 0x16e   : > { %v7769_v57 = vpop.f32.mrf.mxu0  ;;  %v2081_v40 = vsel %vm2079_vm3, %v836_v42, 0  ;;  %1229 = vrot.lane.b32.xlu1 %v1207_v38, %s7165_s24 }
 0x16f   : > { %v7773_v45 = vand.u32 4294901760, %v2081_v40  ;;  %1738 = vmatmul.f32.gmra.mxu2 %v7395_v12  ;;  %v827_v51 = vpop.permute.xlu2 %826 }
 0x170   : > { %1919 = vmatmul.f32.gmra.mxu1 %v7347_v53  ;;  %1793 = vmatmul.f32.gmra.mxu3 %v7310_v30  ;;  %v1042_v53 = vadd.f32 %v7635_v39, %v981_v22 }
 0x171   : > { %1858 = vmatmul.f32.gmra.mxu0 %v7365_v60  ;;  %v7783_v32 = vsub.f32 %v2081_v40, %v7773_v45 }
 0x172   : > { %v1163_v4 = vpop.f32.mrf.mxu2  ;;  %v1109_v25 = vadd.f32 %v11103_v44, %v1042_v53 }
 0x173   : > { %v7786_v0 = vand.u32 4294901760, %v7783_v32  ;;  %v1210_v12 = vpop.f32.mrf.mxu3 }
 0x174   : > { %v1211_v33 = vadd.f32 %v1210_v12, %v1160_v5  ;;  %v811_v19 = vpop.permute.xlu1 %810  ;;  %v1164_v27 = vadd.f32 %v1163_v4, %v1109_v25 }
 0x175   : > { %v2127_v63 = vsub.f32 %v7783_v32, %v7786_v0  ;;  %v832_v47 = vsel %vm830_vm1, %v11101_v55, %v811_v19  ;;  %v7793_v60 = vpop.f32.mrf.mxu1 }
 0x176   : > { %v834_v24 = vsel %vm405_vm0, %v832_v47, %v819_v43  ;;  %1235 = vrot.lane.b32.xlu2 %v1211_v33, %s7166_s25  ;;  %v7800_v56 = vpop.f32.mrf.mxu0 }
 0x177   : > { %v837_v39 = vsel %vm835_vm2, %v834_v24, %v827_v51  ;;  %1952 = vmatmul.f32.vlgmr.msra.gmra.mxu2 %v7253_v8  ;;  %v7804_v15 = vand.u32 4294901760, %v2127_v63  ;;  %v11105_v51 = vld [vmem:[#allocation9_spill] sm:$0xff] }
 0x178   : > { %1925 = vmatmul.f32.gmra.mxu1 %v11102_v46  ;;  %v2084_v49 = vsel %vm2079_vm3, %v837_v39, 0  ;;  %1797 = vmatmul.f32.gmra.mxu3 %v11104_v29  ;;  %v1378_v24 = vadd.f32 %v7733_v14, %v11105_v51 }
 0x179   : > { %v7809_v54 = vand.u32 4294901760, %v2084_v49  ;;  %2129 = vmatmul.f32.vlgmr.msra.gmra.mxu0 %v7804_v15 }
 0x17a   : > { %v1415_v10 = vpop.f32.mrf.mxu2 }
 0x17b   : > { %v7813_v18 = vsub.f32 %v2084_v49, %v7809_v54  ;;  %v1214_v52 = vpop.f32.mrf.mxu3  ;;  %v1416_v16 = vadd.f32 %v1415_v10, %v1362_v26  ;;  %v1382_v49 = vadd.f32 %v7748_v6, %v7735_v17 }
 0x17c   : > { %v1215_v23 = vadd.f32 %v1214_v52, %v1164_v27 }
 0x17d   : > { %v7815_v35 = vpop.f32.mrf.mxu1  ;;  %v7818_v3 = vand.u32 4294901760, %v7813_v18 }
 0x17e   : > { %1237 = vrot.lane.b32.xlu2 %v1215_v23, %s7166_s25  ;;  %v7828_v28 = vpop.f32.mrf.mxu0 }
 0x17f   : > { %1956 = vmatmul.f32.gmra.mxu2 %v7260_v11  ;;  %v2135_v1 = vsub.f32 %v7813_v18, %v7818_v3 }
 0x180   : > { %2226 = vmatmul.f32.vlgmr.msra.gmra.mxu1 %v7773_v45  ;;  %2003 = vmatmul.f32.vlgmr.msra.gmra.mxu3 %v7253_v8 }
 0x181   : > { %v7830_v21 = vand.u32 4294901760, %v2135_v1  ;;  %v1386_v1 = vadd.f32 %v7767_v41, %v7750_v34 }
 0x182   : > { %v1420_v59 = vpop.f32.mrf.mxu2 }
 0x183   : > { %v1421_v38 = vadd.f32 %v1420_v59, %v1366_v48  ;;  %v1475_v62 = vpop.f32.mrf.mxu3  ;;  %2137 = vmatmul.f32.gmra.mxu0 %v7830_v21 }
 0x184   : > { %v7833_v42 = vadd.f32 %v1475_v62, %v1416_v16 }
 0x185   : > { %v7835_v2 = vpop.f32.mrf.mxu1 }
 0x186   : > { %v1552_v50 = vpop.f32.mrf.mxu0 }
 0x187   : > { %1960 = vmatmul.f32.gmra.mxu2 %v7312_v31 }
 0x188   : > { %2230 = vmatmul.f32.gmra.mxu1 %v7809_v54  ;;  %2007 = vmatmul.f32.gmra.mxu3 %v7260_v11  ;;  %v1374_v11 = vadd.f32 %v7712_v20, %v7679_v61 }
 0x18a   : > { %v1425_v8 = vpop.f32.mrf.mxu2 }
 0x18b   : > { %v1481_v43 = vpop.f32.mrf.mxu3  ;;  %v1426_v5 = vadd.f32 %v1425_v8, %v1370_v13 }
 0x18c   : > { %v7840_v40 = vadd.f32 %v1481_v43, %v1421_v38  ;;  %v1390_v43 = vadd.f32 %v7793_v60, %v7769_v57 }
 0x18d   : > { %v1603_v22 = vpop.f32.mrf.mxu1 }
 0x18e   : > { %v1556_v33 = vpop.f32.mrf.mxu0 }
 0x18f   : > { %1964 = vmatmul.f32.gmra.mxu2 %v7358_v58 }
 0x190   : > { %2011 = vmatmul.f32.gmra.mxu3 %v7312_v31 }
 0x192   : > { %v1430_v4 = vpop.f32.mrf.mxu2 }
 0x193   : > { %v1487_v12 = vpop.f32.mrf.mxu3  ;;  %v1431_v37 = vadd.f32 %v1430_v4, %v1374_v11 }
 0x194   : > { %v1488_v53 = vadd.f32 %v1487_v12, %v1426_v5 }
 0x195   : > { %v1607_v63 = vpop.f32.mrf.mxu1 }
 0x196   : > { %v1553_v19 = vadd.f32 %v1552_v50, %v1488_v53  ;;  %v1560_v39 = vpop.f32.mrf.mxu0 }
 0x197   : > { %1968 = vmatmul.f32.gmra.mxu2 %v7251_v7 }
 0x198   : > { %2015 = vmatmul.f32.gmra.mxu3 %v7358_v58  ;;  %v1604_v55 = vadd.f32 %v1603_v22, %v1553_v19 }
 0x19a   : > { %1628 = vrot.lane.b32.xlu0 %v1604_v55, %s7164_s23  ;;  %v1435_v36 = vpop.f32.mrf.mxu2 }
 0x19b   : > { %v1493_v31 = vpop.f32.mrf.mxu3  ;;  %v1436_v46 = vadd.f32 %v1435_v36, %v1378_v24  ;;  %v11106_v36 = vld [vmem:[#allocation7_spill] sm:$0xff] }
 0x19c   : > { %v1494_v47 = vadd.f32 %v1493_v31, %v1431_v37 }
 0x19d   : > { %v1611_v20 = vpop.f32.mrf.mxu1 }
 0x19e   : > { %v1557_v26 = vadd.f32 %v1556_v33, %v1494_v47  ;;  %v1564_v10 = vpop.f32.mrf.mxu0 }
 0x19f   : > { %1972 = vmatmul.f32.gmra.mxu2 %v7255_v9 }
 0x1a0   : > { %2019 = vmatmul.f32.gmra.mxu3 %v7251_v7  ;;  %v1608_v61 = vadd.f32 %v1607_v63, %v1557_v26 }
 0x1a2   : > { %1630 = vrot.lane.b32.xlu0 %v1608_v61, %s7164_s23  ;;  %v1440_v58 = vpop.f32.mrf.mxu2 }
 0x1a3   : > { %v1499_v44 = vpop.f32.mrf.mxu3  ;;  %v1441_v52 = vadd.f32 %v1440_v58, %v1382_v49 }
 0x1a4   : > { %v1500_v25 = vadd.f32 %v1499_v44, %v1436_v46  ;;  %v11107_v44 = vld [vmem:[#allocation8_spill] sm:$0xff] }
 0x1a5   : > { %v1615_v16 = vpop.f32.mrf.mxu1 }
 0x1a6   : > { %v1561_v27 = vadd.f32 %v1560_v39, %v1500_v25  ;;  %v1568_v38 = vpop.f32.mrf.mxu0 }
 0x1a7   : > { %1976 = vmatmul.f32.gmra.mxu2 %v7310_v30 }
 0x1a8   : > { %2023 = vmatmul.f32.gmra.mxu3 %v7255_v9  ;;  %v1612_v14 = vadd.f32 %v1611_v20, %v1561_v27 }
 0x1aa   : > { %1636 = vrot.lane.b32.xlu1 %v1612_v14, %s7165_s24  ;;  %v1445_v7 = vpop.f32.mrf.mxu2 }
 0x1ab   : > { %v1505_v23 = vpop.f32.mrf.mxu3  ;;  %v1446_v6 = vadd.f32 %v1445_v7, %v1386_v1 }
 0x1ac   : > { %v1506_v48 = vadd.f32 %v1505_v23, %v1441_v52 }
 0x1ad   : > { %v1619_v50 = vpop.f32.mrf.mxu1 }
 0x1ae   : > { %v1565_v59 = vadd.f32 %v1564_v10, %v1506_v48  ;;  %v1572_v4 = vpop.f32.mrf.mxu0 }
 0x1af   : > { %1980 = vmatmul.f32.gmra.mxu2 %v11104_v29 }
 0x1b0   : > { %2027 = vmatmul.f32.gmra.mxu3 %v7310_v30  ;;  %v1616_v17 = vadd.f32 %v1615_v16, %v1565_v59 }
 0x1b2   : > { %1638 = vrot.lane.b32.xlu1 %v1616_v17, %s7165_s24  ;;  %v1450_v9 = vpop.f32.mrf.mxu2 }
 0x1b3   : > { %v1511_v62 = vpop.f32.mrf.mxu3  ;;  %v1451_v41 = vadd.f32 %v1450_v9, %v1390_v43 }
 0x1b4   : > { %v1512_v8 = vadd.f32 %v1511_v62, %v1446_v6 }
 0x1b5   : > { %v1623_v53 = vpop.f32.mrf.mxu1 }
 0x1b6   : > { %v1569_v22 = vadd.f32 %v1568_v38, %v1512_v8 }
 0x1b7   : > { %2284 = vmatmul.f32.vlgmr.msrb.gmra.mxu2 %v7783_v32 }
 0x1b8   : > { %2031 = vmatmul.f32.gmra.mxu3 %v11104_v29  ;;  %v1620_v34 = vadd.f32 %v1619_v50, %v1569_v22  ;;  %v7928_v50 = vpop.f32.mrf.mxu0 }
 0x1ba   : > { %1644 = vrot.lane.b32.xlu2 %v1620_v34, %s7166_s25  ;;  %v7871_v30 = vpop.f32.mrf.mxu2 }
 0x1bb   : > { %v1517_v13 = vpop.f32.mrf.mxu3 }
 0x1bc   : > { %v1518_v5 = vadd.f32 %v1517_v13, %v1451_v41 }
 0x1bd   : > { %v7931_v43 = vpop.f32.mrf.mxu1 }
 0x1be   : > { %v1573_v12 = vadd.f32 %v1572_v4, %v1518_v5 }
 0x1bf   : > { %2289 = vmatmul.f32.gmra.mxu2 %v7813_v18 }
 0x1c0   : > { %2346 = vmatmul.f32.vlgmr.msrb.gmra.mxu3 %v7786_v0  ;;  %v1624_v57 = vadd.f32 %v1623_v53, %v1573_v12  ;;  %v7937_v41 = vpop.f32.mrf.mxu0 }
 0x1c2   : > { %1646 = vrot.lane.b32.xlu2 %v1624_v57, %s7166_s25  ;;  %v7876_v60 = vpop.f32.mrf.mxu2 }
 0x1c3   : > { %v7878_v29 = vpop.f32.mrf.mxu3 }
 0x1c5   : > { %v7939_v13 = vpop.f32.mrf.mxu1 }
 0x1c8   : > { %2352 = vmatmul.f32.gmra.mxu3 %v7818_v3  ;;  %v1220_v63 = vpop.permute.xlu0 %1219  ;;  %v1834_v12 = vpop.f32.mrf.mxu0 }
 0x1c9   : > { %v1241_v31 = vsel %vm830_vm1, %v11106_v36, %v1220_v63 }
 0x1ca   : > { %v1699_v33 = vpop.f32.mrf.mxu2 }
 0x1cb   : > { %v7881_v11 = vpop.f32.mrf.mxu3 }
 0x1cd   : > { %v1896_v63 = vpop.f32.mrf.mxu1 }
 0x1d0   : > { %v1236_v37 = vpop.permute.xlu2 %1235  ;;  %v1222_v46 = vpop.permute.xlu0 %1221 }
 0x1d1   : > { %v1242_v25 = vsel %vm830_vm1, %v11107_v44, %v1222_v46 }
 0x1d2   : > { %v1707_v19 = vpop.f32.mrf.mxu2 }
 0x1d3   : > { %v1778_v55 = vpop.f32.mrf.mxu3 }
 0x1d8   : > { %v1228_v47 = vpop.permute.xlu1 %1227  ;;  %v1238_v14 = vpop.permute.xlu2 %1237 }
 0x1d9   : > { %v1243_v51 = vsel %vm405_vm0, %v1241_v31, %v1228_v47  ;;  %v1839_v31 = vpop.f32.mrf.mxu0 }
 0x1da   : > { %v1245_v24 = vsel %vm835_vm2, %v1243_v51, %v1236_v37  ;;  %v1715_v26 = vpop.f32.mrf.mxu2  ;;  %v1779_v37 = vadd.f32 %v1778_v55, %v1699_v33 }
 0x1db   : > { %v2087_v39 = vsel %vm2079_vm3, %v1245_v24, 0  ;;  %v1782_v61 = vpop.f32.mrf.mxu3  ;;  %v1902_v24 = vpop.f32.mrf.mxu1 }
 0x1dc   : > { %v7888_v20 = vand.u32 4294901760, %v2087_v39  ;;  %v1835_v51 = vadd.f32 %v1834_v12, %v1779_v37 }
 0x1de   : > { %v7891_v58 = vsub.f32 %v2087_v39, %v7888_v20  ;;  %2234 = vmatmul.f32.gmra.mxu1 %v7888_v20  ;;  %v1783_v39 = vadd.f32 %v1782_v61, %v1707_v19  ;;  %v1897_v46 = vadd.f32 %v1896_v63, %v1835_v51 }
 0x1e0   : > { %2294 = vmatmul.f32.gmra.mxu2 %v7891_v58  ;;  %v1230_v49 = vpop.permute.xlu1 %1229  ;;  %v7898_v27 = vand.u32 4294901760, %v7891_v58 }
 0x1e1   : > { %v1244_v10 = vsel %vm405_vm0, %v1242_v25, %v1230_v49 }
 0x1e2   : > { %v1246_v52 = vsel %vm835_vm2, %v1244_v10, %v1238_v14  ;;  %2358 = vmatmul.f32.gmra.mxu3 %v7898_v27  ;;  %v7903_v7 = vpop.f32.mrf.mxu2  ;;  %v2143_v16 = vsub.f32 %v7891_v58, %v7898_v27  ;;  %v1840_v14 = vadd.f32 %v1839_v31, %v1783_v39 }
 0x1e3   : > { %v2090_v23 = vsel %vm2079_vm3, %v1246_v52, 0  ;;  %v1786_v48 = vpop.f32.mrf.mxu3  ;;  %v1844_v52 = vpop.f32.mrf.mxu0 }
 0x1e4   : > { %v7908_v1 = vand.u32 4294901760, %v2090_v23  ;;  %v7910_v59 = vand.u32 4294901760, %v2143_v16  ;;  %v1545_v16 = vadd.f32 %v7800_v56, %v7833_v42  ;;  %v1908_v55 = vpop.f32.mrf.mxu1  ;;  %v1549_v56 = vadd.f32 %v7828_v28, %v7840_v40 }
 0x1e6   : > { %v7913_v17 = vsub.f32 %v2090_v23, %v7908_v1  ;;  %2145 = vmatmul.f32.gmra.mxu0 %v7910_v59  ;;  %2238 = vmatmul.f32.gmra.mxu1 %v7908_v1  ;;  %v1787_v23 = vadd.f32 %v1786_v48, %v1715_v26  ;;  %v1596_v12 = vadd.f32 %v7815_v35, %v1545_v16 }
 0x1e8   : > { %2299 = vmatmul.f32.gmra.mxu2 %v7913_v17  ;;  %v7919_v6 = vand.u32 4294901760, %v7913_v17 }
 0x1ea   : > { %2364 = vmatmul.f32.gmra.mxu3 %v7919_v6  ;;  %v7922_v9 = vpop.f32.mrf.mxu2  ;;  %v2151_v38 = vsub.f32 %v7913_v17, %v7919_v6 }
 0x1eb   : > { %v1790_v62 = vpop.f32.mrf.mxu3  ;;  %v1849_v26 = vpop.f32.mrf.mxu0 }
 0x1ec   : > { %v7926_v8 = vand.u32 4294901760, %v2151_v38  ;;  %v1903_v38 = vadd.f32 %v1902_v24, %v1840_v14  ;;  %v1791_v48 = vadd.f32 %v1790_v62, %v7903_v7  ;;  %v1914_v14 = vpop.f32.mrf.mxu1 }
 0x1ee   : > { %2153 = vmatmul.f32.gmra.mxu0 %v7926_v8  ;;  %v1850_v16 = vadd.f32 %v1849_v26, %v1791_v48 }
 0x1f2   : > { %v7933_v22 = vpop.f32.mrf.mxu2 }
 0x1f3   : > { %v7935_v34 = vpop.f32.mrf.mxu3 }
 0x1fa   : > { %v7941_v5 = vpop.f32.mrf.mxu2 }
 0x1fb   : > { %v7943_v4 = vpop.f32.mrf.mxu3 }
 0x202   : > { %v7945_v53 = vpop.f32.mrf.mxu2 }
 0x203   : > { %v7947_v57 = vpop.f32.mrf.mxu3 }
 0x20a   : > { %v1961_v36 = vpop.f32.mrf.mxu2 }
 0x20b   : > { %v7949_v47 = vpop.f32.mrf.mxu3  ;;  %v1962_v44 = vadd.f32 %v1961_v36, %v1897_v46  ;;  %v1845_v36 = vadd.f32 %v1844_v52, %v1787_v23 }
 0x20c   : > { %v1629_v33 = vpop.permute.xlu0 %1628 }
 0x20d   : > { %v1650_v31 = vsel %vm830_vm1, %v1596_v12, %v1629_v33  ;;  %v1909_v24 = vadd.f32 %v1908_v55, %v1845_v36 }
 0x212   : > { %v1965_v25 = vpop.f32.mrf.mxu2 }
 0x213   : > { %v2012_v49 = vpop.f32.mrf.mxu3  ;;  %v1966_v37 = vadd.f32 %v1965_v25, %v1903_v38 }
 0x214   : > { %v2013_v10 = vadd.f32 %v2012_v49, %v1962_v44  ;;  %v1645_v61 = vpop.permute.xlu2 %1644  ;;  %v1631_v25 = vpop.permute.xlu0 %1630  ;;  %v1600_v49 = vadd.f32 %v7835_v2, %v1549_v56 }
 0x216   : > { %2037 = vrot.lane.b32.xlu0 %v2013_v10, %s7164_s23  ;;  %v1651_v33 = vsel %vm830_vm1, %v1600_v49, %v1631_v25  ;;  %v1799_v25 = vadd.f32 %v7943_v4, %v7933_v22 }
 0x21a   : > { %v1969_v19 = vpop.f32.mrf.mxu2 }
 0x21b   : > { %v2016_v63 = vpop.f32.mrf.mxu3  ;;  %v1970_v10 = vadd.f32 %v1969_v19, %v1909_v24  ;;  %v7149_v19 = vld [vmem:[%s7286_s16] sm:$0xff]  ;;  %v7150_v24 = vld [vmem:[%s7286_s16 + $0x18] sm:$0xff] }
 0x21c   : > { %v2017_v51 = vadd.f32 %v2016_v63, %v1966_v37  ;;  %v1637_v39 = vpop.permute.xlu1 %1636  ;;  %v1647_v2 = vpop.permute.xlu2 %1646  ;;  %v1915_v63 = vadd.f32 %v1914_v14, %v1850_v16 }
 0x21d   : > { %v1652_v46 = vsel %vm405_vm0, %v1650_v31, %v1637_v39 }
 0x21e   : > { %v1654_v42 = vsel %vm835_vm2, %v1652_v46, %v1645_v61  ;;  %2039 = vrot.lane.b32.xlu0 %v2017_v51, %s7164_s23  ;;  %v1795_v61 = vadd.f32 %v7935_v34, %v7922_v9  ;;  %v1854_v51 = vpop.f32.mrf.mxu0  ;;  %v1920_v34 = vpop.f32.mrf.mxu1 }
 0x21f   : > { %v2093_v35 = vsel %vm2079_vm3, %v1654_v42, 0 }
 0x220   : > { %v7963_v44 = vand.u32 4294901760, %v2093_v35  ;;  %v1855_v42 = vadd.f32 %v1854_v51, %v1795_v61  ;;  %v7154_v61 = vld [vmem:[%s7286_s16 + $0x38] sm:$0xff] }
 0x221   : > { %v2072_v51 = vld [vmem:[%s10972_s2 + $0x38] sm:$0xff] }
 0x222   : > { %v7967_v52 = vsub.f32 %v2093_v35, %v7963_v44  ;;  %2242 = vmatmul.f32.gmra.mxu1 %v7963_v44  ;;  %v1973_v28 = vpop.f32.mrf.mxu2  ;;  %v1921_v49 = vadd.f32 %v1920_v34, %v1855_v42 }
 0x223   : > { %v2020_v40 = vpop.f32.mrf.mxu3  ;;  %v1974_v39 = vadd.f32 %v1973_v28, %v1915_v63  ;;  %v7155_v63 = vld [vmem:[%s7286_s16 + $0x28] sm:$0xff] }
 0x224   : > { %v2021_v7 = vadd.f32 %v2020_v40, %v1970_v10  ;;  %2304 = vmatmul.f32.gmra.mxu2 %v7967_v52  ;;  %v1639_v62 = vpop.permute.xlu1 %1638  ;;  %v7973_v55 = vand.u32 4294901760, %v7967_v52 }
 0x225   : > { %v1653_v23 = vsel %vm405_vm0, %v1651_v33, %v1639_v62  ;;  %v11108_v62 = vld [vmem:[#allocation5_spill] sm:$0xff] }
 0x226   : > { %v1655_v38 = vsel %vm835_vm2, %v1653_v23, %v1647_v2  ;;  %2045 = vrot.lane.b32.xlu1 %v2021_v7, %s7165_s24  ;;  %2370 = vmatmul.f32.gmra.mxu3 %v7973_v55  ;;  %v2159_v12 = vsub.f32 %v7967_v52, %v7973_v55  ;;  %v1859_v28 = vpop.f32.mrf.mxu0  ;;  %v7151_v7 = vld [vmem:[%s7286_s16 + $0x8] sm:$0xff]  ;;  %v1926_v22 = vpop.f32.mrf.mxu1 }
 0x227   : > { %v2096_v37 = vsel %vm2079_vm3, %v1655_v38, 0  ;;  %6358 = vrot.lane.b32.xlu0 %v7149_v19, %s7165_s24  ;;  %v1860_v16 = vadd.f32 %v1859_v28, %v1799_v25  ;;  %v7153_v19 = vld [vmem:[%s7286_s16 + $0x10] sm:$0xff]  ;;  %v2068_v28 = vld [vmem:[%s10972_s2 + $0x18] sm:$0xff] }
 0x228   : > { %v7986_v36 = vand.u32 4294901760, %v2096_v37  ;;  %v7988_v31 = vand.u32 4294901760, %v2159_v12 }
 0x229   : > { %v1927_v2 = vadd.f32 %v1926_v22, %v1860_v16 }
 0x22a   : > { %v7991_v46 = vsub.f32 %v2096_v37, %v7986_v36  ;;  %2161 = vmatmul.f32.gmra.mxu0 %v7988_v31  ;;  %2246 = vmatmul.f32.gmra.mxu1 %v7986_v36  ;;  %v1977_v35 = vpop.f32.mrf.mxu2  ;;  %v7152_v37 = vld [vmem:[%s7286_s16 + $0x20] sm:$0xff] }
 0x22b   : > { %v2024_v56 = vpop.f32.mrf.mxu3  ;;  %v1978_v10 = vadd.f32 %v1977_v35, %v1921_v49 }
 0x22c   : > { %v2025_v26 = vadd.f32 %v2024_v56, %v1974_v39  ;;  %2309 = vmatmul.f32.gmra.mxu2 %v7991_v46  ;;  %v7997_v9 = vand.u32 4294901760, %v7991_v46  ;;  %v2070_v39 = vld [vmem:[%s10972_s2 + $0x28] sm:$0xff]  ;;  %v2518_v56 = vand.u32 4294901760, %v2072_v51 }
 0x22d   : > { %v2520_v42 = vand.u32 4294901760, %v2070_v39 }
 0x22e   : > { %2047 = vrot.lane.b32.xlu1 %v2025_v26, %s7165_s24  ;;  %2376 = vmatmul.f32.gmra.mxu3 %v7997_v9  ;;  %v2167_v48 = vsub.f32 %v7991_v46, %v7997_v9  ;;  %v2604_v26 = vsub.f32 %v2072_v51, %v2518_v56 }
 0x22f   : > { %6364 = vrot.lane.b32.xlu0 %v7150_v24, %s7165_s24  ;;  %2519 = vmatpush.msra.mxu2 %v2518_v56  ;;  %v2610_v34 = vsub.f32 %v2070_v39, %v2520_v42 }
 0x230   : > { %v8007_v14 = vand.u32 4294901760, %v2167_v48  ;;  %2738 = vmatpush.msra.mxu1 %v2518_v56  ;;  %v2605_v35 = vand.u32 4294901760, %v2604_v26  ;;  %2674 = vmatpush.msra.mxu0 %v2604_v26 }
 0x231   : > { %2521 = vmatpush.msra.mxu2 %v2520_v42  ;;  %v2611_v48 = vand.u32 4294901760, %v2610_v34 }
 0x232   : > { %2169 = vmatmul.f32.gmra.mxu0 %v8007_v14  ;;  %v1981_v4 = vpop.f32.mrf.mxu2  ;;  %2740 = vmatpush.msra.mxu1 %v2520_v42  ;;  %v2606_v24 = vsub.f32 %v2604_v26, %v2605_v35 }
 0x233   : > { %v2028_v40 = vpop.f32.mrf.mxu3  ;;  %v1982_v23 = vadd.f32 %v1981_v4, %v1927_v2  ;;  %v2612_v25 = vsub.f32 %v2610_v34, %v2611_v48  ;;  %2677 = vmatpush.msra.mxu0 %v2610_v34  ;;  %v2066_v4 = vld [vmem:[%s10972_s2 + $0x8] sm:$0xff] }
 0x234   : > { %v2029_v33 = vadd.f32 %v2028_v40, %v1978_v10  ;;  %v2607_v49 = vand.u32 4294901760, %v2606_v24  ;;  %v2522_v40 = vand.u32 4294901760, %v2068_v28 }
 0x235   : > { %v2613_v10 = vand.u32 4294901760, %v2612_v25 }
 0x236   : > { %2053 = vrot.lane.b32.xlu2 %v2029_v33, %s7166_s25  ;;  %6360 = vrot.lane.b32.xlu1 %v7151_v7, %s7165_s24  ;;  %v2616_v16 = vsub.f32 %v2068_v28, %v2522_v40 }
 0x237   : > { %6370 = vrot.lane.b32.xlu0 %v11108_v62, %s7165_s24  ;;  %2608 = vmatpush.msra.mxu3 %v2607_v49  ;;  %v2524_v62 = vand.u32 4294901760, %v2066_v4 }
 0x238   : > { %2523 = vmatpush.msra.mxu2 %v2522_v40  ;;  %2742 = vmatpush.msra.mxu1 %v2522_v40  ;;  %v2617_v33 = vand.u32 4294901760, %v2616_v16 }
 0x239   : > { %2614 = vmatpush.msra.mxu3 %v2613_v10  ;;  %2680 = vmatpush.msra.mxu0 %v2616_v16  ;;  %v2622_v2 = vsub.f32 %v2066_v4, %v2524_v62 }
 0x23a   : > { %v2618_v7 = vsub.f32 %v2616_v16, %v2617_v33  ;;  %2525 = vmatpush.msra.mxu2 %v2524_v62  ;;  %2744 = vmatpush.msra.mxu1 %v2524_v62 }
 0x23b   : > { %v2032_v38 = vpop.f32.mrf.mxu3  ;;  %2683 = vmatpush.msra.mxu0 %v2622_v2 }
 0x23c   : > { %v2033_v12 = vadd.f32 %v2032_v38, %v1982_v23  ;;  %v2619_v22 = vand.u32 4294901760, %v2618_v7  ;;  %v1771_v23 = vadd.f32 %v7878_v29, %v7871_v30  ;;  %2809 = vmatpush.msrb.mxu2 %v2605_v35  ;;  %v2623_v38 = vand.u32 4294901760, %v2622_v2 }
 0x23e   : > { %2055 = vrot.lane.b32.xlu2 %v2033_v12, %s7166_s25  ;;  %6366 = vrot.lane.b32.xlu1 %v7152_v37, %s7165_s24  ;;  %v2624_v12 = vsub.f32 %v2622_v2, %v2623_v38  ;;  %v1825_v37 = vadd.f32 %v7928_v50, %v1771_v23 }
 0x23f   : > { %2620 = vmatpush.msra.mxu3 %v2619_v22  ;;  %2813 = vmatpush.msrb.mxu2 %v2611_v48 }
 0x241   : > { %2817 = vmatpush.msrb.mxu2 %v2617_v33 }
 0x243   : > { %2821 = vmatpush.msrb.mxu2 %v2623_v38 }
 0x246   : > { %6362 = vrot.lane.b32.xlu2 %v7153_v19, %s7165_s24  ;;  %6372 = vrot.lane.b32.xlu1 %v7154_v61, %s7165_s24  ;;  %v2625_v19 = vand.u32 4294901760, %v2624_v12  ;;  %v1775_v61 = vadd.f32 %v7881_v11, %v7876_v60 }
 0x248   : > { %2626 = vmatpush.msra.mxu3 %v2625_v19  ;;  %v1830_v29 = vadd.f32 %v7937_v41, %v1775_v61 }
 0x24a   : > { %2868 = vmatpush.msrb.mxu3 %v2518_v56  ;;  %v1891_v60 = vadd.f32 %v7939_v13, %v1830_v29 }
 0x24c   : > { %2870 = vmatpush.msrb.mxu3 %v2520_v42 }
 0x24e   : > { %6368 = vrot.lane.b32.xlu2 %v7155_v63, %s7165_s24  ;;  %v1885_v63 = vadd.f32 %v7931_v43, %v1825_v37  ;;  %2872 = vmatpush.msrb.mxu3 %v2522_v40 }
 0x250   : > { %v1954_v30 = vadd.f32 %v7941_v5, %v1885_v63  ;;  %2874 = vmatpush.msrb.mxu3 %v2524_v62  ;;  %v1958_v5 = vadd.f32 %v7945_v53, %v1891_v60 }
 0x252   : > { %v2005_v39 = vadd.f32 %v7947_v57, %v1954_v30  ;;  %v2009_v57 = vadd.f32 %v7949_v47, %v1958_v5 }
 0x288   : > { %v2038_v51 = vpop.permute.xlu0 %2037 }
 0x289   : > { %v2059_v26 = vsel %vm830_vm1, %v2005_v39, %v2038_v51  ;;  %v2978_v39 = vld [vmem:[%s10974_s4 + $0xf0] sm:$0xff] }
 0x290   : > { %v2054_v50 = vpop.permute.xlu2 %2053  ;;  %v2040_v41 = vpop.permute.xlu0 %2039 }
 0x291   : > { %v2060_v48 = vsel %vm830_vm1, %v2009_v57, %v2040_v41 }
 0x298   : > { %v2046_v34 = vpop.permute.xlu1 %2045  ;;  %v2056_v25 = vpop.permute.xlu2 %2055 }
 0x299   : > { %v2061_v35 = vsel %vm405_vm0, %v2059_v26, %v2046_v34  ;;  %v2976_v26 = vld [vmem:[%s10974_s4 + $0xe0] sm:$0xff] }
 0x29a   : > { %v2063_v11 = vsel %vm835_vm2, %v2061_v35, %v2054_v50  ;;  %v8221_v50 = vand.u32 4294901760, %v2978_v39  ;;  %v8226_v34 = vand.u32 4294901760, %v2976_v26 }
 0x29b   : > { %v2099_v43 = vsel %vm2079_vm3, %v2063_v11, 0 }
 0x29c   : > { %v8051_v56 = vand.u32 4294901760, %v2099_v43  ;;  %v8229_v35 = vsub.f32 %v2978_v39, %v8221_v50  ;;  %v8234_v60 = vsub.f32 %v2976_v26, %v8226_v34 }
 0x29e   : > { %v8055_v42 = vsub.f32 %v2099_v43, %v8051_v56  ;;  %2250 = vmatmul.f32.gmra.mxu1 %v8051_v56  ;;  %v10989_v5 = vand.u32 4294901760, %v8229_v35 }
 0x2a0   : > { %2314 = vmatmul.f32.gmra.mxu2 %v8055_v42  ;;  %v2048_v13 = vpop.permute.xlu1 %2047  ;;  %v8061_v24 = vand.u32 4294901760, %v8055_v42  ;;  %v3086_v57 = vsub.f32 %v8229_v35, %v10989_v5 }
 0x2a1   : > { %v2062_v53 = vsel %vm405_vm0, %v2060_v48, %v2048_v13  ;;  %v2974_v48 = vld [vmem:[%s10974_s4 + $0xd0] sm:$0xff] }
 0x2a2   : > { %v2064_v49 = vsel %vm835_vm2, %v2062_v53, %v2056_v25  ;;  %2382 = vmatmul.f32.gmra.mxu3 %v8061_v24  ;;  %v2175_v47 = vsub.f32 %v8055_v42, %v8061_v24  ;;  %v3087_v13 = vand.u32 4294901760, %v3086_v57  ;;  %v2972_v25 = vld [vmem:[%s10974_s4 + $0xc0] sm:$0xff]  ;;  %v2970_v57 = vld [vmem:[%s10974_s4 + $0xb0] sm:$0xff] }
 0x2a3   : > { %v2102_v10 = vsel %vm2079_vm3, %v2064_v49, 0  ;;  %v8264_v49 = vand.u32 4294901760, %v2972_v25 }
 0x2a4   : > { %v8069_v28 = vand.u32 4294901760, %v2102_v10  ;;  %v2176_v40 = vand.u32 4294901760, %v2175_v47 }
 0x2a6   : > { %v8072_v16 = vsub.f32 %v2102_v10, %v8069_v28  ;;  %2177 = vmatmul.f32.gmra.mxu0 %v2176_v40  ;;  %2254 = vmatmul.f32.gmra.mxu1 %v8069_v28 }
 0x2a8   : > { %2319 = vmatmul.f32.gmra.mxu2 %v8072_v16  ;;  %v8077_v33 = vand.u32 4294901760, %v8072_v16 }
 0x2aa   : > { %2388 = vmatmul.f32.gmra.mxu3 %v8077_v33  ;;  %v2183_v7 = vsub.f32 %v8072_v16, %v8077_v33 }
 0x2ac   : > { %v2184_v22 = vand.u32 4294901760, %v2183_v7 }
 0x2ae   : > { %2185 = vmatmul.f32.gmra.mxu0 %v2184_v22  ;;  %2474 = vmatmul.f32.vlgmr.msrb.gmra.mxu1 %v7773_v45 }
 0x2af   : > { %3088 = vmatpush.msrb.mxu1 %v3087_v13  ;;  %v8294_v13 = vand.u32 4294901760, %v2970_v57 }
 0x2b0   : > { %2531 = vmatmul.f32.vlgmr.msra.gmra.mxu2 %v7804_v15  ;;  %v8108_v15 = vpop.f32.mrf.mxu1 }
 0x2b1   : > { %3214 = vmatpush.msra.mxu2 %v8229_v35 }
 0x2b2   : > { %2628 = vmatmul.f32.vlgmr.msra.gmra.mxu3 %v7773_v45 }
 0x2b3   : > { %3302 = vmatpush.msra.mxu3 %v8221_v50  ;;  %3217 = vmatpush.msra.mxu2 %v8234_v60 }
 0x2b5   : > { %3304 = vmatpush.msra.mxu3 %v8226_v34 }
 0x2b6   : > { %2421 = vmatmul.f32.vlgmr.msrb.gmra.mxu0 %v7773_v45  ;;  %2478 = vmatmul.f32.gmra.mxu1 %v7809_v54 }
 0x2b7   : > { %2987 = vmatpush.msrb.mxu0 %v8221_v50 }
 0x2b8   : > { %2539 = vmatmul.f32.gmra.mxu2 %v7830_v21  ;;  %v8113_v21 = vpop.f32.mrf.mxu0 }
 0x2b9   : > { %2989 = vmatpush.msrb.mxu0 %v8226_v34 }
 0x2ba   : > { %2632 = vmatmul.f32.gmra.mxu3 %v7809_v54 }
 0x2be   : > { %2425 = vmatmul.f32.gmra.mxu0 %v7809_v54  ;;  %2482 = vmatmul.f32.gmra.mxu1 %v7888_v20 }
 0x2c0   : > { %2547 = vmatmul.f32.gmra.mxu2 %v7910_v59  ;;  %v8115_v59 = vpop.f32.mrf.mxu2 }
 0x2c2   : > { %2636 = vmatmul.f32.gmra.mxu3 %v7888_v20 }
 0x2c6   : > { %2429 = vmatmul.f32.gmra.mxu0 %v7888_v20  ;;  %2486 = vmatmul.f32.gmra.mxu1 %v7908_v1 }
 0x2c8   : > { %2555 = vmatmul.f32.gmra.mxu2 %v7926_v8  ;;  %v8119_v8 = vpop.f32.mrf.mxu1  ;;  %v8131_v62 = vpop.f32.mrf.mxu2 }
 0x2ca   : > { %2640 = vmatmul.f32.gmra.mxu3 %v7908_v1 }
 0x2ce   : > { %2433 = vmatmul.f32.gmra.mxu0 %v7908_v1  ;;  %2490 = vmatmul.f32.gmra.mxu1 %v7963_v44 }
 0x2d0   : > { %2563 = vmatmul.f32.gmra.mxu2 %v7988_v31  ;;  %v8121_v31 = vpop.f32.mrf.mxu3  ;;  %v8129_v4 = vpop.f32.mrf.mxu1 }
 0x2d2   : > { %2644 = vmatmul.f32.gmra.mxu3 %v7963_v44 }
 0x2d6   : > { %2437 = vmatmul.f32.gmra.mxu0 %v7963_v44  ;;  %2494 = vmatmul.f32.gmra.mxu1 %v7986_v36 }
 0x2d8   : > { %2571 = vmatmul.f32.gmra.mxu2 %v8007_v14  ;;  %v8127_v14 = vpop.f32.mrf.mxu0 }
 0x2da   : > { %2648 = vmatmul.f32.gmra.mxu3 %v7986_v36 }
 0x2de   : > { %2441 = vmatmul.f32.gmra.mxu0 %v7986_v36  ;;  %2498 = vmatmul.f32.gmra.mxu1 %v8051_v56 }
 0x2e0   : > { %2579 = vmatmul.f32.gmra.mxu2 %v2176_v40 }
 0x2e2   : > { %2652 = vmatmul.f32.gmra.mxu3 %v8051_v56 }
 0x2e6   : > { %2445 = vmatmul.f32.gmra.mxu0 %v8051_v56  ;;  %2502 = vmatmul.f32.gmra.mxu1 %v8069_v28 }
 0x2e8   : > { %2587 = vmatmul.f32.gmra.mxu2 %v2184_v22 }
 0x2ea   : > { %2656 = vmatmul.f32.gmra.mxu3 %v8069_v28 }
 0x2ee   : > { %2449 = vmatmul.f32.gmra.mxu0 %v8069_v28  ;;  %2748 = vmatmul.f32.vlgmr.msra.gmra.mxu1 %v7786_v0  ;;  %v8134_v0 = vpop.f32.mrf.mxu3 }
 0x2f0   : > { %2823 = vmatmul.f32.vlgmr.msrb.gmra.mxu2 %v7773_v45 }
 0x2f2   : > { %2876 = vmatmul.f32.vlgmr.msrb.gmra.mxu3 %v7773_v45  ;;  %v8139_v45 = vpop.f32.mrf.mxu0 }
 0x2f6   : > { %2686 = vmatmul.f32.vlgmr.msra.gmra.mxu0 %v7783_v32  ;;  %2754 = vmatmul.f32.gmra.mxu1 %v7818_v3  ;;  %v8141_v32 = vpop.f32.mrf.mxu2  ;;  %v8144_v3 = vpop.f32.mrf.mxu1 }
 0x2f7   : > { %v8146_v2 = vpop.f32.mrf.mxu3 }
 0x2f8   : > { %2827 = vmatmul.f32.gmra.mxu2 %v7809_v54 }
 0x2fa   : > { %2880 = vmatmul.f32.gmra.mxu3 %v7809_v54  ;;  %v8152_v54 = vpop.f32.mrf.mxu0 }
 0x2fe   : > { %2691 = vmatmul.f32.gmra.mxu0 %v7813_v18  ;;  %2760 = vmatmul.f32.gmra.mxu1 %v7898_v27  ;;  %v8154_v18 = vpop.f32.mrf.mxu1  ;;  %v8156_v27 = vpop.f32.mrf.mxu2 }
 0x2ff   : > { %v8159_v23 = vpop.f32.mrf.mxu3 }
 0x300   : > { %2831 = vmatmul.f32.gmra.mxu2 %v7888_v20  ;;  %11109 = vst [vmem:[#allocation4_spill] sm:$0xff] %v8159_v23 }
 0x302   : > { %2884 = vmatmul.f32.gmra.mxu3 %v7888_v20  ;;  %v8164_v20 = vpop.f32.mrf.mxu0 }
 0x306   : > { %2696 = vmatmul.f32.gmra.mxu0 %v7891_v58  ;;  %2766 = vmatmul.f32.gmra.mxu1 %v7919_v6  ;;  %v8166_v58 = vpop.f32.mrf.mxu2  ;;  %v8169_v6 = vpop.f32.mrf.mxu1 }
 0x307   : > { %v8171_v38 = vpop.f32.mrf.mxu3 }
 0x308   : > { %2835 = vmatmul.f32.gmra.mxu2 %v7908_v1  ;;  %11110 = vst [vmem:[#allocation3_spill] sm:$0xff] %v8171_v38 }
 0x30a   : > { %2888 = vmatmul.f32.gmra.mxu3 %v7908_v1  ;;  %v8177_v1 = vpop.f32.mrf.mxu0 }
 0x30e   : > { %2701 = vmatmul.f32.gmra.mxu0 %v7913_v17  ;;  %2772 = vmatmul.f32.gmra.mxu1 %v7973_v55  ;;  %v8181_v55 = vpop.f32.mrf.mxu2 }
 0x30f   : > { %11112 = vst [vmem:[#allocation2_spill] sm:$0xff] %v8181_v55  ;;  %v8183_v12 = vpop.f32.mrf.mxu3 }
 0x310   : > { %2839 = vmatmul.f32.gmra.mxu2 %v7963_v44  ;;  %11113 = vst [vmem:[#allocation9_spill] sm:$0xff] %v8183_v12 }
 0x312   : > { %2892 = vmatmul.f32.gmra.mxu3 %v7963_v44 }
 0x316   : > { %2706 = vmatmul.f32.gmra.mxu0 %v7967_v52  ;;  %2778 = vmatmul.f32.gmra.mxu1 %v7997_v9 }
 0x318   : > { %2843 = vmatmul.f32.gmra.mxu2 %v7986_v36 }
 0x31a   : > { %2896 = vmatmul.f32.gmra.mxu3 %v7986_v36 }
 0x31b   : > { %v8179_v17 = vpop.f32.mrf.mxu1 }
 0x31c   : > { %11111 = vst [vmem:[#allocation6_spill] sm:$0xff] %v8179_v17 }
 0x31e   : > { %2711 = vmatmul.f32.gmra.mxu0 %v7991_v46  ;;  %2784 = vmatmul.f32.gmra.mxu1 %v8061_v24  ;;  %v8256_v24 = vand.u32 4294901760, %v2974_v48 }
 0x320   : > { %2847 = vmatmul.f32.gmra.mxu2 %v8051_v56  ;;  %v8267_v47 = vsub.f32 %v2974_v48, %v8256_v24  ;;  %2991 = vmatpush.msrb.mxu0 %v8256_v24 }
 0x321   : > { %3306 = vmatpush.msra.mxu3 %v8256_v24 }
 0x322   : > { %2900 = vmatmul.f32.gmra.mxu3 %v8051_v56  ;;  %3220 = vmatpush.msra.mxu2 %v8267_v47 }
 0x323   : > { %v8189_v44 = vpop.f32.mrf.mxu0  ;;  %v8191_v52 = vpop.f32.mrf.mxu1  ;;  %2993 = vmatpush.msrb.mxu0 %v8264_v49  ;;  %3308 = vmatpush.msra.mxu3 %v8264_v49 }
 0x324   : > { %11114 = vst [vmem:[#allocation7_spill] sm:$0xff] %v8191_v52  ;;  %v8193_v36 = vpop.f32.mrf.mxu2 }
 0x325   : > { %11115 = vst [vmem:[#allocation8_spill] sm:$0xff] %v8193_v36  ;;  %v8195_v9 = vpop.f32.mrf.mxu3  ;;  %2995 = vmatpush.msrb.mxu0 %v8294_v13  ;;  %3310 = vmatpush.msra.mxu3 %v8294_v13 }
 0x326   : > { %11116 = vst [vmem:[#allocation5_spill] sm:$0xff] %v8195_v9  ;;  %2716 = vmatmul.f32.gmra.mxu0 %v8055_v42  ;;  %2790 = vmatmul.f32.gmra.mxu1 %v8077_v33  ;;  %v10988_v42 = vand.u32 4294901760, %v8234_v60  ;;  %v10987_v33 = vand.u32 4294901760, %v8267_v47 }
 0x328   : > { %2851 = vmatmul.f32.gmra.mxu2 %v8069_v28  ;;  %v3092_v53 = vsub.f32 %v8234_v60, %v10988_v42  ;;  %v3098_v39 = vsub.f32 %v8267_v47, %v10987_v33  ;;  %v8305_v33 = vsub.f32 %v2970_v57, %v8294_v13 }
 0x32a   : > { %2904 = vmatmul.f32.gmra.mxu3 %v8069_v28  ;;  %v3093_v10 = vand.u32 4294901760, %v3092_v53  ;;  %v8272_v28 = vsub.f32 %v2972_v25, %v8264_v49  ;;  %v3099_v48 = vand.u32 4294901760, %v3098_v39  ;;  %v2968_v25 = vld [vmem:[%s10974_s4 + $0xa0] sm:$0xff] }
 0x32b   : > { %v8201_v46 = vpop.f32.mrf.mxu0  ;;  %v8203_v37 = vpop.f32.mrf.mxu1 }
 0x32c   : > { %11117 = vst [vmem:[#allocation10_spill] sm:$0xff] %v8201_v46  ;;  %v8205_v19 = vpop.f32.mrf.mxu2  ;;  %3094 = vmatpush.msrb.mxu1 %v3093_v10  ;;  %3223 = vmatpush.msra.mxu2 %v8272_v28  ;;  %v10990_v26 = vand.u32 4294901760, %v8272_v28  ;;  %v8302_v10 = vand.u32 4294901760, %v2968_v25 }
 0x32d   : > { %11118 = vst [vmem:[#allocation11_spill] sm:$0xff] %v8203_v37  ;;  %v8207_v61 = vpop.f32.mrf.mxu3 }
 0x32e   : > { %11119 = vst [vmem:[#allocation12_spill] sm:$0xff] %v8205_v19  ;;  %2721 = vmatmul.f32.gmra.mxu0 %v8072_v16  ;;  %v3104_v53 = vsub.f32 %v8272_v28, %v10990_v26  ;;  %3100 = vmatpush.msrb.mxu1 %v3099_v48  ;;  %v8310_v39 = vsub.f32 %v2968_v25, %v8302_v10  ;;  %v10991_v26 = vand.u32 4294901760, %v8305_v33  ;;  %v2966_v19 = vld [vmem:[%s10974_s4 + $0x90] sm:$0xff] }
 0x32f   : > { %11120 = vst [vmem:[#allocation13_spill] sm:$0xff] %v8207_v61  ;;  %3226 = vmatpush.msra.mxu2 %v8305_v33  ;;  %2997 = vmatpush.msrb.mxu0 %v8302_v10  ;;  %v8332_v9 = vand.u32 4294901760, %v2966_v19 }
 0x330   : > { %v3105_v42 = vand.u32 4294901760, %v3104_v53  ;;  %3312 = vmatpush.msra.mxu3 %v8302_v10  ;;  %v3110_v25 = vsub.f32 %v8305_v33, %v10991_v26  ;;  %v10992_v53 = vand.u32 4294901760, %v8310_v39 }
 0x331   : > { %3229 = vmatpush.msra.mxu2 %v8310_v39  ;;  %2999 = vmatpush.msrb.mxu0 %v8332_v9 }
 0x332   : > { %3106 = vmatpush.msrb.mxu1 %v3105_v42  ;;  %v3111_v52 = vand.u32 4294901760, %v3110_v25  ;;  %v2964_v42 = vld [vmem:[%s10974_s4 + $0x80] sm:$0xff]  ;;  %v3116_v46 = vsub.f32 %v8310_v39, %v10992_v53  ;;  %3314 = vmatpush.msra.mxu3 %v8332_v9 }
 0x333   : > { %v8210_v63 = vpop.f32.mrf.mxu0  ;;  %v8212_v51 = vpop.f32.mrf.mxu1  ;;  %v8340_v26 = vand.u32 4294901760, %v2964_v42 }
 0x334   : > { %11121 = vst [vmem:[#allocation14_spill] sm:$0xff] %v8210_v63  ;;  %v8214_v30 = vpop.f32.mrf.mxu2  ;;  %3112 = vmatpush.msrb.mxu1 %v3111_v52 }
 0x335   : > { %11122 = vst [vmem:[#allocation15_spill] sm:$0xff] %v8212_v51  ;;  %v8216_v29 = vpop.f32.mrf.mxu3  ;;  %v8354_v53 = vsub.f32 %v2964_v42, %v8340_v26  ;;  %3001 = vmatpush.msrb.mxu0 %v8340_v26  ;;  %3316 = vmatpush.msra.mxu3 %v8340_v26 }
 0x337   : > { %v10994_v36 = vand.u32 4294901760, %v8354_v53 }
 0x33b   : > { %v8236_v11 = vpop.f32.mrf.mxu0  ;;  %v8238_v43 = vpop.f32.mrf.mxu1 }
 0x33c   : > { %11123 = vst [vmem:[#allocation16_spill] sm:$0xff] %v8236_v11  ;;  %v8243_v56 = vpop.f32.mrf.mxu2 }
 0x33d   : > { %11124 = vst [vmem:[#allocation17_spill] sm:$0xff] %v8238_v43  ;;  %v8246_v41 = vpop.f32.mrf.mxu3 }
 0x343   : > { %v8274_v40 = vpop.f32.mrf.mxu0  ;;  %v8276_v16 = vpop.f32.mrf.mxu1 }
 0x344   : > { %11125 = vst [vmem:[#allocation18_spill] sm:$0xff] %v8274_v40  ;;  %v8281_v7 = vpop.f32.mrf.mxu2 }
 0x345   : > { %11126 = vst [vmem:[#allocation19_spill] sm:$0xff] %v8276_v16  ;;  %v8284_v22 = vpop.f32.mrf.mxu3 }
 0x346   : > { %11127 = vst [vmem:[#allocation20_spill] sm:$0xff] %v8284_v22 }
 0x34b   : > { %v8312_v5 = vpop.f32.mrf.mxu0  ;;  %v8314_v61 = vpop.f32.mrf.mxu1 }
 0x34c   : > { %11128 = vst [vmem:[#allocation21_spill] sm:$0xff] %v8312_v5  ;;  %v8319_v57 = vpop.f32.mrf.mxu2 }
 0x34d   : > { %11129 = vst [vmem:[#allocation22_spill] sm:$0xff] %v8314_v61  ;;  %v8322_v48 = vpop.f32.mrf.mxu3  ;;  %v8343_v61 = vsub.f32 %v2966_v19, %v8332_v9 }
 0x34e   : > { %11130 = vst [vmem:[#allocation23_spill] sm:$0xff] %v8319_v57 }
 0x34f   : > { %11131 = vst [vmem:[#allocation24_spill] sm:$0xff] %v8322_v48  ;;  %v3117_v48 = vand.u32 4294901760, %v3116_v46  ;;  %3232 = vmatpush.msra.mxu2 %v8343_v61  ;;  %v10993_v43 = vand.u32 4294901760, %v8343_v61  ;;  %v2962_v46 = vld [vmem:[%s10974_s4 + $0x70] sm:$0xff] }
 0x350   : > { %v8369_v42 = vand.u32 4294901760, %v2962_v46 }
 0x351   : > { %3118 = vmatpush.msrb.mxu1 %v3117_v48  ;;  %3235 = vmatpush.msra.mxu2 %v8354_v53  ;;  %v2960_v48 = vld [vmem:[%s10974_s4 + $0x60] sm:$0xff] }
 0x352   : > { %v8376_v12 = vsub.f32 %v2962_v46, %v8369_v42  ;;  %3003 = vmatpush.msrb.mxu0 %v8369_v42  ;;  %3318 = vmatpush.msra.mxu3 %v8369_v42 }
 0x353   : > { %v8347_v25 = vpop.f32.mrf.mxu0  ;;  %v8349_v16 = vpop.f32.mrf.mxu1 }
 0x354   : > { %11132 = vst [vmem:[#allocation25_spill] sm:$0xff] %v8347_v25  ;;  %v8357_v52 = vpop.f32.mrf.mxu2  ;;  %3238 = vmatpush.msra.mxu2 %v8376_v12  ;;  %v10995_v46 = vand.u32 4294901760, %v8376_v12 }
 0x355   : > { %11133 = vst [vmem:[#allocation26_spill] sm:$0xff] %v8349_v16  ;;  %v8363_v19 = vpop.f32.mrf.mxu3  ;;  %v3122_v16 = vsub.f32 %v8343_v61, %v10993_v43  ;;  %v2958_v43 = vld [vmem:[%s10974_s4 + $0x50] sm:$0xff] }
 0x356   : > { %11134 = vst [vmem:[#allocation27_spill] sm:$0xff] %v8357_v52  ;;  %v8390_v37 = vand.u32 4294901760, %v2958_v43  ;;  %v3134_v5 = vsub.f32 %v8376_v12, %v10995_v46 }
 0x357   : > { %11135 = vst [vmem:[#allocation28_spill] sm:$0xff] %v8363_v19  ;;  %v3123_v51 = vand.u32 4294901760, %v3122_v16  ;;  %v8380_v19 = vand.u32 4294901760, %v2960_v48  ;;  %v3128_v16 = vsub.f32 %v8354_v53, %v10994_v36 }
 0x358   : > { %11136 = vst [vmem:[#allocation29_spill] sm:$0xff] %v8390_v37  ;;  %v3135_v46 = vand.u32 4294901760, %v3134_v5  ;;  %v2952_v5 = vld [vmem:[%s10974_s4 + $0x20] sm:$0xff] }
 0x359   : > { %3124 = vmatpush.msrb.mxu1 %v3123_v51  ;;  %v8393_v52 = vsub.f32 %v2960_v48, %v8380_v19  ;;  %3005 = vmatpush.msrb.mxu0 %v8380_v19  ;;  %v2956_v51 = vld [vmem:[%s10974_s4 + $0x40] sm:$0xff]  ;;  %v3129_v57 = vand.u32 4294901760, %v3128_v16  ;;  %v8408_v48 = vsub.f32 %v2958_v43, %v8390_v37  ;;  %v2954_v16 = vld [vmem:[%s10974_s4 + $0x30] sm:$0xff] }
 0x35a   : > { %3320 = vmatpush.msra.mxu3 %v8380_v19  ;;  %v8410_v40 = vand.u32 4294901760, %v2956_v51  ;;  %v8432_v17 = vand.u32 4294901760, %v2954_v16 }
 0x35b   : > { %v8400_v25 = vpop.f32.mrf.mxu0  ;;  %v8402_v36 = vpop.f32.mrf.mxu1  ;;  %3241 = vmatpush.msra.mxu2 %v8393_v52  ;;  %v10996_v63 = vand.u32 4294901760, %v8393_v52  ;;  %3007 = vmatpush.msrb.mxu0 %v8390_v37  ;;  %v10998_v43 = vand.u32 4294901760, %v8408_v48 }
 0x35c   : > { %11137 = vst [vmem:[#allocation30_spill] sm:$0xff] %v8400_v25  ;;  %v8412_v11 = vpop.f32.mrf.mxu2  ;;  %3130 = vmatpush.msrb.mxu1 %v3129_v57  ;;  %3322 = vmatpush.msra.mxu3 %v8390_v37  ;;  %v8425_v25 = vsub.f32 %v2956_v51, %v8410_v40  ;;  %v8446_v37 = vsub.f32 %v2954_v16, %v8432_v17 }
 0x35d   : > { %11138 = vst [vmem:[#allocation31_spill] sm:$0xff] %v8402_v36  ;;  %v8420_v36 = vpop.f32.mrf.mxu3  ;;  %3244 = vmatpush.msra.mxu2 %v8408_v48  ;;  %3009 = vmatpush.msrb.mxu0 %v8410_v40  ;;  %v3146_v57 = vsub.f32 %v8408_v48, %v10998_v43 }
 0x35e   : > { %11139 = vst [vmem:[#allocation32_spill] sm:$0xff] %v8410_v40  ;;  %3136 = vmatpush.msrb.mxu1 %v3135_v46  ;;  %3324 = vmatpush.msra.mxu3 %v8410_v40  ;;  %v11000_v51 = vand.u32 4294901760, %v8425_v25  ;;  %v2950_v46 = vld [vmem:[%s10974_s4 + $0x10] sm:$0xff]  ;;  %v11150_v23 = vand.u32 4294901760, %v8446_v37 }
 0x35f   : > { %11140 = vst [vmem:[#allocation33_spill] sm:$0xff] %v8412_v11  ;;  %v3140_v11 = vsub.f32 %v8393_v52, %v10996_v63  ;;  %v8442_v63 = vand.u32 4294901760, %v2952_v5  ;;  %3247 = vmatpush.msra.mxu2 %v8425_v25  ;;  %3011 = vmatpush.msrb.mxu0 %v8432_v17  ;;  %v3147_v55 = vand.u32 4294901760, %v3146_v57  ;;  %v8459_v40 = vand.u32 4294901760, %v2950_v46  ;;  %v2948_v57 = vld [vmem:[%s10974_s4] sm:$0xff] }
 0x360   : > { %11141 = vst [vmem:[#allocation34_spill] sm:$0xff] %v8420_v36  ;;  %v3152_v43 = vsub.f32 %v8425_v25, %v11000_v51  ;;  %3326 = vmatpush.msra.mxu3 %v8432_v17 }
 0x361   : > { %11142 = vst [vmem:[#allocation35_spill] sm:$0xff] %v8432_v17  ;;  %v3141_v36 = vand.u32 4294901760, %v3140_v11  ;;  %v8457_v11 = vsub.f32 %v2952_v5, %v8442_v63  ;;  %3250 = vmatpush.msra.mxu2 %v8446_v37  ;;  %3013 = vmatpush.msrb.mxu0 %v8442_v63  ;;  %v8476_v5 = vand.u32 4294901760, %v2948_v57 }
 0x362   : > { %11143 = vst [vmem:[#allocation36_spill] sm:$0xff] %v8442_v63  ;;  %v3153_v51 = vand.u32 4294901760, %v3152_v43  ;;  %3328 = vmatpush.msra.mxu3 %v8442_v63 }
 0x363   : > { %11144 = vst [vmem:[#allocation37_spill] sm:$0xff] %v8459_v40  ;;  %3142 = vmatpush.msrb.mxu1 %v3141_v36  ;;  %v8466_v22 = vpop.f32.mrf.mxu0  ;;  %v8468_v38 = vpop.f32.mrf.mxu1  ;;  %v11003_v17 = vand.u32 4294901760, %v8457_v11  ;;  %v8474_v36 = vsub.f32 %v2950_v46, %v8459_v40  ;;  %3253 = vmatpush.msra.mxu2 %v8457_v11  ;;  %v8491_v63 = vsub.f32 %v2948_v57, %v8476_v5  ;;  %v11152_v57 = vand.u32 4294901760, %v8229_v35 }
 0x364   : > { %11145 = vst [vmem:[#allocation38_spill] sm:$0xff] %v8466_v22  ;;  %v8478_v16 = vpop.f32.mrf.mxu2  ;;  %v3158_v22 = vsub.f32 %v8446_v37, %v11150_v23  ;;  %3015 = vmatpush.msrb.mxu0 %v8459_v40  ;;  %3330 = vmatpush.msra.mxu3 %v8459_v40  ;;  %v11153_v40 = vand.u32 4294901760, %v8234_v60  ;;  %v11156_v60 = vand.u32 4294901760, %v8305_v33 }
 0x365   : > { %11146 = vst [vmem:[#allocation39_spill] sm:$0xff] %v8468_v38  ;;  %3148 = vmatpush.msrb.mxu1 %v3147_v55  ;;  %v8484_v43 = vpop.f32.mrf.mxu3  ;;  %v3164_v38 = vsub.f32 %v8457_v11, %v11003_v17  ;;  %v11004_v46 = vand.u32 4294901760, %v8474_v36  ;;  %3256 = vmatpush.msra.mxu2 %v8474_v36  ;;  %v11008_v17 = vand.u32 4294901760, %v8491_v63 }
 0x366   : > { %11147 = vst [vmem:[#allocation40_spill] sm:$0xff] %v8474_v36  ;;  %v3159_v55 = vand.u32 4294901760, %v3158_v22  ;;  %3332 = vmatpush.msra.mxu3 %v8476_v5  ;;  %3017 = vmatpush.msrb.mxu0 %v8476_v5  ;;  %v2073_v22 = vld [vmem:[%s10973_s3] sm:$0x3] }
 0x367   : > { %11148 = vst [vmem:[#allocation41_spill] sm:$0xff] %v8476_v5  ;;  %3154 = vmatpush.msrb.mxu1 %v3153_v51  ;;  %v3165_v23 = vand.u32 4294901760, %v3164_v38  ;;  %3259 = vmatpush.msra.mxu2 %v8491_v63  ;;  %v3176_v38 = vsub.f32 %v8491_v63, %v11008_v17  ;;  %v11154_v17 = vand.u32 4294901760, %v8267_v47 }
 0x368   : > { %11149 = vst [vmem:[#allocation42_spill] sm:$0xff] %v8478_v16  ;;  %3385 = vmatpush.msra.mxu0 %v11152_v57 }
 0x369   : > { %11151 = vst [vmem:[#allocation43_spill] sm:$0xff] %v8484_v43  ;;  %v3170_v43 = vsub.f32 %v8474_v36, %v11004_v46  ;;  %3160 = vmatpush.msrb.mxu1 %v3159_v55  ;;  %v8511_v46 = vperm.slane %v2073_v22, 1  ;;  %v3177_v5 = vand.u32 4294901760, %v3176_v38 }
 0x36a   : > { %3389 = vmatpush.msra.mxu0 %v11153_v40 }
 0x36b   : > { %v3171_v51 = vand.u32 4294901760, %v3170_v43  ;;  %3166 = vmatpush.msrb.mxu1 %v3165_v23  ;;  %v8513_v16 = vpop.f32.mrf.mxu0  ;;  %v2749_v55 = vpop.f32.mrf.mxu1  ;;  %v2533_v35 = vadd.f32 %v8214_v30, %v8511_v46  ;;  %v11155_v23 = vand.u32 4294901760, %v8272_v28  ;;  %v11157_v30 = vand.u32 4294901760, %v8310_v39 }
 0x36c   : > { %v8517_v36 = vpop.f32.mrf.mxu2  ;;  %3393 = vmatpush.msra.mxu0 %v11154_v17  ;;  %v2541_v39 = vadd.f32 %v8243_v56, %v8511_v46 }
 0x36d   : > { %3172 = vmatpush.msrb.mxu1 %v3171_v51  ;;  %v8519_v43 = vpop.f32.mrf.mxu3  ;;  %v2630_v40 = vadd.f32 %v8216_v29, %v2533_v35  ;;  %v8532_v51 = vperm.slane %v2073_v22, 0  ;;  %v11158_v29 = vand.u32 4294901760, %v8343_v61 }
 0x36e   : > { %3397 = vmatpush.msra.mxu0 %v11155_v23 }
 0x36f   : > { %3178 = vmatpush.msrb.mxu1 %v3177_v5  ;;  %v2147_v28 = vadd.f32 %v8139_v45, %v8532_v51  ;;  %v11159_v45 = vand.u32 4294901760, %v8354_v53  ;;  %v2139_v56 = vadd.f32 %v8127_v14, %v8532_v51  ;;  %v2634_v53 = vadd.f32 %v8246_v41, %v2541_v39 }
 0x370   : > { %3401 = vmatpush.msra.mxu0 %v11156_v60 }
 0x371   : > { %3480 = vmatpush.msra.mxu1 %v8221_v50 }
 0x372   : > { %3405 = vmatpush.msra.mxu0 %v11157_v30 }
 0x373   : > { %3482 = vmatpush.msra.mxu1 %v8226_v34  ;;  %v2687_v47 = vpop.f32.mrf.mxu0  ;;  %v2755_v17 = vpop.f32.mrf.mxu1  ;;  %v2155_v34 = vadd.f32 %v8152_v54, %v8532_v51  ;;  %v2131_v54 = vadd.f32 %v8113_v21, %v8532_v51  ;;  %v2171_v21 = vadd.f32 %v8177_v1, %v8532_v51  ;;  %v11162_v1 = vand.u32 4294901760, %v8408_v48 }
 0x374   : > { %v2688_v50 = vadd.f32 %v2687_v47, %v2630_v40  ;;  %v2824_v5 = vpop.f32.mrf.mxu2  ;;  %3409 = vmatpush.msra.mxu0 %v11158_v29 }
 0x375   : > { %3484 = vmatpush.msra.mxu1 %v8256_v24  ;;  %v2877_v33 = vpop.f32.mrf.mxu3  ;;  %v2163_v24 = vadd.f32 %v8164_v20, %v8532_v51  ;;  %v2240_v61 = vadd.f32 %v8144_v3, %v2155_v34  ;;  %v11160_v20 = vand.u32 4294901760, %v8376_v12  ;;  %v11161_v12 = vand.u32 4294901760, %v8393_v52  ;;  %v11170_v34 = vld [vmem:[#allocation14_spill] sm:$0xff] }
 0x376   : > { %v2750_v22 = vadd.f32 %v2749_v55, %v2688_v50  ;;  %3413 = vmatpush.msra.mxu0 %v11159_v45  ;;  %v2228_v55 = vadd.f32 %v8108_v15, %v2131_v54  ;;  %v11168_v50 = vld [vmem:[#allocation2_spill] sm:$0xff] }
 0x377   : > { %3486 = vmatpush.msra.mxu1 %v8264_v49  ;;  %v2236_v49 = vadd.f32 %v8129_v4, %v2147_v28  ;;  %v2301_v15 = vadd.f32 %v8156_v27, %v2240_v61  ;;  %v11163_v27 = vand.u32 4294901760, %v8425_v25  ;;  %v11169_v28 = vld [vmem:[#allocation6_spill] sm:$0xff] }
 0x378   : > { %v2825_v38 = vadd.f32 %v2824_v5, %v2750_v22  ;;  %3417 = vmatpush.msra.mxu0 %v11160_v20  ;;  %v2286_v41 = vadd.f32 %v8115_v59, %v2228_v55  ;;  %v2248_v59 = vadd.f32 %v8169_v6, %v2171_v21  ;;  %v11165_v6 = vld [vmem:[#allocation4_spill] sm:$0xff]  ;;  %v11175_v20 = vld [vmem:[#allocation21_spill] sm:$0xff] }
 0x379   : > { %3488 = vmatpush.msra.mxu1 %v8294_v13  ;;  %v2244_v13 = vadd.f32 %v8154_v18, %v2163_v24  ;;  %v2296_v23 = vadd.f32 %v8141_v32, %v2236_v49  ;;  %v2179_v32 = vadd.f32 %v8189_v44, %v8532_v51  ;;  %v2366_v47 = vadd.f32 %v11165_v6, %v2301_v15  ;;  %v11166_v44 = vld [vmem:[#allocation3_spill] sm:$0xff]  ;;  %v11173_v24 = vld [vmem:[#allocation16_spill] sm:$0xff]  ;;  %v11174_v49 = vld [vmem:[#allocation18_spill] sm:$0xff] }
 0x37a   : > { %v2878_v57 = vadd.f32 %v2877_v33, %v2825_v38  ;;  %3421 = vmatpush.msra.mxu0 %v11161_v12  ;;  %v2311_v5 = vadd.f32 %v11168_v50, %v2248_v59  ;;  %v11186_v59 = vld [vmem:[#allocation8_spill] sm:$0xff]  ;;  %v11194_v50 = vld [vmem:[#allocation33_spill] sm:$0xff] }
 0x37b   : > { %3490 = vmatpush.msra.mxu1 %v8302_v10  ;;  %v2692_v4 = vpop.f32.mrf.mxu0  ;;  %v2761_v3 = vpop.f32.mrf.mxu1  ;;  %v2232_v10 = vadd.f32 %v8119_v8, %v2139_v56  ;;  %v2549_v8 = vadd.f32 %v8281_v7, %v8511_v46  ;;  %v2360_v7 = vadd.f32 %v8146_v2, %v2296_v23  ;;  %v2979_v2 = vld [vmem:[%s10974_s4 + $0xf8] sm:$0xff]  ;;  %v2435_v56 = vadd.f32 %v11175_v20, %v2366_v47  ;;  %v11182_v23 = vld [vmem:[#allocation11_spill] sm:$0xff]  ;;  %v11190_v6 = vld [vmem:[#allocation24_spill] sm:$0xff] }
 0x37c   : > { %v2908_v14 = vmul.f32 0.5, %v2878_v57  ;;  %v2693_v35 = vadd.f32 %v2692_v4, %v2634_v53  ;;  %v2828_v18 = vpop.f32.mrf.mxu2  ;;  %3425 = vmatpush.msra.mxu0 %v11162_v1  ;;  %v8604_v54 = vand.u32 4294901760, %v2979_v2  ;;  %v11178_v4 = vld [vmem:[#allocation40_spill] sm:$0xff] }
 0x37d   : > { %3492 = vmatpush.msra.mxu1 %v8332_v9  ;;  %v2881_v60 = vpop.f32.mrf.mxu3  ;;  %v2306_v9 = vadd.f32 %v8166_v58, %v2244_v13  ;;  %v2291_v40 = vadd.f32 %v8131_v62, %v2232_v10  ;;  %v2348_v58 = vadd.f32 %v8121_v31, %v2286_v41  ;;  %v11164_v62 = vand.u32 4294901760, %v8446_v37  ;;  %v11171_v37 = vld [vmem:[#allocation29_spill] sm:$0xff]  ;;  %v11176_v13 = vld [vmem:[#allocation23_spill] sm:$0xff] }
 0x37e   : > { %7069 = vtanh.f32 %v2908_v14  ;;  %v2756_v52 = vadd.f32 %v2755_v17, %v2693_v35  ;;  %3429 = vmatpush.msra.mxu0 %v11163_v27  ;;  %v2252_v31 = vadd.f32 %v11169_v28, %v2179_v32  ;;  %v2431_v61 = vadd.f32 %v11174_v49, %v2360_v7  ;;  %v11180_v10 = vld [vmem:[#allocation25_spill] sm:$0xff]  ;;  %v11181_v35 = vld [vmem:[#allocation27_spill] sm:$0xff]  ;;  %3545 = vmatpush.msrb.mxu2 %v8604_v54 }
 0x37f   : > { %3494 = vmatpush.msra.mxu1 %v8340_v26  ;;  %v2354_v48 = vadd.f32 %v8134_v0, %v2291_v40  ;;  %v2372_v17 = vadd.f32 %v11166_v44, %v2306_v9  ;;  %v2423_v0 = vadd.f32 %v11170_v34, %v2348_v58  ;;  %v2557_v53 = vadd.f32 %v11176_v13, %v8511_v46  ;;  %v11183_v9 = vld [vmem:[#allocation35_spill] sm:$0xff]  ;;  %v11188_v58 = vld [vmem:[#allocation17_spill] sm:$0xff]  ;;  %v11195_v34 = vld [vmem:[#allocation30_spill] sm:$0xff] }
 0x380   : > { %v2829_v26 = vadd.f32 %v2828_v18, %v2756_v52  ;;  %3433 = vmatpush.msra.mxu0 %v11164_v62  ;;  %v11179_v12 = vand.u32 4294901760, %v11178_v4  ;;  %v2565_v18 = vadd.f32 %v11181_v35, %v8511_v46  ;;  %v8619_v1 = vsub.f32 %v2979_v2, %v8604_v54  ;;  %v11185_v52 = vld [vmem:[#allocation9_spill] sm:$0xff]  ;;  %v11187_v27 = vld [vmem:[#allocation15_spill] sm:$0xff] }
 0x381   : > { %3496 = vmatpush.msra.mxu1 %v8369_v42  ;;  %v11167_v42 = vld [vmem:[#allocation20_spill] sm:$0xff]  ;;  %v2427_v39 = vadd.f32 %v11173_v24, %v2354_v48  ;;  %v2439_v14 = vadd.f32 %v11180_v10, %v2372_v17  ;;  %v2476_v15 = vadd.f32 %v11182_v23, %v2423_v0  ;;  %v2378_v40 = vadd.f32 %v11185_v52, %v2311_v5  ;;  %v11189_v7 = vld [vmem:[#allocation19_spill] sm:$0xff]  ;;  %v11196_v24 = vld [vmem:[#allocation37_spill] sm:$0xff] }
 0x382   : > { %v2638_v30 = vadd.f32 %v11167_v42, %v2549_v8  ;;  %v2882_v25 = vadd.f32 %v2881_v60, %v2829_v26  ;;  %v11184_v8 = vand.u32 4294901760, %v8491_v63  ;;  %v8626_v32 = vadd.f32 %v11186_v59, %v2252_v31  ;;  %v11191_v17 = vld [vmem:[#allocation36_spill] sm:$0xff]  ;;  %v11192_v63 = vld [vmem:[#allocation22_spill] sm:$0xff]  ;;  %v2977_v31 = vld [vmem:[%s10974_s4 + $0xe8] sm:$0xff] }
 0x383   : > { %3498 = vmatpush.msra.mxu1 %v8380_v19  ;;  %v2697_v33 = vpop.f32.mrf.mxu0  ;;  %v11172_v19 = vand.u32 4294901760, %v8457_v11  ;;  %v2767_v55 = vpop.f32.mrf.mxu1  ;;  %v11177_v11 = vld [vmem:[#allocation32_spill] sm:$0xff]  ;;  %v8630_v48 = vadd.f32 %v11188_v58, %v2431_v61  ;;  %v8633_v62 = vadd.f32 %v11189_v7, %v2435_v56  ;;  %v2642_v47 = vadd.f32 %v11190_v6, %v2557_v53  ;;  %v11200_v35 = vld [vmem:[#allocation41_spill] sm:$0xff] }
 0x384   : > { %v7070_v29 = vpop.eup %7069  ;;  %v2909_v22 = vmul.f32 0.5, %v2882_v25  ;;  %v2698_v45 = vadd.f32 %v2697_v33, %v2638_v30  ;;  %v2832_v38 = vpop.f32.mrf.mxu2  ;;  %v8638_v42 = vadd.f32 %v11192_v63, %v2439_v14  ;;  %v11193_v30 = vld [vmem:[#allocation28_spill] sm:$0xff]  ;;  %v2573_v5 = vadd.f32 %v11194_v50, %v8511_v46  ;;  %v2973_v14 = vld [vmem:[%s10974_s4 + $0xc8] sm:$0xff]  ;;  %v2971_v52 = vld [vmem:[%s10974_s4 + $0xb8] sm:$0xff] }
 0x385   : > { %3500 = vmatpush.msra.mxu1 %v11171_v37  ;;  %3437 = vmatpush.msra.mxu0 %v11172_v19  ;;  %v2924_v57 = vadd.f32 1.0, %v7070_v29  ;;  %v2885_v21 = vpop.f32.mrf.mxu3  ;;  %v8641_v25 = vadd.f32 %v11193_v30, %v2565_v18  ;;  %v8649_v0 = vadd.f32 %v11195_v34, %v2378_v40  ;;  %v11019_v37 = vand.u32 4294901760, %v8619_v1  ;;  %v2975_v29 = vld [vmem:[%s10974_s4 + $0xd8] sm:$0xff] }
 0x386   : > { %7071 = vtanh.f32 %v2909_v22  ;;  %v2762_v41 = vadd.f32 %v2761_v3, %v2698_v45  ;;  %v2480_v3 = vadd.f32 %v11187_v27, %v2427_v39  ;;  %v8654_v19 = vand.u32 4294901760, %v2977_v31  ;;  %v11197_v22 = vld [vmem:[#allocation42_spill] sm:$0xff] }
 0x387   : > { %3502 = vmatpush.msra.mxu1 %v11177_v11  ;;  %3441 = vmatpush.msra.mxu0 %v11179_v12  ;;  %v2932_v60 = vmul.f32 0.5, %v2924_v57  ;;  %v2581_v45 = vadd.f32 %v11197_v22, %v8511_v46  ;;  %v8662_v20 = vand.u32 4294901760, %v2975_v29  ;;  %v3644_v57 = vsub.f32 %v8619_v1, %v11019_v37  ;;  %v11199_v11 = vld [vmem:[#allocation34_spill] sm:$0xff] }
 0x388   : > { %v2833_v26 = vadd.f32 %v2832_v38, %v2762_v41  ;;  %3547 = vmatpush.msrb.mxu2 %v8654_v19  ;;  %v8676_v4 = vadd.f32 %v11199_v11, %v2573_v5  ;;  %v2589_v12 = vadd.f32 %v8517_v36, %v8511_v46  ;;  %v11202_v36 = vld [vmem:[#allocation43_spill] sm:$0xff] }
 0x389   : > { %3504 = vmatpush.msra.mxu1 %v11183_v9  ;;  %3445 = vmatpush.msra.mxu0 %v11184_v8  ;;  %v2940_v44 = vmul.f32 %v2932_v60, %v2476_v15  ;;  %v3645_v15 = vand.u32 4294901760, %v3644_v57  ;;  %v8691_v46 = vadd.f32 %v11202_v36, %v2581_v45  ;;  %v8695_v9 = vsub.f32 %v2975_v29, %v8662_v20  ;;  %v2967_v45 = vld [vmem:[%s10974_s4 + $0x98] sm:$0xff] }
 0x38a   : > { %v2886_v28 = vadd.f32 %v2885_v21, %v2833_v26  ;;  %v8673_v21 = vsub.f32 %v2977_v31, %v8654_v19  ;;  %3549 = vmatpush.msrb.mxu2 %v8662_v20  ;;  %v8697_v8 = vand.u32 4294901760, %v2973_v14  ;;  %v8708_v26 = vand.u32 4294901760, %v2971_v52 }
 0x38b   : > { %3506 = vmatpush.msra.mxu1 %v11191_v17  ;;  %v8651_v33 = vand.u32 4294901760, %v2940_v44  ;;  %v2702_v2 = vpop.f32.mrf.mxu0  ;;  %v2773_v41 = vpop.f32.mrf.mxu1  ;;  %v8712_v58 = vadd.f32 %v8519_v43, %v2589_v12  ;;  %3646 = vmatpush.msrb.mxu3 %v3645_v15 }
 0x38c   : > { %v7072_v39 = vpop.eup %7071  ;;  %v2910_v38 = vmul.f32 0.5, %v2886_v28  ;;  %v2703_v49 = vadd.f32 %v2702_v2, %v2642_v47  ;;  %v2836_v61 = vpop.f32.mrf.mxu2  ;;  %v11018_v60 = vand.u32 4294901760, %v8673_v21  ;;  %3551 = vmatpush.msrb.mxu2 %v8697_v8  ;;  %v8717_v6 = vsub.f32 %v2973_v14, %v8697_v8  ;;  %v2969_v47 = vld [vmem:[%s10974_s4 + $0xa8] sm:$0xff] }
 0x38d   : > { %3508 = vmatpush.msra.mxu1 %v11196_v24  ;;  %v8665_v56 = vsub.f32 %v2940_v44, %v8651_v33  ;;  %v2925_v13 = vadd.f32 1.0, %v7072_v39  ;;  %v2889_v53 = vpop.f32.mrf.mxu3  ;;  %v8727_v30 = vsub.f32 %v2971_v52, %v8708_v26  ;;  %v8742_v22 = vand.u32 4294901760, %v2969_v47 }
 0x38e   : > { %3180 = vmatmul.f32.vlgmr.msrb.gmra.mxu1 %v8651_v33  ;;  %7073 = vtanh.f32 %v2910_v38  ;;  %v2768_v10 = vadd.f32 %v2767_v55, %v2703_v49  ;;  %v3650_v27 = vsub.f32 %v8673_v21, %v11018_v60  ;;  %v11015_v2 = vand.u32 4294901760, %v8717_v6  ;;  %3553 = vmatpush.msrb.mxu2 %v8708_v26 }
 0x38f   : > { %11198 = vst [vmem:[#allocation4_spill] sm:$0xff] %v8665_v56  ;;  %3510 = vmatpush.msra.mxu1 %v11200_v35  ;;  %v2933_v18 = vmul.f32 0.5, %v2925_v13  ;;  %3262 = vmatmul.f32.vlgmr.msra.gmra.mxu2 %v8665_v56  ;;  %v8686_v23 = vand.u32 4294901760, %v8665_v56  ;;  %v2965_v13 = vld [vmem:[%s10974_s4 + $0x88] sm:$0xff]  ;;  %v8762_v12 = vsub.f32 %v2969_v47, %v8742_v22  ;;  %v8766_v35 = vand.u32 4294901760, %v2967_v45 }
 0x390   : > { %v2837_v55 = vadd.f32 %v2836_v61, %v2768_v10  ;;  %v3651_v43 = vand.u32 4294901760, %v3650_v27  ;;  %v3662_v61 = vsub.f32 %v8717_v6, %v11015_v2  ;;  %3555 = vmatpush.msrb.mxu2 %v8742_v22  ;;  %v2961_v47 = vld [vmem:[%s10974_s4 + $0x68] sm:$0xff] }
 0x391   : > { %11201 = vst [vmem:[#allocation3_spill] sm:$0xff] %v8686_v23  ;;  %3860 = vmatpush.msrb.mxu1 %v8604_v54  ;;  %v2941_v40 = vmul.f32 %v2933_v18, %v2480_v3  ;;  %3336 = vmatmul.f32.vlgmr.msra.gmra.mxu3 %v8686_v23  ;;  %v3021_v59 = vsub.f32 %v8665_v56, %v8686_v23  ;;  %v11016_v3 = vand.u32 4294901760, %v8695_v9  ;;  %v8768_v18 = vand.u32 4294901760, %v2965_v13 }
 0x392   : > { %v2890_v7 = vadd.f32 %v2889_v53, %v2837_v55  ;;  %3652 = vmatpush.msrb.mxu3 %v3651_v43  ;;  %v3663_v14 = vand.u32 4294901760, %v3662_v61  ;;  %3557 = vmatpush.msrb.mxu2 %v8766_v35  ;;  %v8781_v27 = vsub.f32 %v2967_v45, %v8766_v35 }
 0x393   : > { %3862 = vmatpush.msrb.mxu1 %v8654_v19  ;;  %v8722_v44 = vand.u32 4294901760, %v2941_v40  ;;  %v2707_v17 = vpop.f32.mrf.mxu0  ;;  %v8724_v63 = vand.u32 4294901760, %v3021_v59  ;;  %v3656_v34 = vsub.f32 %v8695_v9, %v11016_v3  ;;  %v2779_v36 = vpop.f32.mrf.mxu1 }
 0x394   : > { %v7074_v50 = vpop.eup %7073  ;;  %v2911_v5 = vmul.f32 0.5, %v2890_v7  ;;  %v2708_v28 = vadd.f32 %v2707_v17, %v8641_v25  ;;  %v2840_v31 = vpop.f32.mrf.mxu2  ;;  %v11013_v25 = vand.u32 4294901760, %v8727_v30  ;;  %v11010_v45 = vand.u32 4294901760, %v8781_v27  ;;  %3559 = vmatpush.msrb.mxu2 %v8768_v18 }
 0x395   : > { %3864 = vmatpush.msrb.mxu1 %v8662_v20  ;;  %v2926_v29 = vadd.f32 1.0, %v7074_v50  ;;  %v2893_v24 = vpop.f32.mrf.mxu3  ;;  %3023 = vmatmul.f32.vlgmr.msrb.gmra.mxu0 %v8724_v63  ;;  %v8739_v39 = vsub.f32 %v2941_v40, %v8722_v44  ;;  %v3657_v49 = vand.u32 4294901760, %v3656_v34  ;;  %v11012_v40 = vand.u32 4294901760, %v8762_v12 }
 0x396   : > { %3184 = vmatmul.f32.gmra.mxu1 %v8722_v44  ;;  %7075 = vtanh.f32 %v2911_v5  ;;  %v2774_v38 = vadd.f32 %v2773_v41, %v2708_v28  ;;  %3772 = vmatpush.msrb.mxu0 %v8619_v1  ;;  %v3668_v11 = vsub.f32 %v8727_v30, %v11013_v25  ;;  %v2963_v41 = vld [vmem:[%s10974_s4 + $0x78] sm:$0xff]  ;;  %v8798_v28 = vand.u32 4294901760, %v2961_v47 }
 0x397   : > { %11203 = vst [vmem:[#allocation20_spill] sm:$0xff] %v8739_v39  ;;  %v2934_v53 = vmul.f32 0.5, %v2926_v29  ;;  %3267 = vmatmul.f32.gmra.mxu2 %v8739_v39  ;;  %v8756_v57 = vand.u32 4294901760, %v8739_v39  ;;  %3866 = vmatpush.msrb.mxu1 %v8697_v8  ;;  %v8786_v7 = vand.u32 4294901760, %v2963_v41  ;;  %v3674_v5 = vsub.f32 %v8762_v12, %v11012_v40 }
 0x398   : > { %v2841_v10 = vadd.f32 %v2840_v31, %v2774_v38  ;;  %3658 = vmatpush.msrb.mxu3 %v3657_v49  ;;  %v3669_v52 = vand.u32 4294901760, %v3668_v11  ;;  %3775 = vmatpush.msrb.mxu0 %v8673_v21  ;;  %v2959_v11 = vld [vmem:[%s10974_s4 + $0x58] sm:$0xff] }
 0x399   : > { %11204 = vst [vmem:[#allocation2_spill] sm:$0xff] %v8756_v57  ;;  %v2942_v15 = vmul.f32 %v2934_v53, %v8630_v48  ;;  %3342 = vmatmul.f32.gmra.mxu3 %v8756_v57  ;;  %v3029_v55 = vsub.f32 %v8739_v39, %v8756_v57  ;;  %v8784_v48 = vsub.f32 %v2965_v13, %v8768_v18  ;;  %v3675_v53 = vand.u32 4294901760, %v3674_v5 }
 0x39a   : > { %v2894_v59 = vadd.f32 %v2893_v24, %v2841_v10  ;;  %3664 = vmatpush.msrb.mxu3 %v3663_v14  ;;  %3778 = vmatpush.msrb.mxu0 %v8695_v9  ;;  %v3680_v14 = vsub.f32 %v8781_v27, %v11010_v45 }
 0x39b   : > { %v8791_v17 = vand.u32 4294901760, %v2942_v15  ;;  %v2712_v43 = vpop.f32.mrf.mxu0  ;;  %v8793_v50 = vand.u32 4294901760, %v3029_v55  ;;  %3868 = vmatpush.msrb.mxu1 %v8708_v26  ;;  %v11009_v38 = vand.u32 4294901760, %v8784_v48  ;;  %3561 = vmatpush.msrb.mxu2 %v8786_v7 }
 0x39c   : > { %v7076_v31 = vpop.eup %7075  ;;  %v2912_v34 = vmul.f32 0.5, %v2894_v59  ;;  %v2713_v29 = vadd.f32 %v2712_v43, %v8676_v4  ;;  %v2844_v24 = vpop.f32.mrf.mxu2  ;;  %3670 = vmatpush.msrb.mxu3 %v3669_v52  ;;  %v8812_v4 = vsub.f32 %v2963_v41, %v8786_v7  ;;  %3781 = vmatpush.msrb.mxu0 %v8717_v6  ;;  %v8831_v52 = vsub.f32 %v2961_v47, %v8798_v28  ;;  %v2957_v59 = vld [vmem:[%s10974_s4 + $0x48] sm:$0xff] }
 0x39d   : > { %v2927_v49 = vadd.f32 1.0, %v7076_v31  ;;  %v2897_v61 = vpop.f32.mrf.mxu3  ;;  %3031 = vmatmul.f32.gmra.mxu0 %v8793_v50  ;;  %v8809_v13 = vsub.f32 %v2942_v15, %v8791_v17  ;;  %v3686_v55 = vsub.f32 %v8784_v48, %v11009_v38  ;;  %v3681_v5 = vand.u32 4294901760, %v3680_v14  ;;  %3563 = vmatpush.msrb.mxu2 %v8798_v28  ;;  %v2785_v38 = vpop.f32.mrf.mxu1 }
 0x39e   : > { %3188 = vmatmul.f32.gmra.mxu1 %v8791_v17  ;;  %7077 = vtanh.f32 %v2912_v34  ;;  %v2780_v10 = vadd.f32 %v2779_v36, %v2713_v29  ;;  %3676 = vmatpush.msrb.mxu3 %v3675_v53  ;;  %v11011_v36 = vand.u32 4294901760, %v8812_v4  ;;  %v8837_v34 = vand.u32 4294901760, %v2959_v11  ;;  %v2955_v29 = vld [vmem:[%s10974_s4 + $0x38] sm:$0xff] }
 0x39f   : > { %11205 = vst [vmem:[#allocation6_spill] sm:$0xff] %v8809_v13  ;;  %v2935_v41 = vmul.f32 0.5, %v2927_v49  ;;  %3272 = vmatmul.f32.gmra.mxu2 %v8809_v13  ;;  %v8827_v15 = vand.u32 4294901760, %v8809_v13  ;;  %v3687_v31 = vand.u32 4294901760, %v3686_v55  ;;  %3784 = vmatpush.msrb.mxu0 %v8727_v30  ;;  %v11014_v53 = vand.u32 4294901760, %v8831_v52 }
 0x3a0   : > { %v2845_v43 = vadd.f32 %v2844_v24, %v2780_v10  ;;  %v3692_v24 = vsub.f32 %v8812_v4, %v11011_v36  ;;  %3870 = vmatpush.msrb.mxu1 %v8742_v22  ;;  %3682 = vmatpush.msrb.mxu3 %v3681_v5  ;;  %v8854_v14 = vsub.f32 %v2959_v11, %v8837_v34  ;;  %v8858_v55 = vand.u32 4294901760, %v2955_v29 }
 0x3a1   : > { %11206 = vst [vmem:[#allocation14_spill] sm:$0xff] %v8827_v15  ;;  %v2943_v47 = vmul.f32 %v2935_v41, %v8633_v62  ;;  %3348 = vmatmul.f32.gmra.mxu3 %v8827_v15  ;;  %v3037_v49 = vsub.f32 %v8809_v13, %v8827_v15  ;;  %3565 = vmatpush.msrb.mxu2 %v8837_v34  ;;  %v8856_v62 = vand.u32 4294901760, %v2957_v59 }
 0x3a2   : > { %v2898_v10 = vadd.f32 %v2897_v61, %v2845_v43  ;;  %v3693_v40 = vand.u32 4294901760, %v3692_v24  ;;  %v3698_v61 = vsub.f32 %v8831_v52, %v11014_v53  ;;  %3787 = vmatpush.msrb.mxu0 %v8762_v12  ;;  %3872 = vmatpush.msrb.mxu1 %v8766_v35  ;;  %v11017_v25 = vand.u32 4294901760, %v8854_v14  ;;  %v2953_v24 = vld [vmem:[%s10974_s4 + $0x28] sm:$0xff] }
 0x3a3   : > { %v8860_v41 = vand.u32 4294901760, %v2943_v47  ;;  %v2717_v45 = vpop.f32.mrf.mxu0  ;;  %v8862_v36 = vand.u32 4294901760, %v3037_v49  ;;  %3688 = vmatpush.msrb.mxu3 %v3687_v31  ;;  %3567 = vmatpush.msrb.mxu2 %v8856_v62  ;;  %v8873_v49 = vsub.f32 %v2957_v59, %v8856_v62  ;;  %v8884_v31 = vsub.f32 %v2955_v29, %v8858_v55  ;;  %v2951_v59 = vld [vmem:[%s10974_s4 + $0x18] sm:$0xff]  ;;  %v2949_v29 = vld [vmem:[%s10974_s4 + $0x8] sm:$0xff] }
 0x3a4   : > { %v7078_v11 = vpop.eup %7077  ;;  %v2913_v43 = vmul.f32 0.5, %v2898_v10  ;;  %v2718_v5 = vadd.f32 %v2717_v45, %v8691_v46  ;;  %v2848_v2 = vpop.f32.mrf.mxu2  ;;  %v3699_v45 = vand.u32 4294901760, %v3698_v61  ;;  %3790 = vmatpush.msrb.mxu0 %v8781_v27  ;;  %3874 = vmatpush.msrb.mxu1 %v8768_v18 }
 0x3a5   : > { %v2928_v53 = vadd.f32 1.0, %v7078_v11  ;;  %3039 = vmatmul.f32.gmra.mxu0 %v8862_v36  ;;  %v8881_v46 = vsub.f32 %v2943_v47, %v8860_v41  ;;  %3694 = vmatpush.msrb.mxu3 %v3693_v40  ;;  %v3704_v11 = vsub.f32 %v8854_v14, %v11017_v25  ;;  %v11021_v3 = vand.u32 4294901760, %v8873_v49  ;;  %v2901_v61 = vpop.f32.mrf.mxu3  ;;  %v2791_v39 = vpop.f32.mrf.mxu1 }
 0x3a6   : > { %3192 = vmatmul.f32.gmra.mxu1 %v8860_v41  ;;  %7079 = vtanh.f32 %v2913_v43  ;;  %v2786_v10 = vadd.f32 %v2785_v38, %v2718_v5  ;;  %3569 = vmatpush.msrb.mxu2 %v8858_v55  ;;  %v8902_v38 = vand.u32 4294901760, %v2953_v24  ;;  %v11209_v13 = vand.u32 4294901760, %v8884_v31 }
 0x3a7   : > { %11207 = vst [vmem:[#allocation29_spill] sm:$0xff] %v8881_v46  ;;  %v2936_v47 = vmul.f32 0.5, %v2928_v53  ;;  %3277 = vmatmul.f32.gmra.mxu2 %v8881_v46  ;;  %v8899_v43 = vand.u32 4294901760, %v8881_v46  ;;  %3700 = vmatpush.msrb.mxu3 %v3699_v45  ;;  %v3705_v25 = vand.u32 4294901760, %v3704_v11  ;;  %v3710_v60 = vsub.f32 %v8873_v49, %v11021_v3 }
 0x3a8   : > { %v2849_v5 = vadd.f32 %v2848_v2, %v2786_v10  ;;  %v8908_v53 = vand.u32 4294901760, %v2951_v59  ;;  %v3716_v2 = vsub.f32 %v8884_v31, %v11209_v13  ;;  %3571 = vmatpush.msrb.mxu2 %v8902_v38  ;;  %v8919_v45 = vand.u32 4294901760, %v2949_v29  ;;  %3793 = vmatpush.msrb.mxu0 %v8784_v48 }
 0x3a9   : > { %11208 = vst [vmem:[#allocation16_spill] sm:$0xff] %v8899_v43  ;;  %v2944_v37 = vmul.f32 %v2936_v47, %v8638_v42  ;;  %3354 = vmatmul.f32.gmra.mxu3 %v8899_v43  ;;  %v3045_v40 = vsub.f32 %v8881_v46, %v8899_v43  ;;  %v3711_v11 = vand.u32 4294901760, %v3710_v60  ;;  %v8922_v3 = vsub.f32 %v2953_v24, %v8902_v38 }
 0x3aa   : > { %v2902_v10 = vadd.f32 %v2901_v61, %v2849_v5  ;;  %3706 = vmatpush.msrb.mxu3 %v3705_v25  ;;  %v8925_v42 = vsub.f32 %v2951_v59, %v8908_v53  ;;  %v3717_v13 = vand.u32 4294901760, %v3716_v2  ;;  %3573 = vmatpush.msrb.mxu2 %v8908_v53  ;;  %v8934_v61 = vsub.f32 %v2949_v29, %v8919_v45 }
 0x3ab   : > { %v8928_v47 = vand.u32 4294901760, %v2944_v37  ;;  %v2722_v46 = vpop.f32.mrf.mxu0  ;;  %v8930_v43 = vand.u32 4294901760, %v3045_v40  ;;  %3876 = vmatpush.msrb.mxu1 %v8786_v7  ;;  %v11027_v59 = vand.u32 4294901760, %v8922_v3  ;;  %3796 = vmatpush.msrb.mxu0 %v8812_v4  ;;  %v11210_v40 = vld [vmem:[#allocation10_spill] sm:$0xff] }
 0x3ac   : > { %v7080_v60 = vpop.eup %7079  ;;  %v2914_v25 = vmul.f32 0.5, %v2902_v10  ;;  %v2723_v24 = vadd.f32 %v2722_v46, %v8712_v58  ;;  %3712 = vmatpush.msrb.mxu3 %v3711_v11  ;;  %v11026_v5 = vand.u32 4294901760, %v8925_v42  ;;  %v2187_v2 = vadd.f32 %v11210_v40, %v8532_v51  ;;  %3575 = vmatpush.msrb.mxu2 %v8919_v45  ;;  %v11211_v11 = vld [vmem:[#allocation26_spill] sm:$0xff]  ;;  %v2852_v40 = vpop.f32.mrf.mxu2 }
 0x3ad   : > { %v2929_v15 = vadd.f32 1.0, %v7080_v60  ;;  %3047 = vmatmul.f32.gmra.mxu0 %v8930_v43  ;;  %v8946_v29 = vsub.f32 %v2944_v37, %v8928_v47  ;;  %v11031_v58 = vand.u32 4294901760, %v8934_v61  ;;  %v3722_v10 = vsub.f32 %v8922_v3, %v11027_v59  ;;  %3878 = vmatpush.msrb.mxu1 %v8798_v28  ;;  %v2905_v23 = vpop.f32.mrf.mxu3 }
 0x3ae   : > { %3196 = vmatmul.f32.gmra.mxu1 %v8928_v47  ;;  %7081 = vtanh.f32 %v2914_v25  ;;  %v2792_v46 = vadd.f32 %v2791_v39, %v2723_v24  ;;  %3718 = vmatpush.msrb.mxu3 %v3717_v13  ;;  %v3728_v51 = vsub.f32 %v8925_v42, %v11026_v5  ;;  %v2496_v60 = vadd.f32 %v11211_v11, %v8649_v0  ;;  %v11212_v25 = vld [vmem:[#allocation5_spill] sm:$0xff] }
 0x3af   : > { %v2937_v37 = vmul.f32 0.5, %v2929_v15  ;;  %3282 = vmatmul.f32.gmra.mxu2 %v8946_v29  ;;  %v8960_v39 = vand.u32 4294901760, %v8946_v29  ;;  %v3734_v13 = vsub.f32 %v8934_v61, %v11031_v58  ;;  %3799 = vmatpush.msrb.mxu0 %v8831_v52  ;;  %v2384_v24 = vadd.f32 %v11212_v25, %v8626_v32  ;;  %v11214_v15 = vld [vmem:[#allocation7_spill] sm:$0xff] }
 0x3b0   : > { %v2853_v5 = vadd.f32 %v2852_v40, %v2792_v46  ;;  %v3723_v59 = vand.u32 4294901760, %v3722_v10  ;;  %v3729_v57 = vand.u32 4294901760, %v3728_v51  ;;  %v11213_v0 = vand.u32 4294901760, %v8619_v1  ;;  %v11216_v1 = vld [vmem:[#allocation38_spill] sm:$0xff]  ;;  %3880 = vmatpush.msrb.mxu1 %v8837_v34  ;;  %v11220_v25 = vld [vmem:[#allocation31_spill] sm:$0xff] }
 0x3b1   : > { %v2256_v11 = vadd.f32 %v11214_v15, %v2187_v2  ;;  %v2945_v56 = vmul.f32 %v2937_v37, %v2496_v60  ;;  %3360 = vmatmul.f32.gmra.mxu3 %v8960_v39  ;;  %v3053_v58 = vsub.f32 %v8946_v29, %v8960_v39  ;;  %3802 = vmatpush.msrb.mxu0 %v8854_v14  ;;  %v3735_v46 = vand.u32 4294901760, %v3734_v13 }
 0x3b2   : > { %3943 = vmatpush.msra.mxu2 %v11213_v0  ;;  %v2906_v32 = vadd.f32 %v2905_v23, %v2853_v5  ;;  %3724 = vmatpush.msrb.mxu3 %v3723_v59  ;;  %v11215_v10 = vand.u32 4294901760, %v8673_v21  ;;  %v2447_v51 = vadd.f32 %v11216_v1, %v2384_v24  ;;  %v11217_v23 = vand.u32 4294901760, %v8695_v9  ;;  %v11218_v59 = vld [vmem:[#allocation12_spill] sm:$0xff] }
 0x3b3   : > { %v8979_v40 = vand.u32 4294901760, %v2945_v56  ;;  %v8981_v2 = vand.u32 4294901760, %v3053_v58  ;;  %3805 = vmatpush.msrb.mxu0 %v8873_v49  ;;  %v2321_v5 = vadd.f32 %v11218_v59, %v2256_v11  ;;  %v11219_v13 = vand.u32 4294901760, %v8717_v6  ;;  %3882 = vmatpush.msrb.mxu1 %v8856_v62 }
 0x3b4   : > { %3947 = vmatpush.msra.mxu2 %v11215_v10  ;;  %v7082_v60 = vpop.eup %7081  ;;  %v2915_v37 = vmul.f32 0.5, %v2906_v32  ;;  %3730 = vmatpush.msrb.mxu3 %v3729_v57  ;;  %v2500_v57 = vadd.f32 %v11220_v25, %v2447_v51  ;;  %v11221_v0 = vand.u32 4294901760, %v8727_v30  ;;  %v11223_v32 = vand.u32 4294901760, %v8762_v12  ;;  %v11226_v51 = vld [vmem:[#allocation39_spill] sm:$0xff]  ;;  %v11241_v25 = vld [vmem:[#allocation16_spill] sm:$0xff] }
 0x3b5   : > { %v2930_v21 = vadd.f32 1.0, %v7082_v60  ;;  %3055 = vmatmul.f32.gmra.mxu0 %v8981_v2  ;;  %v8991_v58 = vsub.f32 %v2945_v56, %v8979_v40  ;;  %v11222_v56 = vld [vmem:[#allocation13_spill] sm:$0xff]  ;;  %3884 = vmatpush.msrb.mxu1 %v8858_v55  ;;  %v11224_v1 = vand.u32 4294901760, %v8781_v27  ;;  %v11225_v12 = vand.u32 4294901760, %v8784_v48 }
 0x3b6   : > { %3951 = vmatpush.msra.mxu2 %v11217_v23  ;;  %3200 = vmatmul.f32.gmra.mxu1 %v8979_v40  ;;  %7083 = vtanh.f32 %v2915_v37  ;;  %v2390_v15 = vadd.f32 %v11222_v56, %v2321_v5  ;;  %v11227_v27 = vand.u32 4294901760, %v8812_v4  ;;  %v11228_v48 = vand.u32 4294901760, %v8831_v52  ;;  %v11243_v56 = vld [vmem:[#allocation29_spill] sm:$0xff] }
 0x3b7   : > { %3736 = vmatpush.msrb.mxu3 %v3735_v46  ;;  %v2938_v24 = vmul.f32 0.5, %v2930_v21  ;;  %3287 = vmatmul.f32.gmra.mxu2 %v8991_v58  ;;  %v8998_v9 = vand.u32 4294901760, %v8991_v58  ;;  %v11230_v4 = vand.u32 4294901760, %v8873_v49  ;;  %v11233_v21 = vand.u32 4294901760, %v8925_v42 }
 0x3b8   : > { %3955 = vmatpush.msra.mxu2 %v11219_v13  ;;  %3808 = vmatpush.msrb.mxu0 %v8884_v31  ;;  %v11240_v13 = vld [vmem:[#allocation6_spill] sm:$0xff] }
 0x3b9   : > { %4038 = vmatpush.msra.mxu3 %v8604_v54  ;;  %v2946_v11 = vmul.f32 %v2938_v24, %v2500_v57  ;;  %v3061_v6 = vsub.f32 %v8991_v58, %v8998_v9  ;;  %v2451_v54 = vadd.f32 %v8513_v16, %v2390_v15  ;;  %3886 = vmatpush.msrb.mxu1 %v8902_v38 }
 0x3ba   : > { %3959 = vmatpush.msra.mxu2 %v11221_v0  ;;  %3366 = vmatmul.f32.gmra.mxu3 %v8998_v9 }
 0x3bb   : > { %4040 = vmatpush.msra.mxu3 %v8654_v19  ;;  %v9013_v30 = vand.u32 4294901760, %v2946_v11  ;;  %v9015_v46 = vand.u32 4294901760, %v3061_v6  ;;  %3811 = vmatpush.msrb.mxu0 %v8922_v3  ;;  %v2504_v60 = vadd.f32 %v11226_v51, %v2451_v54 }
 0x3bc   : > { %3963 = vmatpush.msra.mxu2 %v11223_v32  ;;  %v7084_v10 = vpop.eup %7083  ;;  %3888 = vmatpush.msrb.mxu1 %v8908_v53 }
 0x3bd   : > { %4042 = vmatpush.msra.mxu3 %v8662_v20  ;;  %v2931_v19 = vadd.f32 1.0, %v7084_v10  ;;  %3063 = vmatmul.f32.gmra.mxu0 %v9015_v46  ;;  %v9025_v16 = vsub.f32 %v2946_v11, %v9013_v30 }
 0x3be   : > { %3967 = vmatpush.msra.mxu2 %v11224_v1  ;;  %3204 = vmatmul.f32.gmra.mxu1 %v9013_v30 }
 0x3bf   : > { %4044 = vmatpush.msra.mxu3 %v8697_v8  ;;  %v2939_v37 = vmul.f32 0.5, %v2931_v19  ;;  %3292 = vmatmul.f32.gmra.mxu2 %v9025_v16  ;;  %v9033_v20 = vand.u32 4294901760, %v9025_v16 }
 0x3c0   : > { %3971 = vmatpush.msra.mxu2 %v11225_v12  ;;  %3890 = vmatpush.msrb.mxu1 %v8919_v45 }
 0x3c1   : > { %4046 = vmatpush.msra.mxu3 %v8708_v26  ;;  %v2947_v23 = vmul.f32 %v2939_v37, %v2504_v60  ;;  %v3069_v8 = vsub.f32 %v9025_v16, %v9033_v20  ;;  %3814 = vmatpush.msrb.mxu0 %v8925_v42  ;;  %v11229_v26 = vand.u32 4294901760, %v8854_v14  ;;  %v11232_v14 = vand.u32 4294901760, %v8922_v3  ;;  %v7038_v60 = vld [vmem:[%s10974_s4 + $0x1f0] sm:$0xff] }
 0x3c2   : > { %3975 = vmatpush.msra.mxu2 %v11227_v27  ;;  %3372 = vmatmul.f32.gmra.mxu3 %v9033_v20  ;;  %v9223_v37 = vand.u32 4294901760, %v7038_v60 }
 0x3c3   : > { %4048 = vmatpush.msra.mxu3 %v8742_v22  ;;  %v9046_v59 = vand.u32 4294901760, %v2947_v23  ;;  %v3070_v5 = vand.u32 4294901760, %v3069_v8  ;;  %3817 = vmatpush.msrb.mxu0 %v8934_v61 }
 0x3c4   : > { %3979 = vmatpush.msra.mxu2 %v11228_v48 }
 0x3c5   : > { %4050 = vmatpush.msra.mxu3 %v8766_v35  ;;  %3071 = vmatmul.f32.gmra.mxu0 %v3070_v5  ;;  %v9055_v22 = vsub.f32 %v2947_v23, %v9046_v59  ;;  %v11231_v35 = vand.u32 4294901760, %v8884_v31  ;;  %v9231_v23 = vsub.f32 %v7038_v60, %v9223_v37 }
 0x3c6   : > { %3983 = vmatpush.msra.mxu2 %v11229_v26  ;;  %3208 = vmatmul.f32.gmra.mxu1 %v9046_v59 }
 0x3c7   : > { %4052 = vmatpush.msra.mxu3 %v8768_v18  ;;  %3297 = vmatmul.f32.gmra.mxu2 %v9055_v22  ;;  %v9062_v52 = vand.u32 4294901760, %v9055_v22 }
 0x3c8   : > { %3987 = vmatpush.msra.mxu2 %v11230_v4 }
 0x3c9   : > { %4054 = vmatpush.msra.mxu3 %v8786_v7  ;;  %v3077_v18 = vsub.f32 %v9055_v22, %v9062_v52  ;;  %v11234_v7 = vand.u32 4294901760, %v8934_v61 }
 0x3ca   : > { %3991 = vmatpush.msra.mxu2 %v11231_v35  ;;  %3378 = vmatmul.f32.gmra.mxu3 %v9062_v52  ;;  %v7034_v35 = vld [vmem:[%s10974_s4 + $0x1d0] sm:$0xff] }
 0x3cb   : > { %4056 = vmatpush.msra.mxu3 %v8798_v28  ;;  %v3078_v49 = vand.u32 4294901760, %v3077_v18 }
 0x3cc   : > { %3995 = vmatpush.msra.mxu2 %v11232_v14  ;;  %v9258_v14 = vand.u32 4294901760, %v7034_v35 }
 0x3cd   : > { %4058 = vmatpush.msra.mxu3 %v8837_v34  ;;  %3079 = vmatmul.f32.gmra.mxu0 %v3078_v49 }
 0x3ce   : > { %3999 = vmatpush.msra.mxu2 %v11233_v21  ;;  %3512 = vmatmul.f32.vlgmr.msra.gmra.mxu1 %v8651_v33 }
 0x3cf   : > { %4060 = vmatpush.msra.mxu3 %v8856_v62  ;;  %3581 = vmatmul.f32.vlgmr.msrb.gmra.mxu2 %v8724_v63  ;;  %v11235_v63 = vld [vmem:[#allocation3_spill] sm:$0xff]  ;;  %v11236_v62 = vld [vmem:[#allocation4_spill] sm:$0xff] }
 0x3d0   : > { %4003 = vmatpush.msra.mxu2 %v11234_v7 }
 0x3d1   : > { %4062 = vmatpush.msra.mxu3 %v8858_v55  ;;  %v11237_v55 = vld [vmem:[#allocation2_spill] sm:$0xff] }
 0x3d2   : > { %3738 = vmatmul.f32.vlgmr.msrb.gmra.mxu3 %v8651_v33  ;;  %4410 = vmatpush.msrb.mxu2 %v9231_v23 }
 0x3d3   : > { %4064 = vmatpush.msra.mxu3 %v8902_v38 }
 0x3d5   : > { %4066 = vmatpush.msra.mxu3 %v8908_v53  ;;  %3447 = vmatmul.f32.vlgmr.msra.gmra.mxu0 %v8651_v33  ;;  %v11238_v53 = vld [vmem:[#allocation20_spill] sm:$0xff] }
 0x3d6   : > { %3516 = vmatmul.f32.gmra.mxu1 %v8722_v44  ;;  %4183 = vmatpush.msra.mxu0 %v9223_v37 }
 0x3d7   : > { %4068 = vmatpush.msra.mxu3 %v8919_v45  ;;  %3589 = vmatmul.f32.gmra.mxu2 %v8793_v50  ;;  %v11239_v45 = vld [vmem:[#allocation14_spill] sm:$0xff] }
 0x3d9   : > { %4498 = vmatpush.msrb.mxu3 %v9223_v37 }
 0x3da   : > { %3742 = vmatmul.f32.gmra.mxu3 %v8722_v44 }
 0x3dd   : > { %3451 = vmatmul.f32.gmra.mxu0 %v8722_v44 }
 0x3de   : > { %3520 = vmatmul.f32.gmra.mxu1 %v8791_v17 }
 0x3df   : > { %3597 = vmatmul.f32.gmra.mxu2 %v8862_v36 }
 0x3e2   : > { %3746 = vmatmul.f32.gmra.mxu3 %v8791_v17 }
 0x3e5   : > { %3455 = vmatmul.f32.gmra.mxu0 %v8791_v17 }
 0x3e6   : > { %3524 = vmatmul.f32.gmra.mxu1 %v8860_v41 }
 0x3e7   : > { %3605 = vmatmul.f32.gmra.mxu2 %v8930_v43 }
 0x3ea   : > { %3750 = vmatmul.f32.gmra.mxu3 %v8860_v41 }
 0x3ed   : > { %3459 = vmatmul.f32.gmra.mxu0 %v8860_v41 }
 0x3ee   : > { %3528 = vmatmul.f32.gmra.mxu1 %v8928_v47 }
 0x3ef   : > { %3613 = vmatmul.f32.gmra.mxu2 %v8981_v2 }
 0x3f2   : > { %3754 = vmatmul.f32.gmra.mxu3 %v8928_v47 }
 0x3f5   : > { %3463 = vmatmul.f32.gmra.mxu0 %v8928_v47 }
 0x3f6   : > { %3532 = vmatmul.f32.gmra.mxu1 %v8979_v40 }
 0x3f7   : > { %3621 = vmatmul.f32.gmra.mxu2 %v9015_v46 }
 0x3fa   : > { %3758 = vmatmul.f32.gmra.mxu3 %v8979_v40 }
 0x3fd   : > { %3467 = vmatmul.f32.gmra.mxu0 %v8979_v40 }
 0x3fe   : > { %3536 = vmatmul.f32.gmra.mxu1 %v9013_v30 }
 0x3ff   : > { %3629 = vmatmul.f32.gmra.mxu2 %v3070_v5  ;;  %v11034_v5 = vand.u32 4294901760, %v9231_v23 }
 0x401   : > { %v4282_v4 = vsub.f32 %v9231_v23, %v11034_v5 }
 0x402   : > { %3762 = vmatmul.f32.gmra.mxu3 %v9013_v30 }
 0x403   : > { %v4283_v18 = vand.u32 4294901760, %v4282_v4  ;;  %v7030_v4 = vld [vmem:[%s10974_s4 + $0x1b0] sm:$0xff] }
 0x405   : > { %3471 = vmatmul.f32.gmra.mxu0 %v9013_v30  ;;  %4284 = vmatpush.msra.mxu1 %v4283_v18  ;;  %v9296_v18 = vand.u32 4294901760, %v7030_v4 }
 0x406   : > { %3540 = vmatmul.f32.gmra.mxu1 %v9046_v59 }
 0x407   : > { %3637 = vmatmul.f32.gmra.mxu2 %v3078_v49  ;;  %v7032_v49 = vld [vmem:[%s10974_s4 + $0x1c0] sm:$0xff] }
 0x408   : > { %v9266_v7 = vand.u32 4294901760, %v7032_v49 }
 0x40a   : > { %3766 = vmatmul.f32.gmra.mxu3 %v9046_v59 }
 0x40b   : > { %v9113_v3 = vpop.f32.mrf.mxu1 }
 0x40d   : > { %3475 = vmatmul.f32.gmra.mxu0 %v9046_v59 }
 0x40e   : > { %3894 = vmatmul.f32.vlgmr.msrb.gmra.mxu1 %v11235_v63  ;;  %v9269_v63 = vsub.f32 %v7034_v35, %v9258_v14 }
 0x40f   : > { %4005 = vmatmul.f32.vlgmr.msra.gmra.mxu2 %v8651_v33 }
 0x412   : > { %4070 = vmatmul.f32.vlgmr.msra.gmra.mxu3 %v8651_v33  ;;  %v9119_v50 = vpop.f32.mrf.mxu0  ;;  %v9123_v36 = vpop.f32.mrf.mxu2 }
 0x413   : > { %v9121_v28 = vpop.f32.mrf.mxu1 }
 0x414   : > { %v9125_v34 = vpop.f32.mrf.mxu3 }
 0x415   : > { %3820 = vmatmul.f32.vlgmr.msrb.gmra.mxu0 %v11236_v62 }
 0x416   : > { %3900 = vmatmul.f32.gmra.mxu1 %v11237_v55  ;;  %v9274_v55 = vsub.f32 %v7032_v49, %v9266_v7  ;;  %v7028_v49 = vld [vmem:[%s10974_s4 + $0x1a0] sm:$0xff] }
 0x417   : > { %4009 = vmatmul.f32.gmra.mxu2 %v8722_v44 }
 0x41a   : > { %4074 = vmatmul.f32.gmra.mxu3 %v8722_v44  ;;  %v9131_v31 = vpop.f32.mrf.mxu0  ;;  %v9135_v33 = vpop.f32.mrf.mxu2 }
 0x41b   : > { %v9133_v43 = vpop.f32.mrf.mxu1 }
 0x41c   : > { %v9137_v38 = vpop.f32.mrf.mxu3 }
 0x41d   : > { %3825 = vmatmul.f32.gmra.mxu0 %v11238_v53 }
 0x41e   : > { %3906 = vmatmul.f32.gmra.mxu1 %v11239_v45 }
 0x41f   : > { %4013 = vmatmul.f32.gmra.mxu2 %v8791_v17 }
 0x422   : > { %4078 = vmatmul.f32.gmra.mxu3 %v8791_v17  ;;  %v9143_v42 = vpop.f32.mrf.mxu0  ;;  %v9147_v44 = vpop.f32.mrf.mxu2 }
 0x423   : > { %v9145_v61 = vpop.f32.mrf.mxu1 }
 0x424   : > { %v9149_v2 = vpop.f32.mrf.mxu3 }
 0x425   : > { %3830 = vmatmul.f32.gmra.mxu0 %v11240_v13  ;;  %v11032_v13 = vand.u32 4294901760, %v9269_v63 }
 0x426   : > { %3912 = vmatmul.f32.gmra.mxu1 %v11241_v25 }
 0x427   : > { %4017 = vmatmul.f32.gmra.mxu2 %v8860_v41  ;;  %v4294_v60 = vsub.f32 %v9269_v63, %v11032_v13  ;;  %v9307_v13 = vsub.f32 %v7030_v4, %v9296_v18 }
 0x429   : > { %v4295_v35 = vand.u32 4294901760, %v4294_v60 }
 0x42a   : > { %4082 = vmatmul.f32.gmra.mxu3 %v8860_v41  ;;  %v9155_v57 = vpop.f32.mrf.mxu0  ;;  %v9159_v17 = vpop.f32.mrf.mxu2 }
 0x42b   : > { %v9157_v24 = vpop.f32.mrf.mxu1 }
 0x42c   : > { %v9161_v0 = vpop.f32.mrf.mxu3 }
 0x42d   : > { %11242 = vst [vmem:[#allocation18_spill] sm:$0xff] %v9161_v0  ;;  %3835 = vmatmul.f32.gmra.mxu0 %v11243_v56 }
 0x42e   : > { %3918 = vmatmul.f32.gmra.mxu1 %v8960_v39 }
 0x42f   : > { %4021 = vmatmul.f32.gmra.mxu2 %v8928_v47 }
 0x432   : > { %4086 = vmatmul.f32.gmra.mxu3 %v8928_v47  ;;  %v9167_v15 = vpop.f32.mrf.mxu0  ;;  %v9171_v41 = vpop.f32.mrf.mxu2 }
 0x433   : > { %v9169_v11 = vpop.f32.mrf.mxu1 }
 0x434   : > { %v9173_v6 = vpop.f32.mrf.mxu3 }
 0x435   : > { %11244 = vst [vmem:[#allocation21_spill] sm:$0xff] %v9173_v6  ;;  %3840 = vmatmul.f32.gmra.mxu0 %v8946_v29 }
 0x436   : > { %3924 = vmatmul.f32.gmra.mxu1 %v8998_v9 }
 0x437   : > { %4025 = vmatmul.f32.gmra.mxu2 %v8979_v40 }
 0x43a   : > { %4090 = vmatmul.f32.gmra.mxu3 %v8979_v40  ;;  %v9179_v39 = vpop.f32.mrf.mxu0  ;;  %v9183_v47 = vpop.f32.mrf.mxu2 }
 0x43b   : > { %v9181_v32 = vpop.f32.mrf.mxu1  ;;  %11246 = vst [vmem:[#allocation32_spill] sm:$0xff] %v9183_v47 }
 0x43c   : > { %11245 = vst [vmem:[#allocation23_spill] sm:$0xff] %v9181_v32 }
 0x43d   : > { %v9185_v54 = vpop.f32.mrf.mxu3  ;;  %3845 = vmatmul.f32.gmra.mxu0 %v8991_v58 }
 0x43e   : > { %11247 = vst [vmem:[#allocation40_spill] sm:$0xff] %v9185_v54  ;;  %3930 = vmatmul.f32.gmra.mxu1 %v9033_v20  ;;  %v7036_v20 = vld [vmem:[%s10974_s4 + $0x1e0] sm:$0xff] }
 0x43f   : > { %4029 = vmatmul.f32.gmra.mxu2 %v9013_v30  ;;  %v9228_v27 = vand.u32 4294901760, %v7036_v20 }
 0x441   : > { %v9236_v8 = vsub.f32 %v7036_v20, %v9228_v27  ;;  %4185 = vmatpush.msra.mxu0 %v9228_v27  ;;  %4500 = vmatpush.msrb.mxu3 %v9228_v27  ;;  %v11035_v20 = vand.u32 4294901760, %v9274_v55 }
 0x442   : > { %4094 = vmatmul.f32.gmra.mxu3 %v9013_v30  ;;  %v9191_v29 = vpop.f32.mrf.mxu0  ;;  %v9195_v40 = vpop.f32.mrf.mxu2 }
 0x443   : > { %v9193_v9 = vpop.f32.mrf.mxu1  ;;  %11249 = vst [vmem:[#allocation27_spill] sm:$0xff] %v9195_v40  ;;  %4413 = vmatpush.msrb.mxu2 %v9236_v8  ;;  %4187 = vmatpush.msra.mxu0 %v9258_v14 }
 0x444   : > { %11248 = vst [vmem:[#allocation25_spill] sm:$0xff] %v9193_v9  ;;  %4502 = vmatpush.msrb.mxu3 %v9258_v14 }
 0x445   : > { %v9197_v46 = vpop.f32.mrf.mxu3  ;;  %3850 = vmatmul.f32.gmra.mxu0 %v9025_v16  ;;  %4416 = vmatpush.msrb.mxu2 %v9269_v63 }
 0x446   : > { %11250 = vst [vmem:[#allocation11_spill] sm:$0xff] %v9197_v46  ;;  %3936 = vmatmul.f32.gmra.mxu1 %v9062_v52  ;;  %v11033_v52 = vand.u32 4294901760, %v9236_v8  ;;  %4189 = vmatpush.msra.mxu0 %v9266_v7 }
 0x447   : > { %4033 = vmatmul.f32.gmra.mxu2 %v9046_v59  ;;  %4504 = vmatpush.msrb.mxu3 %v9266_v7 }
 0x448   : > { %v4288_v21 = vsub.f32 %v9236_v8, %v11033_v52  ;;  %4419 = vmatpush.msrb.mxu2 %v9274_v55  ;;  %4191 = vmatpush.msra.mxu0 %v9296_v18 }
 0x449   : > { %4506 = vmatpush.msrb.mxu3 %v9296_v18 }
 0x44a   : > { %4098 = vmatmul.f32.gmra.mxu3 %v9046_v59  ;;  %v9203_v58 = vpop.f32.mrf.mxu0  ;;  %v9207_v30 = vpop.f32.mrf.mxu2  ;;  %v4289_v62 = vand.u32 4294901760, %v4288_v21  ;;  %v4300_v21 = vsub.f32 %v9274_v55, %v11035_v20  ;;  %4422 = vmatpush.msrb.mxu2 %v9307_v13  ;;  %v11036_v20 = vand.u32 4294901760, %v9307_v13 }
 0x44b   : > { %11251 = vst [vmem:[#allocation35_spill] sm:$0xff] %v9203_v58  ;;  %v9205_v10 = vpop.f32.mrf.mxu1 }
 0x44c   : > { %11252 = vst [vmem:[#allocation9_spill] sm:$0xff] %v9205_v10  ;;  %4290 = vmatpush.msra.mxu1 %v4289_v62  ;;  %v9304_v62 = vand.u32 4294901760, %v7028_v49  ;;  %v4301_v52 = vand.u32 4294901760, %v4300_v21 }
 0x44d   : > { %11253 = vst [vmem:[#allocation8_spill] sm:$0xff] %v9207_v30  ;;  %v9209_v1 = vpop.f32.mrf.mxu3  ;;  %3855 = vmatmul.f32.gmra.mxu0 %v9055_v22  ;;  %v7026_v30 = vld [vmem:[%s10974_s4 + $0x190] sm:$0xff] }
 0x44e   : > { %11254 = vst [vmem:[#allocation15_spill] sm:$0xff] %v9209_v1  ;;  %4296 = vmatpush.msra.mxu1 %v4295_v35  ;;  %v9312_v60 = vsub.f32 %v7028_v49, %v9304_v62  ;;  %4193 = vmatpush.msra.mxu0 %v9304_v62  ;;  %v4306_v49 = vsub.f32 %v9307_v13, %v11036_v20  ;;  %v9334_v46 = vand.u32 4294901760, %v7026_v30 }
 0x44f   : > { %4508 = vmatpush.msrb.mxu3 %v9304_v62 }
 0x450   : > { %4302 = vmatpush.msra.mxu1 %v4301_v52  ;;  %4425 = vmatpush.msrb.mxu2 %v9312_v60  ;;  %v11037_v21 = vand.u32 4294901760, %v9312_v60  ;;  %v4307_v9 = vand.u32 4294901760, %v4306_v49  ;;  %v7024_v52 = vld [vmem:[%s10974_s4 + $0x180] sm:$0xff] }
 0x451   : > { %v9342_v20 = vand.u32 4294901760, %v7024_v52  ;;  %4195 = vmatpush.msra.mxu0 %v9334_v46  ;;  %4510 = vmatpush.msrb.mxu3 %v9334_v46 }
 0x452   : > { %v9212_v19 = vpop.f32.mrf.mxu0  ;;  %v9216_v16 = vpop.f32.mrf.mxu2  ;;  %v4312_v58 = vsub.f32 %v9312_v60, %v11037_v21  ;;  %4308 = vmatpush.msra.mxu1 %v4307_v9 }
 0x453   : > { %11255 = vst [vmem:[#allocation17_spill] sm:$0xff] %v9212_v19  ;;  %v9214_v12 = vpop.f32.mrf.mxu1  ;;  %v9356_v21 = vsub.f32 %v7024_v52, %v9342_v20  ;;  %4197 = vmatpush.msra.mxu0 %v9342_v20  ;;  %4512 = vmatpush.msrb.mxu3 %v9342_v20 }
 0x454   : > { %11256 = vst [vmem:[#allocation19_spill] sm:$0xff] %v9214_v12 }
 0x455   : > { %v9218_v51 = vpop.f32.mrf.mxu3  ;;  %v11039_v40 = vand.u32 4294901760, %v9356_v21 }
 0x45a   : > { %v9238_v48 = vpop.f32.mrf.mxu0  ;;  %v9245_v26 = vpop.f32.mrf.mxu2 }
 0x45b   : > { %11257 = vst [vmem:[#allocation24_spill] sm:$0xff] %v9238_v48  ;;  %v9240_v59 = vpop.f32.mrf.mxu1 }
 0x45c   : > { %11258 = vst [vmem:[#allocation36_spill] sm:$0xff] %v9240_v59 }
 0x45d   : > { %v9248_v22 = vpop.f32.mrf.mxu3 }
 0x462   : > { %v9276_v53 = vpop.f32.mrf.mxu0  ;;  %v9283_v25 = vpop.f32.mrf.mxu2 }
 0x463   : > { %11259 = vst [vmem:[#allocation22_spill] sm:$0xff] %v9276_v53  ;;  %v9278_v45 = vpop.f32.mrf.mxu1 }
 0x464   : > { %11260 = vst [vmem:[#allocation28_spill] sm:$0xff] %v9278_v45 }
 0x465   : > { %v9286_v56 = vpop.f32.mrf.mxu3 }
 0x466   : > { %11261 = vst [vmem:[#allocation33_spill] sm:$0xff] %v9286_v56 }
 0x46a   : > { %v9314_v5 = vpop.f32.mrf.mxu0  ;;  %v9321_v4 = vpop.f32.mrf.mxu2 }
 0x46b   : > { %11262 = vst [vmem:[#allocation30_spill] sm:$0xff] %v9314_v5  ;;  %v9316_v1 = vpop.f32.mrf.mxu1 }
 0x46c   : > { %11263 = vst [vmem:[#allocation37_spill] sm:$0xff] %v9316_v1  ;;  %v9345_v1 = vsub.f32 %v7026_v30, %v9334_v46 }
 0x46d   : > { %11264 = vst [vmem:[#allocation42_spill] sm:$0xff] %v9321_v4  ;;  %v9324_v35 = vpop.f32.mrf.mxu3 }
 0x46e   : > { %11265 = vst [vmem:[#allocation34_spill] sm:$0xff] %v9324_v35  ;;  %v4313_v35 = vand.u32 4294901760, %v4312_v58  ;;  %4428 = vmatpush.msrb.mxu2 %v9345_v1  ;;  %v11038_v59 = vand.u32 4294901760, %v9345_v1  ;;  %v7022_v58 = vld [vmem:[%s10974_s4 + $0x170] sm:$0xff] }
 0x46f   : > { %v9371_v52 = vand.u32 4294901760, %v7022_v58 }
 0x470   : > { %4314 = vmatpush.msra.mxu1 %v4313_v35  ;;  %4431 = vmatpush.msrb.mxu2 %v9356_v21  ;;  %v7020_v35 = vld [vmem:[%s10974_s4 + $0x160] sm:$0xff] }
 0x471   : > { %v9378_v54 = vsub.f32 %v7022_v58, %v9371_v52  ;;  %4199 = vmatpush.msra.mxu0 %v9371_v52  ;;  %4514 = vmatpush.msrb.mxu3 %v9371_v52 }
 0x472   : > { %v9349_v49 = vpop.f32.mrf.mxu0  ;;  %v9359_v9 = vpop.f32.mrf.mxu2 }
 0x473   : > { %11266 = vst [vmem:[#allocation41_spill] sm:$0xff] %v9349_v49  ;;  %v9351_v45 = vpop.f32.mrf.mxu1  ;;  %4434 = vmatpush.msrb.mxu2 %v9378_v54  ;;  %v11040_v58 = vand.u32 4294901760, %v9378_v54 }
 0x474   : > { %11267 = vst [vmem:[#allocation43_spill] sm:$0xff] %v9351_v45  ;;  %v4318_v45 = vsub.f32 %v9345_v1, %v11038_v59  ;;  %v7018_v59 = vld [vmem:[%s10974_s4 + $0x150] sm:$0xff] }
 0x475   : > { %11268 = vst [vmem:[#allocation10_spill] sm:$0xff] %v9359_v9  ;;  %v9365_v30 = vpop.f32.mrf.mxu3  ;;  %v9392_v10 = vand.u32 4294901760, %v7018_v59  ;;  %v4330_v5 = vsub.f32 %v9378_v54, %v11040_v58 }
 0x476   : > { %11269 = vst [vmem:[#allocation26_spill] sm:$0xff] %v9365_v30  ;;  %v4319_v12 = vand.u32 4294901760, %v4318_v45  ;;  %v9382_v30 = vand.u32 4294901760, %v7020_v35  ;;  %v4324_v45 = vsub.f32 %v9356_v21, %v11039_v40 }
 0x477   : > { %11270 = vst [vmem:[#allocation5_spill] sm:$0xff] %v9392_v10  ;;  %v4331_v58 = vand.u32 4294901760, %v4330_v5  ;;  %v7012_v5 = vld [vmem:[%s10974_s4 + $0x120] sm:$0xff] }
 0x478   : > { %4320 = vmatpush.msra.mxu1 %v4319_v12  ;;  %v9395_v9 = vsub.f32 %v7020_v35, %v9382_v30  ;;  %4201 = vmatpush.msra.mxu0 %v9382_v30  ;;  %v7016_v12 = vld [vmem:[%s10974_s4 + $0x140] sm:$0xff]  ;;  %v4325_v4 = vand.u32 4294901760, %v4324_v45  ;;  %v9410_v35 = vsub.f32 %v7018_v59, %v9392_v10  ;;  %v7014_v45 = vld [vmem:[%s10974_s4 + $0x130] sm:$0xff] }
 0x479   : > { %4516 = vmatpush.msrb.mxu3 %v9382_v30  ;;  %v9412_v53 = vand.u32 4294901760, %v7016_v12  ;;  %v9434_v32 = vand.u32 4294901760, %v7014_v45 }
 0x47a   : > { %v9402_v49 = vpop.f32.mrf.mxu0  ;;  %v9414_v48 = vpop.f32.mrf.mxu2  ;;  %4437 = vmatpush.msrb.mxu2 %v9395_v9  ;;  %v11041_v19 = vand.u32 4294901760, %v9395_v9  ;;  %4203 = vmatpush.msra.mxu0 %v9392_v10  ;;  %v11043_v59 = vand.u32 4294901760, %v9410_v35 }
 0x47b   : > { %11271 = vst [vmem:[#allocation7_spill] sm:$0xff] %v9402_v49  ;;  %v9404_v40 = vpop.f32.mrf.mxu1  ;;  %4326 = vmatpush.msra.mxu1 %v4325_v4  ;;  %4518 = vmatpush.msrb.mxu3 %v9392_v10  ;;  %v9427_v49 = vsub.f32 %v7016_v12, %v9412_v53  ;;  %v9448_v10 = vsub.f32 %v7014_v45, %v9434_v32 }
 0x47c   : > { %11272 = vst [vmem:[#allocation38_spill] sm:$0xff] %v9404_v40  ;;  %4440 = vmatpush.msrb.mxu2 %v9410_v35  ;;  %4205 = vmatpush.msra.mxu0 %v9412_v53  ;;  %v4342_v4 = vsub.f32 %v9410_v35, %v11043_v59 }
 0x47d   : > { %11273 = vst [vmem:[#allocation12_spill] sm:$0xff] %v9412_v53  ;;  %v9422_v40 = vpop.f32.mrf.mxu3  ;;  %4332 = vmatpush.msra.mxu1 %v4331_v58  ;;  %4520 = vmatpush.msrb.mxu3 %v9412_v53  ;;  %v11045_v12 = vand.u32 4294901760, %v9427_v49  ;;  %v7010_v58 = vld [vmem:[%s10974_s4 + $0x110] sm:$0xff]  ;;  %v11284_v0 = vand.u32 4294901760, %v9448_v10 }
 0x47e   : > { %11274 = vst [vmem:[#allocation31_spill] sm:$0xff] %v9414_v48  ;;  %v4336_v48 = vsub.f32 %v9395_v9, %v11041_v19  ;;  %v9444_v19 = vand.u32 4294901760, %v7012_v5  ;;  %4443 = vmatpush.msrb.mxu2 %v9427_v49  ;;  %4207 = vmatpush.msra.mxu0 %v9434_v32  ;;  %v4343_v47 = vand.u32 4294901760, %v4342_v4  ;;  %v9461_v53 = vand.u32 4294901760, %v7010_v58  ;;  %v7008_v4 = vld [vmem:[%s10974_s4 + $0x100] sm:$0xff] }
 0x47f   : > { %11275 = vst [vmem:[#allocation13_spill] sm:$0xff] %v9422_v40  ;;  %v4348_v59 = vsub.f32 %v9427_v49, %v11045_v12  ;;  %4522 = vmatpush.msrb.mxu3 %v9434_v32 }
 0x480   : > { %11276 = vst [vmem:[#allocation39_spill] sm:$0xff] %v9434_v32  ;;  %v4337_v40 = vand.u32 4294901760, %v4336_v48  ;;  %v9459_v48 = vsub.f32 %v7012_v5, %v9444_v19  ;;  %4446 = vmatpush.msrb.mxu2 %v9448_v10  ;;  %4209 = vmatpush.msra.mxu0 %v9444_v19  ;;  %v9478_v5 = vand.u32 4294901760, %v7008_v4 }
 0x481   : > { %11277 = vst [vmem:[#allocation3_spill] sm:$0xff] %v9444_v19  ;;  %v4349_v12 = vand.u32 4294901760, %v4348_v59  ;;  %4524 = vmatpush.msrb.mxu3 %v9444_v19 }
 0x482   : > { %11278 = vst [vmem:[#allocation4_spill] sm:$0xff] %v9461_v53  ;;  %4338 = vmatpush.msra.mxu1 %v4337_v40  ;;  %v9468_v56 = vpop.f32.mrf.mxu0  ;;  %v11048_v32 = vand.u32 4294901760, %v9459_v48  ;;  %v9476_v40 = vsub.f32 %v7010_v58, %v9461_v53  ;;  %v9480_v45 = vpop.f32.mrf.mxu2  ;;  %4449 = vmatpush.msrb.mxu2 %v9459_v48  ;;  %v9493_v19 = vsub.f32 %v7008_v4, %v9478_v5  ;;  %v11286_v4 = vand.u32 4294901760, %v9231_v23 }
 0x483   : > { %11279 = vst [vmem:[#allocation2_spill] sm:$0xff] %v9468_v56  ;;  %v9470_v6 = vpop.f32.mrf.mxu1  ;;  %v4354_v56 = vsub.f32 %v9448_v10, %v11284_v0  ;;  %4211 = vmatpush.msra.mxu0 %v9461_v53  ;;  %4526 = vmatpush.msrb.mxu3 %v9461_v53  ;;  %v11287_v53 = vand.u32 4294901760, %v9236_v8  ;;  %v11290_v8 = vand.u32 4294901760, %v9307_v13 }
 0x484   : > { %11280 = vst [vmem:[#allocation20_spill] sm:$0xff] %v9470_v6  ;;  %4344 = vmatpush.msra.mxu1 %v4343_v47  ;;  %v4360_v6 = vsub.f32 %v9459_v48, %v11048_v32  ;;  %v11049_v58 = vand.u32 4294901760, %v9476_v40  ;;  %4452 = vmatpush.msrb.mxu2 %v9476_v40  ;;  %v11053_v32 = vand.u32 4294901760, %v9493_v19 }
 0x485   : > { %11281 = vst [vmem:[#allocation14_spill] sm:$0xff] %v9476_v40  ;;  %v9486_v59 = vpop.f32.mrf.mxu3  ;;  %v4355_v47 = vand.u32 4294901760, %v4354_v56  ;;  %4528 = vmatpush.msrb.mxu3 %v9478_v5  ;;  %4213 = vmatpush.msra.mxu0 %v9478_v5  ;;  %v2980_v56 = vld [vmem:[%s10975_s5] sm:$0x3] }
 0x486   : > { %11282 = vst [vmem:[#allocation6_spill] sm:$0xff] %v9478_v5  ;;  %4350 = vmatpush.msra.mxu1 %v4349_v12  ;;  %v4361_v0 = vand.u32 4294901760, %v4360_v6  ;;  %4455 = vmatpush.msrb.mxu2 %v9493_v19  ;;  %v4372_v6 = vsub.f32 %v9493_v19, %v11053_v32  ;;  %v11288_v32 = vand.u32 4294901760, %v9269_v63 }
 0x487   : > { %11283 = vst [vmem:[#allocation16_spill] sm:$0xff] %v9480_v45  ;;  %4581 = vmatpush.msrb.mxu0 %v11286_v4 }
 0x488   : > { %11285 = vst [vmem:[#allocation29_spill] sm:$0xff] %v9486_v59  ;;  %v4366_v59 = vsub.f32 %v9476_v40, %v11049_v58  ;;  %4356 = vmatpush.msra.mxu1 %v4355_v47  ;;  %v9513_v58 = vperm.slane %v2980_v56, 1  ;;  %v4373_v5 = vand.u32 4294901760, %v4372_v6  ;;  %v9530_v6 = vperm.slane %v2980_v56, 0 }
 0x489   : > { %4585 = vmatpush.msrb.mxu0 %v11287_v53 }
 0x48a   : > { %v4367_v12 = vand.u32 4294901760, %v4366_v59  ;;  %4362 = vmatpush.msra.mxu1 %v4361_v0  ;;  %v9515_v45 = vpop.f32.mrf.mxu0  ;;  %v9519_v40 = vpop.f32.mrf.mxu2  ;;  %v3583_v23 = vadd.f32 %v9216_v16, %v9513_v58  ;;  %v11289_v0 = vand.u32 4294901760, %v9274_v55  ;;  %v11291_v16 = vand.u32 4294901760, %v9312_v60 }
 0x48b   : > { %v3895_v47 = vpop.f32.mrf.mxu1  ;;  %4589 = vmatpush.msrb.mxu0 %v11288_v32  ;;  %v3041_v13 = vadd.f32 %v9143_v42, %v9530_v6  ;;  %v3591_v60 = vadd.f32 %v9245_v26, %v9513_v58 }
 0x48c   : > { %4368 = vmatpush.msra.mxu1 %v4367_v12  ;;  %v3740_v53 = vadd.f32 %v9218_v51, %v3583_v23  ;;  %v3049_v51 = vadd.f32 %v9155_v57, %v9530_v6 }
 0x48d   : > { %v9521_v59 = vpop.f32.mrf.mxu3  ;;  %4593 = vmatpush.msrb.mxu0 %v11289_v0 }
 0x48e   : > { %4374 = vmatpush.msra.mxu1 %v4373_v5  ;;  %v3194_v4 = vadd.f32 %v9145_v61, %v3049_v51 }
 0x48f   : > { %4597 = vmatpush.msrb.mxu0 %v11290_v8 }
 0x490   : > { %4676 = vmatpush.msrb.mxu1 %v9223_v37  ;;  %v3025_v37 = vadd.f32 %v9119_v50, %v9530_v6  ;;  %v3057_v50 = vadd.f32 %v9167_v15, %v9530_v6  ;;  %v11294_v15 = vand.u32 4294901760, %v9378_v54  ;;  %v3279_v0 = vadd.f32 %v9159_v17, %v3194_v4  ;;  %v11310_v4 = vld [vmem:[#allocation42_spill] sm:$0xff] }
 0x491   : > { %4601 = vmatpush.msrb.mxu0 %v11291_v16 }
 0x492   : > { %4678 = vmatpush.msrb.mxu1 %v9228_v27  ;;  %v3821_v63 = vpop.f32.mrf.mxu0  ;;  %v4006_v5 = vpop.f32.mrf.mxu2  ;;  %v3033_v27 = vadd.f32 %v9131_v31, %v9530_v6  ;;  %v11293_v31 = vand.u32 4294901760, %v9356_v21  ;;  %v3182_v42 = vadd.f32 %v9113_v3, %v3025_v37  ;;  %v3198_v26 = vadd.f32 %v9157_v24, %v3057_v50  ;;  %v11302_v37 = vld [vmem:[#allocation32_spill] sm:$0xff] }
 0x493   : > { %v3901_v32 = vpop.f32.mrf.mxu1  ;;  %v3822_v55 = vadd.f32 %v3821_v63, %v3740_v53  ;;  %v3065_v3 = vadd.f32 %v9179_v39, %v9530_v6  ;;  %v11296_v39 = vand.u32 4294901760, %v9410_v35 }
 0x494   : > { %4680 = vmatpush.msrb.mxu1 %v9258_v14  ;;  %v11292_v14 = vand.u32 4294901760, %v9345_v1  ;;  %v3190_v1 = vadd.f32 %v9133_v43, %v3041_v13  ;;  %v3264_v43 = vadd.f32 %v9123_v36, %v3182_v42  ;;  %v3599_v36 = vadd.f32 %v9283_v25, %v9513_v58  ;;  %v11308_v42 = vld [vmem:[#allocation22_spill] sm:$0xff] }
 0x495   : > { %v4071_v56 = vpop.f32.mrf.mxu3  ;;  %v3896_v12 = vadd.f32 %v3895_v47, %v3822_v55  ;;  %v3202_v53 = vadd.f32 %v9169_v11, %v3065_v3  ;;  %v11298_v25 = vand.u32 4294901760, %v9448_v10  ;;  %v11299_v11 = vld [vmem:[#allocation18_spill] sm:$0xff]  ;;  %v11305_v10 = vld [vmem:[#allocation5_spill] sm:$0xff] }
 0x496   : > { %4682 = vmatpush.msrb.mxu1 %v9266_v7  ;;  %4605 = vmatpush.msrb.mxu0 %v11292_v14  ;;  %v3186_v7 = vadd.f32 %v9121_v28, %v3033_v27  ;;  %v11295_v28 = vand.u32 4294901760, %v9395_v9  ;;  %v3356_v63 = vadd.f32 %v11299_v11, %v3279_v0  ;;  %v11304_v27 = vld [vmem:[#allocation17_spill] sm:$0xff]  ;;  %v11312_v3 = vld [vmem:[#allocation14_spill] sm:$0xff] }
 0x497   : > { %v4007_v57 = vadd.f32 %v4006_v5, %v3896_v12  ;;  %v3289_v55 = vadd.f32 %v11302_v37, %v3202_v53  ;;  %v11303_v5 = vld [vmem:[#allocation23_spill] sm:$0xff]  ;;  %v11324_v11 = vld [vmem:[#allocation34_spill] sm:$0xff] }
 0x498   : > { %4684 = vmatpush.msrb.mxu1 %v9296_v18  ;;  %4609 = vmatpush.msrb.mxu0 %v11293_v31  ;;  %v3744_v18 = vadd.f32 %v9248_v22, %v3591_v60  ;;  %v3269_v24 = vadd.f32 %v9135_v33, %v3186_v7  ;;  %v3274_v22 = vadd.f32 %v9147_v44, %v3190_v1  ;;  %v11297_v44 = vand.u32 4294901760, %v9427_v49  ;;  %v11309_v7 = vld [vmem:[#allocation30_spill] sm:$0xff]  ;;  %v11320_v53 = vld [vmem:[#allocation27_spill] sm:$0xff] }
 0x499   : > { %v4072_v21 = vadd.f32 %v4071_v56, %v4007_v57  ;;  %v3073_v33 = vadd.f32 %v9191_v29, %v9530_v6  ;;  %v11300_v29 = vld [vmem:[#allocation21_spill] sm:$0xff]  ;;  %v11307_v56 = vld [vmem:[#allocation24_spill] sm:$0xff]  ;;  %v3461_v1 = vadd.f32 %v11309_v7, %v3356_v63  ;;  %v11328_v37 = vld [vmem:[#allocation31_spill] sm:$0xff] }
 0x49a   : > { %4686 = vmatpush.msrb.mxu1 %v9304_v62  ;;  %4613 = vmatpush.msrb.mxu0 %v11294_v15  ;;  %v3826_v47 = vpop.f32.mrf.mxu0  ;;  %v4010_v62 = vpop.f32.mrf.mxu2  ;;  %v3350_v35 = vadd.f32 %v9149_v2, %v3274_v22  ;;  %v7039_v2 = vld [vmem:[%s10974_s4 + $0x1f8] sm:$0xff]  ;;  %v3607_v15 = vadd.f32 %v11310_v4, %v9513_v58 }
 0x49b   : > { %v3907_v23 = vpop.f32.mrf.mxu1  ;;  %v4102_v61 = vmul.f32 0.5, %v4072_v21  ;;  %v3827_v54 = vadd.f32 %v3826_v47, %v3744_v18  ;;  %v9606_v31 = vand.u32 4294901760, %v7039_v2  ;;  %v11313_v47 = vand.u32 4294901760, %v11312_v3 }
 0x49c   : > { %4688 = vmatpush.msrb.mxu1 %v9334_v46  ;;  %4617 = vmatpush.msrb.mxu0 %v11295_v28  ;;  %v3284_v46 = vadd.f32 %v9171_v41, %v3198_v26  ;;  %v3344_v41 = vadd.f32 %v9137_v38, %v3269_v24  ;;  %v3457_v57 = vadd.f32 %v11308_v42, %v3350_v35  ;;  %v11314_v28 = vld [vmem:[#allocation41_spill] sm:$0xff]  ;;  %v11323_v35 = vld [vmem:[#allocation28_spill] sm:$0xff] }
 0x49d   : > { %v4075_v8 = vpop.f32.mrf.mxu3  ;;  %7085 = vtanh.f32 %v4102_v61  ;;  %v3902_v9 = vadd.f32 %v3901_v32, %v3827_v54  ;;  %v11315_v61 = vld [vmem:[#allocation10_spill] sm:$0xff]  ;;  %4741 = vmatpush.msra.mxu2 %v9606_v31  ;;  %v11316_v24 = vld [vmem:[#allocation9_spill] sm:$0xff]  ;;  %v3752_v63 = vadd.f32 %v11324_v11, %v3607_v15 }
 0x49e   : > { %4690 = vmatpush.msrb.mxu1 %v9342_v20  ;;  %4621 = vmatpush.msrb.mxu0 %v11296_v39  ;;  %v3338_v20 = vadd.f32 %v9125_v34, %v3264_v43  ;;  %v3362_v32 = vadd.f32 %v11300_v29, %v3284_v46  ;;  %v3206_v34 = vadd.f32 %v11303_v5, %v3073_v33  ;;  %v11317_v39 = vld [vmem:[#allocation39_spill] sm:$0xff]  ;;  %v11318_v46 = vand.u32 4294901760, %v9493_v19  ;;  %v11326_v19 = vld [vmem:[#allocation37_spill] sm:$0xff] }
 0x49f   : > { %v4011_v17 = vadd.f32 %v4010_v62, %v3902_v9  ;;  %v3453_v14 = vadd.f32 %v11307_v56, %v3344_v41  ;;  %v3615_v54 = vadd.f32 %v11315_v61, %v9513_v58  ;;  %v11330_v56 = vld [vmem:[#allocation4_spill] sm:$0xff]  ;;  %v11334_v61 = vld [vmem:[#allocation6_spill] sm:$0xff] }
 0x4a0   : > { %4692 = vmatpush.msrb.mxu1 %v9371_v52  ;;  %4625 = vmatpush.msrb.mxu0 %v11297_v44  ;;  %v11301_v52 = vld [vmem:[#allocation33_spill] sm:$0xff]  ;;  %v3449_v38 = vadd.f32 %v11304_v27, %v3338_v20  ;;  %v3465_v43 = vadd.f32 %v11314_v28, %v3362_v32  ;;  %v9628_v33 = vadd.f32 %v11320_v53, %v3206_v34  ;;  %v11321_v44 = vld [vmem:[#allocation19_spill] sm:$0xff]  ;;  %v11322_v20 = vld [vmem:[#allocation36_spill] sm:$0xff] }
 0x4a1   : > { %v3748_v16 = vadd.f32 %v11301_v52, %v3599_v36  ;;  %v4076_v49 = vadd.f32 %v4075_v8, %v4011_v17  ;;  %v9621_v8 = vsub.f32 %v7039_v2, %v9606_v31  ;;  %v11319_v36 = vld [vmem:[#allocation40_spill] sm:$0xff]  ;;  %v9632_v41 = vadd.f32 %v11322_v20, %v3457_v57  ;;  %v11325_v32 = vld [vmem:[#allocation3_spill] sm:$0xff] }
 0x4a2   : > { %4694 = vmatpush.msrb.mxu1 %v9382_v30  ;;  %4629 = vmatpush.msrb.mxu0 %v11298_v25  ;;  %v3831_v13 = vpop.f32.mrf.mxu0  ;;  %v11306_v30 = vand.u32 4294901760, %v9459_v48  ;;  %v4014_v12 = vpop.f32.mrf.mxu2  ;;  %v11311_v48 = vld [vmem:[#allocation12_spill] sm:$0xff]  ;;  %v3514_v22 = vadd.f32 %v11316_v24, %v3449_v38  ;;  %v3368_v9 = vadd.f32 %v11319_v36, %v3289_v55  ;;  %v9635_v25 = vadd.f32 %v11323_v35, %v3461_v1  ;;  %v7037_v34 = vld [vmem:[%s10974_s4 + $0x1e8] sm:$0xff]  ;;  %v7031_v36 = vld [vmem:[%s10974_s4 + $0x1b8] sm:$0xff] }
 0x4a3   : > { %v7086_v51 = vpop.eup %7085  ;;  %v4103_v50 = vmul.f32 0.5, %v4076_v49  ;;  %v3832_v60 = vadd.f32 %v3831_v13, %v3748_v16  ;;  %v3913_v18 = vpop.f32.mrf.mxu1  ;;  %v9640_v52 = vadd.f32 %v11326_v19, %v3465_v43  ;;  %v11327_v16 = vld [vmem:[#allocation26_spill] sm:$0xff]  ;;  %v3623_v55 = vadd.f32 %v11328_v37, %v9513_v58  ;;  %v11329_v27 = vld [vmem:[#allocation7_spill] sm:$0xff] }
 0x4a4   : > { %4696 = vmatpush.msrb.mxu1 %v11305_v10  ;;  %4633 = vmatpush.msrb.mxu0 %v11306_v30  ;;  %v4118_v26 = vadd.f32 1.0, %v7086_v51  ;;  %v9643_v49 = vadd.f32 %v11327_v16, %v3615_v54  ;;  %v9651_v38 = vadd.f32 %v11329_v27, %v3368_v9  ;;  %v11064_v10 = vand.u32 4294901760, %v9621_v8  ;;  %v7035_v51 = vld [vmem:[%s10974_s4 + $0x1d8] sm:$0xff]  ;;  %v7033_v43 = vld [vmem:[%s10974_s4 + $0x1c8] sm:$0xff] }
 0x4a5   : > { %v4079_v21 = vpop.f32.mrf.mxu3  ;;  %7087 = vtanh.f32 %v4103_v50  ;;  %v3908_v62 = vadd.f32 %v3907_v23, %v3832_v60  ;;  %v3518_v23 = vadd.f32 %v11321_v44, %v3453_v14  ;;  %v9656_v30 = vand.u32 4294901760, %v7037_v34  ;;  %v11331_v50 = vld [vmem:[#allocation16_spill] sm:$0xff] }
 0x4a6   : > { %4698 = vmatpush.msrb.mxu1 %v11311_v48  ;;  %4637 = vmatpush.msrb.mxu0 %v11313_v47  ;;  %v4126_v0 = vmul.f32 0.5, %v4118_v26  ;;  %v3631_v60 = vadd.f32 %v11331_v50, %v9513_v58  ;;  %v9664_v7 = vand.u32 4294901760, %v7035_v51  ;;  %v4840_v26 = vsub.f32 %v9621_v8, %v11064_v10  ;;  %v11333_v48 = vld [vmem:[#allocation13_spill] sm:$0xff] }
 0x4a7   : > { %v4015_v17 = vadd.f32 %v4014_v12, %v3908_v62  ;;  %4743 = vmatpush.msra.mxu2 %v9656_v30  ;;  %v9678_v3 = vadd.f32 %v11333_v48, %v3623_v55  ;;  %v3639_v47 = vadd.f32 %v9519_v40, %v9513_v58  ;;  %v11336_v40 = vld [vmem:[#allocation29_spill] sm:$0xff] }
 0x4a8   : > { %4700 = vmatpush.msrb.mxu1 %v11317_v39  ;;  %4641 = vmatpush.msrb.mxu0 %v11318_v46  ;;  %v4134_v29 = vmul.f32 %v4126_v0, %v3514_v22  ;;  %v4841_v22 = vand.u32 4294901760, %v4840_v26  ;;  %v9693_v58 = vadd.f32 %v11336_v40, %v3631_v60  ;;  %v9697_v39 = vsub.f32 %v7035_v51, %v9664_v7  ;;  %v7027_v60 = vld [vmem:[%s10974_s4 + $0x198] sm:$0xff] }
 0x4a9   : > { %v4080_v5 = vadd.f32 %v4079_v21, %v4015_v17  ;;  %v9675_v21 = vsub.f32 %v7037_v34, %v9656_v30  ;;  %4745 = vmatpush.msra.mxu2 %v9664_v7  ;;  %v9699_v46 = vand.u32 4294901760, %v7033_v43  ;;  %v9710_v17 = vand.u32 4294901760, %v7031_v36 }
 0x4aa   : > { %4702 = vmatpush.msrb.mxu1 %v11325_v32  ;;  %v9653_v13 = vand.u32 4294901760, %v4134_v29  ;;  %v3836_v2 = vpop.f32.mrf.mxu0  ;;  %v4018_v57 = vpop.f32.mrf.mxu2  ;;  %v9714_v20 = vadd.f32 %v9521_v59, %v3639_v47  ;;  %4842 = vmatpush.msra.mxu3 %v4841_v22 }
 0x4ab   : > { %v7088_v14 = vpop.eup %7087  ;;  %v4104_v12 = vmul.f32 0.5, %v4080_v5  ;;  %v3837_v42 = vadd.f32 %v3836_v2, %v3752_v63  ;;  %v3919_v62 = vpop.f32.mrf.mxu1  ;;  %v11063_v0 = vand.u32 4294901760, %v9675_v21  ;;  %4747 = vmatpush.msra.mxu2 %v9699_v46  ;;  %v9719_v11 = vsub.f32 %v7033_v43, %v9699_v46  ;;  %v7029_v63 = vld [vmem:[%s10974_s4 + $0x1a8] sm:$0xff] }
 0x4ac   : > { %4704 = vmatpush.msrb.mxu1 %v11330_v56  ;;  %v9667_v1 = vsub.f32 %v4134_v29, %v9653_v13  ;;  %v4119_v4 = vadd.f32 1.0, %v7088_v14  ;;  %v9729_v16 = vsub.f32 %v7031_v36, %v9710_v17  ;;  %v9744_v50 = vand.u32 4294901760, %v7029_v63 }
 0x4ad   : > { %v4083_v15 = vpop.f32.mrf.mxu3  ;;  %4376 = vmatmul.f32.vlgmr.msra.gmra.mxu1 %v9653_v13  ;;  %7089 = vtanh.f32 %v4104_v12  ;;  %v3914_v28 = vadd.f32 %v3913_v18, %v3837_v42  ;;  %v4846_v44 = vsub.f32 %v9675_v21, %v11063_v0  ;;  %v11060_v2 = vand.u32 4294901760, %v9719_v11  ;;  %4749 = vmatpush.msra.mxu2 %v9710_v17 }
 0x4ae   : > { %11332 = vst [vmem:[#allocation18_spill] sm:$0xff] %v9667_v1  ;;  %4706 = vmatpush.msrb.mxu1 %v11334_v61  ;;  %v4127_v54 = vmul.f32 0.5, %v4119_v4  ;;  %4458 = vmatmul.f32.vlgmr.msrb.gmra.mxu2 %v9667_v1  ;;  %v9688_v24 = vand.u32 4294901760, %v9667_v1  ;;  %v7025_v4 = vld [vmem:[%s10974_s4 + $0x188] sm:$0xff]  ;;  %v9764_v47 = vsub.f32 %v7029_v63, %v9744_v50  ;;  %v9768_v61 = vand.u32 4294901760, %v7027_v60 }
 0x4af   : > { %v4019_v18 = vadd.f32 %v4018_v57, %v3914_v28  ;;  %v4847_v59 = vand.u32 4294901760, %v4846_v44  ;;  %v4858_v57 = vsub.f32 %v9719_v11, %v11060_v2  ;;  %4751 = vmatpush.msra.mxu2 %v9744_v50  ;;  %v7021_v63 = vld [vmem:[%s10974_s4 + $0x168] sm:$0xff] }
 0x4b0   : > { %11335 = vst [vmem:[#allocation21_spill] sm:$0xff] %v9688_v24  ;;  %5056 = vmatpush.msra.mxu1 %v9606_v31  ;;  %v4135_v9 = vmul.f32 %v4127_v54, %v3518_v23  ;;  %4532 = vmatmul.f32.vlgmr.msrb.gmra.mxu3 %v9688_v24  ;;  %v4217_v53 = vsub.f32 %v9667_v1, %v9688_v24  ;;  %v11061_v23 = vand.u32 4294901760, %v9697_v39  ;;  %v9770_v54 = vand.u32 4294901760, %v7025_v4 }
 0x4b1   : > { %v4084_v35 = vadd.f32 %v4083_v15, %v4019_v18  ;;  %4848 = vmatpush.msra.mxu3 %v4847_v59  ;;  %v4859_v43 = vand.u32 4294901760, %v4858_v57  ;;  %4753 = vmatpush.msra.mxu2 %v9768_v61  ;;  %v9783_v44 = vsub.f32 %v7027_v60, %v9768_v61 }
 0x4b2   : > { %5058 = vmatpush.msra.mxu1 %v9656_v30  ;;  %v9724_v29 = vand.u32 4294901760, %v4135_v9  ;;  %v3841_v32 = vpop.f32.mrf.mxu0  ;;  %v9726_v19 = vand.u32 4294901760, %v4217_v53  ;;  %v4022_v34 = vpop.f32.mrf.mxu2  ;;  %v4852_v27 = vsub.f32 %v9697_v39, %v11061_v23 }
 0x4b3   : > { %v7090_v37 = vpop.eup %7089  ;;  %v4105_v55 = vmul.f32 0.5, %v4084_v35  ;;  %v3842_v5 = vadd.f32 %v3841_v32, %v9643_v49  ;;  %v11058_v49 = vand.u32 4294901760, %v9729_v16  ;;  %v3925_v40 = vpop.f32.mrf.mxu1  ;;  %v11055_v60 = vand.u32 4294901760, %v9783_v44  ;;  %4755 = vmatpush.msra.mxu2 %v9770_v54 }
 0x4b4   : > { %5060 = vmatpush.msra.mxu1 %v9664_v7  ;;  %v4120_v51 = vadd.f32 1.0, %v7090_v37  ;;  %4219 = vmatmul.f32.vlgmr.msra.gmra.mxu0 %v9726_v19  ;;  %v9741_v14 = vsub.f32 %v4135_v9, %v9724_v29  ;;  %v4853_v42 = vand.u32 4294901760, %v4852_v27  ;;  %v11057_v9 = vand.u32 4294901760, %v9764_v47 }
 0x4b5   : > { %v4087_v56 = vpop.f32.mrf.mxu3  ;;  %4380 = vmatmul.f32.gmra.mxu1 %v9724_v29  ;;  %7091 = vtanh.f32 %v4105_v55  ;;  %v3920_v12 = vadd.f32 %v3919_v62, %v3842_v5  ;;  %4968 = vmatpush.msra.mxu0 %v9621_v8  ;;  %v4864_v48 = vsub.f32 %v9729_v16, %v11058_v49  ;;  %v7023_v62 = vld [vmem:[%s10974_s4 + $0x178] sm:$0xff]  ;;  %v9800_v5 = vand.u32 4294901760, %v7021_v63 }
 0x4b6   : > { %11337 = vst [vmem:[#allocation33_spill] sm:$0xff] %v9741_v14  ;;  %v4128_v15 = vmul.f32 0.5, %v4120_v51  ;;  %4463 = vmatmul.f32.gmra.mxu2 %v9741_v14  ;;  %v9758_v26 = vand.u32 4294901760, %v9741_v14  ;;  %5062 = vmatpush.msra.mxu1 %v9699_v46  ;;  %v9788_v35 = vand.u32 4294901760, %v7023_v62  ;;  %v4870_v55 = vsub.f32 %v9764_v47, %v11057_v9 }
 0x4b7   : > { %v4023_v28 = vadd.f32 %v4022_v34, %v3920_v12  ;;  %4854 = vmatpush.msra.mxu3 %v4853_v42  ;;  %v4865_v36 = vand.u32 4294901760, %v4864_v48  ;;  %4971 = vmatpush.msra.mxu0 %v9675_v21  ;;  %v7019_v48 = vld [vmem:[%s10974_s4 + $0x158] sm:$0xff] }
 0x4b8   : > { %11338 = vst [vmem:[#allocation32_spill] sm:$0xff] %v9758_v26  ;;  %v4136_v22 = vmul.f32 %v4128_v15, %v9632_v41  ;;  %4538 = vmatmul.f32.gmra.mxu3 %v9758_v26  ;;  %v4225_v18 = vsub.f32 %v9741_v14, %v9758_v26  ;;  %v9786_v41 = vsub.f32 %v7025_v4, %v9770_v54  ;;  %v4871_v15 = vand.u32 4294901760, %v4870_v55 }
 0x4b9   : > { %v4088_v53 = vadd.f32 %v4087_v56, %v4023_v28  ;;  %4860 = vmatpush.msra.mxu3 %v4859_v43  ;;  %4974 = vmatpush.msra.mxu0 %v9697_v39  ;;  %v4876_v43 = vsub.f32 %v9783_v44, %v11055_v60 }
 0x4ba   : > { %v9793_v32 = vand.u32 4294901760, %v4136_v22  ;;  %v3846_v59 = vpop.f32.mrf.mxu0  ;;  %v9795_v37 = vand.u32 4294901760, %v4225_v18  ;;  %5064 = vmatpush.msra.mxu1 %v9710_v17  ;;  %v4026_v56 = vpop.f32.mrf.mxu2  ;;  %v11054_v12 = vand.u32 4294901760, %v9786_v41  ;;  %4757 = vmatpush.msra.mxu2 %v9788_v35 }
 0x4bb   : > { %v7092_v34 = vpop.eup %7091  ;;  %v4106_v27 = vmul.f32 0.5, %v4088_v53  ;;  %v3847_v51 = vadd.f32 %v3846_v59, %v9678_v3  ;;  %4866 = vmatpush.msra.mxu3 %v4865_v36  ;;  %v9814_v3 = vsub.f32 %v7023_v62, %v9788_v35  ;;  %4977 = vmatpush.msra.mxu0 %v9719_v11  ;;  %v9833_v36 = vsub.f32 %v7021_v63, %v9800_v5  ;;  %v7017_v53 = vld [vmem:[%s10974_s4 + $0x148] sm:$0xff] }
 0x4bc   : > { %v4121_v42 = vadd.f32 1.0, %v7092_v34  ;;  %4227 = vmatmul.f32.gmra.mxu0 %v9795_v37  ;;  %v9811_v4 = vsub.f32 %v4136_v22, %v9793_v32  ;;  %v4882_v18 = vsub.f32 %v9786_v41, %v11054_v12  ;;  %v4877_v55 = vand.u32 4294901760, %v4876_v43  ;;  %4759 = vmatpush.msra.mxu2 %v9800_v5  ;;  %v3931_v12 = vpop.f32.mrf.mxu1 }
 0x4bd   : > { %v4091_v57 = vpop.f32.mrf.mxu3  ;;  %4384 = vmatmul.f32.gmra.mxu1 %v9793_v32  ;;  %7093 = vtanh.f32 %v4106_v27  ;;  %v3926_v28 = vadd.f32 %v3925_v40, %v3847_v51  ;;  %4872 = vmatpush.msra.mxu3 %v4871_v15  ;;  %v11056_v40 = vand.u32 4294901760, %v9814_v3  ;;  %v9839_v27 = vand.u32 4294901760, %v7019_v48  ;;  %v7015_v51 = vld [vmem:[%s10974_s4 + $0x138] sm:$0xff] }
 0x4be   : > { %11339 = vst [vmem:[#allocation23_spill] sm:$0xff] %v9811_v4  ;;  %v4129_v62 = vmul.f32 0.5, %v4121_v42  ;;  %4468 = vmatmul.f32.gmra.mxu2 %v9811_v4  ;;  %v9829_v22 = vand.u32 4294901760, %v9811_v4  ;;  %v4883_v34 = vand.u32 4294901760, %v4882_v18  ;;  %4980 = vmatpush.msra.mxu0 %v9729_v16  ;;  %v11059_v15 = vand.u32 4294901760, %v9833_v36 }
 0x4bf   : > { %v4027_v59 = vadd.f32 %v4026_v56, %v3926_v28  ;;  %v4888_v56 = vsub.f32 %v9814_v3, %v11056_v40  ;;  %5066 = vmatpush.msra.mxu1 %v9744_v50  ;;  %4878 = vmatpush.msra.mxu3 %v4877_v55  ;;  %v9856_v43 = vsub.f32 %v7019_v48, %v9839_v27  ;;  %v9860_v18 = vand.u32 4294901760, %v7015_v51 }
 0x4c0   : > { %11340 = vst [vmem:[#allocation17_spill] sm:$0xff] %v9829_v22  ;;  %v4137_v63 = vmul.f32 %v4129_v62, %v9635_v25  ;;  %4544 = vmatmul.f32.gmra.mxu3 %v9829_v22  ;;  %v4233_v42 = vsub.f32 %v9811_v4, %v9829_v22  ;;  %4761 = vmatpush.msra.mxu2 %v9839_v27  ;;  %v9858_v25 = vand.u32 4294901760, %v7017_v53 }
 0x4c1   : > { %v4092_v28 = vadd.f32 %v4091_v57, %v4027_v59  ;;  %v4889_v9 = vand.u32 4294901760, %v4888_v56  ;;  %v4894_v57 = vsub.f32 %v9833_v36, %v11059_v15  ;;  %4983 = vmatpush.msra.mxu0 %v9764_v47  ;;  %5068 = vmatpush.msra.mxu1 %v9768_v61  ;;  %v11062_v49 = vand.u32 4294901760, %v9856_v43  ;;  %v7013_v56 = vld [vmem:[%s10974_s4 + $0x128] sm:$0xff] }
 0x4c2   : > { %v9862_v62 = vand.u32 4294901760, %v4137_v63  ;;  %v3851_v60 = vpop.f32.mrf.mxu0  ;;  %v9864_v40 = vand.u32 4294901760, %v4233_v42  ;;  %4884 = vmatpush.msra.mxu3 %v4883_v34  ;;  %4763 = vmatpush.msra.mxu2 %v9858_v25  ;;  %v9875_v42 = vsub.f32 %v7017_v53, %v9858_v25  ;;  %v4030_v2 = vpop.f32.mrf.mxu2  ;;  %v9886_v34 = vsub.f32 %v7015_v51, %v9860_v18  ;;  %v7011_v53 = vld [vmem:[%s10974_s4 + $0x118] sm:$0xff]  ;;  %v7009_v51 = vld [vmem:[%s10974_s4 + $0x108] sm:$0xff] }
 0x4c3   : > { %v7094_v48 = vpop.eup %7093  ;;  %v4107_v59 = vmul.f32 0.5, %v4092_v28  ;;  %v3852_v55 = vadd.f32 %v3851_v60, %v9693_v58  ;;  %v4895_v60 = vand.u32 4294901760, %v4894_v57  ;;  %4986 = vmatpush.msra.mxu0 %v9783_v44  ;;  %5070 = vmatpush.msra.mxu1 %v9770_v54 }
 0x4c4   : > { %v4122_v15 = vadd.f32 1.0, %v7094_v48  ;;  %4235 = vmatmul.f32.gmra.mxu0 %v9864_v40  ;;  %v9883_v58 = vsub.f32 %v4137_v63, %v9862_v62  ;;  %4890 = vmatpush.msra.mxu3 %v4889_v9  ;;  %v4900_v48 = vsub.f32 %v9856_v43, %v11062_v49  ;;  %v11066_v23 = vand.u32 4294901760, %v9875_v42  ;;  %v3937_v14 = vpop.f32.mrf.mxu1 }
 0x4c5   : > { %4388 = vmatmul.f32.gmra.mxu1 %v9862_v62  ;;  %7095 = vtanh.f32 %v4107_v59  ;;  %v3932_v28 = vadd.f32 %v3931_v12, %v3852_v55  ;;  %4765 = vmatpush.msra.mxu2 %v9860_v18  ;;  %v4095_v57 = vpop.f32.mrf.mxu3  ;;  %v9904_v12 = vand.u32 4294901760, %v7013_v56  ;;  %v11343_v4 = vand.u32 4294901760, %v9886_v34 }
 0x4c6   : > { %11341 = vst [vmem:[#allocation5_spill] sm:$0xff] %v9883_v58  ;;  %v4130_v63 = vmul.f32 0.5, %v4122_v15  ;;  %4473 = vmatmul.f32.gmra.mxu2 %v9883_v58  ;;  %v9901_v59 = vand.u32 4294901760, %v9883_v58  ;;  %4896 = vmatpush.msra.mxu3 %v4895_v60  ;;  %v4901_v49 = vand.u32 4294901760, %v4900_v48  ;;  %v4906_v0 = vsub.f32 %v9875_v42, %v11066_v23 }
 0x4c7   : > { %v4031_v55 = vadd.f32 %v4030_v2, %v3932_v28  ;;  %v9910_v15 = vand.u32 4294901760, %v7011_v53  ;;  %v4912_v2 = vsub.f32 %v9886_v34, %v11343_v4  ;;  %4767 = vmatpush.msra.mxu2 %v9904_v12  ;;  %v9921_v60 = vand.u32 4294901760, %v7009_v51  ;;  %4989 = vmatpush.msra.mxu0 %v9786_v41 }
 0x4c8   : > { %11342 = vst [vmem:[#allocation24_spill] sm:$0xff] %v9901_v59  ;;  %v4138_v10 = vmul.f32 %v4130_v63, %v9640_v52  ;;  %4550 = vmatmul.f32.gmra.mxu3 %v9901_v59  ;;  %v4241_v9 = vsub.f32 %v9883_v58, %v9901_v59  ;;  %v4907_v48 = vand.u32 4294901760, %v4906_v0  ;;  %v9924_v23 = vsub.f32 %v7013_v56, %v9904_v12 }
 0x4c9   : > { %v4096_v28 = vadd.f32 %v4095_v57, %v4031_v55  ;;  %4902 = vmatpush.msra.mxu3 %v4901_v49  ;;  %v9927_v52 = vsub.f32 %v7011_v53, %v9910_v15  ;;  %v4913_v4 = vand.u32 4294901760, %v4912_v2  ;;  %4769 = vmatpush.msra.mxu2 %v9910_v15  ;;  %v9936_v57 = vsub.f32 %v7009_v51, %v9921_v60 }
 0x4ca   : > { %v9930_v63 = vand.u32 4294901760, %v4138_v10  ;;  %v3856_v58 = vpop.f32.mrf.mxu0  ;;  %v9932_v59 = vand.u32 4294901760, %v4241_v9  ;;  %5072 = vmatpush.msra.mxu1 %v9788_v35  ;;  %v11072_v53 = vand.u32 4294901760, %v9924_v23  ;;  %4992 = vmatpush.msra.mxu0 %v9814_v3  ;;  %v11344_v9 = vld [vmem:[#allocation35_spill] sm:$0xff] }
 0x4cb   : > { %v7096_v0 = vpop.eup %7095  ;;  %v4108_v49 = vmul.f32 0.5, %v4096_v28  ;;  %v3857_v56 = vadd.f32 %v3856_v58, %v9714_v20  ;;  %4908 = vmatpush.msra.mxu3 %v4907_v48  ;;  %v11071_v55 = vand.u32 4294901760, %v9927_v52  ;;  %v3081_v2 = vadd.f32 %v11344_v9, %v9530_v6  ;;  %4771 = vmatpush.msra.mxu2 %v9921_v60  ;;  %v11345_v48 = vld [vmem:[#allocation43_spill] sm:$0xff]  ;;  %v4034_v9 = vpop.f32.mrf.mxu2 }
 0x4cc   : > { %v4123_v22 = vadd.f32 1.0, %v7096_v0  ;;  %4243 = vmatmul.f32.gmra.mxu0 %v9932_v59  ;;  %v9948_v51 = vsub.f32 %v4138_v10, %v9930_v63  ;;  %v11076_v20 = vand.u32 4294901760, %v9936_v57  ;;  %v4918_v28 = vsub.f32 %v9924_v23, %v11072_v53  ;;  %5074 = vmatpush.msra.mxu1 %v9800_v5 }
 0x4cd   : > { %4392 = vmatmul.f32.gmra.mxu1 %v9930_v63  ;;  %7097 = vtanh.f32 %v4108_v49  ;;  %v3938_v58 = vadd.f32 %v3937_v14, %v3857_v56  ;;  %4914 = vmatpush.msra.mxu3 %v4913_v4  ;;  %v4924_v6 = vsub.f32 %v9927_v52, %v11071_v55  ;;  %v3534_v0 = vadd.f32 %v11345_v48, %v9651_v38  ;;  %v11346_v49 = vld [vmem:[#allocation11_spill] sm:$0xff]  ;;  %v4099_v24 = vpop.f32.mrf.mxu3 }
 0x4ce   : > { %v4131_v10 = vmul.f32 0.5, %v4123_v22  ;;  %4478 = vmatmul.f32.gmra.mxu2 %v9948_v51  ;;  %v9962_v14 = vand.u32 4294901760, %v9948_v51  ;;  %v4930_v4 = vsub.f32 %v9936_v57, %v11076_v20  ;;  %4995 = vmatpush.msra.mxu0 %v9833_v36  ;;  %v3374_v56 = vadd.f32 %v11346_v49, %v9628_v33  ;;  %v11348_v22 = vld [vmem:[#allocation25_spill] sm:$0xff]  ;;  %v11354_v49 = vld [vmem:[#allocation38_spill] sm:$0xff] }
 0x4cf   : > { %v4035_v55 = vadd.f32 %v4034_v9, %v3938_v58  ;;  %v4919_v53 = vand.u32 4294901760, %v4918_v28  ;;  %v4925_v26 = vand.u32 4294901760, %v4924_v6  ;;  %v11347_v38 = vand.u32 4294901760, %v9621_v8  ;;  %v11350_v8 = vld [vmem:[#allocation2_spill] sm:$0xff]  ;;  %5076 = vmatpush.msra.mxu1 %v9839_v27 }
 0x4d0   : > { %v3210_v48 = vadd.f32 %v11348_v22, %v3081_v2  ;;  %v4139_v1 = vmul.f32 %v4131_v10, %v3534_v0  ;;  %4556 = vmatmul.f32.gmra.mxu3 %v9962_v14  ;;  %v4249_v20 = vsub.f32 %v9948_v51, %v9962_v14  ;;  %4998 = vmatpush.msra.mxu0 %v9856_v43  ;;  %v4931_v58 = vand.u32 4294901760, %v4930_v4 }
 0x4d1   : > { %5139 = vmatpush.msrb.mxu2 %v11347_v38  ;;  %v4100_v33 = vadd.f32 %v4099_v24, %v4035_v55  ;;  %4920 = vmatpush.msra.mxu3 %v4919_v53  ;;  %v11349_v28 = vand.u32 4294901760, %v9675_v21  ;;  %v3473_v6 = vadd.f32 %v11350_v8, %v3374_v56  ;;  %v11351_v24 = vand.u32 4294901760, %v9697_v39  ;;  %v11352_v53 = vld [vmem:[#allocation8_spill] sm:$0xff] }
 0x4d2   : > { %v9981_v9 = vand.u32 4294901760, %v4139_v1  ;;  %v9983_v2 = vand.u32 4294901760, %v4249_v20  ;;  %5001 = vmatpush.msra.mxu0 %v9875_v42  ;;  %v3299_v55 = vadd.f32 %v11352_v53, %v3210_v48  ;;  %v11353_v4 = vand.u32 4294901760, %v9719_v11  ;;  %5078 = vmatpush.msra.mxu1 %v9858_v25 }
 0x4d3   : > { %5143 = vmatpush.msrb.mxu2 %v11349_v28  ;;  %v7098_v0 = vpop.eup %7097  ;;  %v4109_v10 = vmul.f32 0.5, %v4100_v33  ;;  %4926 = vmatpush.msra.mxu3 %v4925_v26  ;;  %v3538_v26 = vadd.f32 %v11354_v49, %v3473_v6  ;;  %v11355_v38 = vand.u32 4294901760, %v9729_v16  ;;  %v11357_v33 = vand.u32 4294901760, %v9764_v47  ;;  %v11360_v6 = vld [vmem:[#allocation20_spill] sm:$0xff] }
 0x4d4   : > { %v4124_v21 = vadd.f32 1.0, %v7098_v0  ;;  %4251 = vmatmul.f32.gmra.mxu0 %v9983_v2  ;;  %v9993_v20 = vsub.f32 %v4139_v1, %v9981_v9  ;;  %v11356_v1 = vld [vmem:[#allocation15_spill] sm:$0xff]  ;;  %5080 = vmatpush.msra.mxu1 %v9860_v18  ;;  %v11358_v8 = vand.u32 4294901760, %v9783_v44  ;;  %v11359_v47 = vand.u32 4294901760, %v9786_v41  ;;  %v11378_v49 = vld [vmem:[#allocation24_spill] sm:$0xff] }
 0x4d5   : > { %5147 = vmatpush.msrb.mxu2 %v11351_v24  ;;  %4396 = vmatmul.f32.gmra.mxu1 %v9981_v9  ;;  %7099 = vtanh.f32 %v4109_v10  ;;  %v3380_v22 = vadd.f32 %v11356_v1, %v3299_v55  ;;  %v11361_v44 = vand.u32 4294901760, %v9814_v3  ;;  %v11362_v41 = vand.u32 4294901760, %v9833_v36  ;;  %v11383_v1 = vld [vmem:[#allocation5_spill] sm:$0xff] }
 0x4d6   : > { %4932 = vmatpush.msra.mxu3 %v4931_v58  ;;  %v4132_v56 = vmul.f32 0.5, %v4124_v21  ;;  %4483 = vmatmul.f32.gmra.mxu2 %v9993_v20  ;;  %v10000_v39 = vand.u32 4294901760, %v9993_v20  ;;  %v11364_v3 = vand.u32 4294901760, %v9875_v42  ;;  %v11367_v21 = vand.u32 4294901760, %v9927_v52 }
 0x4d7   : > { %5151 = vmatpush.msrb.mxu2 %v11353_v4  ;;  %5004 = vmatpush.msra.mxu0 %v9886_v34  ;;  %v11377_v4 = vld [vmem:[#allocation23_spill] sm:$0xff] }
 0x4d8   : > { %5234 = vmatpush.msrb.mxu3 %v9606_v31  ;;  %v4140_v48 = vmul.f32 %v4132_v56, %v3538_v26  ;;  %v4257_v11 = vsub.f32 %v9993_v20, %v10000_v39  ;;  %v3477_v31 = vadd.f32 %v9515_v45, %v3380_v22  ;;  %5082 = vmatpush.msra.mxu1 %v9904_v12 }
 0x4d9   : > { %5155 = vmatpush.msrb.mxu2 %v11355_v38  ;;  %4562 = vmatmul.f32.gmra.mxu3 %v10000_v39 }
 0x4da   : > { %5236 = vmatpush.msrb.mxu3 %v9656_v30  ;;  %v10015_v16 = vand.u32 4294901760, %v4140_v48  ;;  %v10017_v58 = vand.u32 4294901760, %v4257_v11  ;;  %5007 = vmatpush.msra.mxu0 %v9924_v23  ;;  %v3542_v0 = vadd.f32 %v11360_v6, %v3477_v31 }
 0x4db   : > { %5159 = vmatpush.msrb.mxu2 %v11357_v33  ;;  %v7100_v28 = vpop.eup %7099  ;;  %5084 = vmatpush.msra.mxu1 %v9910_v15 }
 0x4dc   : > { %5238 = vmatpush.msrb.mxu3 %v9664_v7  ;;  %v4125_v30 = vadd.f32 1.0, %v7100_v28  ;;  %4259 = vmatmul.f32.gmra.mxu0 %v10017_v58  ;;  %v10027_v45 = vsub.f32 %v4140_v48, %v10015_v16 }
 0x4dd   : > { %5163 = vmatpush.msrb.mxu2 %v11358_v8  ;;  %4400 = vmatmul.f32.gmra.mxu1 %v10015_v16 }
 0x4de   : > { %5240 = vmatpush.msrb.mxu3 %v9699_v46  ;;  %v4133_v10 = vmul.f32 0.5, %v4125_v30  ;;  %4488 = vmatmul.f32.gmra.mxu2 %v10027_v45  ;;  %v10035_v7 = vand.u32 4294901760, %v10027_v45 }
 0x4df   : > { %5167 = vmatpush.msrb.mxu2 %v11359_v47  ;;  %5086 = vmatpush.msra.mxu1 %v9921_v60 }
 0x4e0   : > { %5242 = vmatpush.msrb.mxu3 %v9710_v17  ;;  %v4141_v24 = vmul.f32 %v4133_v10, %v3542_v0  ;;  %v4265_v46 = vsub.f32 %v10027_v45, %v10035_v7  ;;  %5010 = vmatpush.msra.mxu0 %v9927_v52  ;;  %v11363_v17 = vand.u32 4294901760, %v9856_v43  ;;  %v11366_v43 = vand.u32 4294901760, %v9924_v23  ;;  %v5353_v0 = vld [vmem:[%s10976_s6 + $0x78] sm:$0xff]  ;;  %v5352_v10 = vld [vmem:[%s10976_s6 + $0x70] sm:$0xff] }
 0x4e1   : > { %5171 = vmatpush.msrb.mxu2 %v11361_v44  ;;  %4568 = vmatmul.f32.gmra.mxu3 %v10035_v7 }
 0x4e2   : > { %5244 = vmatpush.msrb.mxu3 %v9744_v50  ;;  %v10048_v53 = vand.u32 4294901760, %v4141_v24  ;;  %v4266_v55 = vand.u32 4294901760, %v4265_v46  ;;  %5013 = vmatpush.msra.mxu0 %v9936_v57 }
 0x4e3   : > { %5175 = vmatpush.msrb.mxu2 %v11362_v41 }
 0x4e4   : > { %5246 = vmatpush.msrb.mxu3 %v9768_v61  ;;  %4267 = vmatmul.f32.gmra.mxu0 %v4266_v55  ;;  %v10057_v50 = vsub.f32 %v4141_v24, %v10048_v53  ;;  %v11365_v61 = vand.u32 4294901760, %v9886_v34  ;;  %v10234_v24 = vand.u32 4294901760, %v5352_v10 }
 0x4e5   : > { %5179 = vmatpush.msrb.mxu2 %v11363_v17  ;;  %4404 = vmatmul.f32.gmra.mxu1 %v10048_v53 }
 0x4e6   : > { %5248 = vmatpush.msrb.mxu3 %v9770_v54  ;;  %4493 = vmatmul.f32.gmra.mxu2 %v10057_v50  ;;  %v10064_v36 = vand.u32 4294901760, %v10057_v50 }
 0x4e7   : > { %5183 = vmatpush.msrb.mxu2 %v11364_v3  ;;  %v10253_v3 = vsub.f32 %v5352_v10, %v10234_v24  ;;  %v5349_v10 = vld [vmem:[%s10976_s6 + $0x58] sm:$0xff] }
 0x4e8   : > { %5250 = vmatpush.msrb.mxu3 %v9788_v35  ;;  %v4273_v54 = vsub.f32 %v10057_v50, %v10064_v36  ;;  %v11368_v35 = vand.u32 4294901760, %v9936_v57 }
 0x4e9   : > { %5187 = vmatpush.msrb.mxu2 %v11365_v61  ;;  %4574 = vmatmul.f32.gmra.mxu3 %v10064_v36  ;;  %v5350_v61 = vld [vmem:[%s10976_s6 + $0x60] sm:$0xff] }
 0x4ea   : > { %5252 = vmatpush.msrb.mxu3 %v9800_v5  ;;  %v4274_v42 = vand.u32 4294901760, %v4273_v54 }
 0x4eb   : > { %5191 = vmatpush.msrb.mxu2 %v11366_v43  ;;  %v11078_v43 = vand.u32 4294901760, %v10253_v3 }
 0x4ec   : > { %5254 = vmatpush.msrb.mxu3 %v9839_v27  ;;  %4275 = vmatmul.f32.gmra.mxu0 %v4274_v42 }
 0x4ed   : > { %5195 = vmatpush.msrb.mxu2 %v11367_v21  ;;  %4708 = vmatmul.f32.vlgmr.msrb.gmra.mxu1 %v9653_v13  ;;  %v5460_v21 = vsub.f32 %v10253_v3, %v11078_v43 }
 0x4ee   : > { %5256 = vmatpush.msrb.mxu3 %v9858_v25  ;;  %4777 = vmatmul.f32.vlgmr.msra.gmra.mxu2 %v9726_v19  ;;  %v11369_v19 = vld [vmem:[#allocation21_spill] sm:$0xff]  ;;  %v11370_v25 = vld [vmem:[#allocation18_spill] sm:$0xff] }
 0x4ef   : > { %5199 = vmatpush.msrb.mxu2 %v11368_v35 }
 0x4f0   : > { %5258 = vmatpush.msrb.mxu3 %v9860_v18  ;;  %v11371_v18 = vld [vmem:[#allocation32_spill] sm:$0xff] }
 0x4f1   : > { %4934 = vmatmul.f32.vlgmr.msra.gmra.mxu3 %v9653_v13 }
 0x4f2   : > { %5260 = vmatpush.msrb.mxu3 %v9904_v12 }
 0x4f4   : > { %5262 = vmatpush.msrb.mxu3 %v9910_v15  ;;  %4643 = vmatmul.f32.vlgmr.msrb.gmra.mxu0 %v9653_v13  ;;  %v11372_v15 = vld [vmem:[#allocation33_spill] sm:$0xff] }
 0x4f5   : > { %4712 = vmatmul.f32.gmra.mxu1 %v9724_v29 }
 0x4f6   : > { %5264 = vmatpush.msrb.mxu3 %v9921_v60  ;;  %4785 = vmatmul.f32.gmra.mxu2 %v9795_v37  ;;  %v11373_v60 = vld [vmem:[#allocation17_spill] sm:$0xff] }
 0x4f9   : > { %4938 = vmatmul.f32.gmra.mxu3 %v9724_v29 }
 0x4fc   : > { %4647 = vmatmul.f32.gmra.mxu0 %v9724_v29 }
 0x4fd   : > { %4716 = vmatmul.f32.gmra.mxu1 %v9793_v32 }
 0x4fe   : > { %4793 = vmatmul.f32.gmra.mxu2 %v9864_v40 }
 0x501   : > { %4942 = vmatmul.f32.gmra.mxu3 %v9793_v32 }
 0x504   : > { %4651 = vmatmul.f32.gmra.mxu0 %v9793_v32 }
 0x505   : > { %4720 = vmatmul.f32.gmra.mxu1 %v9862_v62 }
 0x506   : > { %4801 = vmatmul.f32.gmra.mxu2 %v9932_v59 }
 0x509   : > { %4946 = vmatmul.f32.gmra.mxu3 %v9862_v62 }
 0x50c   : > { %4655 = vmatmul.f32.gmra.mxu0 %v9862_v62 }
 0x50d   : > { %4724 = vmatmul.f32.gmra.mxu1 %v9930_v63 }
 0x50e   : > { %4809 = vmatmul.f32.gmra.mxu2 %v9983_v2 }
 0x511   : > { %4950 = vmatmul.f32.gmra.mxu3 %v9930_v63 }
 0x514   : > { %4659 = vmatmul.f32.gmra.mxu0 %v9930_v63 }
 0x515   : > { %4728 = vmatmul.f32.gmra.mxu1 %v9981_v9 }
 0x516   : > { %4817 = vmatmul.f32.gmra.mxu2 %v10017_v58 }
 0x519   : > { %4954 = vmatmul.f32.gmra.mxu3 %v9981_v9 }
 0x51c   : > { %4663 = vmatmul.f32.gmra.mxu0 %v9981_v9 }
 0x51d   : > { %4732 = vmatmul.f32.gmra.mxu1 %v10015_v16 }
 0x51e   : > { %4825 = vmatmul.f32.gmra.mxu2 %v4266_v55 }
 0x521   : > { %4958 = vmatmul.f32.gmra.mxu3 %v10015_v16 }
 0x524   : > { %4667 = vmatmul.f32.gmra.mxu0 %v10015_v16 }
 0x525   : > { %4736 = vmatmul.f32.gmra.mxu1 %v10048_v53 }
 0x526   : > { %4833 = vmatmul.f32.gmra.mxu2 %v4274_v42 }
 0x529   : > { %4962 = vmatmul.f32.gmra.mxu3 %v10048_v53 }
 0x52a   : > { %v10115_v23 = vpop.f32.mrf.mxu1 }
 0x52c   : > { %4671 = vmatmul.f32.gmra.mxu0 %v10048_v53 }
 0x52d   : > { %5090 = vmatmul.f32.vlgmr.msra.gmra.mxu1 %v11369_v19  ;;  %v10272_v19 = vand.u32 4294901760, %v5350_v61 }
 0x52e   : > { %5201 = vmatmul.f32.vlgmr.msrb.gmra.mxu2 %v9653_v13 }
 0x531   : > { %5266 = vmatmul.f32.vlgmr.msrb.gmra.mxu3 %v9653_v13  ;;  %v10121_v37 = vpop.f32.mrf.mxu0  ;;  %v10125_v40 = vpop.f32.mrf.mxu2 }
 0x532   : > { %v10123_v5 = vpop.f32.mrf.mxu1 }
 0x533   : > { %v10127_v27 = vpop.f32.mrf.mxu3 }
 0x534   : > { %5016 = vmatmul.f32.vlgmr.msra.gmra.mxu0 %v11370_v25 }
 0x535   : > { %5096 = vmatmul.f32.gmra.mxu1 %v11371_v18 }
 0x536   : > { %5205 = vmatmul.f32.gmra.mxu2 %v9724_v29 }
 0x539   : > { %5270 = vmatmul.f32.gmra.mxu3 %v9724_v29  ;;  %v10133_v34 = vpop.f32.mrf.mxu0  ;;  %v10137_v13 = vpop.f32.mrf.mxu2 }
 0x53a   : > { %v10135_v59 = vpop.f32.mrf.mxu1 }
 0x53b   : > { %v10139_v12 = vpop.f32.mrf.mxu3 }
 0x53c   : > { %5021 = vmatmul.f32.gmra.mxu0 %v11372_v15 }
 0x53d   : > { %5102 = vmatmul.f32.gmra.mxu1 %v11373_v60  ;;  %v5461_v60 = vand.u32 4294901760, %v5460_v21  ;;  %v10300_v21 = vand.u32 4294901760, %v5349_v10 }
 0x53e   : > { %5209 = vmatmul.f32.gmra.mxu2 %v9793_v32 }
 0x541   : > { %5274 = vmatmul.f32.gmra.mxu3 %v9793_v32  ;;  %v10145_v52 = vpop.f32.mrf.mxu0  ;;  %v10149_v29 = vpop.f32.mrf.mxu2 }
 0x542   : > { %v10147_v57 = vpop.f32.mrf.mxu1  ;;  %11375 = vst [vmem:[#allocation30_spill] sm:$0xff] %v10149_v29  ;;  %v11423_v29 = vand.u32 4294901760, %v10253_v3 }
 0x543   : > { %11374 = vst [vmem:[#allocation22_spill] sm:$0xff] %v10147_v57  ;;  %v10151_v2 = vpop.f32.mrf.mxu3 }
 0x544   : > { %11376 = vst [vmem:[#allocation42_spill] sm:$0xff] %v10151_v2  ;;  %5026 = vmatmul.f32.gmra.mxu0 %v11377_v4 }
 0x545   : > { %5108 = vmatmul.f32.gmra.mxu1 %v11378_v49 }
 0x546   : > { %5213 = vmatmul.f32.gmra.mxu2 %v9862_v62 }
 0x549   : > { %5278 = vmatmul.f32.gmra.mxu3 %v9862_v62  ;;  %v10157_v26 = vpop.f32.mrf.mxu0  ;;  %v10161_v32 = vpop.f32.mrf.mxu2 }
 0x54a   : > { %11379 = vst [vmem:[#allocation12_spill] sm:$0xff] %v10157_v26  ;;  %v10159_v56 = vpop.f32.mrf.mxu1 }
 0x54b   : > { %11380 = vst [vmem:[#allocation14_spill] sm:$0xff] %v10159_v56  ;;  %v10163_v38 = vpop.f32.mrf.mxu3 }
 0x54c   : > { %11381 = vst [vmem:[#allocation41_spill] sm:$0xff] %v10161_v32  ;;  %5031 = vmatmul.f32.gmra.mxu0 %v11383_v1 }
 0x54d   : > { %11382 = vst [vmem:[#allocation10_spill] sm:$0xff] %v10163_v38  ;;  %5114 = vmatmul.f32.gmra.mxu1 %v9962_v14 }
 0x54e   : > { %5217 = vmatmul.f32.gmra.mxu2 %v9930_v63 }
 0x551   : > { %5282 = vmatmul.f32.gmra.mxu3 %v9930_v63  ;;  %v10169_v22 = vpop.f32.mrf.mxu0  ;;  %v10173_v62 = vpop.f32.mrf.mxu2 }
 0x552   : > { %11384 = vst [vmem:[#allocation9_spill] sm:$0xff] %v10169_v22  ;;  %v10171_v48 = vpop.f32.mrf.mxu1 }
 0x553   : > { %11385 = vst [vmem:[#allocation39_spill] sm:$0xff] %v10171_v48  ;;  %v10175_v11 = vpop.f32.mrf.mxu3 }
 0x554   : > { %11386 = vst [vmem:[#allocation40_spill] sm:$0xff] %v10173_v62  ;;  %5036 = vmatmul.f32.gmra.mxu0 %v9948_v51 }
 0x555   : > { %11387 = vst [vmem:[#allocation27_spill] sm:$0xff] %v10175_v11  ;;  %5120 = vmatmul.f32.gmra.mxu1 %v10000_v39 }
 0x556   : > { %5221 = vmatmul.f32.gmra.mxu2 %v9981_v9 }
 0x559   : > { %5286 = vmatmul.f32.gmra.mxu3 %v9981_v9  ;;  %v10181_v14 = vpop.f32.mrf.mxu0  ;;  %v10185_v63 = vpop.f32.mrf.mxu2 }
 0x55a   : > { %11388 = vst [vmem:[#allocation19_spill] sm:$0xff] %v10181_v14  ;;  %v10183_v33 = vpop.f32.mrf.mxu1 }
 0x55b   : > { %11389 = vst [vmem:[#allocation36_spill] sm:$0xff] %v10183_v33 }
 0x55c   : > { %11390 = vst [vmem:[#allocation28_spill] sm:$0xff] %v10185_v63  ;;  %v10187_v31 = vpop.f32.mrf.mxu3  ;;  %5041 = vmatmul.f32.gmra.mxu0 %v9993_v20  ;;  %v5344_v63 = vld [vmem:[%s10976_s6 + $0x30] sm:$0xff] }
 0x55d   : > { %11391 = vst [vmem:[#allocation34_spill] sm:$0xff] %v10187_v31  ;;  %5126 = vmatmul.f32.gmra.mxu1 %v10035_v7  ;;  %v10228_v7 = vand.u32 4294901760, %v5353_v0  ;;  %v10382_v48 = vand.u32 4294901760, %v5344_v63 }
 0x55e   : > { %5225 = vmatmul.f32.gmra.mxu2 %v10015_v16 }
 0x55f   : > { %5355 = vmatpush.msrb.mxu0 %v10228_v7  ;;  %v10232_v44 = vsub.f32 %v5353_v0, %v10228_v7  ;;  %5670 = vmatpush.msra.mxu3 %v10228_v7  ;;  %v10291_v0 = vsub.f32 %v5350_v61, %v10272_v19 }
 0x561   : > { %5290 = vmatmul.f32.gmra.mxu3 %v10015_v16  ;;  %v10193_v51 = vpop.f32.mrf.mxu0  ;;  %v10197_v9 = vpop.f32.mrf.mxu2  ;;  %v11079_v55 = vand.u32 4294901760, %v10232_v44  ;;  %5357 = vmatpush.msrb.mxu0 %v10234_v24 }
 0x562   : > { %11392 = vst [vmem:[#allocation3_spill] sm:$0xff] %v10193_v51  ;;  %v10195_v39 = vpop.f32.mrf.mxu1  ;;  %5582 = vmatpush.msra.mxu2 %v10232_v44  ;;  %5672 = vmatpush.msra.mxu3 %v10234_v24 }
 0x563   : > { %11393 = vst [vmem:[#allocation37_spill] sm:$0xff] %v10195_v39  ;;  %v5346_v39 = vld [vmem:[%s10976_s6 + $0x40] sm:$0xff] }
 0x564   : > { %11394 = vst [vmem:[#allocation26_spill] sm:$0xff] %v10197_v9  ;;  %v10199_v58 = vpop.f32.mrf.mxu3  ;;  %5046 = vmatmul.f32.gmra.mxu0 %v10027_v45  ;;  %5585 = vmatpush.msra.mxu2 %v10253_v3 }
 0x565   : > { %11395 = vst [vmem:[#allocation31_spill] sm:$0xff] %v10199_v58  ;;  %5132 = vmatmul.f32.gmra.mxu1 %v10064_v36  ;;  %v5351_v36 = vld [vmem:[%s10976_s6 + $0x68] sm:$0xff] }
 0x566   : > { %5229 = vmatmul.f32.gmra.mxu2 %v10048_v53  ;;  %v10262_v42 = vand.u32 4294901760, %v5351_v36 }
 0x568   : > { %5359 = vmatpush.msrb.mxu0 %v10262_v42  ;;  %v10270_v35 = vsub.f32 %v5351_v36, %v10262_v42  ;;  %5674 = vmatpush.msra.mxu3 %v10262_v42 }
 0x569   : > { %5294 = vmatmul.f32.gmra.mxu3 %v10048_v53  ;;  %v10205_v20 = vpop.f32.mrf.mxu0  ;;  %v10209_v16 = vpop.f32.mrf.mxu2 }
 0x56a   : > { %11396 = vst [vmem:[#allocation7_spill] sm:$0xff] %v10205_v20  ;;  %v10207_v28 = vpop.f32.mrf.mxu1  ;;  %v11077_v4 = vand.u32 4294901760, %v10270_v35  ;;  %5361 = vmatpush.msrb.mxu0 %v10272_v19  ;;  %5588 = vmatpush.msra.mxu2 %v10270_v35 }
 0x56b   : > { %11397 = vst [vmem:[#allocation4_spill] sm:$0xff] %v10209_v16  ;;  %5676 = vmatpush.msra.mxu3 %v10272_v19 }
 0x56c   : > { %v10211_v8 = vpop.f32.mrf.mxu3  ;;  %5051 = vmatmul.f32.gmra.mxu0 %v10057_v50  ;;  %v5454_v50 = vsub.f32 %v10232_v44, %v11079_v55  ;;  %v5466_v1 = vsub.f32 %v10270_v35, %v11077_v4  ;;  %5591 = vmatpush.msra.mxu2 %v10291_v0 }
 0x56d   : > { %11398 = vst [vmem:[#allocation16_spill] sm:$0xff] %v10211_v8  ;;  %5363 = vmatpush.msrb.mxu0 %v10300_v21  ;;  %5678 = vmatpush.msra.mxu3 %v10300_v21 }
 0x56e   : > { %v5455_v54 = vand.u32 4294901760, %v5454_v50  ;;  %v5348_v50 = vld [vmem:[%s10976_s6 + $0x50] sm:$0xff]  ;;  %v5467_v36 = vand.u32 4294901760, %v5466_v1 }
 0x56f   : > { %v10310_v4 = vand.u32 4294901760, %v5348_v50 }
 0x570   : > { %5456 = vmatpush.msrb.mxu1 %v5455_v54  ;;  %v11080_v54 = vand.u32 4294901760, %v10291_v0 }
 0x571   : > { %v10214_v30 = vpop.f32.mrf.mxu0  ;;  %v10218_v45 = vpop.f32.mrf.mxu2  ;;  %5365 = vmatpush.msrb.mxu0 %v10310_v4  ;;  %5680 = vmatpush.msra.mxu3 %v10310_v4  ;;  %v10329_v16 = vsub.f32 %v5348_v50, %v10310_v4 }
 0x572   : > { %v10216_v47 = vpop.f32.mrf.mxu1  ;;  %5462 = vmatpush.msrb.mxu1 %v5461_v60  ;;  %v5472_v61 = vsub.f32 %v10291_v0, %v11080_v54  ;;  %v10308_v60 = vsub.f32 %v5349_v10, %v10300_v21 }
 0x573   : > { %11399 = vst [vmem:[#allocation13_spill] sm:$0xff] %v10216_v47  ;;  %v11082_v20 = vand.u32 4294901760, %v10329_v16 }
 0x574   : > { %v10220_v6 = vpop.f32.mrf.mxu3  ;;  %5468 = vmatpush.msrb.mxu1 %v5467_v36  ;;  %v5473_v36 = vand.u32 4294901760, %v5472_v61  ;;  %v11081_v8 = vand.u32 4294901760, %v10308_v60  ;;  %5594 = vmatpush.msra.mxu2 %v10308_v60  ;;  %v5347_v61 = vld [vmem:[%s10976_s6 + $0x48] sm:$0xff] }
 0x575   : > { %v10338_v9 = vand.u32 4294901760, %v5347_v61  ;;  %v5484_v50 = vsub.f32 %v10329_v16, %v11082_v20  ;;  %v5345_v20 = vld [vmem:[%s10976_s6 + $0x38] sm:$0xff] }
 0x576   : > { %5474 = vmatpush.msrb.mxu1 %v5473_v36  ;;  %v5478_v10 = vsub.f32 %v10308_v60, %v11081_v8  ;;  %5597 = vmatpush.msra.mxu2 %v10329_v16  ;;  %v10341_v36 = vand.u32 4294901760, %v5346_v39 }
 0x577   : > { %5367 = vmatpush.msrb.mxu0 %v10338_v9  ;;  %v10348_v8 = vsub.f32 %v5347_v61, %v10338_v9  ;;  %5682 = vmatpush.msra.mxu3 %v10338_v9 }
 0x578   : > { %v5479_v58 = vand.u32 4294901760, %v5478_v10  ;;  %v10366_v51 = vsub.f32 %v5346_v39, %v10341_v36 }
 0x579   : > { %v10237_v46 = vpop.f32.mrf.mxu0  ;;  %v10241_v53 = vpop.f32.mrf.mxu2  ;;  %5369 = vmatpush.msrb.mxu0 %v10341_v36  ;;  %5600 = vmatpush.msra.mxu2 %v10348_v8 }
 0x57a   : > { %v10239_v41 = vpop.f32.mrf.mxu1  ;;  %5480 = vmatpush.msrb.mxu1 %v5479_v58  ;;  %v11083_v58 = vand.u32 4294901760, %v10348_v8  ;;  %5684 = vmatpush.msra.mxu3 %v10341_v36 }
 0x57b   : > { %11400 = vst [vmem:[#allocation6_spill] sm:$0xff] %v10239_v41  ;;  %5603 = vmatpush.msra.mxu2 %v10366_v51 }
 0x57c   : > { %v10246_v17 = vpop.f32.mrf.mxu3 }
 0x581   : > { %v10274_v25 = vpop.f32.mrf.mxu0  ;;  %v10279_v15 = vpop.f32.mrf.mxu2 }
 0x582   : > { %11401 = vst [vmem:[#allocation29_spill] sm:$0xff] %v10274_v25  ;;  %v10276_v18 = vpop.f32.mrf.mxu1 }
 0x583   : > { %11402 = vst [vmem:[#allocation35_spill] sm:$0xff] %v10276_v18 }
 0x584   : > { %v10284_v49 = vpop.f32.mrf.mxu3 }
 0x589   : > { %v10312_v43 = vpop.f32.mrf.mxu0  ;;  %v10317_v55 = vpop.f32.mrf.mxu2 }
 0x58a   : > { %11403 = vst [vmem:[#allocation43_spill] sm:$0xff] %v10312_v43  ;;  %v10314_v1 = vpop.f32.mrf.mxu1 }
 0x58b   : > { %11404 = vst [vmem:[#allocation11_spill] sm:$0xff] %v10314_v1  ;;  %v5485_v1 = vand.u32 4294901760, %v5484_v50  ;;  %v5490_v50 = vsub.f32 %v10348_v8, %v11083_v58  ;;  %v5343_v58 = vld [vmem:[%s10976_s6 + $0x28] sm:$0xff] }
 0x58c   : > { %v10322_v54 = vpop.f32.mrf.mxu3  ;;  %v10397_v14 = vand.u32 4294901760, %v5343_v58 }
 0x58d   : > { %5486 = vmatpush.msrb.mxu1 %v5485_v1  ;;  %v5491_v1 = vand.u32 4294901760, %v5490_v50  ;;  %v5342_v50 = vld [vmem:[%s10976_s6 + $0x20] sm:$0xff] }
 0x58e   : > { %v10419_v41 = vand.u32 4294901760, %v5342_v50 }
 0x58f   : > { %5492 = vmatpush.msrb.mxu1 %v5491_v1  ;;  %v10414_v1 = vsub.f32 %v5343_v58, %v10397_v14 }
 0x591   : > { %v10350_v33 = vpop.f32.mrf.mxu0  ;;  %v10355_v31 = vpop.f32.mrf.mxu2 }
 0x592   : > { %11405 = vst [vmem:[#allocation25_spill] sm:$0xff] %v10350_v33  ;;  %v10352_v10 = vpop.f32.mrf.mxu1  ;;  %v11084_v33 = vand.u32 4294901760, %v10366_v51 }
 0x593   : > { %11406 = vst [vmem:[#allocation2_spill] sm:$0xff] %v10352_v10  ;;  %v10368_v10 = vand.u32 4294901760, %v5345_v20 }
 0x594   : > { %11407 = vst [vmem:[#allocation8_spill] sm:$0xff] %v10355_v31  ;;  %v10363_v61 = vpop.f32.mrf.mxu3  ;;  %v5496_v11 = vsub.f32 %v10366_v51, %v11084_v33 }
 0x595   : > { %11408 = vst [vmem:[#allocation38_spill] sm:$0xff] %v10363_v61  ;;  %5371 = vmatpush.msrb.mxu0 %v10368_v10  ;;  %v10380_v39 = vsub.f32 %v5345_v20, %v10368_v10  ;;  %5686 = vmatpush.msra.mxu3 %v10368_v10  ;;  %v10395_v20 = vsub.f32 %v5344_v63, %v10382_v48 }
 0x596   : > { %v5497_v18 = vand.u32 4294901760, %v5496_v11  ;;  %v5341_v11 = vld [vmem:[%s10976_s6 + $0x18] sm:$0xff] }
 0x597   : > { %5373 = vmatpush.msrb.mxu0 %v10382_v48  ;;  %5606 = vmatpush.msra.mxu2 %v10380_v39  ;;  %v11411_v43 = vand.u32 4294901760, %v10380_v39  ;;  %v10436_v22 = vand.u32 4294901760, %v5341_v11 }
 0x598   : > { %5688 = vmatpush.msra.mxu3 %v10382_v48  ;;  %5498 = vmatpush.msrb.mxu1 %v5497_v18  ;;  %v5340_v18 = vld [vmem:[%s10976_s6 + $0x10] sm:$0xff] }
 0x599   : > { %v10404_v62 = vpop.f32.mrf.mxu0  ;;  %v5502_v63 = vsub.f32 %v10380_v39, %v11411_v43  ;;  %5375 = vmatpush.msrb.mxu0 %v10397_v14  ;;  %5609 = vmatpush.msra.mxu2 %v10395_v20  ;;  %v10417_v38 = vpop.f32.mrf.mxu2 }
 0x59a   : > { %11409 = vst [vmem:[#allocation15_spill] sm:$0xff] %v10404_v62  ;;  %v10406_v33 = vpop.f32.mrf.mxu1  ;;  %5690 = vmatpush.msra.mxu3 %v10397_v14  ;;  %v11085_v62 = vand.u32 4294901760, %v10414_v1 }
 0x59b   : > { %11410 = vst [vmem:[#allocation20_spill] sm:$0xff] %v10406_v33  ;;  %v5503_v56 = vand.u32 4294901760, %v5502_v63  ;;  %v11414_v33 = vand.u32 4294901760, %v10395_v20  ;;  %5612 = vmatpush.msra.mxu2 %v10414_v1  ;;  %5377 = vmatpush.msrb.mxu0 %v10419_v41 }
 0x59c   : > { %11412 = vst [vmem:[#allocation21_spill] sm:$0xff] %v10417_v38  ;;  %v10425_v43 = vpop.f32.mrf.mxu3  ;;  %v10434_v38 = vsub.f32 %v5342_v50, %v10419_v41  ;;  %5692 = vmatpush.msra.mxu3 %v10419_v41  ;;  %v10450_v50 = vsub.f32 %v5341_v11, %v10436_v22 }
 0x59d   : > { %11413 = vst [vmem:[#allocation18_spill] sm:$0xff] %v10425_v43  ;;  %v5508_v58 = vsub.f32 %v10395_v20, %v11414_v33  ;;  %5504 = vmatpush.msrb.mxu1 %v5503_v56  ;;  %v5514_v33 = vsub.f32 %v10414_v1, %v11085_v62  ;;  %v10445_v43 = vand.u32 4294901760, %v5340_v18  ;;  %5379 = vmatpush.msrb.mxu0 %v10436_v22  ;;  %v5339_v56 = vld [vmem:[%s10976_s6 + $0x8] sm:$0xff] }
 0x59e   : > { %v11086_v32 = vand.u32 4294901760, %v10434_v38  ;;  %5615 = vmatpush.msra.mxu2 %v10434_v38  ;;  %v10459_v62 = vand.u32 4294901760, %v5339_v56  ;;  %5694 = vmatpush.msra.mxu3 %v10436_v22  ;;  %v11420_v31 = vand.u32 4294901760, %v10450_v50 }
 0x59f   : > { %v5509_v63 = vand.u32 4294901760, %v5508_v58  ;;  %v5515_v58 = vand.u32 4294901760, %v5514_v33  ;;  %v10457_v25 = vsub.f32 %v5340_v18, %v10445_v43  ;;  %5381 = vmatpush.msrb.mxu0 %v10445_v43 }
 0x5a0   : > { %11415 = vst [vmem:[#allocation32_spill] sm:$0xff] %v10459_v62  ;;  %v5520_v11 = vsub.f32 %v10434_v38, %v11086_v32  ;;  %5618 = vmatpush.msra.mxu2 %v10450_v50  ;;  %v10477_v2 = vsub.f32 %v5339_v56, %v10459_v62  ;;  %5696 = vmatpush.msra.mxu3 %v10445_v43 }
 0x5a1   : > { %5510 = vmatpush.msrb.mxu1 %v5509_v63  ;;  %v5338_v63 = vld [vmem:[%s10976_s6] sm:$0xff]  ;;  %v10471_v18 = vpop.f32.mrf.mxu0  ;;  %v11088_v57 = vand.u32 4294901760, %v10457_v25  ;;  %v10482_v61 = vpop.f32.mrf.mxu2  ;;  %v5526_v26 = vsub.f32 %v10450_v50, %v11420_v31  ;;  %5383 = vmatpush.msrb.mxu0 %v10459_v62 }
 0x5a2   : > { %11416 = vst [vmem:[#allocation33_spill] sm:$0xff] %v10471_v18  ;;  %v10473_v33 = vpop.f32.mrf.mxu1  ;;  %v10479_v32 = vand.u32 4294901760, %v5338_v63  ;;  %v5521_v47 = vand.u32 4294901760, %v5520_v11  ;;  %5621 = vmatpush.msra.mxu2 %v10457_v25  ;;  %5698 = vmatpush.msra.mxu3 %v10459_v62 }
 0x5a3   : > { %11417 = vst [vmem:[#allocation17_spill] sm:$0xff] %v10473_v33  ;;  %5516 = vmatpush.msrb.mxu1 %v5515_v58  ;;  %v5532_v56 = vsub.f32 %v10457_v25, %v11088_v57  ;;  %v11087_v33 = vand.u32 4294901760, %v10477_v2  ;;  %v5527_v11 = vand.u32 4294901760, %v5526_v26  ;;  %v7040_v26 = vld [vmem:[%s10975_s5 + $0x2] sm:$0x3] }
 0x5a4   : > { %11418 = vst [vmem:[#allocation23_spill] sm:$0xff] %v10479_v32  ;;  %v10489_v58 = vpop.f32.mrf.mxu3  ;;  %v10496_v18 = vsub.f32 %v5338_v63, %v10479_v32  ;;  %5624 = vmatpush.msra.mxu2 %v10477_v2  ;;  %5700 = vmatpush.msra.mxu3 %v10479_v32 }
 0x5a5   : > { %11419 = vst [vmem:[#allocation24_spill] sm:$0xff] %v10482_v61  ;;  %5522 = vmatpush.msrb.mxu1 %v5521_v47  ;;  %v5533_v31 = vand.u32 4294901760, %v5532_v56  ;;  %5385 = vmatpush.msrb.mxu0 %v10479_v32  ;;  %v11422_v56 = vand.u32 4294901760, %v10232_v44 }
 0x5a6   : > { %11421 = vst [vmem:[#allocation5_spill] sm:$0xff] %v10489_v58  ;;  %v5538_v58 = vsub.f32 %v10477_v2, %v11087_v33  ;;  %v11091_v61 = vand.u32 4294901760, %v10496_v18  ;;  %5627 = vmatpush.msra.mxu2 %v10496_v18  ;;  %v10515_v33 = vperm.slane %v7040_v26, 1 }
 0x5a7   : > { %5528 = vmatpush.msrb.mxu1 %v5527_v11  ;;  %5753 = vmatpush.msra.mxu0 %v11422_v56 }
 0x5a8   : > { %v5539_v47 = vand.u32 4294901760, %v5538_v58  ;;  %v5544_v63 = vsub.f32 %v10496_v18, %v11091_v61  ;;  %v11424_v61 = vand.u32 4294901760, %v10270_v35  ;;  %v4779_v44 = vadd.f32 %v10218_v45, %v10515_v33 }
 0x5a9   : > { %5534 = vmatpush.msrb.mxu1 %v5533_v31  ;;  %v10517_v57 = vpop.f32.mrf.mxu0  ;;  %5757 = vmatpush.msra.mxu0 %v11423_v29  ;;  %v10521_v62 = vpop.f32.mrf.mxu2  ;;  %v11425_v31 = vand.u32 4294901760, %v10291_v0  ;;  %v11426_v29 = vand.u32 4294901760, %v10308_v60 }
 0x5aa   : > { %v5091_v11 = vpop.f32.mrf.mxu1  ;;  %v5545_v32 = vand.u32 4294901760, %v5544_v63  ;;  %v10532_v63 = vperm.slane %v7040_v26, 0  ;;  %v4936_v3 = vadd.f32 %v10220_v6, %v4779_v44  ;;  %v4787_v6 = vadd.f32 %v10241_v53, %v10515_v33 }
 0x5ab   : > { %5540 = vmatpush.msrb.mxu1 %v5539_v47  ;;  %5761 = vmatpush.msra.mxu0 %v11424_v61  ;;  %v11431_v53 = vand.u32 4294901760, %v10395_v20 }
 0x5ac   : > { %v10523_v58 = vpop.f32.mrf.mxu3  ;;  %v4221_v0 = vadd.f32 %v10121_v37, %v10532_v63  ;;  %v11430_v37 = vand.u32 4294901760, %v10380_v39 }
 0x5ad   : > { %5546 = vmatpush.msrb.mxu1 %v5545_v32  ;;  %5765 = vmatpush.msra.mxu0 %v11425_v31  ;;  %v11427_v32 = vand.u32 4294901760, %v10329_v16  ;;  %v11429_v16 = vand.u32 4294901760, %v10366_v51  ;;  %v11433_v31 = vand.u32 4294901760, %v10434_v38  ;;  %v11435_v38 = vand.u32 4294901760, %v10457_v25 }
 0x5ae   : > { %v4378_v47 = vadd.f32 %v10115_v23, %v4221_v0 }
 0x5af   : > { %5848 = vmatpush.msra.mxu1 %v10228_v7  ;;  %5769 = vmatpush.msra.mxu0 %v11426_v29 }
 0x5b0   : > { %v4460_v23 = vadd.f32 %v10125_v40, %v4378_v47 }
 0x5b1   : > { %5850 = vmatpush.msra.mxu1 %v10234_v24  ;;  %v5017_v35 = vpop.f32.mrf.mxu0  ;;  %5773 = vmatpush.msra.mxu0 %v11427_v32  ;;  %v5202_v7 = vpop.f32.mrf.mxu2  ;;  %v11428_v24 = vand.u32 4294901760, %v10348_v8  ;;  %v4940_v8 = vadd.f32 %v10246_v17, %v4787_v6  ;;  %v11432_v17 = vand.u32 4294901760, %v10414_v1 }
 0x5b2   : > { %v5097_v61 = vpop.f32.mrf.mxu1  ;;  %v5018_v45 = vadd.f32 %v5017_v35, %v4936_v3  ;;  %v4534_v29 = vadd.f32 %v10127_v27, %v4460_v23 }
 0x5b3   : > { %5852 = vmatpush.msra.mxu1 %v10262_v42  ;;  %5777 = vmatpush.msra.mxu0 %v11428_v24 }
 0x5b4   : > { %v5267_v26 = vpop.f32.mrf.mxu3  ;;  %v5092_v60 = vadd.f32 %v5091_v11, %v5018_v45  ;;  %v4645_v3 = vadd.f32 %v10214_v30, %v4534_v29  ;;  %v11436_v30 = vand.u32 4294901760, %v10477_v2 }
 0x5b5   : > { %5854 = vmatpush.msra.mxu1 %v10272_v19  ;;  %5781 = vmatpush.msra.mxu0 %v11429_v16 }
 0x5b6   : > { %v5203_v42 = vadd.f32 %v5202_v7, %v5092_v60  ;;  %v4710_v7 = vadd.f32 %v10207_v28, %v4645_v3 }
 0x5b7   : > { %5856 = vmatpush.msra.mxu1 %v10300_v21  ;;  %5785 = vmatpush.msra.mxu0 %v11430_v37 }
 0x5b8   : > { %v5268_v19 = vadd.f32 %v5267_v26, %v5203_v42 }
 0x5b9   : > { %5858 = vmatpush.msra.mxu1 %v10310_v4  ;;  %v5022_v56 = vpop.f32.mrf.mxu0  ;;  %5789 = vmatpush.msra.mxu0 %v11431_v53  ;;  %v5206_v11 = vpop.f32.mrf.mxu2  ;;  %v4229_v4 = vadd.f32 %v10133_v34, %v10532_v63  ;;  %v11442_v53 = vld [vmem:[#allocation23_spill] sm:$0xff] }
 0x5ba   : > { %v5103_v44 = vpop.f32.mrf.mxu1  ;;  %v5298_v51 = vmul.f32 0.5, %v5268_v19  ;;  %v5023_v21 = vadd.f32 %v5022_v56, %v4940_v8 }
 0x5bb   : > { %5860 = vmatpush.msra.mxu1 %v10338_v9  ;;  %5793 = vmatpush.msra.mxu0 %v11432_v17  ;;  %v4795_v9 = vadd.f32 %v10279_v15, %v10515_v33  ;;  %v4382_v34 = vadd.f32 %v10123_v5, %v4229_v4  ;;  %v11444_v17 = vld [vmem:[#allocation42_spill] sm:$0xff] }
 0x5bc   : > { %v5271_v39 = vpop.f32.mrf.mxu3  ;;  %7101 = vtanh.f32 %v5298_v51  ;;  %v5098_v20 = vadd.f32 %v5097_v61, %v5023_v21  ;;  %v11443_v51 = vld [vmem:[#allocation13_spill] sm:$0xff] }
 0x5bd   : > { %5862 = vmatpush.msra.mxu1 %v10341_v36  ;;  %5797 = vmatpush.msra.mxu0 %v11433_v31  ;;  %v11434_v36 = vand.u32 4294901760, %v10450_v50  ;;  %v4944_v1 = vadd.f32 %v10284_v49, %v4795_v9  ;;  %v4237_v50 = vadd.f32 %v10145_v52, %v10532_v63 }
 0x5be   : > { %v5207_v40 = vadd.f32 %v5206_v11, %v5098_v20  ;;  %v11445_v20 = vld [vmem:[#allocation22_spill] sm:$0xff] }
 0x5bf   : > { %5864 = vmatpush.msra.mxu1 %v10368_v10  ;;  %5801 = vmatpush.msra.mxu0 %v11434_v36 }
 0x5c0   : > { %v5272_v15 = vadd.f32 %v5271_v39, %v5207_v40 }
 0x5c1   : > { %5866 = vmatpush.msra.mxu1 %v10382_v48  ;;  %v5027_v35 = vpop.f32.mrf.mxu0  ;;  %5805 = vmatpush.msra.mxu0 %v11435_v38  ;;  %v5210_v5 = vpop.f32.mrf.mxu2  ;;  %v4465_v48 = vadd.f32 %v10137_v13, %v4382_v34  ;;  %v11437_v13 = vand.u32 4294901760, %v10496_v18  ;;  %v11446_v34 = vld [vmem:[#allocation38_spill] sm:$0xff] }
 0x5c2   : > { %v7102_v10 = vpop.eup %7101  ;;  %v5299_v27 = vmul.f32 0.5, %v5272_v15  ;;  %v5028_v61 = vadd.f32 %v5027_v35, %v4944_v1  ;;  %v5109_v49 = vpop.f32.mrf.mxu1  ;;  %v11447_v15 = vld [vmem:[#allocation29_spill] sm:$0xff] }
 0x5c3   : > { %5868 = vmatpush.msra.mxu1 %v10397_v14  ;;  %v5314_v32 = vadd.f32 1.0, %v7102_v10  ;;  %5809 = vmatpush.msra.mxu0 %v11436_v30  ;;  %v4803_v14 = vadd.f32 %v10317_v55, %v10515_v33  ;;  %v4540_v26 = vadd.f32 %v10139_v12, %v4465_v48  ;;  %v11439_v12 = vld [vmem:[#allocation30_spill] sm:$0xff] }
 0x5c4   : > { %v5275_v45 = vpop.f32.mrf.mxu3  ;;  %7103 = vtanh.f32 %v5299_v27  ;;  %v5104_v25 = vadd.f32 %v5103_v44, %v5028_v61 }
 0x5c5   : > { %5870 = vmatpush.msra.mxu1 %v10419_v41  ;;  %v5322_v0 = vmul.f32 0.5, %v5314_v32  ;;  %5813 = vmatpush.msra.mxu0 %v11437_v13  ;;  %v4386_v41 = vadd.f32 %v10135_v59, %v4237_v50  ;;  %v4948_v55 = vadd.f32 %v10322_v54, %v4803_v14  ;;  %v4649_v6 = vadd.f32 %v10237_v46, %v4540_v26  ;;  %v11440_v59 = vld [vmem:[#allocation12_spill] sm:$0xff]  ;;  %v11448_v50 = vld [vmem:[#allocation41_spill] sm:$0xff] }
 0x5c6   : > { %v5211_v52 = vadd.f32 %v5210_v5, %v5104_v25  ;;  %v4245_v8 = vadd.f32 %v11440_v59, %v10532_v63  ;;  %v11441_v46 = vld [vmem:[#allocation8_spill] sm:$0xff]  ;;  %v11455_v59 = vld [vmem:[#allocation43_spill] sm:$0xff] }
 0x5c7   : > { %5872 = vmatpush.msra.mxu1 %v10436_v22  ;;  %v5330_v2 = vmul.f32 %v5322_v0, %v4710_v7  ;;  %v11438_v22 = vld [vmem:[#allocation32_spill] sm:$0xff]  ;;  %v4470_v37 = vadd.f32 %v11439_v12, %v4386_v41  ;;  %v4811_v56 = vadd.f32 %v11441_v46, %v10515_v33  ;;  %v4714_v21 = vadd.f32 %v11443_v51, %v4649_v6  ;;  %v11450_v7 = vld [vmem:[#allocation21_spill] sm:$0xff] }
 0x5c8   : > { %v5276_v24 = vadd.f32 %v5275_v45, %v5211_v52  ;;  %v4390_v31 = vadd.f32 %v11445_v20, %v4245_v8  ;;  %v4819_v0 = vadd.f32 %v11450_v7, %v10515_v33  ;;  %v11451_v52 = vld [vmem:[#allocation6_spill] sm:$0xff]  ;;  %v11456_v51 = vld [vmem:[#allocation40_spill] sm:$0xff] }
 0x5c9   : > { %5874 = vmatpush.msra.mxu1 %v10445_v43  ;;  %v10597_v28 = vand.u32 4294901760, %v5330_v2  ;;  %v5032_v60 = vpop.f32.mrf.mxu0  ;;  %v5214_v47 = vpop.f32.mrf.mxu2  ;;  %v4546_v9 = vadd.f32 %v11444_v17, %v4470_v37  ;;  %v4952_v36 = vadd.f32 %v11446_v34, %v4811_v56 }
 0x5ca   : > { %v7104_v18 = vpop.eup %7103  ;;  %v5300_v16 = vmul.f32 0.5, %v5276_v24  ;;  %v5033_v42 = vadd.f32 %v5032_v60, %v4948_v55  ;;  %v5115_v23 = vpop.f32.mrf.mxu1  ;;  %v4475_v32 = vadd.f32 %v11448_v50, %v4390_v31  ;;  %v11452_v24 = vld [vmem:[#allocation10_spill] sm:$0xff] }
 0x5cb   : > { %5876 = vmatpush.msra.mxu1 %v11438_v22  ;;  %v5387_v43 = vsub.f32 %v5330_v2, %v10597_v28  ;;  %v5315_v54 = vadd.f32 1.0, %v7104_v18  ;;  %v4653_v3 = vadd.f32 %v11447_v15, %v4546_v9  ;;  %v11453_v60 = vld [vmem:[#allocation14_spill] sm:$0xff]  ;;  %v11458_v9 = vld [vmem:[#allocation24_spill] sm:$0xff]  ;;  %v11460_v15 = vld [vmem:[#allocation27_spill] sm:$0xff] }
 0x5cc   : > { %v5279_v19 = vpop.f32.mrf.mxu3  ;;  %5548 = vmatmul.f32.vlgmr.msrb.gmra.mxu1 %v10597_v28  ;;  %7105 = vtanh.f32 %v5300_v16  ;;  %v5110_v44 = vadd.f32 %v5109_v49, %v5033_v42  ;;  %v11449_v49 = vld [vmem:[#allocation9_spill] sm:$0xff]  ;;  %v4552_v6 = vadd.f32 %v11452_v24, %v4475_v32  ;;  %v4827_v20 = vadd.f32 %v11458_v9, %v10515_v33 }
 0x5cd   : > { %5878 = vmatpush.msra.mxu1 %v11442_v53  ;;  %v5323_v11 = vmul.f32 0.5, %v5315_v54  ;;  %5630 = vmatmul.f32.vlgmr.msra.gmra.mxu2 %v5387_v43  ;;  %v5388_v4 = vand.u32 4294901760, %v5387_v43  ;;  %v4253_v45 = vadd.f32 %v11449_v49, %v10532_v63  ;;  %v4718_v26 = vadd.f32 %v11451_v52, %v4653_v3  ;;  %v11463_v32 = vld [vmem:[#allocation25_spill] sm:$0xff]  ;;  %v11464_v52 = vld [vmem:[#allocation28_spill] sm:$0xff] }
 0x5ce   : > { %v5215_v39 = vadd.f32 %v5214_v47, %v5110_v44  ;;  %v11454_v47 = vld [vmem:[#allocation18_spill] sm:$0xff]  ;;  %v4657_v8 = vadd.f32 %v11455_v59, %v4552_v6 }
 0x5cf   : > { %v5331_v40 = vmul.f32 %v5323_v11, %v4714_v21  ;;  %5704 = vmatmul.f32.vlgmr.msra.gmra.mxu3 %v5388_v4  ;;  %v5389_v29 = vsub.f32 %v5387_v43, %v5388_v4  ;;  %v4394_v22 = vadd.f32 %v11453_v60, %v4253_v45  ;;  %v4956_v12 = vadd.f32 %v11454_v47, %v4819_v0  ;;  %v11457_v11 = vld [vmem:[#allocation19_spill] sm:$0xff]  ;;  %v11467_v59 = vld [vmem:[#allocation34_spill] sm:$0xff] }
 0x5d0   : > { %v5280_v1 = vadd.f32 %v5279_v19, %v5215_v39  ;;  %v4835_v60 = vadd.f32 %v10521_v62, %v10515_v33  ;;  %v11469_v62 = vld [vmem:[#allocation15_spill] sm:$0xff] }
 0x5d1   : > { %v5037_v35 = vpop.f32.mrf.mxu0  ;;  %v5390_v38 = vand.u32 4294901760, %v5389_v29  ;;  %v10613_v10 = vand.u32 4294901760, %v5331_v40  ;;  %v5218_v48 = vpop.f32.mrf.mxu2  ;;  %v4480_v21 = vadd.f32 %v11456_v51, %v4394_v22 }
 0x5d2   : > { %v7106_v27 = vpop.eup %7105  ;;  %v5301_v61 = vmul.f32 0.5, %v5280_v1  ;;  %v5038_v5 = vadd.f32 %v5037_v35, %v4952_v36  ;;  %v5121_v16 = vpop.f32.mrf.mxu1  ;;  %v11461_v35 = vld [vmem:[#allocation39_spill] sm:$0xff] }
 0x5d3   : > { %v5316_v30 = vadd.f32 1.0, %v7106_v27  ;;  %5391 = vmatmul.f32.vlgmr.msrb.gmra.mxu0 %v5390_v38  ;;  %v5395_v25 = vsub.f32 %v5331_v40, %v10613_v10  ;;  %v11459_v40 = vld [vmem:[#allocation35_spill] sm:$0xff]  ;;  %v4558_v3 = vadd.f32 %v11460_v15, %v4480_v21 }
 0x5d4   : > { %v5283_v14 = vpop.f32.mrf.mxu3  ;;  %5552 = vmatmul.f32.gmra.mxu1 %v10613_v10  ;;  %7107 = vtanh.f32 %v5301_v61  ;;  %v5116_v13 = vadd.f32 %v5115_v23, %v5038_v5  ;;  %v4261_v23 = vadd.f32 %v11457_v11, %v10532_v63  ;;  %v4722_v29 = vadd.f32 %v11459_v40, %v4657_v8  ;;  %v11462_v5 = vld [vmem:[#allocation5_spill] sm:$0xff] }
 0x5d5   : > { %v5324_v41 = vmul.f32 0.5, %v5316_v30  ;;  %5635 = vmatmul.f32.gmra.mxu2 %v5395_v25  ;;  %v5396_v2 = vand.u32 4294901760, %v5395_v25  ;;  %v4661_v49 = vadd.f32 %v11463_v32, %v4558_v3 }
 0x5d6   : > { %v5219_v55 = vadd.f32 %v5218_v48, %v5116_v13  ;;  %v4398_v38 = vadd.f32 %v11461_v35, %v4261_v23  ;;  %v4960_v48 = vadd.f32 %v11462_v5, %v4827_v20  ;;  %v11471_v20 = vld [vmem:[#allocation7_spill] sm:$0xff]  ;;  %v11474_v5 = vld [vmem:[#allocation37_spill] sm:$0xff] }
 0x5d7   : > { %v5332_v18 = vmul.f32 %v5324_v41, %v4718_v26  ;;  %5710 = vmatmul.f32.gmra.mxu3 %v5396_v2  ;;  %v5397_v42 = vsub.f32 %v5395_v25, %v5396_v2  ;;  %v11465_v41 = vld [vmem:[#allocation3_spill] sm:$0xff] }
 0x5d8   : > { %v5284_v37 = vadd.f32 %v5283_v14, %v5219_v55  ;;  %v4485_v26 = vadd.f32 %v11464_v52, %v4398_v38  ;;  %v4269_v2 = vadd.f32 %v11465_v41, %v10532_v63  ;;  %v11476_v52 = vld [vmem:[#allocation4_spill] sm:$0xff] }
 0x5d9   : > { %v5042_v43 = vpop.f32.mrf.mxu0  ;;  %v5398_v54 = vand.u32 4294901760, %v5397_v42  ;;  %v10627_v19 = vand.u32 4294901760, %v5332_v18  ;;  %v5222_v53 = vpop.f32.mrf.mxu2 }
 0x5da   : > { %v7108_v46 = vpop.eup %7107  ;;  %v5302_v56 = vmul.f32 0.5, %v5284_v37  ;;  %v5043_v44 = vadd.f32 %v5042_v43, %v4956_v12  ;;  %v5127_v45 = vpop.f32.mrf.mxu1  ;;  %v4564_v8 = vadd.f32 %v11467_v59, %v4485_v26  ;;  %v11468_v43 = vld [vmem:[#allocation36_spill] sm:$0xff] }
 0x5db   : > { %v5317_v4 = vadd.f32 1.0, %v7108_v46  ;;  %5399 = vmatmul.f32.gmra.mxu0 %v5398_v54  ;;  %v5403_v17 = vsub.f32 %v5332_v18, %v10627_v19  ;;  %v11466_v18 = vld [vmem:[#allocation11_spill] sm:$0xff]  ;;  %v4402_v54 = vadd.f32 %v11468_v43, %v4269_v2 }
 0x5dc   : > { %v5287_v39 = vpop.f32.mrf.mxu3  ;;  %5556 = vmatmul.f32.gmra.mxu1 %v10627_v19  ;;  %7109 = vtanh.f32 %v5302_v56  ;;  %v5122_v31 = vadd.f32 %v5121_v16, %v5043_v44  ;;  %v4726_v16 = vadd.f32 %v11466_v18, %v4661_v49  ;;  %v4964_v44 = vadd.f32 %v10523_v58, %v4835_v60 }
 0x5dd   : > { %v5325_v34 = vmul.f32 0.5, %v5317_v4  ;;  %5640 = vmatmul.f32.gmra.mxu2 %v5403_v17  ;;  %v5404_v36 = vand.u32 4294901760, %v5403_v17  ;;  %v4665_v33 = vadd.f32 %v11469_v62, %v4564_v8 }
 0x5de   : > { %v5223_v1 = vadd.f32 %v5222_v53, %v5122_v31  ;;  %v4277_v31 = vadd.f32 %v11471_v20, %v10532_v63 }
 0x5df   : > { %v5333_v27 = vmul.f32 %v5325_v34, %v4722_v29  ;;  %5716 = vmatmul.f32.gmra.mxu3 %v5404_v36  ;;  %v5405_v61 = vsub.f32 %v5403_v17, %v5404_v36  ;;  %v11470_v17 = vld [vmem:[#allocation26_spill] sm:$0xff] }
 0x5e0   : > { %v5288_v50 = vadd.f32 %v5287_v39, %v5223_v1  ;;  %v4490_v9 = vadd.f32 %v11470_v17, %v4402_v54  ;;  %v11472_v36 = vld [vmem:[#allocation2_spill] sm:$0xff]  ;;  %v4406_v63 = vadd.f32 %v11474_v5, %v4277_v31  ;;  %v11479_v54 = vld [vmem:[#allocation17_spill] sm:$0xff] }
 0x5e1   : > { %v5047_v30 = vpop.f32.mrf.mxu0  ;;  %v5406_v14 = vand.u32 4294901760, %v5405_v61  ;;  %v10641_v25 = vand.u32 4294901760, %v5333_v27  ;;  %v5226_v24 = vpop.f32.mrf.mxu2  ;;  %v4730_v1 = vadd.f32 %v11472_v36, %v4665_v33 }
 0x5e2   : > { %v7110_v7 = vpop.eup %7109  ;;  %v5303_v0 = vmul.f32 0.5, %v5288_v50  ;;  %v5048_v13 = vadd.f32 %v5047_v30, %v4960_v48  ;;  %v5133_v29 = vpop.f32.mrf.mxu1  ;;  %v4495_v26 = vadd.f32 %v11476_v52, %v4406_v63 }
 0x5e3   : > { %v5318_v55 = vadd.f32 1.0, %v7110_v7  ;;  %5407 = vmatmul.f32.gmra.mxu0 %v5406_v14  ;;  %v5411_v6 = vsub.f32 %v5333_v27, %v10641_v25  ;;  %v11473_v27 = vld [vmem:[#allocation31_spill] sm:$0xff] }
 0x5e4   : > { %5560 = vmatmul.f32.gmra.mxu1 %v10641_v25  ;;  %7111 = vtanh.f32 %v5303_v0  ;;  %v5128_v22 = vadd.f32 %v5127_v45, %v5048_v13  ;;  %v5291_v47 = vpop.f32.mrf.mxu3  ;;  %v4570_v61 = vadd.f32 %v11473_v27, %v4490_v9  ;;  %v11475_v45 = vld [vmem:[#allocation33_spill] sm:$0xff] }
 0x5e5   : > { %v5326_v42 = vmul.f32 0.5, %v5318_v55  ;;  %5645 = vmatmul.f32.gmra.mxu2 %v5411_v6  ;;  %v5412_v12 = vand.u32 4294901760, %v5411_v6  ;;  %v11477_v55 = vld [vmem:[#allocation20_spill] sm:$0xff] }
 0x5e6   : > { %v5227_v37 = vadd.f32 %v5226_v24, %v5128_v22  ;;  %v4669_v30 = vadd.f32 %v11475_v45, %v4570_v61  ;;  %v11478_v22 = vld [vmem:[#allocation16_spill] sm:$0xff] }
 0x5e7   : > { %v5334_v46 = vmul.f32 %v5326_v42, %v4726_v16  ;;  %5722 = vmatmul.f32.gmra.mxu3 %v5412_v12  ;;  %v5413_v56 = vsub.f32 %v5411_v6, %v5412_v12  ;;  %v4576_v18 = vadd.f32 %v11478_v22, %v4495_v26 }
 0x5e8   : > { %v5292_v53 = vadd.f32 %v5291_v47, %v5227_v37  ;;  %v4734_v24 = vadd.f32 %v11477_v55, %v4669_v30 }
 0x5e9   : > { %v5052_v51 = vpop.f32.mrf.mxu0  ;;  %v5414_v21 = vand.u32 4294901760, %v5413_v56  ;;  %v10655_v11 = vand.u32 4294901760, %v5334_v46  ;;  %v5230_v3 = vpop.f32.mrf.mxu2  ;;  %v4673_v47 = vadd.f32 %v10517_v57, %v4576_v18 }
 0x5ea   : > { %v7112_v23 = vpop.eup %7111  ;;  %v5304_v4 = vmul.f32 0.5, %v5292_v53  ;;  %v5053_v39 = vadd.f32 %v5052_v51, %v4964_v44 }
 0x5eb   : > { %v5319_v40 = vadd.f32 1.0, %v7112_v23  ;;  %5415 = vmatmul.f32.gmra.mxu0 %v5414_v21  ;;  %v5419_v58 = vsub.f32 %v5334_v46, %v10655_v11  ;;  %v4738_v46 = vadd.f32 %v11479_v54, %v4673_v47 }
 0x5ec   : > { %5564 = vmatmul.f32.gmra.mxu1 %v10655_v11  ;;  %7113 = vtanh.f32 %v5304_v4  ;;  %v5134_v34 = vadd.f32 %v5133_v29, %v5053_v39  ;;  %v5295_v50 = vpop.f32.mrf.mxu3 }
 0x5ed   : > { %v5327_v15 = vmul.f32 0.5, %v5319_v40  ;;  %5650 = vmatmul.f32.gmra.mxu2 %v5419_v58  ;;  %v5420_v35 = vand.u32 4294901760, %v5419_v58 }
 0x5ee   : > { %v5231_v38 = vadd.f32 %v5230_v3, %v5134_v34  ;;  %v5912_v34 = vld [vmem:[%s10977_s7] sm:$0xff] }
 0x5ef   : > { %v5335_v48 = vmul.f32 %v5327_v15, %v4730_v1  ;;  %5728 = vmatmul.f32.gmra.mxu3 %v5420_v35  ;;  %v5421_v32 = vsub.f32 %v5419_v58, %v5420_v35  ;;  %v5958_v36 = vand.u32 4294901760, %v5912_v34 }
 0x5f0   : > { %v5296_v49 = vadd.f32 %v5295_v50, %v5231_v38 }
 0x5f1   : > { %v5422_v14 = vand.u32 4294901760, %v5421_v32  ;;  %v5426_v7 = vand.u32 4294901760, %v5335_v48  ;;  %v6046_v1 = vsub.f32 %v5912_v34, %v5958_v36 }
 0x5f2   : > { %v7114_v0 = vpop.eup %7113  ;;  %v5305_v13 = vmul.f32 0.5, %v5296_v49 }
 0x5f3   : > { %v5320_v41 = vadd.f32 1.0, %v7114_v0  ;;  %5423 = vmatmul.f32.gmra.mxu0 %v5422_v14  ;;  %v5427_v2 = vsub.f32 %v5335_v48, %v5426_v7  ;;  %v6047_v35 = vand.u32 4294901760, %v6046_v1 }
 0x5f4   : > { %5568 = vmatmul.f32.gmra.mxu1 %v5426_v7  ;;  %7115 = vtanh.f32 %v5305_v13 }
 0x5f5   : > { %v5328_v6 = vmul.f32 0.5, %v5320_v41  ;;  %5655 = vmatmul.f32.gmra.mxu2 %v5427_v2  ;;  %v5428_v60 = vand.u32 4294901760, %v5427_v2  ;;  %v6048_v38 = vsub.f32 %v6046_v1, %v6047_v35 }
 0x5f7   : > { %v5336_v16 = vmul.f32 %v5328_v6, %v4734_v24  ;;  %5734 = vmatmul.f32.gmra.mxu3 %v5428_v60  ;;  %v5429_v42 = vsub.f32 %v5427_v2, %v5428_v60  ;;  %v6049_v27 = vand.u32 4294901760, %v6048_v38 }
 0x5f9   : > { %v5430_v12 = vand.u32 4294901760, %v5429_v42  ;;  %v5434_v37 = vand.u32 4294901760, %v5336_v16 }
 0x5fa   : > { %v7116_v59 = vpop.eup %7115 }
 0x5fb   : > { %v5321_v8 = vadd.f32 1.0, %v7116_v59  ;;  %5431 = vmatmul.f32.gmra.mxu0 %v5430_v12  ;;  %v5435_v43 = vsub.f32 %v5336_v16, %v5434_v37 }
 0x5fc   : > { %5572 = vmatmul.f32.gmra.mxu1 %v5434_v37 }
 0x5fd   : > { %v5329_v56 = vmul.f32 0.5, %v5321_v8  ;;  %5660 = vmatmul.f32.gmra.mxu2 %v5435_v43  ;;  %v5436_v44 = vand.u32 4294901760, %v5435_v43 }
 0x5ff   : > { %v5337_v53 = vmul.f32 %v5329_v56, %v4738_v46  ;;  %5740 = vmatmul.f32.gmra.mxu3 %v5436_v44  ;;  %v5437_v62 = vsub.f32 %v5435_v43, %v5436_v44 }
 0x601   : > { %v5438_v33 = vand.u32 4294901760, %v5437_v62  ;;  %v5442_v51 = vand.u32 4294901760, %v5337_v53 }
 0x603   : > { %5439 = vmatmul.f32.gmra.mxu0 %v5438_v33  ;;  %v5443_v57 = vsub.f32 %v5337_v53, %v5442_v51 }
 0x604   : > { %5576 = vmatmul.f32.gmra.mxu1 %v5442_v51 }
 0x605   : > { %5665 = vmatmul.f32.gmra.mxu2 %v5443_v57  ;;  %v5444_v21 = vand.u32 4294901760, %v5443_v57 }
 0x607   : > { %5746 = vmatmul.f32.gmra.mxu3 %v5444_v21  ;;  %v5445_v23 = vsub.f32 %v5443_v57, %v5444_v21 }
 0x609   : > { %v5446_v4 = vand.u32 4294901760, %v5445_v23 }
 0x60b   : > { %5447 = vmatmul.f32.gmra.mxu0 %v5446_v4 }
 0x60c   : > { %5880 = vmatmul.f32.vlgmr.msra.gmra.mxu1 %v10597_v28 }
 0x613   : > { %5815 = vmatmul.f32.vlgmr.msra.gmra.mxu0 %v10597_v28  ;;  %v5913_v28 = vld [vmem:[%s10977_s7 + $0x8] sm:$0xff] }
 0x614   : > { %5884 = vmatmul.f32.gmra.mxu1 %v10613_v10 }
 0x61b   : > { %5819 = vmatmul.f32.gmra.mxu0 %v10613_v10  ;;  %v5956_v10 = vand.u32 4294901760, %v5913_v28 }
 0x61c   : > { %5888 = vmatmul.f32.gmra.mxu1 %v10627_v19 }
 0x61d   : > { %5957 = vmatpush.msrb.mxu2 %v5956_v10  ;;  %6160 = vmatpush.msrb.mxu1 %v5956_v10 }
 0x61f   : > { %5959 = vmatpush.msrb.mxu2 %v5958_v36  ;;  %6162 = vmatpush.msrb.mxu1 %v5958_v36 }
 0x623   : > { %5823 = vmatmul.f32.gmra.mxu0 %v10627_v19  ;;  %v6040_v19 = vsub.f32 %v5913_v28, %v5956_v10 }
 0x624   : > { %5892 = vmatmul.f32.gmra.mxu1 %v10641_v25 }
 0x625   : > { %v6041_v17 = vand.u32 4294901760, %v6040_v19  ;;  %6100 = vmatpush.msrb.mxu0 %v6040_v19 }
 0x627   : > { %6229 = vmatpush.msra.mxu2 %v6041_v17  ;;  %6103 = vmatpush.msrb.mxu0 %v6046_v1 }
 0x629   : > { %6233 = vmatpush.msra.mxu2 %v6047_v35 }
 0x62b   : > { %5827 = vmatmul.f32.gmra.mxu0 %v10641_v25  ;;  %v6042_v25 = vsub.f32 %v6040_v19, %v6041_v17 }
 0x62c   : > { %5896 = vmatmul.f32.gmra.mxu1 %v10655_v11 }
 0x62d   : > { %v6043_v9 = vand.u32 4294901760, %v6042_v25 }
 0x62f   : > { %6044 = vmatpush.msrb.mxu3 %v6043_v9 }
 0x631   : > { %6050 = vmatpush.msrb.mxu3 %v6049_v27 }
 0x633   : > { %5831 = vmatmul.f32.gmra.mxu0 %v10655_v11  ;;  %6282 = vmatpush.msra.mxu3 %v5956_v10 }
 0x634   : > { %5900 = vmatmul.f32.gmra.mxu1 %v5426_v7 }
 0x635   : > { %6284 = vmatpush.msra.mxu3 %v5958_v36 }
 0x63b   : > { %5835 = vmatmul.f32.gmra.mxu0 %v5426_v7 }
 0x63c   : > { %5904 = vmatmul.f32.gmra.mxu1 %v5434_v37 }
 0x643   : > { %5839 = vmatmul.f32.gmra.mxu0 %v5434_v37 }
 0x644   : > { %5908 = vmatmul.f32.gmra.mxu1 %v5442_v51 }
 0x649   : > { %v5549_v39 = vpop.f32.mrf.mxu1 }
 0x64b   : > { %5843 = vmatmul.f32.gmra.mxu0 %v5442_v51 }
 0x650   : > { %v5392_v11 = vpop.f32.mrf.mxu0  ;;  %v5631_v50 = vpop.f32.mrf.mxu2 }
 0x651   : > { %v5553_v20 = vpop.f32.mrf.mxu1  ;;  %v5550_v14 = vadd.f32 %v5549_v39, %v5392_v11 }
 0x652   : > { %v5705_v32 = vpop.f32.mrf.mxu3 }
 0x653   : > { %v5632_v52 = vadd.f32 %v5631_v50, %v5550_v14 }
 0x655   : > { %v5706_v26 = vadd.f32 %v5705_v32, %v5632_v52 }
 0x658   : > { %v5400_v31 = vpop.f32.mrf.mxu0  ;;  %v5636_v30 = vpop.f32.mrf.mxu2 }
 0x659   : > { %v5557_v40 = vpop.f32.mrf.mxu1  ;;  %v5554_v41 = vadd.f32 %v5553_v20, %v5400_v31 }
 0x65a   : > { %v5711_v13 = vpop.f32.mrf.mxu3 }
 0x65b   : > { %v5637_v60 = vadd.f32 %v5636_v30, %v5554_v41 }
 0x65d   : > { %v5712_v47 = vadd.f32 %v5711_v13, %v5637_v60 }
 0x660   : > { %v5408_v29 = vpop.f32.mrf.mxu0  ;;  %v5641_v2 = vpop.f32.mrf.mxu2 }
 0x661   : > { %v5561_v58 = vpop.f32.mrf.mxu1  ;;  %v5558_v12 = vadd.f32 %v5557_v40, %v5408_v29 }
 0x662   : > { %v5717_v18 = vpop.f32.mrf.mxu3 }
 0x663   : > { %v5642_v56 = vadd.f32 %v5641_v2, %v5558_v12 }
 0x665   : > { %v5718_v21 = vadd.f32 %v5717_v18, %v5642_v56 }
 0x668   : > { %v5416_v15 = vpop.f32.mrf.mxu0  ;;  %v5646_v54 = vpop.f32.mrf.mxu2 }
 0x669   : > { %v10687_v3 = vpop.f32.mrf.mxu1  ;;  %v5562_v23 = vadd.f32 %v5561_v58, %v5416_v15 }
 0x66a   : > { %v5723_v33 = vpop.f32.mrf.mxu3 }
 0x66b   : > { %v5647_v17 = vadd.f32 %v5646_v54, %v5562_v23 }
 0x66d   : > { %v5724_v29 = vadd.f32 %v5723_v33, %v5647_v17 }
 0x670   : > { %v10689_v61 = vpop.f32.mrf.mxu0  ;;  %v5651_v9 = vpop.f32.mrf.mxu2 }
 0x671   : > { %v10691_v5 = vpop.f32.mrf.mxu1  ;;  %v5566_v58 = vadd.f32 %v10687_v3, %v10689_v61 }
 0x672   : > { %v5729_v34 = vpop.f32.mrf.mxu3 }
 0x673   : > { %v5652_v38 = vadd.f32 %v5651_v9, %v5566_v58 }
 0x675   : > { %v5730_v61 = vadd.f32 %v5729_v34, %v5652_v38 }
 0x678   : > { %v10693_v63 = vpop.f32.mrf.mxu0  ;;  %v5656_v14 = vpop.f32.mrf.mxu2 }
 0x679   : > { %v10695_v48 = vpop.f32.mrf.mxu1  ;;  %v5570_v13 = vadd.f32 %v10691_v5, %v10693_v63 }
 0x67a   : > { %v5735_v2 = vpop.f32.mrf.mxu3 }
 0x680   : > { %v10697_v49 = vpop.f32.mrf.mxu0  ;;  %v5661_v12 = vpop.f32.mrf.mxu2 }
 0x681   : > { %v10699_v45 = vpop.f32.mrf.mxu1 }
 0x682   : > { %v5741_v56 = vpop.f32.mrf.mxu3 }
 0x688   : > { %v10701_v7 = vpop.f32.mrf.mxu0 }
 0x689   : > { %v5881_v0 = vpop.f32.mrf.mxu1 }
 0x68a   : > { %v5747_v9 = vpop.f32.mrf.mxu3 }
 0x690   : > { %v5816_v55 = vpop.f32.mrf.mxu0 }
 0x691   : > { %v5885_v24 = vpop.f32.mrf.mxu1  ;;  %v5817_v6 = vadd.f32 %v5816_v55, %v5706_v26 }
 0x693   : > { %v5882_v22 = vadd.f32 %v5881_v0, %v5817_v6 }
 0x695   : > { %v5919_v16 = vsel %vm405_vm0, %v5882_v22, 0 }
 0x696   : > { %v10704_v42 = vand.u32 4294901760, %v5919_v16 }
 0x698   : > { %v5961_v37 = vsub.f32 %v5919_v16, %v10704_v42  ;;  %v5820_v59 = vpop.f32.mrf.mxu0  ;;  %6052 = vmatmul.f32.vlgmr.msrb.gmra.mxu3 %v10704_v42 }
 0x699   : > { %v5889_v8 = vpop.f32.mrf.mxu1  ;;  %v5821_v43 = vadd.f32 %v5820_v59, %v5712_v47  ;;  %v5574_v47 = vadd.f32 %v10695_v48, %v10697_v49  ;;  %v5578_v49 = vadd.f32 %v10699_v45, %v10701_v7 }
 0x69a   : > { %v5962_v46 = vand.u32 4294901760, %v5961_v37  ;;  %6106 = vmatmul.f32.vlgmr.msrb.gmra.mxu0 %v5961_v37 }
 0x69b   : > { %v5886_v44 = vadd.f32 %v5885_v24, %v5821_v43  ;;  %v5657_v24 = vadd.f32 %v5656_v14, %v5570_v13  ;;  %v5662_v54 = vadd.f32 %v5661_v12, %v5574_v47 }
 0x69c   : > { %v5963_v53 = vsub.f32 %v5961_v37, %v5962_v46  ;;  %6166 = vmatmul.f32.vlgmr.msrb.gmra.mxu1 %v5962_v46 }
 0x69d   : > { %v5922_v62 = vsel %vm405_vm0, %v5886_v44, 0  ;;  %v5736_v63 = vadd.f32 %v5735_v2, %v5657_v24  ;;  %v5742_v48 = vadd.f32 %v5741_v56, %v5662_v54  ;;  %v6391_v24 = vld [vmem:[%s10979_s9 + $0x8] sm:$0xff] }
 0x69e   : > { %v5964_v51 = vand.u32 4294901760, %v5963_v53  ;;  %v10709_v57 = vand.u32 4294901760, %v5922_v62 }
 0x6a0   : > { %v5824_v4 = vpop.f32.mrf.mxu0  ;;  %5965 = vmatmul.f32.vlgmr.msrb.gmra.mxu2 %v5964_v51  ;;  %6056 = vmatmul.f32.gmra.mxu3 %v10709_v57  ;;  %v5969_v28 = vsub.f32 %v5922_v62, %v10709_v57 }
 0x6a1   : > { %v5825_v10 = vadd.f32 %v5824_v4, %v5718_v21  ;;  %v5893_v19 = vpop.f32.mrf.mxu1 }
 0x6a2   : > { %6111 = vmatmul.f32.gmra.mxu0 %v5969_v28  ;;  %v5970_v39 = vand.u32 4294901760, %v5969_v28 }
 0x6a3   : > { %v5890_v25 = vadd.f32 %v5889_v8, %v5825_v10 }
 0x6a4   : > { %6172 = vmatmul.f32.gmra.mxu1 %v5970_v39  ;;  %v5971_v11 = vsub.f32 %v5969_v28, %v5970_v39  ;;  %v5666_v28 = vpop.f32.mrf.mxu2 }
 0x6a5   : > { %v5925_v20 = vsel %vm405_vm0, %v5890_v25, 0 }
 0x6a6   : > { %v10714_v31 = vand.u32 4294901760, %v5925_v20  ;;  %v5972_v40 = vand.u32 4294901760, %v5971_v11 }
 0x6a8   : > { %v5828_v36 = vpop.f32.mrf.mxu0  ;;  %5973 = vmatmul.f32.gmra.mxu2 %v5972_v40  ;;  %6060 = vmatmul.f32.gmra.mxu3 %v10714_v31  ;;  %v5977_v1 = vsub.f32 %v5925_v20, %v10714_v31 }
 0x6a9   : > { %v5829_v15 = vadd.f32 %v5828_v36, %v5724_v29  ;;  %v5897_v50 = vpop.f32.mrf.mxu1 }
 0x6aa   : > { %6116 = vmatmul.f32.gmra.mxu0 %v5977_v1  ;;  %v5978_v35 = vand.u32 4294901760, %v5977_v1 }
 0x6ab   : > { %v5894_v27 = vadd.f32 %v5893_v19, %v5829_v15  ;;  %v5667_v19 = vadd.f32 %v5666_v28, %v5578_v49 }
 0x6ac   : > { %6178 = vmatmul.f32.gmra.mxu1 %v5978_v35  ;;  %v5979_v32 = vsub.f32 %v5977_v1, %v5978_v35 }
 0x6ad   : > { %v5928_v30 = vsel %vm405_vm0, %v5894_v27, 0  ;;  %v5748_v40 = vadd.f32 %v5747_v9, %v5667_v19 }
 0x6ae   : > { %v10721_v0 = vand.u32 4294901760, %v5928_v30  ;;  %v5980_v3 = vand.u32 4294901760, %v5979_v32 }
 0x6b0   : > { %v5832_v52 = vpop.f32.mrf.mxu0  ;;  %5981 = vmatmul.f32.gmra.mxu2 %v5980_v3  ;;  %6064 = vmatmul.f32.gmra.mxu3 %v10721_v0  ;;  %v5985_v26 = vsub.f32 %v5928_v30, %v10721_v0 }
 0x6b1   : > { %v5833_v41 = vadd.f32 %v5832_v52, %v5730_v61  ;;  %v5901_v16 = vpop.f32.mrf.mxu1 }
 0x6b2   : > { %6121 = vmatmul.f32.gmra.mxu0 %v5985_v26  ;;  %v5986_v55 = vand.u32 4294901760, %v5985_v26 }
 0x6b3   : > { %v5898_v6 = vadd.f32 %v5897_v50, %v5833_v41 }
 0x6b4   : > { %6184 = vmatmul.f32.gmra.mxu1 %v5986_v55  ;;  %v5987_v60 = vsub.f32 %v5985_v26, %v5986_v55 }
 0x6b5   : > { %v5931_v22 = vsel %vm405_vm0, %v5898_v6, 0  ;;  %v6436_v6 = vand.u32 4294901760, %v6391_v24 }
 0x6b6   : > { %v10728_v18 = vand.u32 4294901760, %v5931_v22  ;;  %v5988_v5 = vand.u32 4294901760, %v5987_v60 }
 0x6b7   : > { %v6525_v60 = vsub.f32 %v6391_v24, %v6436_v6 }
 0x6b8   : > { %v5836_v37 = vpop.f32.mrf.mxu0  ;;  %5989 = vmatmul.f32.gmra.mxu2 %v5988_v5  ;;  %6068 = vmatmul.f32.gmra.mxu3 %v10728_v18  ;;  %v5993_v59 = vsub.f32 %v5931_v22, %v10728_v18 }
 0x6b9   : > { %v5837_v8 = vadd.f32 %v5836_v37, %v5736_v63  ;;  %v5905_v51 = vpop.f32.mrf.mxu1 }
 0x6ba   : > { %6126 = vmatmul.f32.gmra.mxu0 %v5993_v59  ;;  %v5994_v43 = vand.u32 4294901760, %v5993_v59 }
 0x6bb   : > { %v5902_v46 = vadd.f32 %v5901_v16, %v5837_v8  ;;  %v6526_v16 = vand.u32 4294901760, %v6525_v60 }
 0x6bc   : > { %6190 = vmatmul.f32.gmra.mxu1 %v5994_v43  ;;  %v5995_v44 = vsub.f32 %v5993_v59, %v5994_v43  ;;  %v6390_v43 = vld [vmem:[%s10979_s9] sm:$0xff] }
 0x6bd   : > { %v5934_v53 = vsel %vm405_vm0, %v5902_v46, 0  ;;  %v6527_v5 = vsub.f32 %v6525_v60, %v6526_v16  ;;  %v6438_v54 = vand.u32 4294901760, %v6390_v43 }
 0x6be   : > { %v6000_v62 = vand.u32 4294901760, %v5934_v53  ;;  %v5996_v33 = vand.u32 4294901760, %v5995_v44  ;;  %v10773_v44 = vld [vmem:[%s10978_s8] ss:$0 sm:$0xff] }
 0x6bf   : > { %v6528_v63 = vand.u32 4294901760, %v6527_v5  ;;  %v6531_v46 = vsub.f32 %v6390_v43, %v6438_v54 }
 0x6c0   : > { %v5840_v21 = vpop.f32.mrf.mxu0  ;;  %5997 = vmatmul.f32.gmra.mxu2 %v5996_v33  ;;  %6072 = vmatmul.f32.gmra.mxu3 %v6000_v62  ;;  %v6001_v23 = vsub.f32 %v5934_v53, %v6000_v62 }
 0x6c1   : > { %v5841_v4 = vadd.f32 %v5840_v21, %v5742_v48  ;;  %v5909_v58 = vpop.f32.mrf.mxu1  ;;  %v6532_v33 = vand.u32 4294901760, %v6531_v46 }
 0x6c2   : > { %6131 = vmatmul.f32.gmra.mxu0 %v6001_v23  ;;  %v6002_v10 = vand.u32 4294901760, %v6001_v23 }
 0x6c3   : > { %v5906_v39 = vadd.f32 %v5905_v51, %v5841_v4  ;;  %v6533_v48 = vsub.f32 %v6531_v46, %v6532_v33 }
 0x6c4   : > { %6196 = vmatmul.f32.gmra.mxu1 %v6002_v10  ;;  %v6003_v17 = vsub.f32 %v6001_v23, %v6002_v10 }
 0x6c5   : > { %v5937_v25 = vsel %vm405_vm0, %v5906_v39, 0  ;;  %v6534_v51 = vand.u32 4294901760, %v6533_v48 }
 0x6c6   : > { %v6008_v11 = vand.u32 4294901760, %v5937_v25  ;;  %v6004_v20 = vand.u32 4294901760, %v6003_v17 }
 0x6c8   : > { %v5844_v45 = vpop.f32.mrf.mxu0  ;;  %6005 = vmatmul.f32.gmra.mxu2 %v6004_v20  ;;  %6076 = vmatmul.f32.gmra.mxu3 %v6008_v11  ;;  %v6009_v7 = vsub.f32 %v5937_v25, %v6008_v11 }
 0x6c9   : > { %v5845_v29 = vadd.f32 %v5844_v45, %v5748_v40 }
 0x6ca   : > { %6136 = vmatmul.f32.gmra.mxu0 %v6009_v7  ;;  %v6010_v34 = vand.u32 4294901760, %v6009_v7 }
 0x6cb   : > { %v5910_v36 = vadd.f32 %v5909_v58, %v5845_v29 }
 0x6cc   : > { %6202 = vmatmul.f32.gmra.mxu1 %v6010_v34  ;;  %v6011_v1 = vsub.f32 %v6009_v7, %v6010_v34 }
 0x6cd   : > { %v5940_v15 = vsel %vm405_vm0, %v5910_v36, 0 }
 0x6ce   : > { %v6016_v35 = vand.u32 4294901760, %v5940_v15  ;;  %v6012_v38 = vand.u32 4294901760, %v6011_v1 }
 0x6d0   : > { %6013 = vmatmul.f32.gmra.mxu2 %v6012_v38  ;;  %6080 = vmatmul.f32.gmra.mxu3 %v6016_v35  ;;  %v6017_v27 = vsub.f32 %v5940_v15, %v6016_v35 }
 0x6d2   : > { %6141 = vmatmul.f32.gmra.mxu0 %v6017_v27  ;;  %v6018_v50 = vand.u32 4294901760, %v6017_v27 }
 0x6d4   : > { %6208 = vmatmul.f32.gmra.mxu1 %v6018_v50  ;;  %v6019_v32 = vsub.f32 %v6017_v27, %v6018_v50 }
 0x6d6   : > { %v6020_v30 = vand.u32 4294901760, %v6019_v32 }
 0x6d8   : > { %6021 = vmatmul.f32.gmra.mxu2 %v6020_v30  ;;  %6286 = vmatmul.f32.vlgmr.msra.gmra.mxu3 %v10704_v42 }
 0x6e0   : > { %6235 = vmatmul.f32.vlgmr.msra.gmra.mxu2 %v10704_v42  ;;  %6290 = vmatmul.f32.gmra.mxu3 %v10709_v57 }
 0x6e8   : > { %6239 = vmatmul.f32.gmra.mxu2 %v10709_v57  ;;  %6294 = vmatmul.f32.gmra.mxu3 %v10714_v31  ;;  %v6392_v57 = vld [vmem:[%s10979_s9 + $0x10] sm:$0xff] }
 0x6f0   : > { %6243 = vmatmul.f32.gmra.mxu2 %v10714_v31  ;;  %6298 = vmatmul.f32.gmra.mxu3 %v10721_v0  ;;  %v6434_v31 = vand.u32 4294901760, %v6392_v57 }
 0x6f2   : > { %6435 = vmatpush.msra.mxu0 %v6434_v31  ;;  %6646 = vmatpush.msrb.mxu3 %v6434_v31 }
 0x6f4   : > { %6437 = vmatpush.msra.mxu0 %v6436_v6  ;;  %6648 = vmatpush.msrb.mxu3 %v6436_v6 }
 0x6f6   : > { %6439 = vmatpush.msra.mxu0 %v6438_v54  ;;  %6650 = vmatpush.msrb.mxu3 %v6438_v54 }
 0x6f8   : > { %6247 = vmatmul.f32.gmra.mxu2 %v10721_v0  ;;  %6302 = vmatmul.f32.gmra.mxu3 %v10728_v18  ;;  %v6519_v0 = vsub.f32 %v6392_v57, %v6434_v31 }
 0x6fa   : > { %v6520_v61 = vand.u32 4294901760, %v6519_v0  ;;  %6584 = vmatpush.msrb.mxu2 %v6519_v0 }
 0x6fc   : > { %v6521_v13 = vsub.f32 %v6519_v0, %v6520_v61  ;;  %6587 = vmatpush.msrb.mxu2 %v6525_v60  ;;  %6716 = vmatpush.msrb.mxu0 %v6520_v61  ;;  %v6359_v61 = vpop.permute.xlu0 %6358 }
 0x6fe   : > { %v6522_v52 = vand.u32 4294901760, %v6521_v13  ;;  %6590 = vmatpush.msrb.mxu2 %v6531_v46  ;;  %6720 = vmatpush.msrb.mxu0 %v6526_v16  ;;  %v6361_v46 = vpop.permute.xlu1 %6360 }
 0x700   : > { %6251 = vmatmul.f32.gmra.mxu2 %v10728_v18  ;;  %6306 = vmatmul.f32.gmra.mxu3 %v6000_v62 }
 0x701   : > { %6523 = vmatpush.msra.mxu1 %v6522_v52  ;;  %6724 = vmatpush.msrb.mxu0 %v6532_v33 }
 0x703   : > { %6529 = vmatpush.msra.mxu1 %v6528_v63 }
 0x705   : > { %6535 = vmatpush.msra.mxu1 %v6534_v51 }
 0x707   : > { %6772 = vmatpush.msrb.mxu1 %v6434_v31 }
 0x708   : > { %6255 = vmatmul.f32.gmra.mxu2 %v6000_v62  ;;  %6310 = vmatmul.f32.gmra.mxu3 %v6008_v11 }
 0x709   : > { %6774 = vmatpush.msrb.mxu1 %v6436_v6 }
 0x70b   : > { %6776 = vmatpush.msrb.mxu1 %v6438_v54 }
 0x710   : > { %6259 = vmatmul.f32.gmra.mxu2 %v6008_v11  ;;  %6314 = vmatmul.f32.gmra.mxu3 %v6016_v35 }
 0x717   : > { %v6107_v8 = vpop.f32.mrf.mxu0 }
 0x718   : > { %6263 = vmatmul.f32.gmra.mxu2 %v6016_v35 }
 0x719   : > { %v6167_v56 = vpop.f32.mrf.mxu1 }
 0x71b   : > { %v6053_v42 = vpop.f32.mrf.mxu3 }
 0x71f   : > { %v6112_v21 = vpop.f32.mrf.mxu0 }
 0x721   : > { %v6173_v10 = vpop.f32.mrf.mxu1 }
 0x723   : > { %v5966_v14 = vpop.f32.mrf.mxu2  ;;  %v6057_v3 = vpop.f32.mrf.mxu3 }
 0x724   : > { %v5967_v49 = vadd.f32 %v10773_v44, %v5966_v14 }
 0x726   : > { %v6054_v23 = vadd.f32 %v6053_v42, %v5967_v49 }
 0x727   : > { %v6117_v17 = vpop.f32.mrf.mxu0 }
 0x728   : > { %v6108_v39 = vadd.f32 %v6107_v8, %v6054_v23 }
 0x729   : > { %v6179_v58 = vpop.f32.mrf.mxu1 }
 0x72a   : > { %v6168_v9 = vadd.f32 %v6167_v56, %v6108_v39 }
 0x72b   : > { %v5974_v26 = vpop.f32.mrf.mxu2  ;;  %v6061_v41 = vpop.f32.mrf.mxu3 }
 0x72c   : > { %v5975_v19 = vadd.f32 %v10773_v44, %v5974_v26 }
 0x72e   : > { %v6058_v25 = vadd.f32 %v6057_v3, %v5975_v19 }
 0x72f   : > { %v6122_v27 = vpop.f32.mrf.mxu0 }
 0x730   : > { %v6113_v29 = vadd.f32 %v6112_v21, %v6058_v25 }
 0x731   : > { %v6185_v31 = vpop.f32.mrf.mxu1 }
 0x732   : > { %v6174_v1 = vadd.f32 %v6173_v10, %v6113_v29 }
 0x733   : > { %v5982_v2 = vpop.f32.mrf.mxu2  ;;  %v10752_v55 = vpop.f32.mrf.mxu3 }
 0x734   : > { %v5983_v45 = vadd.f32 %v10773_v44, %v5982_v2 }
 0x736   : > { %v6062_v36 = vadd.f32 %v6061_v41, %v5983_v45 }
 0x737   : > { %v6127_v16 = vpop.f32.mrf.mxu0 }
 0x738   : > { %v6118_v30 = vadd.f32 %v6117_v17, %v6062_v36 }
 0x739   : > { %v6191_v56 = vpop.f32.mrf.mxu1 }
 0x73a   : > { %v6180_v0 = vadd.f32 %v6179_v58, %v6118_v30  ;;  %v6363_v58 = vpop.permute.xlu2 %6362 }
 0x73b   : > { %v5990_v22 = vpop.f32.mrf.mxu2  ;;  %v10757_v18 = vpop.f32.mrf.mxu3 }
 0x73c   : > { %v5991_v50 = vadd.f32 %v10773_v44, %v5990_v22 }
 0x73e   : > { %v6066_v3 = vadd.f32 %v10752_v55, %v5991_v50 }
 0x740   : > { %v6123_v22 = vadd.f32 %v6122_v27, %v6066_v3 }
 0x743   : > { %v10759_v47 = vpop.f32.mrf.mxu2  ;;  %v10761_v12 = vpop.f32.mrf.mxu3 }
 0x744   : > { %v5999_v24 = vadd.f32 %v10773_v44, %v10759_v47  ;;  %v6186_v47 = vadd.f32 %v6185_v31, %v6123_v22 }
 0x746   : > { %v6070_v54 = vadd.f32 %v10757_v18, %v5999_v24 }
 0x748   : > { %v6128_v19 = vadd.f32 %v6127_v16, %v6070_v54 }
 0x74a   : > { %v6192_v29 = vadd.f32 %v6191_v56, %v6128_v19 }
 0x74b   : > { %v10763_v37 = vpop.f32.mrf.mxu2  ;;  %v10765_v59 = vpop.f32.mrf.mxu3 }
 0x753   : > { %v10775_v53 = vpop.f32.mrf.mxu2  ;;  %v10777_v62 = vpop.f32.mrf.mxu3 }
 0x754   : > { %v6015_v50 = vadd.f32 %v10773_v44, %v10775_v53 }
 0x756   : > { %v6078_v53 = vadd.f32 %v10765_v59, %v6015_v50 }
 0x75b   : > { %v10780_v4 = vpop.f32.mrf.mxu2  ;;  %v6287_v28 = vpop.f32.mrf.mxu3 }
 0x763   : > { %v6236_v11 = vpop.f32.mrf.mxu2  ;;  %v6291_v20 = vpop.f32.mrf.mxu3 }
 0x764   : > { %v6237_v40 = vadd.f32 %v6236_v11, %v6168_v9 }
 0x766   : > { %v10784_v7 = vadd.f32 %v6287_v28, %v6237_v40  ;;  %v6007_v28 = vadd.f32 %v10773_v44, %v10763_v37 }
 0x768   : > { %v6318_v34 = vmul.f32 0.5, %v10784_v7  ;;  %v6074_v37 = vadd.f32 %v10761_v12, %v6007_v28 }
 0x76a   : > { %7117 = vtanh.f32 %v6318_v34 }
 0x76b   : > { %v6240_v15 = vpop.f32.mrf.mxu2  ;;  %v6295_v35 = vpop.f32.mrf.mxu3 }
 0x76c   : > { %v6241_v38 = vadd.f32 %v6240_v15, %v6174_v1 }
 0x76e   : > { %v10788_v32 = vadd.f32 %v6291_v20, %v6241_v38  ;;  %v6132_v20 = vpop.f32.mrf.mxu0 }
 0x770   : > { %v7118_v42 = vpop.eup %7117  ;;  %v6319_v57 = vmul.f32 0.5, %v10788_v32 }
 0x771   : > { %v6334_v14 = vadd.f32 1.0, %v7118_v42  ;;  %v6133_v42 = vadd.f32 %v6132_v20, %v6074_v37 }
 0x772   : > { %7119 = vtanh.f32 %v6319_v57 }
 0x773   : > { %v6244_v13 = vpop.f32.mrf.mxu2  ;;  %v6342_v52 = vmul.f32 0.5, %v6334_v14  ;;  %v6299_v41 = vpop.f32.mrf.mxu3 }
 0x774   : > { %v6245_v26 = vadd.f32 %v6244_v13, %v6180_v0 }
 0x775   : > { %v6382_v2 = vsel %vm405_vm0, %v6342_v52, %v6359_v61 }
 0x776   : > { %v10795_v6 = vadd.f32 %v6295_v35, %v6245_v26  ;;  %v6398_v60 = vsel %vm835_vm2, %v6382_v2, 0  ;;  %v6197_v35 = vpop.f32.mrf.mxu1  ;;  %v6365_v26 = vpop.permute.xlu0 %6364 }
 0x777   : > { %v10798_v5 = vand.u32 4294901760, %v6398_v60  ;;  %v6198_v52 = vadd.f32 %v6197_v35, %v6133_v42 }
 0x778   : > { %v7120_v55 = vpop.eup %7119  ;;  %v6320_v63 = vmul.f32 0.5, %v10795_v6 }
 0x779   : > { %v6441_v8 = vsub.f32 %v6398_v60, %v10798_v5  ;;  %6537 = vmatmul.f32.vlgmr.msra.gmra.mxu1 %v10798_v5  ;;  %v6335_v43 = vadd.f32 1.0, %v7120_v55 }
 0x77a   : > { %7121 = vtanh.f32 %v6320_v63  ;;  %v6023_v63 = vadd.f32 %v10773_v44, %v10780_v4 }
 0x77b   : > { %v6442_v33 = vand.u32 4294901760, %v6441_v8  ;;  %v6248_v48 = vpop.f32.mrf.mxu2  ;;  %6593 = vmatmul.f32.vlgmr.msrb.gmra.mxu2 %v6441_v8  ;;  %v6343_v49 = vmul.f32 0.5, %v6335_v43  ;;  %v6303_v17 = vpop.f32.mrf.mxu3 }
 0x77c   : > { %v6249_v51 = vadd.f32 %v6248_v48, %v6186_v47  ;;  %v6082_v44 = vadd.f32 %v10777_v62, %v6023_v63 }
 0x77d   : > { %v6443_v21 = vsub.f32 %v6441_v8, %v6442_v33  ;;  %v6383_v23 = vsel %vm405_vm0, %v6343_v49, %v6361_v46  ;;  %6654 = vmatmul.f32.vlgmr.msrb.gmra.mxu3 %v6442_v33 }
 0x77e   : > { %v10807_v10 = vadd.f32 %v6299_v41, %v6249_v51  ;;  %v6401_v18 = vsel %vm835_vm2, %v6383_v23, 0  ;;  %v6137_v41 = vpop.f32.mrf.mxu0  ;;  %v6203_v54 = vpop.f32.mrf.mxu1 }
 0x77f   : > { %v6444_v39 = vand.u32 4294901760, %v6443_v21  ;;  %v10810_v25 = vand.u32 4294901760, %v6401_v18  ;;  %v6138_v43 = vadd.f32 %v6137_v41, %v6078_v53  ;;  %v6367_v51 = vpop.permute.xlu1 %6366  ;;  %v6371_v41 = vpop.permute.xlu0 %6370 }
 0x780   : > { %v7122_v9 = vpop.eup %7121  ;;  %v6321_v11 = vmul.f32 0.5, %v10807_v10 }
 0x781   : > { %v6449_v40 = vsub.f32 %v6401_v18, %v10810_v25  ;;  %6445 = vmatmul.f32.vlgmr.msra.gmra.mxu0 %v6444_v39  ;;  %6541 = vmatmul.f32.gmra.mxu1 %v10810_v25  ;;  %v6336_v45 = vadd.f32 1.0, %v7122_v9  ;;  %v6204_v4 = vadd.f32 %v6203_v54, %v6138_v43 }
 0x782   : > { %7123 = vtanh.f32 %v6321_v11 }
 0x783   : > { %v6252_v34 = vpop.f32.mrf.mxu2  ;;  %6598 = vmatmul.f32.gmra.mxu2 %v6449_v40  ;;  %v6344_v36 = vmul.f32 0.5, %v6336_v45  ;;  %v6450_v1 = vand.u32 4294901760, %v6449_v40  ;;  %v6307_v0 = vpop.f32.mrf.mxu3 }
 0x784   : > { %v6253_v15 = vadd.f32 %v6252_v34, %v6192_v29 }
 0x785   : > { %v6384_v38 = vsel %vm405_vm0, %v6344_v36, %v6363_v58  ;;  %6660 = vmatmul.f32.gmra.mxu3 %v6450_v1  ;;  %v6451_v27 = vsub.f32 %v6449_v40, %v6450_v1 }
 0x786   : > { %v10819_v30 = vadd.f32 %v6303_v17, %v6253_v15  ;;  %v6404_v12 = vsel %vm835_vm2, %v6384_v38, 0  ;;  %v6142_v39 = vpop.f32.mrf.mxu0  ;;  %v6209_v58 = vpop.f32.mrf.mxu1 }
 0x787   : > { %v10822_v57 = vand.u32 4294901760, %v6404_v12  ;;  %v6452_v31 = vand.u32 4294901760, %v6451_v27  ;;  %v6143_v40 = vadd.f32 %v6142_v39, %v6082_v44  ;;  %v6369_v15 = vpop.permute.xlu2 %6368 }
 0x788   : > { %v7124_v14 = vpop.eup %7123  ;;  %v6322_v3 = vmul.f32 0.5, %v10819_v30 }
 0x789   : > { %v6457_v61 = vsub.f32 %v6404_v12, %v10822_v57  ;;  %6453 = vmatmul.f32.gmra.mxu0 %v6452_v31  ;;  %6545 = vmatmul.f32.gmra.mxu1 %v10822_v57  ;;  %v6337_v13 = vadd.f32 1.0, %v7124_v14  ;;  %v6210_v1 = vadd.f32 %v6209_v58, %v6143_v40  ;;  %v10873_v58 = vld [vmem:[%s10980_s10] ss:$0 sm:$0xff] }
 0x78a   : > { %7125 = vtanh.f32 %v6322_v3 }
 0x78b   : > { %v6256_v2 = vpop.f32.mrf.mxu2  ;;  %6603 = vmatmul.f32.gmra.mxu2 %v6457_v61  ;;  %v6345_v24 = vmul.f32 0.5, %v6337_v13  ;;  %v6458_v60 = vand.u32 4294901760, %v6457_v61  ;;  %v6311_v21 = vpop.f32.mrf.mxu3 }
 0x78c   : > { %v6257_v22 = vadd.f32 %v6256_v2, %v6198_v52 }
 0x78d   : > { %v6385_v16 = vsel %vm405_vm0, %v6345_v24, %v6365_v26  ;;  %6666 = vmatmul.f32.gmra.mxu3 %v6458_v60  ;;  %v6459_v55 = vsub.f32 %v6457_v61, %v6458_v60 }
 0x78e   : > { %v10831_v8 = vadd.f32 %v6307_v0, %v6257_v22  ;;  %v6407_v59 = vsel %vm835_vm2, %v6385_v16, 0 }
 0x78f   : > { %v10834_v47 = vand.u32 4294901760, %v6407_v59  ;;  %v6460_v46 = vand.u32 4294901760, %v6459_v55 }
 0x790   : > { %v7126_v56 = vpop.eup %7125  ;;  %v6323_v33 = vmul.f32 0.5, %v10831_v8 }
 0x791   : > { %v6465_v48 = vsub.f32 %v6407_v59, %v10834_v47  ;;  %6461 = vmatmul.f32.gmra.mxu0 %v6460_v46  ;;  %6549 = vmatmul.f32.gmra.mxu1 %v10834_v47  ;;  %v6338_v49 = vadd.f32 1.0, %v7126_v56  ;;  %v6373_v46 = vpop.permute.xlu1 %6372 }
 0x792   : > { %7127 = vtanh.f32 %v6323_v33 }
 0x793   : > { %v6260_v23 = vpop.f32.mrf.mxu2  ;;  %6608 = vmatmul.f32.gmra.mxu2 %v6465_v48  ;;  %v6346_v28 = vmul.f32 0.5, %v6338_v49  ;;  %v6466_v18 = vand.u32 4294901760, %v6465_v48  ;;  %v6315_v12 = vpop.f32.mrf.mxu3 }
 0x794   : > { %v6261_v19 = vadd.f32 %v6260_v23, %v6204_v4 }
 0x795   : > { %v6386_v17 = vsel %vm405_vm0, %v6346_v28, %v6367_v51  ;;  %6672 = vmatmul.f32.gmra.mxu3 %v6466_v18  ;;  %v6467_v9 = vsub.f32 %v6465_v48, %v6466_v18 }
 0x796   : > { %v10841_v11 = vadd.f32 %v6311_v21, %v6261_v19  ;;  %v6410_v20 = vsel %vm835_vm2, %v6386_v17, 0 }
 0x797   : > { %v10844_v62 = vand.u32 4294901760, %v6410_v20  ;;  %v6468_v45 = vand.u32 4294901760, %v6467_v9 }
 0x798   : > { %v7128_v37 = vpop.eup %7127  ;;  %v6324_v29 = vmul.f32 0.5, %v10841_v11 }
 0x799   : > { %v6473_v34 = vsub.f32 %v6410_v20, %v10844_v62  ;;  %6469 = vmatmul.f32.gmra.mxu0 %v6468_v45  ;;  %6553 = vmatmul.f32.gmra.mxu1 %v10844_v62  ;;  %v6339_v36 = vadd.f32 1.0, %v7128_v37 }
 0x79a   : > { %7129 = vtanh.f32 %v6324_v29 }
 0x79b   : > { %v6264_v35 = vpop.f32.mrf.mxu2  ;;  %6613 = vmatmul.f32.gmra.mxu2 %v6473_v34  ;;  %v6347_v38 = vmul.f32 0.5, %v6339_v36  ;;  %v6474_v27 = vand.u32 4294901760, %v6473_v34 }
 0x79c   : > { %v6265_v50 = vadd.f32 %v6264_v35, %v6210_v1 }
 0x79d   : > { %v6387_v42 = vsel %vm405_vm0, %v6347_v38, %v6369_v15  ;;  %6678 = vmatmul.f32.gmra.mxu3 %v6474_v27  ;;  %v6475_v31 = vsub.f32 %v6473_v34, %v6474_v27 }
 0x79e   : > { %v10850_v14 = vadd.f32 %v6315_v12, %v6265_v50  ;;  %v6413_v3 = vsel %vm835_vm2, %v6387_v42, 0 }
 0x79f   : > { %v6480_v0 = vand.u32 4294901760, %v6413_v3  ;;  %v6476_v61 = vand.u32 4294901760, %v6475_v31 }
 0x7a0   : > { %v7130_v13 = vpop.eup %7129  ;;  %v6325_v53 = vmul.f32 0.5, %v10850_v14 }
 0x7a1   : > { %v6481_v52 = vsub.f32 %v6413_v3, %v6480_v0  ;;  %6477 = vmatmul.f32.gmra.mxu0 %v6476_v61  ;;  %6557 = vmatmul.f32.gmra.mxu1 %v6480_v0  ;;  %v6340_v26 = vadd.f32 1.0, %v7130_v13 }
 0x7a2   : > { %7131 = vtanh.f32 %v6325_v53 }
 0x7a3   : > { %6618 = vmatmul.f32.gmra.mxu2 %v6481_v52  ;;  %v6348_v2 = vmul.f32 0.5, %v6340_v26  ;;  %v6482_v24 = vand.u32 4294901760, %v6481_v52 }
 0x7a5   : > { %v6388_v60 = vsel %vm405_vm0, %v6348_v2, %v6371_v41  ;;  %6684 = vmatmul.f32.gmra.mxu3 %v6482_v24  ;;  %v6483_v22 = vsub.f32 %v6481_v52, %v6482_v24 }
 0x7a6   : > { %v6416_v16 = vsel %vm835_vm2, %v6388_v60, 0 }
 0x7a7   : > { %v6488_v55 = vand.u32 4294901760, %v6416_v16  ;;  %v6484_v63 = vand.u32 4294901760, %v6483_v22 }
 0x7a8   : > { %v7132_v59 = vpop.eup %7131 }
 0x7a9   : > { %v6489_v43 = vsub.f32 %v6416_v16, %v6488_v55  ;;  %6485 = vmatmul.f32.gmra.mxu0 %v6484_v63  ;;  %6561 = vmatmul.f32.gmra.mxu1 %v6488_v55  ;;  %v6341_v54 = vadd.f32 1.0, %v7132_v59 }
 0x7ab   : > { %6623 = vmatmul.f32.gmra.mxu2 %v6489_v43  ;;  %v6349_v56 = vmul.f32 0.5, %v6341_v54  ;;  %v6490_v33 = vand.u32 4294901760, %v6489_v43 }
 0x7ad   : > { %v6389_v48 = vsel %vm405_vm0, %v6349_v56, %v6373_v46  ;;  %6690 = vmatmul.f32.gmra.mxu3 %v6490_v33  ;;  %v6491_v49 = vsub.f32 %v6489_v43, %v6490_v33 }
 0x7ae   : > { %v6419_v44 = vsel %vm835_vm2, %v6389_v48, 0 }
 0x7af   : > { %v6496_v4 = vand.u32 4294901760, %v6419_v44  ;;  %v6492_v51 = vand.u32 4294901760, %v6491_v49 }
 0x7b1   : > { %v6497_v21 = vsub.f32 %v6419_v44, %v6496_v4  ;;  %6493 = vmatmul.f32.gmra.mxu0 %v6492_v51  ;;  %6565 = vmatmul.f32.gmra.mxu1 %v6496_v4 }
 0x7b3   : > { %6628 = vmatmul.f32.gmra.mxu2 %v6497_v21  ;;  %v6498_v23 = vand.u32 4294901760, %v6497_v21 }
 0x7b5   : > { %6696 = vmatmul.f32.gmra.mxu3 %v6498_v23  ;;  %v6499_v28 = vsub.f32 %v6497_v21, %v6498_v23 }
 0x7b7   : > { %v6500_v18 = vand.u32 4294901760, %v6499_v28 }
 0x7b9   : > { %6501 = vmatmul.f32.gmra.mxu0 %v6500_v18  ;;  %6778 = vmatmul.f32.vlgmr.msrb.gmra.mxu1 %v10798_v5 }
 0x7c1   : > { %6726 = vmatmul.f32.vlgmr.msrb.gmra.mxu0 %v10798_v5  ;;  %6782 = vmatmul.f32.gmra.mxu1 %v10810_v25 }
 0x7c9   : > { %6730 = vmatmul.f32.gmra.mxu0 %v10810_v25  ;;  %6786 = vmatmul.f32.gmra.mxu1 %v10822_v57 }
 0x7d1   : > { %6734 = vmatmul.f32.gmra.mxu0 %v10822_v57  ;;  %6790 = vmatmul.f32.gmra.mxu1 %v10834_v47 }
 0x7d9   : > { %6738 = vmatmul.f32.gmra.mxu0 %v10834_v47  ;;  %6794 = vmatmul.f32.gmra.mxu1 %v10844_v62 }
 0x7e1   : > { %6742 = vmatmul.f32.gmra.mxu0 %v10844_v62  ;;  %6798 = vmatmul.f32.gmra.mxu1 %v6480_v0 }
 0x7e9   : > { %6746 = vmatmul.f32.gmra.mxu0 %v6480_v0  ;;  %6802 = vmatmul.f32.gmra.mxu1 %v6488_v55 }
 0x7f1   : > { %6750 = vmatmul.f32.gmra.mxu0 %v6488_v55  ;;  %6806 = vmatmul.f32.gmra.mxu1 %v6496_v4 }
 0x7f6   : > { %v6538_v5 = vpop.f32.mrf.mxu1 }
 0x7f9   : > { %6754 = vmatmul.f32.gmra.mxu0 %v6496_v4 }
 0x7fe   : > { %v6446_v25 = vpop.f32.mrf.mxu0  ;;  %v6542_v19 = vpop.f32.mrf.mxu1 }
 0x7ff   : > { %v6594_v62 = vpop.f32.mrf.mxu2  ;;  %v6447_v15 = vadd.f32 %v10873_v58, %v6446_v25 }
 0x800   : > { %v6655_v34 = vpop.f32.mrf.mxu3 }
 0x801   : > { %v6539_v38 = vadd.f32 %v6538_v5, %v6447_v15 }
 0x803   : > { %v6595_v42 = vadd.f32 %v6594_v62, %v6539_v38 }
 0x805   : > { %v6656_v3 = vadd.f32 %v6655_v34, %v6595_v42 }
 0x806   : > { %v6454_v39 = vpop.f32.mrf.mxu0  ;;  %v6546_v17 = vpop.f32.mrf.mxu1 }
 0x807   : > { %v6599_v35 = vpop.f32.mrf.mxu2  ;;  %v6455_v31 = vadd.f32 %v10873_v58, %v6454_v39 }
 0x808   : > { %v6661_v12 = vpop.f32.mrf.mxu3 }
 0x809   : > { %v6543_v0 = vadd.f32 %v6542_v19, %v6455_v31 }
 0x80b   : > { %v6600_v26 = vadd.f32 %v6599_v35, %v6543_v0 }
 0x80d   : > { %v6662_v60 = vadd.f32 %v6661_v12, %v6600_v26 }
 0x80e   : > { %v6462_v57 = vpop.f32.mrf.mxu0  ;;  %v6550_v9 = vpop.f32.mrf.mxu1 }
 0x80f   : > { %v6604_v61 = vpop.f32.mrf.mxu2  ;;  %v6463_v41 = vadd.f32 %v10873_v58, %v6462_v57 }
 0x810   : > { %v6667_v24 = vpop.f32.mrf.mxu3 }
 0x811   : > { %v6547_v22 = vadd.f32 %v6546_v17, %v6463_v41 }
 0x813   : > { %v6605_v43 = vadd.f32 %v6604_v61, %v6547_v22 }
 0x815   : > { %v6668_v33 = vadd.f32 %v6667_v24, %v6605_v43 }
 0x816   : > { %v6470_v20 = vpop.f32.mrf.mxu0  ;;  %v6554_v40 = vpop.f32.mrf.mxu1 }
 0x817   : > { %v6609_v59 = vpop.f32.mrf.mxu2  ;;  %v6471_v54 = vadd.f32 %v10873_v58, %v6470_v20 }
 0x818   : > { %v6673_v56 = vpop.f32.mrf.mxu3 }
 0x819   : > { %v6551_v48 = vadd.f32 %v6550_v9, %v6471_v54 }
 0x81b   : > { %v6610_v51 = vadd.f32 %v6609_v59, %v6551_v48 }
 0x81d   : > { %v6674_v18 = vadd.f32 %v6673_v56, %v6610_v51 }
 0x81e   : > { %v6478_v47 = vpop.f32.mrf.mxu0  ;;  %v6558_v45 = vpop.f32.mrf.mxu1 }
 0x81f   : > { %v6479_v21 = vadd.f32 %v10873_v58, %v6478_v47  ;;  %v6614_v28 = vpop.f32.mrf.mxu2 }
 0x820   : > { %v6679_v25 = vpop.f32.mrf.mxu3 }
 0x821   : > { %v6555_v5 = vadd.f32 %v6554_v40, %v6479_v21 }
 0x823   : > { %v6615_v17 = vadd.f32 %v6614_v28, %v6555_v5 }
 0x825   : > { %v6680_v62 = vadd.f32 %v6679_v25, %v6615_v17 }
 0x826   : > { %v6486_v37 = vpop.f32.mrf.mxu0  ;;  %v10868_v29 = vpop.f32.mrf.mxu1 }
 0x827   : > { %v6487_v57 = vadd.f32 %v10873_v58, %v6486_v37  ;;  %v6619_v47 = vpop.f32.mrf.mxu2 }
 0x828   : > { %v6685_v38 = vpop.f32.mrf.mxu3 }
 0x829   : > { %v6559_v34 = vadd.f32 %v6558_v45, %v6487_v57 }
 0x82e   : > { %v6494_v36 = vpop.f32.mrf.mxu0  ;;  %v10875_v1 = vpop.f32.mrf.mxu1 }
 0x82f   : > { %v6495_v40 = vadd.f32 %v10873_v58, %v6494_v36 }
 0x831   : > { %v6563_v31 = vadd.f32 %v10868_v29, %v6495_v40 }
 0x836   : > { %v10878_v27 = vpop.f32.mrf.mxu0  ;;  %v6779_v50 = vpop.f32.mrf.mxu1 }
 0x837   : > { %v6503_v45 = vadd.f32 %v10873_v58, %v10878_v27 }
 0x839   : > { %v6567_v26 = vadd.f32 %v10875_v1, %v6503_v45 }
 0x83e   : > { %v6727_v13 = vpop.f32.mrf.mxu0  ;;  %v6783_v53 = vpop.f32.mrf.mxu1 }
 0x83f   : > { %v6728_v52 = vadd.f32 %v6727_v13, %v6656_v3  ;;  %v6624_v3 = vpop.f32.mrf.mxu2 }
 0x840   : > { %v6625_v13 = vadd.f32 %v6624_v3, %v6563_v31 }
 0x841   : > { %v10882_v2 = vadd.f32 %v6779_v50, %v6728_v52  ;;  %v6620_v50 = vadd.f32 %v6619_v47, %v6559_v34  ;;  %v6691_v52 = vpop.f32.mrf.mxu3 }
 0x842   : > { %v6692_v36 = vadd.f32 %v6691_v52, %v6625_v13 }
 0x843   : > { %6818 = vrot.lane.b32.xlu2 %v10882_v2, %s7164_s23  ;;  %v6686_v42 = vadd.f32 %v6685_v38, %v6620_v50 }
 0x846   : > { %v6731_v16 = vpop.f32.mrf.mxu0  ;;  %v6787_v55 = vpop.f32.mrf.mxu1 }
 0x847   : > { %v6732_v63 = vadd.f32 %v6731_v16, %v6662_v60  ;;  %v6629_v29 = vpop.f32.mrf.mxu2 }
 0x848   : > { %v6630_v22 = vadd.f32 %v6629_v29, %v6567_v26 }
 0x849   : > { %v10887_v46 = vadd.f32 %v6783_v53, %v6732_v63  ;;  %v6697_v58 = vpop.f32.mrf.mxu3 }
 0x84a   : > { %v6698_v27 = vadd.f32 %v6697_v58, %v6630_v22 }
 0x84b   : > { %6820 = vrot.lane.b32.xlu0 %v10887_v46, %s7164_s23 }
 0x84e   : > { %v6735_v49 = vpop.f32.mrf.mxu0  ;;  %v6791_v4 = vpop.f32.mrf.mxu1 }
 0x84f   : > { %v6736_v44 = vadd.f32 %v6735_v49, %v6668_v33 }
 0x851   : > { %v10892_v23 = vadd.f32 %v6787_v55, %v6736_v44 }
 0x853   : > { %6822 = vrot.lane.b32.xlu1 %v10892_v23, %s7164_s23 }
 0x856   : > { %v6739_v19 = vpop.f32.mrf.mxu0  ;;  %v6795_v20 = vpop.f32.mrf.mxu1 }
 0x857   : > { %v6740_v39 = vadd.f32 %v6739_v19, %v6674_v18 }
 0x859   : > { %v10897_v9 = vadd.f32 %v6791_v4, %v6740_v39 }
 0x85b   : > { %6824 = vrot.lane.b32.xlu2 %v10897_v9, %s7164_s23 }
 0x85e   : > { %v6743_v15 = vpop.f32.mrf.mxu0  ;;  %v6799_v37 = vpop.f32.mrf.mxu1 }
 0x85f   : > { %v6744_v35 = vadd.f32 %v6743_v15, %v6680_v62 }
 0x861   : > { %v10902_v12 = vadd.f32 %v6795_v20, %v6744_v35 }
 0x863   : > { %6826 = vrot.lane.b32.xlu0 %v10902_v12, %s7164_s23 }
 0x866   : > { %v6747_v0 = vpop.f32.mrf.mxu0  ;;  %v6803_v41 = vpop.f32.mrf.mxu1 }
 0x867   : > { %v6748_v61 = vadd.f32 %v6747_v0, %v6686_v42 }
 0x869   : > { %v10909_v53 = vadd.f32 %v6799_v37, %v6748_v61 }
 0x86b   : > { %6828 = vrot.lane.b32.xlu1 %v10909_v53, %s7164_s23 }
 0x86e   : > { %v6751_v24 = vpop.f32.mrf.mxu0  ;;  %v6807_v59 = vpop.f32.mrf.mxu1 }
 0x86f   : > { %v6752_v60 = vadd.f32 %v6751_v24, %v6692_v36 }
 0x871   : > { %v10914_v16 = vadd.f32 %v6803_v41, %v6752_v60 }
 0x873   : > { %6830 = vrot.lane.b32.xlu2 %v10914_v16, %s7164_s23 }
 0x876   : > { %v6755_v55 = vpop.f32.mrf.mxu0 }
 0x877   : > { %v6756_v63 = vadd.f32 %v6755_v55, %v6698_v27 }
 0x879   : > { %v10918_v43 = vadd.f32 %v6807_v59, %v6756_v63 }
 0x87b   : > { %6832 = vrot.lane.b32.xlu0 %v10918_v43, %s7164_s23 }
 0x89d   : > { %v6819_v1 = vpop.permute.xlu2 %6818 }
 0x89e   : > { %v6842_v54 = vsub.f32 %v10784_v7, %v6819_v1 }
 0x8a0   : > { %v6850_v56 = vmul.f32 0.5, %v6842_v54 }
 0x8a2   : > { %7133 = vtanh.f32 %v6850_v56 }
 0x8a8   : > { %v7134_v33 = vpop.eup %7133 }
 0x8a9   : > { %v6866_v48 = vadd.f32 1.0, %v7134_v33 }
 0x8ab   : > { %v6874_v49 = vmul.f32 0.5, %v6866_v48 }
 0x8ad   : > { %6890 = vrot.lane.b32.xlu1 %v6874_v49, %s7167_s27 }
 0x8b5   : > { %v6825_v44 = vpop.permute.xlu2 %6824 }
 0x8b6   : > { %v6845_v4 = vsub.f32 %v10807_v10, %v6825_v44 }
 0x8b8   : > { %v6853_v51 = vmul.f32 0.5, %v6845_v4 }
 0x8ba   : > { %7135 = vtanh.f32 %v6853_v51 }
 0x8bd   : > { %v6821_v21 = vpop.permute.xlu0 %6820 }
 0x8be   : > { %v6843_v28 = vsub.f32 %v10788_v32, %v6821_v21 }
 0x8c0   : > { %v7136_v18 = vpop.eup %7135  ;;  %v6851_v5 = vmul.f32 0.5, %v6843_v28 }
 0x8c1   : > { %v6869_v25 = vadd.f32 1.0, %v7136_v18 }
 0x8c2   : > { %7137 = vtanh.f32 %v6851_v5 }
 0x8c3   : > { %v6877_v7 = vmul.f32 0.5, %v6869_v25 }
 0x8c5   : > { %v6823_v19 = vpop.permute.xlu1 %6822  ;;  %6896 = vrot.lane.b32.xlu1 %v6877_v7, %s7167_s27 }
 0x8c6   : > { %v6844_v39 = vsub.f32 %v10795_v6, %v6823_v19 }
 0x8c8   : > { %v7138_v17 = vpop.eup %7137  ;;  %v6852_v57 = vmul.f32 0.5, %v6844_v39 }
 0x8c9   : > { %v6867_v20 = vadd.f32 1.0, %v7138_v17 }
 0x8ca   : > { %7139 = vtanh.f32 %v6852_v57 }
 0x8cb   : > { %v6875_v10 = vmul.f32 0.5, %v6867_v20 }
 0x8cd   : > { %6892 = vrot.lane.b32.xlu2 %v6875_v10, %s7167_s27  ;;  %v6831_v47 = vpop.permute.xlu2 %6830 }
 0x8ce   : > { %v6848_v32 = vsub.f32 %v10841_v11, %v6831_v47 }
 0x8d0   : > { %v7140_v62 = vpop.eup %7139  ;;  %v6856_v34 = vmul.f32 0.5, %v6848_v32 }
 0x8d1   : > { %v6868_v15 = vadd.f32 1.0, %v7140_v62 }
 0x8d2   : > { %7141 = vtanh.f32 %v6856_v34 }
 0x8d3   : > { %v6876_v35 = vmul.f32 0.5, %v6868_v15 }
 0x8d5   : > { %v6827_v38 = vpop.permute.xlu0 %6826  ;;  %6894 = vrot.lane.b32.xlu0 %v6876_v35, %s7167_s27 }
 0x8d6   : > { %v6846_v6 = vsub.f32 %v10819_v30, %v6827_v38 }
 0x8d8   : > { %v7142_v50 = vpop.eup %7141  ;;  %v6854_v40 = vmul.f32 0.5, %v6846_v6 }
 0x8d9   : > { %v6872_v37 = vadd.f32 1.0, %v7142_v50 }
 0x8da   : > { %7143 = vtanh.f32 %v6854_v40 }
 0x8db   : > { %v6880_v42 = vmul.f32 0.5, %v6872_v37 }
 0x8dd   : > { %v6829_v31 = vpop.permute.xlu1 %6828  ;;  %6902 = vrot.lane.b32.xlu1 %v6880_v42, %s7167_s27 }
 0x8de   : > { %v6847_v11 = vsub.f32 %v10831_v8, %v6829_v31 }
 0x8e0   : > { %v7144_v3 = vpop.eup %7143  ;;  %v6855_v0 = vmul.f32 0.5, %v6847_v11 }
 0x8e1   : > { %v6870_v61 = vadd.f32 1.0, %v7144_v3 }
 0x8e2   : > { %7145 = vtanh.f32 %v6855_v0 }
 0x8e3   : > { %v6878_v13 = vmul.f32 0.5, %v6870_v61 }
 0x8e5   : > { %6898 = vrot.lane.b32.xlu2 %v6878_v13, %s7167_s27 }
 0x8e8   : > { %v7146_v45 = vpop.eup %7145 }
 0x8e9   : > { %v6871_v30 = vadd.f32 1.0, %v7146_v45 }
 0x8eb   : > { %v6879_v52 = vmul.f32 0.5, %v6871_v30 }
 0x8ed   : > { %6900 = vrot.lane.b32.xlu0 %v6879_v52, %s7167_s27  ;;  %v6833_v36 = vpop.permute.xlu0 %6832 }
 0x8ee   : > { %v6849_v26 = vsub.f32 %v10850_v14, %v6833_v36 }
 0x8f0   : > { %v6857_v41 = vmul.f32 0.5, %v6849_v26 }
 0x8f2   : > { %7147 = vtanh.f32 %v6857_v41 }
 0x8f8   : > { %v7148_v24 = vpop.eup %7147 }
 0x8f9   : > { %v6873_v8 = vadd.f32 1.0, %v7148_v24 }
 0x8fb   : > { %v6881_v60 = vmul.f32 0.5, %v6873_v8 }
 0x8fd   : > { %6904 = vrot.lane.b32.xlu2 %v6881_v60, %s7167_s27 }
 0x91f   : > { %v6891_v29 = vpop.permute.xlu1 %6890 }
 0x920   : > { %v6914_v22 = vsel %vm830_vm1, %v10882_v2, %v6891_v29 }
 0x921   : > { %6922 = vst.msk [vmem:[%s393_s29] sm:$0xff] %vm405_vm0, %v6914_v22 }
 0x927   : > { %v6893_v58 = vpop.permute.xlu2 %6892 }
 0x928   : > { %v6915_v14 = vsel %vm830_vm1, %v10887_v46, %v6893_v58 }
 0x929   : > { %6923 = vst.msk [vmem:[%s393_s29 + $0x8] sm:$0xff] %vm405_vm0, %v6915_v14 }
 0x937   : > { %v6897_v27 = vpop.permute.xlu1 %6896 }
 0x938   : > { %v6917_v55 = vsel %vm830_vm1, %v10897_v9, %v6897_v27 }
 0x939   : > { %7042 = vst.msk [vmem:[%s393_s29 + $0x18] sm:$0xff] %vm405_vm0, %v6917_v55 }
 0x93f   : > { %v6899_v63 = vpop.permute.xlu2 %6898 }
 0x940   : > { %v6918_v2 = vsel %vm830_vm1, %v10902_v12, %v6899_v63 }
 0x941   : > { %7043 = vst.msk [vmem:[%s393_s29 + $0x20] sm:$0xff] %vm405_vm0, %v6918_v2 }
 0x947   : > { %v6895_v59 = vpop.permute.xlu0 %6894 }
 0x948   : > { %v6916_v1 = vsel %vm830_vm1, %v10892_v23, %v6895_v59 }
 0x949   : > { %7041 = vst.msk [vmem:[%s393_s29 + $0x10] sm:$0xff] %vm405_vm0, %v6916_v1 }
 0x94f   : > { %v6903_v46 = vpop.permute.xlu1 %6902 }
 0x950   : > { %v6920_v54 = vsel %vm830_vm1, %v10914_v16, %v6903_v46 }
 0x951   : > { %7045 = vst.msk [vmem:[%s393_s29 + $0x30] sm:$0xff] %vm405_vm0, %v6920_v54 }
 0x957   : > { %v6905_v9 = vpop.permute.xlu2 %6904 }
 0x958   : > { %v6921_v23 = vsel %vm830_vm1, %v10918_v43, %v6905_v9 }
 0x959   : > { %7046 = vst.msk [vmem:[%s393_s29 + $0x38] sm:$0xff] %vm405_vm0, %v6921_v23 }
 0x95f   : > { %v6901_v56 = vpop.permute.xlu0 %6900 }
 0x960   : > { %v6919_v33 = vsel %vm830_vm1, %v10909_v53, %v6901_v56 }
 0x961   : > { %7044 = vst.msk [vmem:[%s393_s29 + $0x28] sm:$0xff] %vm405_vm0, %v6919_v33 }
 0x962 PF: > { %s21_s17 = sadd.s32 1, %s7162_s17  }
 0x963   : > { %p18_p4 = scmp.ge.s32.totalorder %s21_s17, 4  }
 0x965   :  { %20 = sbr.rel (!%p18_p4) target bundleno = 1 (0x1), region = 102 }

</bundles_post_ra>
